<compile_context>
chip_gen: v7x
topology: tpu7x:2x2x1
jax: 0.10.0
libtpu: 0.0.40
codegen_flags: <defaults>
</compile_context>

<pallas_src>
import functools
import numpy as np
import jax
import jax.numpy as jnp
from jax import lax
from jax.experimental import pallas as pl
from jax.experimental.pallas import tpu as pltpu

ALPHA = 0.9
POOL_W = 4
OUT_CHS = [8, 16, 32]
IN_CHS = [1, 8, 16]
BLOCK_LAYERS = [2, 2, 3]
MLP_CH = [128, 32]
NUM_CLASS = 1
N_ROI = 20          # mask channels; bilateral_feature pairs consecutive ROIs
BN_EPS = 1e-5
LEAKY_SLOPE = 0.01
CONV_DTYPE = jnp.bfloat16   # MXU-native; halves HBM traffic for activations
MAX_TMO = 1024              # lane-tile over the flattened Ho*Wo*Zo axis
VMEM_LIMIT = 32 * 1024 * 1024


# ---------------------------------------------------------------------------
# Pallas kernel: transposed conv matmul with fused epilogue.
#   r = W (Ng,K) @ A (K,tmo)            (Ng = n_groups * n_out, f32 MXU acc)
#   epilogue = flip-group max over sublane ranges -> +bias -> activation
#              -> optional (alpha*h + (1-alpha)*x1) -> BN scale/shift -> cast
# ---------------------------------------------------------------------------
def _convmm_kernel(w_ref, a_ref, bias_ref, *rest, n_groups, n_out, activation,
                   alpha):
    if alpha is None:
        (o_ref,) = rest
        x1_ref = scale_ref = shift_ref = None
    else:
        x1_ref, scale_ref, shift_ref, o_ref = rest

    r = jnp.dot(w_ref[...], a_ref[...], preferred_element_type=jnp.float32)

    if n_groups > 1:                       # SymGroup flip-max: aligned sublane slices
        m = r[0:n_out, :]
        for g in range(1, n_groups):
            m = jnp.maximum(m, r[g * n_out:(g + 1) * n_out, :])
        r = m

    r = r + bias_ref[...]                  # (n_out,1) broadcast along lanes
    if activation == "relu":
        r = jnp.maximum(r, 0.0)
    elif activation == "leaky_relu":
        r = jnp.where(r > 0, r, LEAKY_SLOPE * r)

    if alpha is not None:                  # residual mix + eval-mode BN affine
        r = alpha * r + (1.0 - alpha) * x1_ref[...].astype(jnp.float32)
        r = r * scale_ref[...] + shift_ref[...]

    o_ref[...] = r.astype(o_ref.dtype)


def _pick_tile(mo):
    """Pick a lane tile over the flattened spatial axis (multiple of 128)."""
    if mo <= MAX_TMO:
        mop = mo if mo % 128 == 0 else ((mo + 127) // 128) * 128
        return mop, mop
    t = MAX_TMO
    while t >= 128:
        if mo % t == 0:
            return t, mo
        t -= 128
    t = MAX_TMO
    return t, ((mo + t - 1) // t) * t


def pallas_conv_matmul(w, a, bias, *, n_groups=1, activation="none",
                       residual=None, bn_scale=None, bn_shift=None, alpha=None,
                       out_dtype=CONV_DTYPE):
    """out[b] = epilogue(W @ A[b]).  W:(Ng,K) bf16 resident in VMEM,
    A:(B,K,Mo) bf16, output (B, n_out, Mo) in out_dtype.  Grid: (B, Mo tiles)."""
    Ng, K = w.shape
    B, Ka, Mo = a.shape
    assert K == Ka
    n_out = Ng // n_groups

    tmo, Mop = _pick_tile(Mo)
    if Mop != Mo:
        a = jnp.pad(a, ((0, 0), (0, 0), (0, Mop - Mo)))
        if residual is not None:
            residual = jnp.pad(residual, ((0, 0), (0, 0), (0, Mop - Mo)))

    fused = alpha is not None
    kernel = functools.partial(_convmm_kernel, n_groups=n_groups, n_out=n_out,
                               activation=activation,
                               alpha=float(alpha) if fused else None)

    in_specs = [
        pl.BlockSpec((Ng, K), lambda b, i: (0, 0)),          # weight resident in VMEM
        pl.BlockSpec((None, K, tmo), lambda b, i: (b, 0, i)),  # patches tile
        pl.BlockSpec((n_out, 1), lambda b, i: (0, 0)),       # bias
    ]
    args = [w, a, bias]
    if fused:
        in_specs += [
            pl.BlockSpec((None, n_out, tmo), lambda b, i: (b, 0, i)),  # x1 (bf16)
            pl.BlockSpec((n_out, 1), lambda b, i: (0, 0)),             # BN scale
            pl.BlockSpec((n_out, 1), lambda b, i: (0, 0)),             # BN shift
        ]
        args += [residual.astype(CONV_DTYPE), bn_scale, bn_shift]

    out = pl.pallas_call(
        kernel,
        out_shape=jax.ShapeDtypeStruct((B, n_out, Mop), out_dtype),
        grid=(B, Mop // tmo),
        in_specs=in_specs,
        out_specs=pl.BlockSpec((None, n_out, tmo), lambda b, i: (b, 0, i)),
        compiler_params=pltpu.CompilerParams(
            dimension_semantics=("parallel", "parallel"),
            vmem_limit_bytes=VMEM_LIMIT),
    )(*args)
    return out[..., :Mo] if Mop != Mo else out


# ---------------------------------------------------------------------------
# Conv3d via channels-first im2col + Pallas transposed matmul.
# ---------------------------------------------------------------------------
def conv3d_im2col(x, w_mat, bias, *, kernel_size, stride, padding, n_groups=1,
                  activation="none", residual=None, bn_scale=None, bn_shift=None,
                  alpha=None, out_dtype=CONV_DTYPE):
    # x: (B, C, H, W, Z); w_mat: (n_groups*n_out, taps*C) bf16 (precomputed)
    B, C, H, W, Z = x.shape
    kh, kw, kz = kernel_size
    sh, sw, sz = stride
    ph, pw, pz = padding
    x = x.astype(CONV_DTYPE)
    xp = jnp.pad(x, ((0, 0), (0, 0), (ph, ph), (pw, pw), (pz, pz)))
    Ho = (H + 2 * ph - kh) // sh + 1
    Wo = (W + 2 * pw - kw) // sw + 1
    Zo = (Z + 2 * pz - kz) // sz + 1
    cols = []
    for ih in range(kh):
        for iw in range(kw):
            for iz in range(kz):
                cols.append(xp[:, :, ih:ih + sh * (Ho - 1) + 1:sh,
                               iw:iw + sw * (Wo - 1) + 1:sw,
                               iz:iz + sz * (Zo - 1) + 1:sz])
    # TODO(synk): the bf16 patch tensor is still materialized once per conv in HBM;
    # removing it needs halo/Element BlockSpecs (tap accumulation in-kernel).
    patches = jnp.concatenate(cols, axis=1)          # (B, taps*C, Ho, Wo, Zo)
    K = kh * kw * kz * C
    Mo = Ho * Wo * Zo
    A = patches.reshape(B, K, Mo)
    res = None if residual is None else residual.reshape(B, -1, Mo)
    out = pallas_conv_matmul(w_mat, A, bias, n_groups=n_groups,
                             activation=activation, residual=res,
                             bn_scale=bn_scale, bn_shift=bn_shift, alpha=alpha,
                             out_dtype=out_dtype)
    n_out = w_mat.shape[0] // n_groups
    return out.reshape(B, n_out, Ho, Wo, Zo)


# TODO(synk): SymGroupConv3d source was not provided; approximated as a conv whose
# output is max-aggregated (agg_fun=torch.max) over the in-plane flip group
# {id, flipH, flipW, flipHW} (use_flip=True).  Stride-2 flipped copies may shift by
# one row/col vs. the exact reference.
def _flip_group_weight(w):
    # w: (O, Cin, kh, kw, kz) PyTorch Conv3d layout -> (4*O, taps*Cin) bf16 matrix
    ws = [w,
          w[:, :, ::-1, :, :],
          w[:, :, :, ::-1, :],
          w[:, :, ::-1, ::-1, :]]
    mats = [jnp.transpose(v, (0, 2, 3, 4, 1)).reshape(w.shape[0], -1) for v in ws]
    return jnp.concatenate(mats, axis=0).astype(CONV_DTYPE)


# ---------------------------------------------------------------------------
# ResSymGroupConv block + feature extractor (channels-first throughout).
# ---------------------------------------------------------------------------
def res_sym_block(x, blk):
    x1 = conv3d_im2col(x, blk["conv1_w"], blk["conv1_b"],
                       kernel_size=(3, 3, 3), stride=(2, 2, 1), padding=(1, 1, 1),
                       n_groups=4)
    h = x1
    n = len(blk["convs"])
    for j, (w, b) in enumerate(blk["convs"]):
        last = (j == n - 1)
        h = conv3d_im2col(h, w, b,
                          kernel_size=(3, 3, 3), stride=(1, 1, 1), padding=(1, 1, 1),
                          n_groups=4, activation="leaky_relu",
                          residual=x1 if last else None,
                          bn_scale=blk["bn_scale"] if last else None,
                          bn_shift=blk["bn_shift"] if last else None,
                          alpha=ALPHA if last else None)
    return h


def features(img, prep):
    x = img                                        # (B, 1, H, W, Z) channels-first
    for blk in prep["blocks"]:
        x = res_sym_block(x, blk)
    return x                                       # (B, 32, H/8, W/8, Z) bf16


# ---------------------------------------------------------------------------
# "dummy" mask pooling: 3x AvgPool3d(kernel=(3,3,1), stride=(2,2,1), pad=(1,1,0))
# ---------------------------------------------------------------------------
def dummy_pool(mask):
    x = mask
    for _ in range(3):
        s = lax.reduce_window(x, 0.0, lax.add, (1, 1, 3, 3, 1), (1, 1, 2, 2, 1),
                              [(0, 0), (0, 0), (1, 1), (1, 1), (0, 0)])
        x = s / 9.0                                # count_include_pad=True
    return x


# ---------------------------------------------------------------------------
# Fused head: enc0 (4x4x1 conv-as-matmul) -> enc1 (1x1) -> bilateral pairing ->
# classifier, all in one pallas_call with every weight resident in VMEM.
# ---------------------------------------------------------------------------
def _head_kernel(a_ref, w0_ref, b0_ref, w1_ref, b1_ref, w2a_ref, w2b_ref, b2_ref,
                 o_ref):
    h0 = jnp.dot(a_ref[...], w0_ref[...], preferred_element_type=jnp.float32)
    h0 = jnp.maximum(h0 + b0_ref[...], 0.0)                        # (M, 128)
    h1 = jnp.dot(h0, w1_ref[...], preferred_element_type=jnp.float32)
    h1 = jnp.maximum(h1 + b1_ref[...], 0.0)                        # (M, 32)

    # Bilateral pairing via tiny selection matmuls (avoids sublane shuffles).
    m2 = o_ref.shape[0]
    rows = lax.broadcasted_iota(jnp.int32, (m2, 2 * m2), 0)
    cols = lax.broadcasted_iota(jnp.int32, (m2, 2 * m2), 1)
    s_even = (cols == 2 * rows).astype(jnp.float32)
    s_odd = (cols == 2 * rows + 1).astype(jnp.float32)
    h1e = jnp.dot(s_even, h1, preferred_element_type=jnp.float32)  # (m2, 32)
    h1o = jnp.dot(s_odd, h1, preferred_element_type=jnp.float32)

    cls = (jnp.dot(h1e, w2a_ref[...], preferred_element_type=jnp.float32)
           + jnp.dot(h1o, w2b_ref[...], preferred_element_type=jnp.float32)
           + b2_ref[...])
    o_ref[...] = cls


def head_forward(a, prep):
    # a: (B*R, C*P*P) f32 ; output: (B*R//2, 2*NUM_CLASS) f32 logits
    M, _ = a.shape
    M2 = M // 2
    w0, b0 = prep["enc0_w"], prep["enc0_b"]
    w1, b1 = prep["enc1_w"], prep["enc1_b"]
    w2a, w2b, b2 = prep["cls_wa"], prep["cls_wb"], prep["cls_b"]
    full = lambda s: pl.BlockSpec(s, lambda i: tuple(0 for _ in s))
    return pl.pallas_call(
        _head_kernel,
        out_shape=jax.ShapeDtypeStruct((M2, w2a.shape[1]), jnp.float32),
        grid=(1,),
        in_specs=[full(a.shape), full(w0.shape), full(b0.shape), full(w1.shape),
                  full(b1.shape), full(w2a.shape), full(w2b.shape), full(b2.shape)],
        out_specs=full((M2, w2a.shape[1])),
        compiler_params=pltpu.CompilerParams(
            dimension_semantics=("arbitrary",),
            vmem_limit_bytes=VMEM_LIMIT),
    )(a.astype(jnp.float32), w0, b0, w1, b1, w2a, w2b, b2)


# ---------------------------------------------------------------------------
# ROI crop + AdaptiveMaxPool3d((4,4,None)) as separable 1-D binned maxes.
# ---------------------------------------------------------------------------
def _bin_assign(m):
    """m: (B,R,L) bool selection -> (B,R,POOL_W,L) bool bin assignment over the
    compacted (cropped) selected indices, matching AdaptiveMaxPool bin edges."""
    mi = m.astype(jnp.int32)
    rank = jnp.cumsum(mi, axis=-1) - 1
    n = mi.sum(axis=-1)
    p = jnp.arange(POOL_W, dtype=jnp.int32)
    start = (p[None, None, :] * n[:, :, None]) // POOL_W
    end = ((p[None, None, :] + 1) * n[:, :, None] + POOL_W - 1) // POOL_W
    r = rank[:, :, None, :]
    return m[:, :, None, :] & (r >= start[..., None]) & (r < end[..., None])


def get_preds(feat, mask, prep):
    # feat: (B, C, H8, W8, Z) bf16 channels-first; mask: (B, R, H8, W8, Z) f32
    B, C, H8, W8, Z = feat.shape
    R = mask.shape[1]
    P = POOL_W
    feat = feat.astype(jnp.float32)     # keep pooling/sentinel math in f32

    mx = mask.max(axis=-1).max(axis=-1) > 0           # (B,R,H8)
    my = mask.max(axis=-1).max(axis=-2) > 0           # (B,R,W8)
    mz = mask.max(axis=-2).max(axis=-2) > 0           # (B,R,Z)
    n_slices = jnp.maximum(mz.sum(axis=-1).astype(jnp.float32), 1.0)

    Ah = _bin_assign(mx)                               # (B,R,P,H8)
    Aw = _bin_assign(my)                               # (B,R,P,W8)

    NEG = jnp.float32(-3e38)
    # Separable adaptive max: bin over H first, then over W.
    f = feat[:, None, :, None, :, :, :]                # (B,1,C,1,H8,W8,Z)
    ah = Ah[:, :, None, :, :, None, None]              # (B,R,1,P,H8,1,1)
    t1 = jnp.max(jnp.where(ah, f, NEG), axis=4)        # (B,R,C,P,W8,Z)
    aw = Aw[:, :, None, None, :, :, None]              # (B,R,1,1,P,W8,1)
    xx = jnp.max(jnp.where(aw, t1[:, :, :, :, None, :, :], NEG), axis=5)  # (B,R,C,P,P,Z)
    valid = jnp.any(Ah, axis=-1)[:, :, :, None] & jnp.any(Aw, axis=-1)[:, :, None, :]
    xx = jnp.where(valid[:, :, None, :, :, None], xx, 0.0)

    mk = mask[:, :, None, :, :, :]                     # (B,R,1,H8,W8,Z)
    am = Ah[:, :, :, :, None, None]                    # (B,R,P,H8,1,1)
    m1 = jnp.max(jnp.where(am, mk, 0.0), axis=3)       # (B,R,P,W8,Z)
    aw2 = Aw[:, :, None, :, :, None]                   # (B,R,1,P,W8,1)
    mbox = jnp.max(jnp.where(aw2, m1[:, :, :, None, :, :], 0.0), axis=4)  # (B,R,P,P,Z)

    out = xx * mbox[:, :, None]                        # (B,R,C,P,P,Z)

    # encoder = identity (agg_before_layer == 0)

    # TODO(synk): nDSELayer3D source not provided; approximated as masked softmax
    # attention over z with a linear C->C excite (kernel_w=1, use_softmax, no bias).
    s = out.mean(axis=(3, 4))                          # (B,R,C,Z)
    e = jnp.einsum("brcz,kc->brkz", s, prep["se_w"])
    logits = jnp.where(mz[:, :, None, :], e, -1e30)
    attn = jax.nn.softmax(logits, axis=-1)
    out = out * attn[:, :, :, None, None, :]

    out = out.sum(axis=-1) / n_slices[:, :, None, None, None]   # (B,R,C,P,P)

    # agg_BN (eval-mode affine with running stats)
    out = (out * prep["aggbn_scale"][None, None, :, None, None]
           + prep["aggbn_shift"][None, None, :, None, None])

    A0 = out.reshape(B * R, C * P * P)                 # columns ordered (c, ph, pw)
    cls = head_forward(A0, prep)                       # (B*R//2, 2*NUM_CLASS)
    return cls.reshape(B, R, NUM_CLASS)


@jax.jit
def dga3net_forward(x, prep):
    # x: (B, 2 + N_ROI, H, W, Z); channel 0 = image, channels 2.. = ROI masks
    mask = dummy_pool(x[:, 2:, ...])
    img = x[:, 0:1, ...]
    feat = features(img, prep)
    return get_preds(feat, mask, prep)


# ---------------------------------------------------------------------------
# Parameters: raw (PyTorch-like) init + one-time inference preparation
# (flip-group weight matrices, bf16 casts, BN scale/shift, reshaped biases).
# ---------------------------------------------------------------------------
def init_params(key):
    keys = iter(jax.random.split(key, 64))

    def nrm(shape, scale):
        return scale * jax.random.normal(next(keys), shape, jnp.float32)

    blocks = []
    for i in range(3):
        cin, cout, nl = IN_CHS[i], OUT_CHS[i], BLOCK_LAYERS[i]
        blocks.append({
            "conv1_w": nrm((cout, cin, 3, 3, 3), 1.0 / np.sqrt(cin * 27)),
            "conv1_b": nrm((cout,), 0.01),
            "convs": [(nrm((cout, cout, 3, 3, 3), 1.0 / np.sqrt(cout * 27)),
                       nrm((cout,), 0.01)) for _ in range(nl)],
            "bn_gamma": 1.0 + nrm((cout,), 0.05),
            "bn_beta": nrm((cout,), 0.05),
            "bn_mean": nrm((cout,), 0.05),
            "bn_var": jnp.exp(nrm((cout,), 0.05)),
        })
    C = OUT_CHS[-1]
    return {
        "blocks": blocks,
        "se_w": nrm((C, C), 1.0 / np.sqrt(C)),
        "aggbn_gamma": 1.0 + nrm((C,), 0.05),
        "aggbn_beta": nrm((C,), 0.05),
        "aggbn_mean": nrm((C,), 0.05),
        "aggbn_var": jnp.exp(nrm((C,), 0.05)),
        "enc0_w": nrm((MLP_CH[0], C, POOL_W, POOL_W, 1),
                      1.0 / np.sqrt(C * POOL_W * POOL_W)),
        "enc0_b": nrm((MLP_CH[0],), 0.01),
        "enc1_w": nrm((MLP_CH[1], MLP_CH[0]), 1.0 / np.sqrt(MLP_CH[0])),
        "enc1_b": nrm((MLP_CH[1],), 0.01),
        "cls_w": nrm((NUM_CLASS * 2, MLP_CH[1] * 2), 1.0 / np.sqrt(MLP_CH[1] * 2)),
        "cls_b": nrm((NUM_CLASS * 2,), 0.01),
    }


def prepare_params(p):
    prep = {"blocks": []}
    for blk in p["blocks"]:
        scale = blk["bn_gamma"] / jnp.sqrt(blk["bn_var"] + BN_EPS)
        shift = blk["bn_beta"] - blk["bn_mean"] * scale
        prep["blocks"].append({
            "conv1_w": _flip_group_weight(blk["conv1_w"]),
            "conv1_b": blk["conv1_b"].reshape(-1, 1).astype(jnp.float32),
            "convs": [(_flip_group_weight(w), b.reshape(-1, 1).astype(jnp.float32))
                      for (w, b) in blk["convs"]],
            "bn_scale": scale.reshape(-1, 1).astype(jnp.float32),
            "bn_shift": shift.reshape(-1, 1).astype(jnp.float32),
        })
    agg_scale = p["aggbn_gamma"] / jnp.sqrt(p["aggbn_var"] + BN_EPS)
    agg_shift = p["aggbn_beta"] - p["aggbn_mean"] * agg_scale
    prep.update({
        "se_w": p["se_w"].astype(jnp.float32),
        "aggbn_scale": agg_scale.astype(jnp.float32),
        "aggbn_shift": agg_shift.astype(jnp.float32),
        "enc0_w": jnp.transpose(
            p["enc0_w"][:, :, :, :, 0].reshape(MLP_CH[0], -1)).astype(jnp.float32),
        "enc0_b": p["enc0_b"].reshape(1, -1).astype(jnp.float32),
        "enc1_w": jnp.transpose(p["enc1_w"]).astype(jnp.float32),
        "enc1_b": p["enc1_b"].reshape(1, -1).astype(jnp.float32),
        "cls_wa": jnp.transpose(p["cls_w"][:, :MLP_CH[1]]).astype(jnp.float32),
        "cls_wb": jnp.transpose(p["cls_w"][:, MLP_CH[1]:]).astype(jnp.float32),
        "cls_b": p["cls_b"].reshape(1, -1).astype(jnp.float32),
    })
    return prep


if __name__ == "__main__":
    key = jax.random.PRNGKey(0)
    kp, kx, km = jax.random.split(key, 3)
    B, H, W, Z = 2, 32, 32, 8
    params = init_params(kp)
    prep = prepare_params(params)      # one-time weight prep (hoisted out of forward)

    img = jax.random.normal(kx, (B, 2, H, W, Z), jnp.float32)
    masks = (jax.random.uniform(km, (B, N_ROI, H, W, Z)) < 0.5).astype(jnp.float32)
    masks = masks.at[:, :, 0, 0, :].set(1.0)      # guarantee non-empty ROIs
    x = jnp.concatenate([img, masks], axis=1)     # (B, 22, H, W, Z)

    out = dga3net_forward(x, prep)
    out = jax.block_until_ready(out)
    assert out.shape == (B, N_ROI, NUM_CLASS), out.shape
    assert bool(jnp.all(jnp.isfinite(out)))
    print("KERNEL_OK")
</pallas_src>

<mosaic_0001>
module attributes {stable_mosaic.version = 11 : i64} {
  func.func @_convmm_kernel(%arg0: i32, %arg1: i32, %arg2: memref<32x27xbf16, #tpu.memory_space<vmem>>, %arg3: memref<1x27x1024xbf16, #tpu.memory_space<vmem>>, %arg4: memref<8x1xf32, #tpu.memory_space<vmem>>, %arg5: memref<1x8x1024xbf16, #tpu.memory_space<vmem>>) attributes {dimension_semantics = [#tpu.dimension_semantics<parallel>, #tpu.dimension_semantics<parallel>], iteration_bounds = array<i64: 2, 2>, scalar_prefetch = 0 : i64, scratch_operands = 0 : i64, tpu.core_type = #tpu.core_type<tc>, window_params = [{pipeline_mode = #tpu.pipeline_mode<synchronous>, transform_indices = @transform_0, window_bounds = array<i64: 32, 27>}, {transform_indices = @transform_1, window_bounds = array<i64: 1, 27, 1024>}, {pipeline_mode = #tpu.pipeline_mode<synchronous>, transform_indices = @transform_2, window_bounds = array<i64: 8, 1>}, {transform_indices = @transform_3, window_bounds = array<i64: 1, 8, 1024>}]} {
    %c0 = arith.constant 0 : index
    %c0_0 = arith.constant 0 : index
    %0 = vector.load %arg2[%c0, %c0_0] : memref<32x27xbf16, #tpu.memory_space<vmem>>, vector<32x27xbf16>
    %c0_1 = arith.constant 0 : index
    %c0_2 = arith.constant 0 : index
    %c0_3 = arith.constant 0 : index
    %1 = vector.load %arg3[%c0_1, %c0_2, %c0_3] : memref<1x27x1024xbf16, #tpu.memory_space<vmem>>, vector<1x27x1024xbf16>
    %2 = vector.shape_cast %1 : vector<1x27x1024xbf16> to vector<27x1024xbf16>
    %cst = arith.constant dense<0.000000e+00> : vector<32x1024xf32>
    %3 = tpu.matmul %0, %2, %cst {dimension_numbers = #tpu.dot_dimension_numbers<[1], [0], [0], [1], [0, 0, 1, 1], [], []>} : vector<32x27xbf16>, vector<27x1024xbf16>, vector<32x1024xf32> -> vector<32x1024xf32>
    %4 = vector.extract_strided_slice %3 {offsets = [0, 0], sizes = [8, 1024], strides = [1, 1]} : vector<32x1024xf32> to vector<8x1024xf32>
    %5 = vector.extract_strided_slice %3 {offsets = [8, 0], sizes = [8, 1024], strides = [1, 1]} : vector<32x1024xf32> to vector<8x1024xf32>
    %6 = arith.maximumf %4, %5 : vector<8x1024xf32>
    %7 = vector.extract_strided_slice %3 {offsets = [16, 0], sizes = [8, 1024], strides = [1, 1]} : vector<32x1024xf32> to vector<8x1024xf32>
    %8 = arith.maximumf %6, %7 : vector<8x1024xf32>
    %9 = vector.extract_strided_slice %3 {offsets = [24, 0], sizes = [8, 1024], strides = [1, 1]} : vector<32x1024xf32> to vector<8x1024xf32>
    %10 = arith.maximumf %8, %9 : vector<8x1024xf32>
    %c0_4 = arith.constant 0 : index
    %c0_5 = arith.constant 0 : index
    %11 = vector.load %arg4[%c0_4, %c0_5] : memref<8x1xf32, #tpu.memory_space<vmem>>, vector<8x1xf32>
    %12 = vector.broadcast %11 : vector<8x1xf32> to vector<8x1024xf32>
    %13 = arith.addf %10, %12 : vector<8x1024xf32>
    %14 = arith.truncf %13 : vector<8x1024xf32> to vector<8x1024xbf16>
    %c0_6 = arith.constant 0 : index
    %c0_7 = arith.constant 0 : index
    %c0_8 = arith.constant 0 : index
    %15 = vector.load %arg5[%c0_6, %c0_7, %c0_8] : memref<1x8x1024xbf16, #tpu.memory_space<vmem>>, vector<1x8x1024xbf16>
    %16 = vector.shape_cast %15 : vector<1x8x1024xbf16> to vector<8x1024xbf16>
    %17 = vector.shape_cast %14 : vector<8x1024xbf16> to vector<1x8x1024xbf16>
    tpu.vector_store %arg5[%c0_6, %c0_7, %c0_8], %17 {strides = array<i32>} : memref<1x8x1024xbf16, #tpu.memory_space<vmem>>, vector<1x8x1024xbf16>,
    return
  }
  func.func @transform_0(%arg0: i32, %arg1: i32) -> (i32, i32) {
    %c0_i32 = arith.constant 0 : i32
    %c0_i32_0 = arith.constant 0 : i32
    %c0_i32_1 = arith.constant 0 : i32
    return %c0_i32, %c0_i32_0 : i32, i32
  }
  func.func @transform_1(%arg0: i32, %arg1: i32) -> (i32, i32, i32) {
    %c0_i32 = arith.constant 0 : i32
    %c0_i32_0 = arith.constant 0 : i32
    return %arg0, %c0_i32, %arg1 : i32, i32, i32
  }
  func.func @transform_2(%arg0: i32, %arg1: i32) -> (i32, i32) {
    %c0_i32 = arith.constant 0 : i32
    %c0_i32_0 = arith.constant 0 : i32
    %c0_i32_1 = arith.constant 0 : i32
    return %c0_i32, %c0_i32_0 : i32, i32
  }
  func.func @transform_3(%arg0: i32, %arg1: i32) -> (i32, i32, i32) {
    %c0_i32 = arith.constant 0 : i32
    %c0_i32_0 = arith.constant 0 : i32
    return %arg0, %c0_i32, %arg1 : i32, i32, i32
  }
}

module attributes {stable_mosaic.version = 11 : i64} {
  func.func @_convmm_kernel(%arg0: i32, %arg1: i32, %arg2: memref<32x216xbf16, #tpu.memory_space<vmem>>, %arg3: memref<1x216x1024xbf16, #tpu.memory_space<vmem>>, %arg4: memref<8x1xf32, #tpu.memory_space<vmem>>, %arg5: memref<1x8x1024xbf16, #tpu.memory_space<vmem>>) attributes {dimension_semantics = [#tpu.dimension_semantics<parallel>, #tpu.dimension_semantics<parallel>], iteration_bounds = array<i64: 2, 2>, scalar_prefetch = 0 : i64, scratch_operands = 0 : i64, tpu.core_type = #tpu.core_type<tc>, window_params = [{pipeline_mode = #tpu.pipeline_mode<synchronous>, transform_indices = @transform_0, window_bounds = array<i64: 32, 216>}, {transform_indices = @transform_1, window_bounds = array<i64: 1, 216, 1024>}, {pipeline_mode = #tpu.pipeline_mode<synchronous>, transform_indices = @transform_2, window_bounds = array<i64: 8, 1>}, {transform_indices = @transform_3, window_bounds = array<i64: 1, 8, 1024>}]} {
    %c0 = arith.constant 0 : index
    %c0_0 = arith.constant 0 : index
    %0 = vector.load %arg2[%c0, %c0_0] : memref<32x216xbf16, #tpu.memory_space<vmem>>, vector<32x216xbf16>
    %c0_1 = arith.constant 0 : index
    %c0_2 = arith.constant 0 : index
    %c0_3 = arith.constant 0 : index
    %1 = vector.load %arg3[%c0_1, %c0_2, %c0_3] : memref<1x216x1024xbf16, #tpu.memory_space<vmem>>, vector<1x216x1024xbf16>
    %2 = vector.shape_cast %1 : vector<1x216x1024xbf16> to vector<216x1024xbf16>
    %cst = arith.constant dense<0.000000e+00> : vector<32x1024xf32>
    %3 = tpu.matmul %0, %2, %cst {dimension_numbers = #tpu.dot_dimension_numbers<[1], [0], [0], [1], [0, 0, 1, 1], [], []>} : vector<32x216xbf16>, vector<216x1024xbf16>, vector<32x1024xf32> -> vector<32x1024xf32>
    %4 = vector.extract_strided_slice %3 {offsets = [0, 0], sizes = [8, 1024], strides = [1, 1]} : vector<32x1024xf32> to vector<8x1024xf32>
    %5 = vector.extract_strided_slice %3 {offsets = [8, 0], sizes = [8, 1024], strides = [1, 1]} : vector<32x1024xf32> to vector<8x1024xf32>
    %6 = arith.maximumf %4, %5 : vector<8x1024xf32>
    %7 = vector.extract_strided_slice %3 {offsets = [16, 0], sizes = [8, 1024], strides = [1, 1]} : vector<32x1024xf32> to vector<8x1024xf32>
    %8 = arith.maximumf %6, %7 : vector<8x1024xf32>
    %9 = vector.extract_strided_slice %3 {offsets = [24, 0], sizes = [8, 1024], strides = [1, 1]} : vector<32x1024xf32> to vector<8x1024xf32>
    %10 = arith.maximumf %8, %9 : vector<8x1024xf32>
    %c0_4 = arith.constant 0 : index
    %c0_5 = arith.constant 0 : index
    %11 = vector.load %arg4[%c0_4, %c0_5] : memref<8x1xf32, #tpu.memory_space<vmem>>, vector<8x1xf32>
    %12 = vector.broadcast %11 : vector<8x1xf32> to vector<8x1024xf32>
    %13 = arith.addf %10, %12 : vector<8x1024xf32>
    %cst_6 = arith.constant 0.000000e+00 : f32
    %14 = vector.broadcast %cst_6 : f32 to vector<8x1024xf32>
    %15 = arith.cmpf ogt, %13, %14 : vector<8x1024xf32>
    %cst_7 = arith.constant 0.00999999977 : f32
    %16 = vector.broadcast %cst_7 : f32 to vector<8x1024xf32>
    %17 = arith.mulf %16, %13 : vector<8x1024xf32>
    %18 = arith.select %15, %13, %17 : vector<8x1024xi1>, vector<8x1024xf32>
    %19 = arith.truncf %18 : vector<8x1024xf32> to vector<8x1024xbf16>
    %c0_8 = arith.constant 0 : index
    %c0_9 = arith.constant 0 : index
    %c0_10 = arith.constant 0 : index
    %20 = vector.load %arg5[%c0_8, %c0_9, %c0_10] : memref<1x8x1024xbf16, #tpu.memory_space<vmem>>, vector<1x8x1024xbf16>
    %21 = vector.shape_cast %20 : vector<1x8x1024xbf16> to vector<8x1024xbf16>
    %22 = vector.shape_cast %19 : vector<8x1024xbf16> to vector<1x8x1024xbf16>
    tpu.vector_store %arg5[%c0_8, %c0_9, %c0_10], %22 {strides = array<i32>} : memref<1x8x1024xbf16, #tpu.memory_space<vmem>>, vector<1x8x1024xbf16>,
    return
  }
  func.func @transform_0(%arg0: i32, %arg1: i32) -> (i32, i32) {
    %c0_i32 = arith.constant 0 : i32
    %c0_i32_0 = arith.constant 0 : i32
    %c0_i32_1 = arith.constant 0 : i32
    return %c0_i32, %c0_i32_0 : i32, i32
  }
  func.func @transform_1(%arg0: i32, %arg1: i32) -> (i32, i32, i32) {
    %c0_i32 = arith.constant 0 : i32
    %c0_i32_0 = arith.constant 0 : i32
    return %arg0, %c0_i32, %arg1 : i32, i32, i32
  }
  func.func @transform_2(%arg0: i32, %arg1: i32) -> (i32, i32) {
    %c0_i32 = arith.constant 0 : i32
    %c0_i32_0 = arith.constant 0 : i32
    %c0_i32_1 = arith.constant 0 : i32
    return %c0_i32, %c0_i32_0 : i32, i32
  }
  func.func @transform_3(%arg0: i32, %arg1: i32) -> (i32, i32, i32) {
    %c0_i32 = arith.constant 0 : i32
    %c0_i32_0 = arith.constant 0 : i32
    return %arg0, %c0_i32, %arg1 : i32, i32, i32
  }
}

module attributes {stable_mosaic.version = 11 : i64} {
  func.func @_convmm_kernel(%arg0: i32, %arg1: i32, %arg2: memref<32x216xbf16, #tpu.memory_space<vmem>>, %arg3: memref<1x216x1024xbf16, #tpu.memory_space<vmem>>, %arg4: memref<8x1xf32, #tpu.memory_space<vmem>>, %arg5: memref<1x8x1024xbf16, #tpu.memory_space<vmem>>, %arg6: memref<8x1xf32, #tpu.memory_space<vmem>>, %arg7: memref<8x1xf32, #tpu.memory_space<vmem>>, %arg8: memref<1x8x1024xbf16, #tpu.memory_space<vmem>>) attributes {dimension_semantics = [#tpu.dimension_semantics<parallel>, #tpu.dimension_semantics<parallel>], iteration_bounds = array<i64: 2, 2>, scalar_prefetch = 0 : i64, scratch_operands = 0 : i64, tpu.core_type = #tpu.core_type<tc>, window_params = [{pipeline_mode = #tpu.pipeline_mode<synchronous>, transform_indices = @transform_0, window_bounds = array<i64: 32, 216>}, {transform_indices = @transform_1, window_bounds = array<i64: 1, 216, 1024>}, {pipeline_mode = #tpu.pipeline_mode<synchronous>, transform_indices = @transform_2, window_bounds = array<i64: 8, 1>}, {transform_indices = @transform_3, window_bounds = array<i64: 1, 8, 1024>}, {pipeline_mode = #tpu.pipeline_mode<synchronous>, transform_indices = @transform_4, window_bounds = array<i64: 8, 1>}, {pipeline_mode = #tpu.pipeline_mode<synchronous>, transform_indices = @transform_5, window_bounds = array<i64: 8, 1>}, {transform_indices = @transform_6, window_bounds = array<i64: 1, 8, 1024>}]} {
    %c0 = arith.constant 0 : index
    %c0_0 = arith.constant 0 : index
    %0 = vector.load %arg2[%c0, %c0_0] : memref<32x216xbf16, #tpu.memory_space<vmem>>, vector<32x216xbf16>
    %c0_1 = arith.constant 0 : index
    %c0_2 = arith.constant 0 : index
    %c0_3 = arith.constant 0 : index
    %1 = vector.load %arg3[%c0_1, %c0_2, %c0_3] : memref<1x216x1024xbf16, #tpu.memory_space<vmem>>, vector<1x216x1024xbf16>
    %2 = vector.shape_cast %1 : vector<1x216x1024xbf16> to vector<216x1024xbf16>
    %cst = arith.constant dense<0.000000e+00> : vector<32x1024xf32>
    %3 = tpu.matmul %0, %2, %cst {dimension_numbers = #tpu.dot_dimension_numbers<[1], [0], [0], [1], [0, 0, 1, 1], [], []>} : vector<32x216xbf16>, vector<216x1024xbf16>, vector<32x1024xf32> -> vector<32x1024xf32>
    %4 = vector.extract_strided_slice %3 {offsets = [0, 0], sizes = [8, 1024], strides = [1, 1]} : vector<32x1024xf32> to vector<8x1024xf32>
    %5 = vector.extract_strided_slice %3 {offsets = [8, 0], sizes = [8, 1024], strides = [1, 1]} : vector<32x1024xf32> to vector<8x1024xf32>
    %6 = arith.maximumf %4, %5 : vector<8x1024xf32>
    %7 = vector.extract_strided_slice %3 {offsets = [16, 0], sizes = [8, 1024], strides = [1, 1]} : vector<32x1024xf32> to vector<8x1024xf32>
    %8 = arith.maximumf %6, %7 : vector<8x1024xf32>
    %9 = vector.extract_strided_slice %3 {offsets = [24, 0], sizes = [8, 1024], strides = [1, 1]} : vector<32x1024xf32> to vector<8x1024xf32>
    %10 = arith.maximumf %8, %9 : vector<8x1024xf32>
    %c0_4 = arith.constant 0 : index
    %c0_5 = arith.constant 0 : index
    %11 = vector.load %arg4[%c0_4, %c0_5] : memref<8x1xf32, #tpu.memory_space<vmem>>, vector<8x1xf32>
    %12 = vector.broadcast %11 : vector<8x1xf32> to vector<8x1024xf32>
    %13 = arith.addf %10, %12 : vector<8x1024xf32>
    %cst_6 = arith.constant 0.000000e+00 : f32
    %14 = vector.broadcast %cst_6 : f32 to vector<8x1024xf32>
    %15 = arith.cmpf ogt, %13, %14 : vector<8x1024xf32>
    %cst_7 = arith.constant 0.00999999977 : f32
    %16 = vector.broadcast %cst_7 : f32 to vector<8x1024xf32>
    %17 = arith.mulf %16, %13 : vector<8x1024xf32>
    %18 = arith.select %15, %13, %17 : vector<8x1024xi1>, vector<8x1024xf32>
    %cst_8 = arith.constant 0.899999976 : f32
    %19 = vector.broadcast %cst_8 : f32 to vector<8x1024xf32>
    %20 = arith.mulf %19, %18 : vector<8x1024xf32>
    %c0_9 = arith.constant 0 : index
    %c0_10 = arith.constant 0 : index
    %c0_11 = arith.constant 0 : index
    %21 = vector.load %arg5[%c0_9, %c0_10, %c0_11] : memref<1x8x1024xbf16, #tpu.memory_space<vmem>>, vector<1x8x1024xbf16>
    %22 = vector.shape_cast %21 : vector<1x8x1024xbf16> to vector<8x1024xbf16>
    %23 = arith.extf %22 : vector<8x1024xbf16> to vector<8x1024xf32>
    %cst_12 = arith.constant 1.000000e-01 : f32
    %24 = vector.broadcast %cst_12 : f32 to vector<8x1024xf32>
    %25 = arith.mulf %24, %23 : vector<8x1024xf32>
    %26 = arith.addf %20, %25 : vector<8x1024xf32>
    %c0_13 = arith.constant 0 : index
    %c0_14 = arith.constant 0 : index
    %27 = vector.load %arg6[%c0_13, %c0_14] : memref<8x1xf32, #tpu.memory_space<vmem>>, vector<8x1xf32>
    %28 = vector.broadcast %27 : vector<8x1xf32> to vector<8x1024xf32>
    %29 = arith.mulf %26, %28 : vector<8x1024xf32>
    %c0_15 = arith.constant 0 : index
    %c0_16 = arith.constant 0 : index
    %30 = vector.load %arg7[%c0_15, %c0_16] : memref<8x1xf32, #tpu.memory_space<vmem>>, vector<8x1xf32>
    %31 = vector.broadcast %30 : vector<8x1xf32> to vector<8x1024xf32>
    %32 = arith.addf %29, %31 : vector<8x1024xf32>
    %33 = arith.truncf %32 : vector<8x1024xf32> to vector<8x1024xbf16>
    %c0_17 = arith.constant 0 : index
    %c0_18 = arith.constant 0 : index
    %c0_19 = arith.constant 0 : index
    %34 = vector.load %arg8[%c0_17, %c0_18, %c0_19] : memref<1x8x1024xbf16, #tpu.memory_space<vmem>>, vector<1x8x1024xbf16>
    %35 = vector.shape_cast %34 : vector<1x8x1024xbf16> to vector<8x1024xbf16>
    %36 = vector.shape_cast %33 : vector<8x1024xbf16> to vector<1x8x1024xbf16>
    tpu.vector_store %arg8[%c0_17, %c0_18, %c0_19], %36 {strides = array<i32>} : memref<1x8x1024xbf16, #tpu.memory_space<vmem>>, vector<1x8x1024xbf16>,
    return
  }
  func.func @transform_0(%arg0: i32, %arg1: i32) -> (i32, i32) {
    %c0_i32 = arith.constant 0 : i32
    %c0_i32_0 = arith.constant 0 : i32
    %c0_i32_1 = arith.constant 0 : i32
    return %c0_i32, %c0_i32_0 : i32, i32
  }
  func.func @transform_1(%arg0: i32, %arg1: i32) -> (i32, i32, i32) {
    %c0_i32 = arith.constant 0 : i32
    %c0_i32_0 = arith.constant 0 : i32
    return %arg0, %c0_i32, %arg1 : i32, i32, i32
  }
  func.func @transform_2(%arg0: i32, %arg1: i32) -> (i32, i32) {
    %c0_i32 = arith.constant 0 : i32
    %c0_i32_0 = arith.constant 0 : i32
    %c0_i32_1 = arith.constant 0 : i32
    return %c0_i32, %c0_i32_0 : i32, i32
  }
  func.func @transform_3(%arg0: i32, %arg1: i32) -> (i32, i32, i32) {
    %c0_i32 = arith.constant 0 : i32
    %c0_i32_0 = arith.constant 0 : i32
    return %arg0, %c0_i32, %arg1 : i32, i32, i32
  }
  func.func @transform_4(%arg0: i32, %arg1: i32) -> (i32, i32) {
    %c0_i32 = arith.constant 0 : i32
    %c0_i32_0 = arith.constant 0 : i32
    %c0_i32_1 = arith.constant 0 : i32
    return %c0_i32, %c0_i32_0 : i32, i32
  }
  func.func @transform_5(%arg0: i32, %arg1: i32) -> (i32, i32) {
    %c0_i32 = arith.constant 0 : i32
    %c0_i32_0 = arith.constant 0 : i32
    %c0_i32_1 = arith.constant 0 : i32
    return %c0_i32, %c0_i32_0 : i32, i32
  }
  func.func @transform_6(%arg0: i32, %arg1: i32) -> (i32, i32, i32) {
    %c0_i32 = arith.constant 0 : i32
    %c0_i32_0 = arith.constant 0 : i32
    return %arg0, %c0_i32, %arg1 : i32, i32, i32
  }
}

module attributes {stable_mosaic.version = 11 : i64} {
  func.func @_convmm_kernel(%arg0: i32, %arg1: i32, %arg2: memref<64x216xbf16, #tpu.memory_space<vmem>>, %arg3: memref<1x216x512xbf16, #tpu.memory_space<vmem>>, %arg4: memref<16x1xf32, #tpu.memory_space<vmem>>, %arg5: memref<1x16x512xbf16, #tpu.memory_space<vmem>>) attributes {dimension_semantics = [#tpu.dimension_semantics<parallel>, #tpu.dimension_semantics<parallel>], iteration_bounds = array<i64: 2, 1>, scalar_prefetch = 0 : i64, scratch_operands = 0 : i64, tpu.core_type = #tpu.core_type<tc>, window_params = [{pipeline_mode = #tpu.pipeline_mode<synchronous>, transform_indices = @transform_0, window_bounds = array<i64: 64, 216>}, {transform_indices = @transform_1, window_bounds = array<i64: 1, 216, 512>}, {pipeline_mode = #tpu.pipeline_mode<synchronous>, transform_indices = @transform_2, window_bounds = array<i64: 16, 1>}, {transform_indices = @transform_3, window_bounds = array<i64: 1, 16, 512>}]} {
    %c0 = arith.constant 0 : index
    %c0_0 = arith.constant 0 : index
    %0 = vector.load %arg2[%c0, %c0_0] : memref<64x216xbf16, #tpu.memory_space<vmem>>, vector<64x216xbf16>
    %c0_1 = arith.constant 0 : index
    %c0_2 = arith.constant 0 : index
    %c0_3 = arith.constant 0 : index
    %1 = vector.load %arg3[%c0_1, %c0_2, %c0_3] : memref<1x216x512xbf16, #tpu.memory_space<vmem>>, vector<1x216x512xbf16>
    %2 = vector.shape_cast %1 : vector<1x216x512xbf16> to vector<216x512xbf16>
    %cst = arith.constant dense<0.000000e+00> : vector<64x512xf32>
    %3 = tpu.matmul %0, %2, %cst {dimension_numbers = #tpu.dot_dimension_numbers<[1], [0], [0], [1], [0, 0, 1, 1], [], []>} : vector<64x216xbf16>, vector<216x512xbf16>, vector<64x512xf32> -> vector<64x512xf32>
    %4 = vector.extract_strided_slice %3 {offsets = [0, 0], sizes = [16, 512], strides = [1, 1]} : vector<64x512xf32> to vector<16x512xf32>
    %5 = vector.extract_strided_slice %3 {offsets = [16, 0], sizes = [16, 512], strides = [1, 1]} : vector<64x512xf32> to vector<16x512xf32>
    %6 = arith.maximumf %4, %5 : vector<16x512xf32>
    %7 = vector.extract_strided_slice %3 {offsets = [32, 0], sizes = [16, 512], strides = [1, 1]} : vector<64x512xf32> to vector<16x512xf32>
    %8 = arith.maximumf %6, %7 : vector<16x512xf32>
    %9 = vector.extract_strided_slice %3 {offsets = [48, 0], sizes = [16, 512], strides = [1, 1]} : vector<64x512xf32> to vector<16x512xf32>
    %10 = arith.maximumf %8, %9 : vector<16x512xf32>
    %c0_4 = arith.constant 0 : index
    %c0_5 = arith.constant 0 : index
    %11 = vector.load %arg4[%c0_4, %c0_5] : memref<16x1xf32, #tpu.memory_space<vmem>>, vector<16x1xf32>
    %12 = vector.broadcast %11 : vector<16x1xf32> to vector<16x512xf32>
    %13 = arith.addf %10, %12 : vector<16x512xf32>
    %14 = arith.truncf %13 : vector<16x512xf32> to vector<16x512xbf16>
    %c0_6 = arith.constant 0 : index
    %c0_7 = arith.constant 0 : index
    %c0_8 = arith.constant 0 : index
    %15 = vector.load %arg5[%c0_6, %c0_7, %c0_8] : memref<1x16x512xbf16, #tpu.memory_space<vmem>>, vector<1x16x512xbf16>
    %16 = vector.shape_cast %15 : vector<1x16x512xbf16> to vector<16x512xbf16>
    %17 = vector.shape_cast %14 : vector<16x512xbf16> to vector<1x16x512xbf16>
    tpu.vector_store %arg5[%c0_6, %c0_7, %c0_8], %17 {strides = array<i32>} : memref<1x16x512xbf16, #tpu.memory_space<vmem>>, vector<1x16x512xbf16>,
    return
  }
  func.func @transform_0(%arg0: i32, %arg1: i32) -> (i32, i32) {
    %c0_i32 = arith.constant 0 : i32
    %c0_i32_0 = arith.constant 0 : i32
    %c0_i32_1 = arith.constant 0 : i32
    return %c0_i32, %c0_i32_0 : i32, i32
  }
  func.func @transform_1(%arg0: i32, %arg1: i32) -> (i32, i32, i32) {
    %c0_i32 = arith.constant 0 : i32
    %c0_i32_0 = arith.constant 0 : i32
    return %arg0, %c0_i32, %arg1 : i32, i32, i32
  }
  func.func @transform_2(%arg0: i32, %arg1: i32) -> (i32, i32) {
    %c0_i32 = arith.constant 0 : i32
    %c0_i32_0 = arith.constant 0 : i32
    %c0_i32_1 = arith.constant 0 : i32
    return %c0_i32, %c0_i32_0 : i32, i32
  }
  func.func @transform_3(%arg0: i32, %arg1: i32) -> (i32, i32, i32) {
    %c0_i32 = arith.constant 0 : i32
    %c0_i32_0 = arith.constant 0 : i32
    return %arg0, %c0_i32, %arg1 : i32, i32, i32
  }
}

module attributes {stable_mosaic.version = 11 : i64} {
  func.func @_convmm_kernel(%arg0: i32, %arg1: i32, %arg2: memref<64x432xbf16, #tpu.memory_space<vmem>>, %arg3: memref<1x432x512xbf16, #tpu.memory_space<vmem>>, %arg4: memref<16x1xf32, #tpu.memory_space<vmem>>, %arg5: memref<1x16x512xbf16, #tpu.memory_space<vmem>>) attributes {dimension_semantics = [#tpu.dimension_semantics<parallel>, #tpu.dimension_semantics<parallel>], iteration_bounds = array<i64: 2, 1>, scalar_prefetch = 0 : i64, scratch_operands = 0 : i64, tpu.core_type = #tpu.core_type<tc>, window_params = [{pipeline_mode = #tpu.pipeline_mode<synchronous>, transform_indices = @transform_0, window_bounds = array<i64: 64, 432>}, {transform_indices = @transform_1, window_bounds = array<i64: 1, 432, 512>}, {pipeline_mode = #tpu.pipeline_mode<synchronous>, transform_indices = @transform_2, window_bounds = array<i64: 16, 1>}, {transform_indices = @transform_3, window_bounds = array<i64: 1, 16, 512>}]} {
    %c0 = arith.constant 0 : index
    %c0_0 = arith.constant 0 : index
    %0 = vector.load %arg2[%c0, %c0_0] : memref<64x432xbf16, #tpu.memory_space<vmem>>, vector<64x432xbf16>
    %c0_1 = arith.constant 0 : index
    %c0_2 = arith.constant 0 : index
    %c0_3 = arith.constant 0 : index
    %1 = vector.load %arg3[%c0_1, %c0_2, %c0_3] : memref<1x432x512xbf16, #tpu.memory_space<vmem>>, vector<1x432x512xbf16>
    %2 = vector.shape_cast %1 : vector<1x432x512xbf16> to vector<432x512xbf16>
    %cst = arith.constant dense<0.000000e+00> : vector<64x512xf32>
    %3 = tpu.matmul %0, %2, %cst {dimension_numbers = #tpu.dot_dimension_numbers<[1], [0], [0], [1], [0, 0, 1, 1], [], []>} : vector<64x432xbf16>, vector<432x512xbf16>, vector<64x512xf32> -> vector<64x512xf32>
    %4 = vector.extract_strided_slice %3 {offsets = [0, 0], sizes = [16, 512], strides = [1, 1]} : vector<64x512xf32> to vector<16x512xf32>
    %5 = vector.extract_strided_slice %3 {offsets = [16, 0], sizes = [16, 512], strides = [1, 1]} : vector<64x512xf32> to vector<16x512xf32>
    %6 = arith.maximumf %4, %5 : vector<16x512xf32>
    %7 = vector.extract_strided_slice %3 {offsets = [32, 0], sizes = [16, 512], strides = [1, 1]} : vector<64x512xf32> to vector<16x512xf32>
    %8 = arith.maximumf %6, %7 : vector<16x512xf32>
    %9 = vector.extract_strided_slice %3 {offsets = [48, 0], sizes = [16, 512], strides = [1, 1]} : vector<64x512xf32> to vector<16x512xf32>
    %10 = arith.maximumf %8, %9 : vector<16x512xf32>
    %c0_4 = arith.constant 0 : index
    %c0_5 = arith.constant 0 : index
    %11 = vector.load %arg4[%c0_4, %c0_5] : memref<16x1xf32, #tpu.memory_space<vmem>>, vector<16x1xf32>
    %12 = vector.broadcast %11 : vector<16x1xf32> to vector<16x512xf32>
    %13 = arith.addf %10, %12 : vector<16x512xf32>
    %cst_6 = arith.constant 0.000000e+00 : f32
    %14 = vector.broadcast %cst_6 : f32 to vector<16x512xf32>
    %15 = arith.cmpf ogt, %13, %14 : vector<16x512xf32>
    %cst_7 = arith.constant 0.00999999977 : f32
    %16 = vector.broadcast %cst_7 : f32 to vector<16x512xf32>
    %17 = arith.mulf %16, %13 : vector<16x512xf32>
    %18 = arith.select %15, %13, %17 : vector<16x512xi1>, vector<16x512xf32>
    %19 = arith.truncf %18 : vector<16x512xf32> to vector<16x512xbf16>
    %c0_8 = arith.constant 0 : index
    %c0_9 = arith.constant 0 : index
    %c0_10 = arith.constant 0 : index
    %20 = vector.load %arg5[%c0_8, %c0_9, %c0_10] : memref<1x16x512xbf16, #tpu.memory_space<vmem>>, vector<1x16x512xbf16>
    %21 = vector.shape_cast %20 : vector<1x16x512xbf16> to vector<16x512xbf16>
    %22 = vector.shape_cast %19 : vector<16x512xbf16> to vector<1x16x512xbf16>
    tpu.vector_store %arg5[%c0_8, %c0_9, %c0_10], %22 {strides = array<i32>} : memref<1x16x512xbf16, #tpu.memory_space<vmem>>, vector<1x16x512xbf16>,
    return
  }
  func.func @transform_0(%arg0: i32, %arg1: i32) -> (i32, i32) {
    %c0_i32 = arith.constant 0 : i32
    %c0_i32_0 = arith.constant 0 : i32
    %c0_i32_1 = arith.constant 0 : i32
    return %c0_i32, %c0_i32_0 : i32, i32
  }
  func.func @transform_1(%arg0: i32, %arg1: i32) -> (i32, i32, i32) {
    %c0_i32 = arith.constant 0 : i32
    %c0_i32_0 = arith.constant 0 : i32
    return %arg0, %c0_i32, %arg1 : i32, i32, i32
  }
  func.func @transform_2(%arg0: i32, %arg1: i32) -> (i32, i32) {
    %c0_i32 = arith.constant 0 : i32
    %c0_i32_0 = arith.constant 0 : i32
    %c0_i32_1 = arith.constant 0 : i32
    return %c0_i32, %c0_i32_0 : i32, i32
  }
  func.func @transform_3(%arg0: i32, %arg1: i32) -> (i32, i32, i32) {
    %c0_i32 = arith.constant 0 : i32
    %c0_i32_0 = arith.constant 0 : i32
    return %arg0, %c0_i32, %arg1 : i32, i32, i32
  }
}

module attributes {stable_mosaic.version = 11 : i64} {
  func.func @_convmm_kernel(%arg0: i32, %arg1: i32, %arg2: memref<64x432xbf16, #tpu.memory_space<vmem>>, %arg3: memref<1x432x512xbf16, #tpu.memory_space<vmem>>, %arg4: memref<16x1xf32, #tpu.memory_space<vmem>>, %arg5: memref<1x16x512xbf16, #tpu.memory_space<vmem>>, %arg6: memref<16x1xf32, #tpu.memory_space<vmem>>, %arg7: memref<16x1xf32, #tpu.memory_space<vmem>>, %arg8: memref<1x16x512xbf16, #tpu.memory_space<vmem>>) attributes {dimension_semantics = [#tpu.dimension_semantics<parallel>, #tpu.dimension_semantics<parallel>], iteration_bounds = array<i64: 2, 1>, scalar_prefetch = 0 : i64, scratch_operands = 0 : i64, tpu.core_type = #tpu.core_type<tc>, window_params = [{pipeline_mode = #tpu.pipeline_mode<synchronous>, transform_indices = @transform_0, window_bounds = array<i64: 64, 432>}, {transform_indices = @transform_1, window_bounds = array<i64: 1, 432, 512>}, {pipeline_mode = #tpu.pipeline_mode<synchronous>, transform_indices = @transform_2, window_bounds = array<i64: 16, 1>}, {transform_indices = @transform_3, window_bounds = array<i64: 1, 16, 512>}, {pipeline_mode = #tpu.pipeline_mode<synchronous>, transform_indices = @transform_4, window_bounds = array<i64: 16, 1>}, {pipeline_mode = #tpu.pipeline_mode<synchronous>, transform_indices = @transform_5, window_bounds = array<i64: 16, 1>}, {transform_indices = @transform_6, window_bounds = array<i64: 1, 16, 512>}]} {
    %c0 = arith.constant 0 : index
    %c0_0 = arith.constant 0 : index
    %0 = vector.load %arg2[%c0, %c0_0] : memref<64x432xbf16, #tpu.memory_space<vmem>>, vector<64x432xbf16>
    %c0_1 = arith.constant 0 : index
    %c0_2 = arith.constant 0 : index
    %c0_3 = arith.constant 0 : index
    %1 = vector.load %arg3[%c0_1, %c0_2, %c0_3] : memref<1x432x512xbf16, #tpu.memory_space<vmem>>, vector<1x432x512xbf16>
    %2 = vector.shape_cast %1 : vector<1x432x512xbf16> to vector<432x512xbf16>
    %cst = arith.constant dense<0.000000e+00> : vector<64x512xf32>
    %3 = tpu.matmul %0, %2, %cst {dimension_numbers = #tpu.dot_dimension_numbers<[1], [0], [0], [1], [0, 0, 1, 1], [], []>} : vector<64x432xbf16>, vector<432x512xbf16>, vector<64x512xf32> -> vector<64x512xf32>
    %4 = vector.extract_strided_slice %3 {offsets = [0, 0], sizes = [16, 512], strides = [1, 1]} : vector<64x512xf32> to vector<16x512xf32>
    %5 = vector.extract_strided_slice %3 {offsets = [16, 0], sizes = [16, 512], strides = [1, 1]} : vector<64x512xf32> to vector<16x512xf32>
    %6 = arith.maximumf %4, %5 : vector<16x512xf32>
    %7 = vector.extract_strided_slice %3 {offsets = [32, 0], sizes = [16, 512], strides = [1, 1]} : vector<64x512xf32> to vector<16x512xf32>
    %8 = arith.maximumf %6, %7 : vector<16x512xf32>
    %9 = vector.extract_strided_slice %3 {offsets = [48, 0], sizes = [16, 512], strides = [1, 1]} : vector<64x512xf32> to vector<16x512xf32>
    %10 = arith.maximumf %8, %9 : vector<16x512xf32>
    %c0_4 = arith.constant 0 : index
    %c0_5 = arith.constant 0 : index
    %11 = vector.load %arg4[%c0_4, %c0_5] : memref<16x1xf32, #tpu.memory_space<vmem>>, vector<16x1xf32>
    %12 = vector.broadcast %11 : vector<16x1xf32> to vector<16x512xf32>
    %13 = arith.addf %10, %12 : vector<16x512xf32>
    %cst_6 = arith.constant 0.000000e+00 : f32
    %14 = vector.broadcast %cst_6 : f32 to vector<16x512xf32>
    %15 = arith.cmpf ogt, %13, %14 : vector<16x512xf32>
    %cst_7 = arith.constant 0.00999999977 : f32
    %16 = vector.broadcast %cst_7 : f32 to vector<16x512xf32>
    %17 = arith.mulf %16, %13 : vector<16x512xf32>
    %18 = arith.select %15, %13, %17 : vector<16x512xi1>, vector<16x512xf32>
    %cst_8 = arith.constant 0.899999976 : f32
    %19 = vector.broadcast %cst_8 : f32 to vector<16x512xf32>
    %20 = arith.mulf %19, %18 : vector<16x512xf32>
    %c0_9 = arith.constant 0 : index
    %c0_10 = arith.constant 0 : index
    %c0_11 = arith.constant 0 : index
    %21 = vector.load %arg5[%c0_9, %c0_10, %c0_11] : memref<1x16x512xbf16, #tpu.memory_space<vmem>>, vector<1x16x512xbf16>
    %22 = vector.shape_cast %21 : vector<1x16x512xbf16> to vector<16x512xbf16>
    %23 = arith.extf %22 : vector<16x512xbf16> to vector<16x512xf32>
    %cst_12 = arith.constant 1.000000e-01 : f32
    %24 = vector.broadcast %cst_12 : f32 to vector<16x512xf32>
    %25 = arith.mulf %24, %23 : vector<16x512xf32>
    %26 = arith.addf %20, %25 : vector<16x512xf32>
    %c0_13 = arith.constant 0 : index
    %c0_14 = arith.constant 0 : index
    %27 = vector.load %arg6[%c0_13, %c0_14] : memref<16x1xf32, #tpu.memory_space<vmem>>, vector<16x1xf32>
    %28 = vector.broadcast %27 : vector<16x1xf32> to vector<16x512xf32>
    %29 = arith.mulf %26, %28 : vector<16x512xf32>
    %c0_15 = arith.constant 0 : index
    %c0_16 = arith.constant 0 : index
    %30 = vector.load %arg7[%c0_15, %c0_16] : memref<16x1xf32, #tpu.memory_space<vmem>>, vector<16x1xf32>
    %31 = vector.broadcast %30 : vector<16x1xf32> to vector<16x512xf32>
    %32 = arith.addf %29, %31 : vector<16x512xf32>
    %33 = arith.truncf %32 : vector<16x512xf32> to vector<16x512xbf16>
    %c0_17 = arith.constant 0 : index
    %c0_18 = arith.constant 0 : index
    %c0_19 = arith.constant 0 : index
    %34 = vector.load %arg8[%c0_17, %c0_18, %c0_19] : memref<1x16x512xbf16, #tpu.memory_space<vmem>>, vector<1x16x512xbf16>
    %35 = vector.shape_cast %34 : vector<1x16x512xbf16> to vector<16x512xbf16>
    %36 = vector.shape_cast %33 : vector<16x512xbf16> to vector<1x16x512xbf16>
    tpu.vector_store %arg8[%c0_17, %c0_18, %c0_19], %36 {strides = array<i32>} : memref<1x16x512xbf16, #tpu.memory_space<vmem>>, vector<1x16x512xbf16>,
    return
  }
  func.func @transform_0(%arg0: i32, %arg1: i32) -> (i32, i32) {
    %c0_i32 = arith.constant 0 : i32
    %c0_i32_0 = arith.constant 0 : i32
    %c0_i32_1 = arith.constant 0 : i32
    return %c0_i32, %c0_i32_0 : i32, i32
  }
  func.func @transform_1(%arg0: i32, %arg1: i32) -> (i32, i32, i32) {
    %c0_i32 = arith.constant 0 : i32
    %c0_i32_0 = arith.constant 0 : i32
    return %arg0, %c0_i32, %arg1 : i32, i32, i32
  }
  func.func @transform_2(%arg0: i32, %arg1: i32) -> (i32, i32) {
    %c0_i32 = arith.constant 0 : i32
    %c0_i32_0 = arith.constant 0 : i32
    %c0_i32_1 = arith.constant 0 : i32
    return %c0_i32, %c0_i32_0 : i32, i32
  }
  func.func @transform_3(%arg0: i32, %arg1: i32) -> (i32, i32, i32) {
    %c0_i32 = arith.constant 0 : i32
    %c0_i32_0 = arith.constant 0 : i32
    return %arg0, %c0_i32, %arg1 : i32, i32, i32
  }
  func.func @transform_4(%arg0: i32, %arg1: i32) -> (i32, i32) {
    %c0_i32 = arith.constant 0 : i32
    %c0_i32_0 = arith.constant 0 : i32
    %c0_i32_1 = arith.constant 0 : i32
    return %c0_i32, %c0_i32_0 : i32, i32
  }
  func.func @transform_5(%arg0: i32, %arg1: i32) -> (i32, i32) {
    %c0_i32 = arith.constant 0 : i32
    %c0_i32_0 = arith.constant 0 : i32
    %c0_i32_1 = arith.constant 0 : i32
    return %c0_i32, %c0_i32_0 : i32, i32
  }
  func.func @transform_6(%arg0: i32, %arg1: i32) -> (i32, i32, i32) {
    %c0_i32 = arith.constant 0 : i32
    %c0_i32_0 = arith.constant 0 : i32
    return %arg0, %c0_i32, %arg1 : i32, i32, i32
  }
}

module attributes {stable_mosaic.version = 11 : i64} {
  func.func @_convmm_kernel(%arg0: i32, %arg1: i32, %arg2: memref<128x432xbf16, #tpu.memory_space<vmem>>, %arg3: memref<1x432x128xbf16, #tpu.memory_space<vmem>>, %arg4: memref<32x1xf32, #tpu.memory_space<vmem>>, %arg5: memref<1x32x128xbf16, #tpu.memory_space<vmem>>) attributes {dimension_semantics = [#tpu.dimension_semantics<parallel>, #tpu.dimension_semantics<parallel>], iteration_bounds = array<i64: 2, 1>, scalar_prefetch = 0 : i64, scratch_operands = 0 : i64, tpu.core_type = #tpu.core_type<tc>, window_params = [{pipeline_mode = #tpu.pipeline_mode<synchronous>, transform_indices = @transform_0, window_bounds = array<i64: 128, 432>}, {transform_indices = @transform_1, window_bounds = array<i64: 1, 432, 128>}, {pipeline_mode = #tpu.pipeline_mode<synchronous>, transform_indices = @transform_2, window_bounds = array<i64: 32, 1>}, {transform_indices = @transform_3, window_bounds = array<i64: 1, 32, 128>}]} {
    %c0 = arith.constant 0 : index
    %c0_0 = arith.constant 0 : index
    %0 = vector.load %arg2[%c0, %c0_0] : memref<128x432xbf16, #tpu.memory_space<vmem>>, vector<128x432xbf16>
    %c0_1 = arith.constant 0 : index
    %c0_2 = arith.constant 0 : index
    %c0_3 = arith.constant 0 : index
    %1 = vector.load %arg3[%c0_1, %c0_2, %c0_3] : memref<1x432x128xbf16, #tpu.memory_space<vmem>>, vector<1x432x128xbf16>
    %2 = vector.shape_cast %1 : vector<1x432x128xbf16> to vector<432x128xbf16>
    %cst = arith.constant dense<0.000000e+00> : vector<128x128xf32>
    %3 = tpu.matmul %0, %2, %cst {dimension_numbers = #tpu.dot_dimension_numbers<[1], [0], [0], [1], [0, 0, 1, 1], [], []>} : vector<128x432xbf16>, vector<432x128xbf16>, vector<128x128xf32> -> vector<128x128xf32>
    %4 = vector.extract_strided_slice %3 {offsets = [0, 0], sizes = [32, 128], strides = [1, 1]} : vector<128x128xf32> to vector<32x128xf32>
    %5 = vector.extract_strided_slice %3 {offsets = [32, 0], sizes = [32, 128], strides = [1, 1]} : vector<128x128xf32> to vector<32x128xf32>
    %6 = arith.maximumf %4, %5 : vector<32x128xf32>
    %7 = vector.extract_strided_slice %3 {offsets = [64, 0], sizes = [32, 128], strides = [1, 1]} : vector<128x128xf32> to vector<32x128xf32>
    %8 = arith.maximumf %6, %7 : vector<32x128xf32>
    %9 = vector.extract_strided_slice %3 {offsets = [96, 0], sizes = [32, 128], strides = [1, 1]} : vector<128x128xf32> to vector<32x128xf32>
    %10 = arith.maximumf %8, %9 : vector<32x128xf32>
    %c0_4 = arith.constant 0 : index
    %c0_5 = arith.constant 0 : index
    %11 = vector.load %arg4[%c0_4, %c0_5] : memref<32x1xf32, #tpu.memory_space<vmem>>, vector<32x1xf32>
    %12 = vector.broadcast %11 : vector<32x1xf32> to vector<32x128xf32>
    %13 = arith.addf %10, %12 : vector<32x128xf32>
    %14 = arith.truncf %13 : vector<32x128xf32> to vector<32x128xbf16>
    %c0_6 = arith.constant 0 : index
    %c0_7 = arith.constant 0 : index
    %c0_8 = arith.constant 0 : index
    %15 = vector.load %arg5[%c0_6, %c0_7, %c0_8] : memref<1x32x128xbf16, #tpu.memory_space<vmem>>, vector<1x32x128xbf16>
    %16 = vector.shape_cast %15 : vector<1x32x128xbf16> to vector<32x128xbf16>
    %17 = vector.shape_cast %14 : vector<32x128xbf16> to vector<1x32x128xbf16>
    tpu.vector_store %arg5[%c0_6, %c0_7, %c0_8], %17 {strides = array<i32>} : memref<1x32x128xbf16, #tpu.memory_space<vmem>>, vector<1x32x128xbf16>,
    return
  }
  func.func @transform_0(%arg0: i32, %arg1: i32) -> (i32, i32) {
    %c0_i32 = arith.constant 0 : i32
    %c0_i32_0 = arith.constant 0 : i32
    %c0_i32_1 = arith.constant 0 : i32
    return %c0_i32, %c0_i32_0 : i32, i32
  }
  func.func @transform_1(%arg0: i32, %arg1: i32) -> (i32, i32, i32) {
    %c0_i32 = arith.constant 0 : i32
    %c0_i32_0 = arith.constant 0 : i32
    return %arg0, %c0_i32, %arg1 : i32, i32, i32
  }
  func.func @transform_2(%arg0: i32, %arg1: i32) -> (i32, i32) {
    %c0_i32 = arith.constant 0 : i32
    %c0_i32_0 = arith.constant 0 : i32
    %c0_i32_1 = arith.constant 0 : i32
    return %c0_i32, %c0_i32_0 : i32, i32
  }
  func.func @transform_3(%arg0: i32, %arg1: i32) -> (i32, i32, i32) {
    %c0_i32 = arith.constant 0 : i32
    %c0_i32_0 = arith.constant 0 : i32
    return %arg0, %c0_i32, %arg1 : i32, i32, i32
  }
}

module attributes {stable_mosaic.version = 11 : i64} {
  func.func @_convmm_kernel(%arg0: i32, %arg1: i32, %arg2: memref<128x864xbf16, #tpu.memory_space<vmem>>, %arg3: memref<1x864x128xbf16, #tpu.memory_space<vmem>>, %arg4: memref<32x1xf32, #tpu.memory_space<vmem>>, %arg5: memref<1x32x128xbf16, #tpu.memory_space<vmem>>, %arg6: memref<32x1xf32, #tpu.memory_space<vmem>>, %arg7: memref<32x1xf32, #tpu.memory_space<vmem>>, %arg8: memref<1x32x128xbf16, #tpu.memory_space<vmem>>) attributes {dimension_semantics = [#tpu.dimension_semantics<parallel>, #tpu.dimension_semantics<parallel>], iteration_bounds = array<i64: 2, 1>, scalar_prefetch = 0 : i64, scratch_operands = 0 : i64, tpu.core_type = #tpu.core_type<tc>, window_params = [{pipeline_mode = #tpu.pipeline_mode<synchronous>, transform_indices = @transform_0, window_bounds = array<i64: 128, 864>}, {transform_indices = @transform_1, window_bounds = array<i64: 1, 864, 128>}, {pipeline_mode = #tpu.pipeline_mode<synchronous>, transform_indices = @transform_2, window_bounds = array<i64: 32, 1>}, {transform_indices = @transform_3, window_bounds = array<i64: 1, 32, 128>}, {pipeline_mode = #tpu.pipeline_mode<synchronous>, transform_indices = @transform_4, window_bounds = array<i64: 32, 1>}, {pipeline_mode = #tpu.pipeline_mode<synchronous>, transform_indices = @transform_5, window_bounds = array<i64: 32, 1>}, {transform_indices = @transform_6, window_bounds = array<i64: 1, 32, 128>}]} {
    %c0 = arith.constant 0 : index
    %c0_0 = arith.constant 0 : index
    %0 = vector.load %arg2[%c0, %c0_0] : memref<128x864xbf16, #tpu.memory_space<vmem>>, vector<128x864xbf16>
    %c0_1 = arith.constant 0 : index
    %c0_2 = arith.constant 0 : index
    %c0_3 = arith.constant 0 : index
    %1 = vector.load %arg3[%c0_1, %c0_2, %c0_3] : memref<1x864x128xbf16, #tpu.memory_space<vmem>>, vector<1x864x128xbf16>
    %2 = vector.shape_cast %1 : vector<1x864x128xbf16> to vector<864x128xbf16>
    %cst = arith.constant dense<0.000000e+00> : vector<128x128xf32>
    %3 = tpu.matmul %0, %2, %cst {dimension_numbers = #tpu.dot_dimension_numbers<[1], [0], [0], [1], [0, 0, 1, 1], [], []>} : vector<128x864xbf16>, vector<864x128xbf16>, vector<128x128xf32> -> vector<128x128xf32>
    %4 = vector.extract_strided_slice %3 {offsets = [0, 0], sizes = [32, 128], strides = [1, 1]} : vector<128x128xf32> to vector<32x128xf32>
    %5 = vector.extract_strided_slice %3 {offsets = [32, 0], sizes = [32, 128], strides = [1, 1]} : vector<128x128xf32> to vector<32x128xf32>
    %6 = arith.maximumf %4, %5 : vector<32x128xf32>
    %7 = vector.extract_strided_slice %3 {offsets = [64, 0], sizes = [32, 128], strides = [1, 1]} : vector<128x128xf32> to vector<32x128xf32>
    %8 = arith.maximumf %6, %7 : vector<32x128xf32>
    %9 = vector.extract_strided_slice %3 {offsets = [96, 0], sizes = [32, 128], strides = [1, 1]} : vector<128x128xf32> to vector<32x128xf32>
    %10 = arith.maximumf %8, %9 : vector<32x128xf32>
    %c0_4 = arith.constant 0 : index
    %c0_5 = arith.constant 0 : index
    %11 = vector.load %arg4[%c0_4, %c0_5] : memref<32x1xf32, #tpu.memory_space<vmem>>, vector<32x1xf32>
    %12 = vector.broadcast %11 : vector<32x1xf32> to vector<32x128xf32>
    %13 = arith.addf %10, %12 : vector<32x128xf32>
    %cst_6 = arith.constant 0.000000e+00 : f32
    %14 = vector.broadcast %cst_6 : f32 to vector<32x128xf32>
    %15 = arith.cmpf ogt, %13, %14 : vector<32x128xf32>
    %cst_7 = arith.constant 0.00999999977 : f32
    %16 = vector.broadcast %cst_7 : f32 to vector<32x128xf32>
    %17 = arith.mulf %16, %13 : vector<32x128xf32>
    %18 = arith.select %15, %13, %17 : vector<32x128xi1>, vector<32x128xf32>
    %cst_8 = arith.constant 0.899999976 : f32
    %19 = vector.broadcast %cst_8 : f32 to vector<32x128xf32>
    %20 = arith.mulf %19, %18 : vector<32x128xf32>
    %c0_9 = arith.constant 0 : index
    %c0_10 = arith.constant 0 : index
    %c0_11 = arith.constant 0 : index
    %21 = vector.load %arg5[%c0_9, %c0_10, %c0_11] : memref<1x32x128xbf16, #tpu.memory_space<vmem>>, vector<1x32x128xbf16>
    %22 = vector.shape_cast %21 : vector<1x32x128xbf16> to vector<32x128xbf16>
    %23 = arith.extf %22 : vector<32x128xbf16> to vector<32x128xf32>
    %cst_12 = arith.constant 1.000000e-01 : f32
    %24 = vector.broadcast %cst_12 : f32 to vector<32x128xf32>
    %25 = arith.mulf %24, %23 : vector<32x128xf32>
    %26 = arith.addf %20, %25 : vector<32x128xf32>
    %c0_13 = arith.constant 0 : index
    %c0_14 = arith.constant 0 : index
    %27 = vector.load %arg6[%c0_13, %c0_14] : memref<32x1xf32, #tpu.memory_space<vmem>>, vector<32x1xf32>
    %28 = vector.broadcast %27 : vector<32x1xf32> to vector<32x128xf32>
    %29 = arith.mulf %26, %28 : vector<32x128xf32>
    %c0_15 = arith.constant 0 : index
    %c0_16 = arith.constant 0 : index
    %30 = vector.load %arg7[%c0_15, %c0_16] : memref<32x1xf32, #tpu.memory_space<vmem>>, vector<32x1xf32>
    %31 = vector.broadcast %30 : vector<32x1xf32> to vector<32x128xf32>
    %32 = arith.addf %29, %31 : vector<32x128xf32>
    %33 = arith.truncf %32 : vector<32x128xf32> to vector<32x128xbf16>
    %c0_17 = arith.constant 0 : index
    %c0_18 = arith.constant 0 : index
    %c0_19 = arith.constant 0 : index
    %34 = vector.load %arg8[%c0_17, %c0_18, %c0_19] : memref<1x32x128xbf16, #tpu.memory_space<vmem>>, vector<1x32x128xbf16>
    %35 = vector.shape_cast %34 : vector<1x32x128xbf16> to vector<32x128xbf16>
    %36 = vector.shape_cast %33 : vector<32x128xbf16> to vector<1x32x128xbf16>
    tpu.vector_store %arg8[%c0_17, %c0_18, %c0_19], %36 {strides = array<i32>} : memref<1x32x128xbf16, #tpu.memory_space<vmem>>, vector<1x32x128xbf16>,
    return
  }
  func.func @transform_0(%arg0: i32, %arg1: i32) -> (i32, i32) {
    %c0_i32 = arith.constant 0 : i32
    %c0_i32_0 = arith.constant 0 : i32
    %c0_i32_1 = arith.constant 0 : i32
    return %c0_i32, %c0_i32_0 : i32, i32
  }
  func.func @transform_1(%arg0: i32, %arg1: i32) -> (i32, i32, i32) {
    %c0_i32 = arith.constant 0 : i32
    %c0_i32_0 = arith.constant 0 : i32
    return %arg0, %c0_i32, %arg1 : i32, i32, i32
  }
  func.func @transform_2(%arg0: i32, %arg1: i32) -> (i32, i32) {
    %c0_i32 = arith.constant 0 : i32
    %c0_i32_0 = arith.constant 0 : i32
    %c0_i32_1 = arith.constant 0 : i32
    return %c0_i32, %c0_i32_0 : i32, i32
  }
  func.func @transform_3(%arg0: i32, %arg1: i32) -> (i32, i32, i32) {
    %c0_i32 = arith.constant 0 : i32
    %c0_i32_0 = arith.constant 0 : i32
    return %arg0, %c0_i32, %arg1 : i32, i32, i32
  }
  func.func @transform_4(%arg0: i32, %arg1: i32) -> (i32, i32) {
    %c0_i32 = arith.constant 0 : i32
    %c0_i32_0 = arith.constant 0 : i32
    %c0_i32_1 = arith.constant 0 : i32
    return %c0_i32, %c0_i32_0 : i32, i32
  }
  func.func @transform_5(%arg0: i32, %arg1: i32) -> (i32, i32) {
    %c0_i32 = arith.constant 0 : i32
    %c0_i32_0 = arith.constant 0 : i32
    %c0_i32_1 = arith.constant 0 : i32
    return %c0_i32, %c0_i32_0 : i32, i32
  }
  func.func @transform_6(%arg0: i32, %arg1: i32) -> (i32, i32, i32) {
    %c0_i32 = arith.constant 0 : i32
    %c0_i32_0 = arith.constant 0 : i32
    return %arg0, %c0_i32, %arg1 : i32, i32, i32
  }
}

module attributes {stable_mosaic.version = 11 : i64} {
  func.func @_convmm_kernel(%arg0: i32, %arg1: i32, %arg2: memref<128x864xbf16, #tpu.memory_space<vmem>>, %arg3: memref<1x864x128xbf16, #tpu.memory_space<vmem>>, %arg4: memref<32x1xf32, #tpu.memory_space<vmem>>, %arg5: memref<1x32x128xbf16, #tpu.memory_space<vmem>>) attributes {dimension_semantics = [#tpu.dimension_semantics<parallel>, #tpu.dimension_semantics<parallel>], iteration_bounds = array<i64: 2, 1>, scalar_prefetch = 0 : i64, scratch_operands = 0 : i64, tpu.core_type = #tpu.core_type<tc>, window_params = [{pipeline_mode = #tpu.pipeline_mode<synchronous>, transform_indices = @transform_0, window_bounds = array<i64: 128, 864>}, {transform_indices = @transform_1, window_bounds = array<i64: 1, 864, 128>}, {pipeline_mode = #tpu.pipeline_mode<synchronous>, transform_indices = @transform_2, window_bounds = array<i64: 32, 1>}, {transform_indices = @transform_3, window_bounds = array<i64: 1, 32, 128>}]} {
    %c0 = arith.constant 0 : index
    %c0_0 = arith.constant 0 : index
    %0 = vector.load %arg2[%c0, %c0_0] : memref<128x864xbf16, #tpu.memory_space<vmem>>, vector<128x864xbf16>
    %c0_1 = arith.constant 0 : index
    %c0_2 = arith.constant 0 : index
    %c0_3 = arith.constant 0 : index
    %1 = vector.load %arg3[%c0_1, %c0_2, %c0_3] : memref<1x864x128xbf16, #tpu.memory_space<vmem>>, vector<1x864x128xbf16>
    %2 = vector.shape_cast %1 : vector<1x864x128xbf16> to vector<864x128xbf16>
    %cst = arith.constant dense<0.000000e+00> : vector<128x128xf32>
    %3 = tpu.matmul %0, %2, %cst {dimension_numbers = #tpu.dot_dimension_numbers<[1], [0], [0], [1], [0, 0, 1, 1], [], []>} : vector<128x864xbf16>, vector<864x128xbf16>, vector<128x128xf32> -> vector<128x128xf32>
    %4 = vector.extract_strided_slice %3 {offsets = [0, 0], sizes = [32, 128], strides = [1, 1]} : vector<128x128xf32> to vector<32x128xf32>
    %5 = vector.extract_strided_slice %3 {offsets = [32, 0], sizes = [32, 128], strides = [1, 1]} : vector<128x128xf32> to vector<32x128xf32>
    %6 = arith.maximumf %4, %5 : vector<32x128xf32>
    %7 = vector.extract_strided_slice %3 {offsets = [64, 0], sizes = [32, 128], strides = [1, 1]} : vector<128x128xf32> to vector<32x128xf32>
    %8 = arith.maximumf %6, %7 : vector<32x128xf32>
    %9 = vector.extract_strided_slice %3 {offsets = [96, 0], sizes = [32, 128], strides = [1, 1]} : vector<128x128xf32> to vector<32x128xf32>
    %10 = arith.maximumf %8, %9 : vector<32x128xf32>
    %c0_4 = arith.constant 0 : index
    %c0_5 = arith.constant 0 : index
    %11 = vector.load %arg4[%c0_4, %c0_5] : memref<32x1xf32, #tpu.memory_space<vmem>>, vector<32x1xf32>
    %12 = vector.broadcast %11 : vector<32x1xf32> to vector<32x128xf32>
    %13 = arith.addf %10, %12 : vector<32x128xf32>
    %cst_6 = arith.constant 0.000000e+00 : f32
    %14 = vector.broadcast %cst_6 : f32 to vector<32x128xf32>
    %15 = arith.cmpf ogt, %13, %14 : vector<32x128xf32>
    %cst_7 = arith.constant 0.00999999977 : f32
    %16 = vector.broadcast %cst_7 : f32 to vector<32x128xf32>
    %17 = arith.mulf %16, %13 : vector<32x128xf32>
    %18 = arith.select %15, %13, %17 : vector<32x128xi1>, vector<32x128xf32>
    %19 = arith.truncf %18 : vector<32x128xf32> to vector<32x128xbf16>
    %c0_8 = arith.constant 0 : index
    %c0_9 = arith.constant 0 : index
    %c0_10 = arith.constant 0 : index
    %20 = vector.load %arg5[%c0_8, %c0_9, %c0_10] : memref<1x32x128xbf16, #tpu.memory_space<vmem>>, vector<1x32x128xbf16>
    %21 = vector.shape_cast %20 : vector<1x32x128xbf16> to vector<32x128xbf16>
    %22 = vector.shape_cast %19 : vector<32x128xbf16> to vector<1x32x128xbf16>
    tpu.vector_store %arg5[%c0_8, %c0_9, %c0_10], %22 {strides = array<i32>} : memref<1x32x128xbf16, #tpu.memory_space<vmem>>, vector<1x32x128xbf16>,
    return
  }
  func.func @transform_0(%arg0: i32, %arg1: i32) -> (i32, i32) {
    %c0_i32 = arith.constant 0 : i32
    %c0_i32_0 = arith.constant 0 : i32
    %c0_i32_1 = arith.constant 0 : i32
    return %c0_i32, %c0_i32_0 : i32, i32
  }
  func.func @transform_1(%arg0: i32, %arg1: i32) -> (i32, i32, i32) {
    %c0_i32 = arith.constant 0 : i32
    %c0_i32_0 = arith.constant 0 : i32
    return %arg0, %c0_i32, %arg1 : i32, i32, i32
  }
  func.func @transform_2(%arg0: i32, %arg1: i32) -> (i32, i32) {
    %c0_i32 = arith.constant 0 : i32
    %c0_i32_0 = arith.constant 0 : i32
    %c0_i32_1 = arith.constant 0 : i32
    return %c0_i32, %c0_i32_0 : i32, i32
  }
  func.func @transform_3(%arg0: i32, %arg1: i32) -> (i32, i32, i32) {
    %c0_i32 = arith.constant 0 : i32
    %c0_i32_0 = arith.constant 0 : i32
    return %arg0, %c0_i32, %arg1 : i32, i32, i32
  }
}

module attributes {stable_mosaic.version = 11 : i64} {
  func.func @_head_kernel(%arg0: i32, %arg1: memref<40x512xf32, #tpu.memory_space<vmem>>, %arg2: memref<512x128xf32, #tpu.memory_space<vmem>>, %arg3: memref<1x128xf32, #tpu.memory_space<vmem>>, %arg4: memref<128x32xf32, #tpu.memory_space<vmem>>, %arg5: memref<1x32xf32, #tpu.memory_space<vmem>>, %arg6: memref<32x2xf32, #tpu.memory_space<vmem>>, %arg7: memref<32x2xf32, #tpu.memory_space<vmem>>, %arg8: memref<1x2xf32, #tpu.memory_space<vmem>>, %arg9: memref<20x2xf32, #tpu.memory_space<vmem>>) attributes {dimension_semantics = [#tpu.dimension_semantics<arbitrary>], iteration_bounds = array<i64: 1>, scalar_prefetch = 0 : i64, scratch_operands = 0 : i64, tpu.core_type = #tpu.core_type<tc>, window_params = [{pipeline_mode = #tpu.pipeline_mode<synchronous>, transform_indices = @transform_0, window_bounds = array<i64: 40, 512>}, {pipeline_mode = #tpu.pipeline_mode<synchronous>, transform_indices = @transform_1, window_bounds = array<i64: 512, 128>}, {pipeline_mode = #tpu.pipeline_mode<synchronous>, transform_indices = @transform_2, window_bounds = array<i64: 1, 128>}, {pipeline_mode = #tpu.pipeline_mode<synchronous>, transform_indices = @transform_3, window_bounds = array<i64: 128, 32>}, {pipeline_mode = #tpu.pipeline_mode<synchronous>, transform_indices = @transform_4, window_bounds = array<i64: 1, 32>}, {pipeline_mode = #tpu.pipeline_mode<synchronous>, transform_indices = @transform_5, window_bounds = array<i64: 32, 2>}, {pipeline_mode = #tpu.pipeline_mode<synchronous>, transform_indices = @transform_6, window_bounds = array<i64: 32, 2>}, {pipeline_mode = #tpu.pipeline_mode<synchronous>, transform_indices = @transform_7, window_bounds = array<i64: 1, 2>}, {pipeline_mode = #tpu.pipeline_mode<synchronous>, transform_indices = @transform_8, window_bounds = array<i64: 20, 2>}]} {
    %c0 = arith.constant 0 : index
    %c0_0 = arith.constant 0 : index
    %0 = vector.load %arg1[%c0, %c0_0] : memref<40x512xf32, #tpu.memory_space<vmem>>, vector<40x512xf32>
    %c0_1 = arith.constant 0 : index
    %c0_2 = arith.constant 0 : index
    %1 = vector.load %arg2[%c0_1, %c0_2] : memref<512x128xf32, #tpu.memory_space<vmem>>, vector<512x128xf32>
    %cst = arith.constant dense<0.000000e+00> : vector<40x128xf32>
    %2 = tpu.matmul %0, %1, %cst {dimension_numbers = #tpu.dot_dimension_numbers<[1], [0], [0], [1], [0, 0, 1, 1], [], []>} : vector<40x512xf32>, vector<512x128xf32>, vector<40x128xf32> -> vector<40x128xf32>
    %c0_3 = arith.constant 0 : index
    %c0_4 = arith.constant 0 : index
    %3 = vector.load %arg3[%c0_3, %c0_4] : memref<1x128xf32, #tpu.memory_space<vmem>>, vector<1x128xf32>
    %4 = vector.broadcast %3 : vector<1x128xf32> to vector<40x128xf32>
    %5 = arith.addf %2, %4 : vector<40x128xf32>
    %cst_5 = arith.constant 0.000000e+00 : f32
    %6 = vector.broadcast %cst_5 : f32 to vector<40x128xf32>
    %7 = arith.maximumf %5, %6 : vector<40x128xf32>
    %c0_6 = arith.constant 0 : index
    %c0_7 = arith.constant 0 : index
    %8 = vector.load %arg4[%c0_6, %c0_7] : memref<128x32xf32, #tpu.memory_space<vmem>>, vector<128x32xf32>
    %cst_8 = arith.constant dense<0.000000e+00> : vector<40x32xf32>
    %9 = tpu.matmul %7, %8, %cst_8 {dimension_numbers = #tpu.dot_dimension_numbers<[1], [0], [0], [1], [0, 0, 1, 1], [], []>} : vector<40x128xf32>, vector<128x32xf32>, vector<40x32xf32> -> vector<40x32xf32>
    %c0_9 = arith.constant 0 : index
    %c0_10 = arith.constant 0 : index
    %10 = vector.load %arg5[%c0_9, %c0_10] : memref<1x32xf32, #tpu.memory_space<vmem>>, vector<1x32xf32>
    %11 = vector.broadcast %10 : vector<1x32xf32> to vector<40x32xf32>
    %12 = arith.addf %9, %11 : vector<40x32xf32>
    %cst_11 = arith.constant 0.000000e+00 : f32
    %13 = vector.broadcast %cst_11 : f32 to vector<40x32xf32>
    %14 = arith.maximumf %12, %13 : vector<40x32xf32>
    %15 = tpu.iota {dimensions = array<i32: 0>} : vector<20x40xi32>
    %16 = tpu.iota {dimensions = array<i32: 1>} : vector<20x40xi32>
    %c2_i32 = arith.constant 2 : i32
    %17 = vector.broadcast %c2_i32 : i32 to vector<20x40xi32>
    %18 = arith.muli %17, %15 : vector<20x40xi32>
    %19 = arith.cmpi eq, %16, %18 : vector<20x40xi32>
    %20 = arith.extui %19 : vector<20x40xi1> to vector<20x40xi32>
    %21 = arith.sitofp %20 : vector<20x40xi32> to vector<20x40xf32>
    %c2_i32_12 = arith.constant 2 : i32
    %22 = vector.broadcast %c2_i32_12 : i32 to vector<20x40xi32>
    %23 = arith.muli %22, %15 : vector<20x40xi32>
    %c1_i32 = arith.constant 1 : i32
    %24 = vector.broadcast %c1_i32 : i32 to vector<20x40xi32>
    %25 = arith.addi %23, %24 : vector<20x40xi32>
    %26 = arith.cmpi eq, %16, %25 : vector<20x40xi32>
    %27 = arith.extui %26 : vector<20x40xi1> to vector<20x40xi32>
    %28 = arith.sitofp %27 : vector<20x40xi32> to vector<20x40xf32>
    %cst_13 = arith.constant dense<0.000000e+00> : vector<20x32xf32>
    %29 = tpu.matmul %21, %14, %cst_13 {dimension_numbers = #tpu.dot_dimension_numbers<[1], [0], [0], [1], [0, 0, 1, 1], [], []>} : vector<20x40xf32>, vector<40x32xf32>, vector<20x32xf32> -> vector<20x32xf32>
    %cst_14 = arith.constant dense<0.000000e+00> : vector<20x32xf32>
    %30 = tpu.matmul %28, %14, %cst_14 {dimension_numbers = #tpu.dot_dimension_numbers<[1], [0], [0], [1], [0, 0, 1, 1], [], []>} : vector<20x40xf32>, vector<40x32xf32>, vector<20x32xf32> -> vector<20x32xf32>
    %c0_15 = arith.constant 0 : index
    %c0_16 = arith.constant 0 : index
    %31 = vector.load %arg6[%c0_15, %c0_16] : memref<32x2xf32, #tpu.memory_space<vmem>>, vector<32x2xf32>
    %cst_17 = arith.constant dense<0.000000e+00> : vector<20x2xf32>
    %32 = tpu.matmul %29, %31, %cst_17 {dimension_numbers = #tpu.dot_dimension_numbers<[1], [0], [0], [1], [0, 0, 1, 1], [], []>} : vector<20x32xf32>, vector<32x2xf32>, vector<20x2xf32> -> vector<20x2xf32>
    %c0_18 = arith.constant 0 : index
    %c0_19 = arith.constant 0 : index
    %33 = vector.load %arg7[%c0_18, %c0_19] : memref<32x2xf32, #tpu.memory_space<vmem>>, vector<32x2xf32>
    %cst_20 = arith.constant dense<0.000000e+00> : vector<20x2xf32>
    %34 = tpu.matmul %30, %33, %cst_20 {dimension_numbers = #tpu.dot_dimension_numbers<[1], [0], [0], [1], [0, 0, 1, 1], [], []>} : vector<20x32xf32>, vector<32x2xf32>, vector<20x2xf32> -> vector<20x2xf32>
    %35 = arith.addf %32, %34 : vector<20x2xf32>
    %c0_21 = arith.constant 0 : index
    %c0_22 = arith.constant 0 : index
    %36 = vector.load %arg8[%c0_21, %c0_22] : memref<1x2xf32, #tpu.memory_space<vmem>>, vector<1x2xf32>
    %37 = vector.broadcast %36 : vector<1x2xf32> to vector<20x2xf32>
    %38 = arith.addf %35, %37 : vector<20x2xf32>
    %c0_23 = arith.constant 0 : index
    %c0_24 = arith.constant 0 : index
    %39 = vector.load %arg9[%c0_23, %c0_24] : memref<20x2xf32, #tpu.memory_space<vmem>>, vector<20x2xf32>
    tpu.vector_store %arg9[%c0_23, %c0_24], %38 {strides = array<i32>} : memref<20x2xf32, #tpu.memory_space<vmem>>, vector<20x2xf32>,
    return
  }
  func.func @transform_0(%arg0: i32) -> (i32, i32) {
    %c0_i32 = arith.constant 0 : i32
    %c0_i32_0 = arith.constant 0 : i32
    %c0_i32_1 = arith.constant 0 : i32
    return %c0_i32, %c0_i32_0 : i32, i32
  }
  func.func @transform_1(%arg0: i32) -> (i32, i32) {
    %c0_i32 = arith.constant 0 : i32
    %c0_i32_0 = arith.constant 0 : i32
    %c0_i32_1 = arith.constant 0 : i32
    return %c0_i32, %c0_i32_0 : i32, i32
  }
  func.func @transform_2(%arg0: i32) -> (i32, i32) {
    %c0_i32 = arith.constant 0 : i32
    %c0_i32_0 = arith.constant 0 : i32
    %c0_i32_1 = arith.constant 0 : i32
    return %c0_i32, %c0_i32_0 : i32, i32
  }
  func.func @transform_3(%arg0: i32) -> (i32, i32) {
    %c0_i32 = arith.constant 0 : i32
    %c0_i32_0 = arith.constant 0 : i32
    %c0_i32_1 = arith.constant 0 : i32
    return %c0_i32, %c0_i32_0 : i32, i32
  }
  func.func @transform_4(%arg0: i32) -> (i32, i32) {
    %c0_i32 = arith.constant 0 : i32
    %c0_i32_0 = arith.constant 0 : i32
    %c0_i32_1 = arith.constant 0 : i32
    return %c0_i32, %c0_i32_0 : i32, i32
  }
  func.func @transform_5(%arg0: i32) -> (i32, i32) {
    %c0_i32 = arith.constant 0 : i32
    %c0_i32_0 = arith.constant 0 : i32
    %c0_i32_1 = arith.constant 0 : i32
    return %c0_i32, %c0_i32_0 : i32, i32
  }
  func.func @transform_6(%arg0: i32) -> (i32, i32) {
    %c0_i32 = arith.constant 0 : i32
    %c0_i32_0 = arith.constant 0 : i32
    %c0_i32_1 = arith.constant 0 : i32
    return %c0_i32, %c0_i32_0 : i32, i32
  }
  func.func @transform_7(%arg0: i32) -> (i32, i32) {
    %c0_i32 = arith.constant 0 : i32
    %c0_i32_0 = arith.constant 0 : i32
    %c0_i32_1 = arith.constant 0 : i32
    return %c0_i32, %c0_i32_0 : i32, i32
  }
  func.func @transform_8(%arg0: i32) -> (i32, i32) {
    %c0_i32 = arith.constant 0 : i32
    %c0_i32_0 = arith.constant 0 : i32
    %c0_i32_1 = arith.constant 0 : i32
    return %c0_i32, %c0_i32_0 : i32, i32
  }
}

</mosaic_0001>

<bundles_post_ra>
// kernel: dga3net_forward.11
= control target key start
LH: loop header
LB: loop body
LE: loop exit
PB: predicated region body
PF: predicated region fallthrough
CT: control target
= control target key end

     0   :  { %s954_s12 = smov 0   ;;  %s956_s13 = smov 0   ;;  %s1113_s0 = inlined_call_operand.vmem [shape: bf16[32,27], index: 0, kind: input, shape index: {}]   ;;  %s1114_s1 = inlined_call_operand.vmem [shape: bf16[2,27,2048], index: 1, kind: input, shape index: {}]   ;;  %s1115_s2 = inlined_call_operand.vmem [shape: f32[8,1], index: 2, kind: input, shape index: {}]   ;;  %s1116_s3 = inlined_call_operand.vmem [shape: bf16[2,8,2048], index: 3, kind: output, shape index: {}]  }
   0x1   :  { %s958_s14 = smov 0   ;;  %s960_s15 = smov 0  }
   0x2   :  { %s962_s16 = smov 0   ;;  %s964_s17 = smov 0  }
   0x3   :  { %s966_s18 = smov 0  }
   0x4 LB: > { %s22_s19 = sadd.s32 1, %s922_s16  ;;  %s25_s20 = sadd.s32 1, %s926_s17  ;;  %s930_s18 = sphi %s966_s18, %s13_s18   ;;  %s926_s17 = sphi %s964_s17, %s1122_s17   ;;  %s922_s16 = sphi %s962_s16, %s1121_s16   ;;  %s918_s15 = sphi %s960_s15, %s1120_s15   ;;  %s914_s14 = sphi %s958_s14, %s1119_s14   ;;  %s910_s13 = sphi %s956_s13, %s1118_s13   ;;  %s906_s12 = sphi %s954_s12, %s1117_s12  }
   0x5   : > { %p23_p0 = scmp.ge.s32.totalorder %s22_s19, 2  ;;  %p62_p1 = scmp.ne.s32.totalorder %s910_s13, %s906_s12 }
   0x6   : > { %p63_p2 = scmp.eq.s32.totalorder %s930_s18, 0  ;;  %s55_s24 = sadd.s32 1, %s910_s13 }
   0x7   : > { %s1124_s19 = smov (%p23_p0, %s22_s19), 0  ;;  %s1126_s20 = smov (!%p23_p0, %s25_s20), %s926_s17 }
   0x8   : > { %p64_p3 = por %p63_p2, %p62_p1  ;;  %p27_p4 = scmp.ge.s32.totalorder %s1126_s20, 2 }
   0x9   : > { %s51_s21 = ssub.s32 %s922_s16, %s1124_s19  ;;  %p769_p6 = scmp.ge.s32.totalorder %s930_s18, 4 }
   0xa   : > { %s1128_s20 = smov (%p27_p4, %s1126_s20), 0 }
   0xb   : > { %s50_s22 = ssub.s32 %s926_s17, %s1128_s20  ;;  %143 = sbr.rel (%p769_p6) target bundleno = 33 (0x21), region = 24 }
   0xc   : > { %s52_s23 = sor.u32 %s51_s21, %s50_s22 }
   0xd   : > { %p53_p5 = scmp.eq.s32.totalorder %s52_s23, 0 }
   0xf   : > { %s1005_s25 = scalar_select %p53_p5, %s910_s13, %s55_s24  }
  0x12   : > { %146 = sbr.rel (!%p64_p3) target bundleno = 33 (0x21), region = 28  ;;  %s148_s26 = sand.u32 (%p64_p3), 1, %s910_s13  }
  0x13   : > { %s771_s27 = sshll.u32 (%p64_p3), %s922_s16, 3  ;;  %s770_s28 = sshll.u32 (%p64_p3), %s148_s26, 7 }
  0x14   : > { %s772_s29 = sshll.u32 (%p64_p3), %s926_s17, 6  ;;  %s150_s8 = scalar_lea.vmem (%p64_p3), [#allocation2], %s770_s28 }
  0x15   : > { %s153_s30 = sadd.s32 (%p64_p3), %s772_s29, %s771_s27 }
  0x16   : > { %s773_s4 = sshll.u32 (%p64_p3), %s153_s30, 2 }
  0x17   : > { %s1014_s7 = scalar_lea.vmem (%p64_p3), %s1114_s1, %s773_s4 }
  0x18   : > { %v168_v0 = vld [vmem:[%s1014_s7] sm:$0xff] (%p64_p3)  ;;  %v170_v1 = vld [vmem:[%s1014_s7 + $0x8] sm:$0xff] (%p64_p3)  ;;  %v172_v2 = vld [vmem:[%s1014_s7 + $0x10] sm:$0xff] (%p64_p3) }
  0x19   : > { %169 = vst [vmem:[%s150_s8] sm:$0xff] %v168_v0  ;;  %171 = vst [vmem:[%s150_s8 + $0x8] sm:$0xff] %v170_v1  ;;  %v174_v3 = vld [vmem:[%s1014_s7 + $0x18] sm:$0xff]  ;;  %v176_v4 = vld [vmem:[%s1014_s7 + $0x40] sm:$0xff] }
  0x1a   : > { %173 = vst [vmem:[%s150_s8 + $0x10] sm:$0xff] %v172_v2  ;;  %v178_v5 = vld [vmem:[%s1014_s7 + $0x48] sm:$0xff]  ;;  %175 = vst [vmem:[%s150_s8 + $0x18] sm:$0xff] %v174_v3  ;;  %v180_v6 = vld [vmem:[%s1014_s7 + $0x50] sm:$0xff] }
  0x1b   : > { %177 = vst [vmem:[%s150_s8 + $0x20] sm:$0xff] %v176_v4  ;;  %179 = vst [vmem:[%s150_s8 + $0x28] sm:$0xff] %v178_v5  ;;  %v182_v7 = vld [vmem:[%s1014_s7 + $0x58] sm:$0xff]  ;;  %v184_v8 = vld [vmem:[%s1014_s7 + $0x80] sm:$0xff] }
  0x1c   : > { %181 = vst [vmem:[%s150_s8 + $0x30] sm:$0xff] %v180_v6  ;;  %183 = vst [vmem:[%s150_s8 + $0x38] sm:$0xff] %v182_v7  ;;  %v186_v9 = vld [vmem:[%s1014_s7 + $0x88] sm:$0xff]  ;;  %v188_v10 = vld [vmem:[%s1014_s7 + $0x90] sm:$0xff] }
  0x1d   : > { %185 = vst [vmem:[%s150_s8 + $0x40] sm:$0xff] %v184_v8  ;;  %v190_v11 = vld [vmem:[%s1014_s7 + $0x98] sm:$0xff]  ;;  %187 = vst [vmem:[%s150_s8 + $0x48] sm:$0xff] %v186_v9  ;;  %v192_v12 = vld [vmem:[%s1014_s7 + $0xc0] sm:$0xff] }
  0x1e   : > { %189 = vst [vmem:[%s150_s8 + $0x50] sm:$0xff] %v188_v10  ;;  %191 = vst [vmem:[%s150_s8 + $0x58] sm:$0xff] %v190_v11  ;;  %v194_v13 = vld [vmem:[%s1014_s7 + $0xc8] sm:$0xff]  ;;  %v196_v14 = vld [vmem:[%s1014_s7 + $0xd0] sm:$0xff] }
  0x1f   : > { %193 = vst [vmem:[%s150_s8 + $0x60] sm:$0xff] %v192_v12  ;;  %195 = vst [vmem:[%s150_s8 + $0x68] sm:$0xff] %v194_v13  ;;  %v198_v15 = vld [vmem:[%s1014_s7 + $0xd8] sm:$0xff] }
  0x20   : > { %197 = vst [vmem:[%s150_s8 + $0x70] sm:$0xff] %v196_v14  ;;  %199 = vst [vmem:[%s150_s8 + $0x78] sm:$0xff] %v198_v15 }
  0x21 PF: > { %p774_p7 = scmp.ge.s32.totalorder %s930_s18, 1  ;;  %p204_p8 = scmp.lt.s32.totalorder %s930_s18, 5 }
  0x23   : > { %p205_p9 = pnand %p774_p7, %p204_p8 }
  0x24   : > { %s211_s9 = sand.u32 (!%p205_p9), 1, %s906_s12   ;;  %vm359_vm0 = vcmask (!%p205_p9), 1044480   ;;  %vm360_vm1 = vcmask (!%p205_p9), 1045504   ;;  %v932_v16 = vmov (!%p205_p9), 65535   ;;  %v933_v18 = vmov (!%p205_p9), 0   ;;  %v623_v49 = vld [vmem:[%s1115_s2] sm:$0xff] (!%p205_p9) }
  0x25   : > { %208 = sbr.rel (%p205_p9) target bundleno = 298 (0x12a), region = 51  ;;  %s775_s10 = sshll.u32 (!%p205_p9), %s211_s9, 7  ;;  %v361_v17 = vsel (!%p205_p9), %vm359_vm0, 4294967295, %v932_v16  ;;  %419 = vmatprep.mubr.bf16.mxu0 (!%p205_p9), %v933_v18  ;;  %472 = vmatprep.mubr.bf16.mxu1 (!%p205_p9), %v933_v18  ;;  %v874_v52 = vld [vmem:[%s1113_s0] sm:$0xff] (!%p205_p9)   ;;  %vm352_vm2 = vcmask (!%p205_p9), 220160   ;;  %v875_v62 = vld [vmem:[%s1113_s0 + $0x8] sm:$0xff] (!%p205_p9)  }
  0x26   : > { %873 = vset.pattern.permute.xlu0 (!%p205_p9), %v933_v18  ;;  %s1038_s11 = scalar_lea.vmem (!%p205_p9), [#allocation2], %s775_s10  ;;  %v362_v27 = vsel (!%p205_p9), %vm360_vm1, %v361_v17, 0  ;;  %s776_s27 = sshll.u32 (!%p205_p9), %s914_s14, 3 }
  0x27   : > { %v254_v19 = vld [vmem:[%s1038_s11] sm:$0xff] (!%p205_p9)  ;;  %v255_v21 = vld [vmem:[%s1038_s11 + $0x8] sm:$0xff] (!%p205_p9)  ;;  %v256_v34 = vld [vmem:[%s1038_s11 + $0x10] sm:$0xff] (!%p205_p9)  ;;  %626 = vperm.xlu0 (!%p205_p9), %873, %v623_v49   ;;  %p240_p10 = scmp.lt.s32.totalorder (!%p205_p9), %s918_s15, 1  ;;  %p242_p11 = scmp.lt.s32.totalorder (!%p205_p9), %s776_s27, 15 }
  0x28   : > { %v258_v20 = vld [vmem:[%s1038_s11 + $0x20] sm:$0xff] (!%p205_p9)  ;;  %v259_v23 = vld [vmem:[%s1038_s11 + $0x28] sm:$0xff] (!%p205_p9)  ;;  %v260_v37 = vld [vmem:[%s1038_s11 + $0x30] sm:$0xff] (!%p205_p9) }
  0x29   : > { %v782_v22 = vcombine.high (!%p205_p9), %v254_v19, %v258_v20  ;;  %v781_v24 = vcombine.low (!%p205_p9), %v254_v19, %v258_v20  ;;  %v262_v25 = vld [vmem:[%s1038_s11 + $0x40] sm:$0xff] (!%p205_p9)  ;;  %v784_v28 = vcombine.high (!%p205_p9), %v255_v21, %v259_v23  ;;  %v783_v29 = vcombine.low (!%p205_p9), %v255_v21, %v259_v23  ;;  %v263_v31 = vld [vmem:[%s1038_s11 + $0x48] sm:$0xff] (!%p205_p9)  ;;  %v257_v38 = vld [vmem:[%s1038_s11 + $0x18] sm:$0xff] (!%p205_p9) }
  0x2a   : > { %v266_v26 = vld [vmem:[%s1038_s11 + $0x60] sm:$0x33] (!%p205_p9)  ;;  %v267_v32 = vld [vmem:[%s1038_s11 + $0x68] sm:$0x33] (!%p205_p9)  ;;  %v261_v39 = vld [vmem:[%s1038_s11 + $0x38] sm:$0xff] (!%p205_p9)  ;;  %v786_v46 = vcombine.high (!%p205_p9), %v256_v34, %v260_v37  ;;  %v785_v54 = vcombine.low (!%p205_p9), %v256_v34, %v260_v37 }
  0x2b   : > { %v790_v30 = vcombine.high (!%p205_p9), %v262_v25, %v266_v26  ;;  %v789_v33 = vcombine.low (!%p205_p9), %v262_v25, %v266_v26  ;;  %387 = vmatprep.subr.bf16.mxu0 (!%p205_p9), %v782_v22  ;;  %v792_v35 = vcombine.high (!%p205_p9), %v263_v31, %v267_v32  ;;  %v791_v36 = vcombine.low (!%p205_p9), %v263_v31, %v267_v32  ;;  %v264_v42 = vld [vmem:[%s1038_s11 + $0x50] sm:$0xff] (!%p205_p9)  ;;  %v265_v47 = vld [vmem:[%s1038_s11 + $0x58] sm:$0xff] (!%p205_p9) }
  0x2c   : > { %440 = vmatprep.subr.bf16.mxu1 %v784_v28  ;;  %388 = vmatpush1.bf16.msra.mxu0 %v781_v24  ;;  %v268_v43 = vld [vmem:[%s1038_s11 + $0x70] sm:$0x33]  ;;  %v269_v48 = vld [vmem:[%s1038_s11 + $0x78] sm:$0x33]  ;;  %v788_v50 = vcombine.high %v257_v38, %v261_v39  ;;  %v787_v56 = vcombine.low %v257_v38, %v261_v39  ;;  %s1130_s15 = smov (!%p240_p10, %s918_s15), 1  ;;  %s1132_s27 = smov (!%p242_p11, %s776_s27), 15 }
  0x2d   : > { %v367_v40 = vand.u32 %v790_v30, %v362_v27  ;;  %v364_v41 = vand.u32 %v789_v33, %v362_v27  ;;  %441 = vmatpush1.bf16.msra.mxu1 %v783_v29  ;;  %v373_v44 = vand.u32 %v792_v35, %v362_v27  ;;  %v370_v45 = vand.u32 %v791_v36, %v362_v27  ;;  %s777_s28 = sshll.u32 %s1130_s15, 4 }
  0x2e   : > { %v794_v51 = vcombine.high %v264_v42, %v268_v43  ;;  %v796_v53 = vcombine.high %v265_v47, %v269_v48  ;;  %v793_v55 = vcombine.low %v264_v42, %v268_v43  ;;  %v795_v57 = vcombine.low %v265_v47, %v269_v48  ;;  %s245_s14 = sadd.s32 %s777_s28, %s1132_s27 }
  0x2f   : > { %389 = vmatprep.subr.bf16.mxu0 %v367_v40  ;;  %442 = vmatprep.subr.bf16.mxu1 %v373_v44  ;;  %s778_s29 = sshll.u32 %s245_s14, 2 }
  0x30   : > { %390 = vmatpush1.bf16.msra.mxu0 %v364_v41  ;;  %v379_v58 = vand.u32 %v794_v51, %v362_v27  ;;  %v385_v59 = vand.u32 %v796_v53, %v362_v27  ;;  %v376_v60 = vand.u32 %v793_v55, %v362_v27  ;;  %v382_v61 = vand.u32 %v795_v57, %v362_v27  ;;  %s1086_s4 = scalar_lea.vmem %s1116_s3, %s778_s29 }
  0x31   : > { %443 = vmatpush1.bf16.msra.mxu1 %v370_v45  ;;  %493 = vmatprep.subr.bf16.mxu0 %v786_v46 }
  0x32   : > { %546 = vmatprep.subr.bf16.mxu1 %v788_v50 }
  0x33   : > { %797 = vmatmul.mubr.msk.bf16.vlgmr.msra.gmra.mrb[0].mxu0 %vm352_vm2, %v874_v52 }
  0x34   : > { %799 = vmatmul.mubr.msk.bf16.vlgmr.msra.gmra.mrb[0].mxu1 %vm352_vm2, %v874_v52  ;;  %494 = vmatpush1.bf16.msra.mxu0 %v785_v54 }
  0x35   : > { %547 = vmatpush1.bf16.msra.mxu1 %v787_v56  ;;  %429 = vmatprep.mubr.bf16.mxu0 %v933_v18 }
  0x36   : > { %482 = vmatprep.mubr.bf16.mxu1 %v933_v18  ;;  %495 = vmatprep.subr.bf16.mxu0 %v379_v58 }
  0x37   : > { %548 = vmatprep.subr.bf16.mxu1 %v385_v59 }
  0x38   : > { %496 = vmatpush1.bf16.msra.mxu0 %v376_v60 }
  0x39   : > { %549 = vmatpush1.bf16.msra.mxu1 %v382_v61 }
  0x3b   : > { %798 = vmatmul.mubr.msk.bf16.gmra.mrb[4].mxu0 %vm352_vm2, %v875_v62 }
  0x3c   : > { %800 = vmatmul.mubr.msk.bf16.gmra.mrb[4].mxu1 %vm352_vm2, %v875_v62  ;;  %525 = vmatprep.mubr.bf16.mxu0 %v933_v18 }
  0x3d   : > { %578 = vmatprep.mubr.bf16.mxu1 %v933_v18 }
  0x43   : > { %801 = vmatmul.mubr.msk.bf16.vlgmr.msra.gmra.mrb[8].mxu0 %vm352_vm2, %v874_v52 }
  0x44   : > { %803 = vmatmul.mubr.msk.bf16.vlgmr.msra.gmra.mrb[8].mxu1 %vm352_vm2, %v874_v52  ;;  %535 = vmatprep.mubr.bf16.mxu0 %v933_v18 }
  0x45   : > { %588 = vmatprep.mubr.bf16.mxu1 %v933_v18 }
  0x4b   : > { %802 = vmatmul.mubr.msk.bf16.gmra.mrb[12].mxu0 %vm352_vm2, %v875_v62 }
  0x4c   : > { %804 = vmatmul.mubr.msk.bf16.gmra.mrb[12].mxu1 %vm352_vm2, %v875_v62 }
  0xa6   : > { %v627_v12 = vpop.permute.xlu0 %626 }
 0x106   : > { %v421_v63 = vpop.f32.mrb[0].mxu0 }
 0x107   : > { %v474_v0 = vpop.f32.mrb[0].mxu1  ;;  %v423_v1 = vpop.f32.mrb[1].mxu0 }
 0x108   : > { %v476_v2 = vpop.f32.mrb[1].mxu1  ;;  %v425_v3 = vpop.f32.mrb[2].mxu0 }
 0x109   : > { %v599_v4 = vmax.f32 %v421_v63, %v425_v3  ;;  %v478_v5 = vpop.f32.mrb[2].mxu1  ;;  %v427_v6 = vpop.f32.mrb[3].mxu0 }
 0x10a   : > { %v601_v7 = vmax.f32 %v474_v0, %v478_v5  ;;  %v600_v8 = vmax.f32 %v423_v1, %v427_v6  ;;  %v480_v9 = vpop.f32.mrb[3].mxu1 }
 0x10b   : > { %v602_v10 = vmax.f32 %v476_v2, %v480_v9 }
 0x10e   : > { %v431_v11 = vpop.f32.mrb[4].mxu0 }
 0x10f   : > { %v607_v13 = vmax.f32 %v599_v4, %v431_v11  ;;  %v484_v14 = vpop.f32.mrb[4].mxu1  ;;  %v433_v15 = vpop.f32.mrb[5].mxu0 }
 0x110   : > { %v609_v16 = vmax.f32 %v601_v7, %v484_v14  ;;  %v608_v17 = vmax.f32 %v600_v8, %v433_v15  ;;  %v486_v18 = vpop.f32.mrb[5].mxu1  ;;  %v435_v19 = vpop.f32.mrb[6].mxu0 }
 0x111   : > { %v610_v20 = vmax.f32 %v602_v10, %v486_v18  ;;  %v615_v21 = vmax.f32 %v607_v13, %v435_v19  ;;  %v488_v22 = vpop.f32.mrb[6].mxu1  ;;  %v437_v23 = vpop.f32.mrb[7].mxu0 }
 0x112   : > { %v617_v24 = vmax.f32 %v609_v16, %v488_v22  ;;  %v616_v25 = vmax.f32 %v608_v17, %v437_v23  ;;  %v490_v26 = vpop.f32.mrb[7].mxu1 }
 0x113   : > { %v618_v27 = vmax.f32 %v610_v20, %v490_v26  ;;  %v629_v28 = vadd.f32 %v627_v12, %v615_v21 }
 0x114   : > { %v630_v29 = vadd.f32 %v627_v12, %v616_v25  ;;  %v631_v30 = vadd.f32 %v627_v12, %v617_v24 }
 0x115   : > { %v632_v31 = vadd.f32 %v627_v12, %v618_v27 }
 0x116   : > { %v527_v32 = vpop.f32.mrb[8].mxu0  ;;  %v811_v33 = vpack.c.bf16 %v630_v29, %v629_v28 }
 0x117   : > { %v580_v34 = vpop.f32.mrb[8].mxu1  ;;  %v529_v35 = vpop.f32.mrb[9].mxu0  ;;  %v812_v36 = vpack.c.bf16 %v632_v31, %v631_v30 }
 0x118   : > { %v582_v37 = vpop.f32.mrb[9].mxu1  ;;  %v531_v38 = vpop.f32.mrb[10].mxu0  ;;  %669 = vst [vmem:[%s1086_s4] sm:$0xff] %v811_v33 }
 0x119   : > { %v603_v39 = vmax.f32 %v527_v32, %v531_v38  ;;  %v584_v40 = vpop.f32.mrb[10].mxu1  ;;  %v533_v41 = vpop.f32.mrb[11].mxu0  ;;  %670 = vst [vmem:[%s1086_s4 + $0x8] sm:$0xff] %v812_v36 }
 0x11a   : > { %v605_v42 = vmax.f32 %v580_v34, %v584_v40  ;;  %v604_v43 = vmax.f32 %v529_v35, %v533_v41  ;;  %v586_v44 = vpop.f32.mrb[11].mxu1 }
 0x11b   : > { %v606_v45 = vmax.f32 %v582_v37, %v586_v44 }
 0x11e   : > { %v537_v46 = vpop.f32.mrb[12].mxu0 }
 0x11f   : > { %v611_v47 = vmax.f32 %v603_v39, %v537_v46  ;;  %v590_v48 = vpop.f32.mrb[12].mxu1  ;;  %v539_v49 = vpop.f32.mrb[13].mxu0 }
 0x120   : > { %v613_v50 = vmax.f32 %v605_v42, %v590_v48  ;;  %v612_v51 = vmax.f32 %v604_v43, %v539_v49  ;;  %v592_v52 = vpop.f32.mrb[13].mxu1  ;;  %v541_v53 = vpop.f32.mrb[14].mxu0 }
 0x121   : > { %v614_v54 = vmax.f32 %v606_v45, %v592_v52  ;;  %v619_v55 = vmax.f32 %v611_v47, %v541_v53  ;;  %v594_v56 = vpop.f32.mrb[14].mxu1  ;;  %v543_v57 = vpop.f32.mrb[15].mxu0 }
 0x122   : > { %v621_v58 = vmax.f32 %v613_v50, %v594_v56  ;;  %v620_v59 = vmax.f32 %v612_v51, %v543_v57  ;;  %v596_v60 = vpop.f32.mrb[15].mxu1 }
 0x123   : > { %v633_v61 = vadd.f32 %v627_v12, %v619_v55  ;;  %v622_v62 = vmax.f32 %v614_v54, %v596_v60 }
 0x124   : > { %v635_v63 = vadd.f32 %v627_v12, %v621_v58  ;;  %v634_v0 = vadd.f32 %v627_v12, %v620_v59 }
 0x125   : > { %v636_v1 = vadd.f32 %v627_v12, %v622_v62 }
 0x126   : > { %v813_v2 = vpack.c.bf16 %v634_v0, %v633_v61 }
 0x127   : > { %v814_v3 = vpack.c.bf16 %v636_v1, %v635_v63 }
 0x128   : > { %671 = vst [vmem:[%s1086_s4 + $0x10] sm:$0xff] %v813_v2 }
 0x129   : > { %672 = vst [vmem:[%s1086_s4 + $0x18] sm:$0xff] %v814_v3 }
 0x12a PF: > { %s13_s18 = sadd.s32 1, %s930_s18   ;;  %s1117_s12 = smov %s910_s13 }
 0x12b   : > { %p10_p12 = scmp.ge.s32.totalorder %s13_s18, 6   ;;  %s1118_s13 = smov %s1005_s25 }
 0x12c   : > { %s1119_s14 = smov %s922_s16  ;;  %s1120_s15 = smov %s926_s17 }
 0x12d   : > { %s1121_s16 = smov %s1124_s19  ;;  %s1122_s17 = smov %s1128_s20 }
 0x12e   :  { %12 = sbr.rel (!%p10_p12) target bundleno = 4 (0x4), region = 90 }

// kernel: dga3net_forward.12
= control target key start
LH: loop header
LB: loop body
LE: loop exit
PB: predicated region body
PF: predicated region fallthrough
CT: control target
= control target key end

     0   :  { %s1839_s12 = smov 0   ;;  %s1841_s13 = smov 0   ;;  %s2330_s0 = inlined_call_operand.vmem [shape: bf16[32,216], index: 0, kind: input, shape index: {}]   ;;  %s2331_s1 = inlined_call_operand.vmem [shape: bf16[2,216,2048], index: 1, kind: input, shape index: {}]   ;;  %s2332_s2 = inlined_call_operand.vmem [shape: f32[8,1], index: 2, kind: input, shape index: {}]   ;;  %s2333_s3 = inlined_call_operand.vmem [shape: bf16[2,8,2048], index: 3, kind: output, shape index: {}]  }
   0x1   :  { %s1843_s14 = smov 0   ;;  %s1845_s15 = smov 0  }
   0x2   :  { %s1847_s16 = smov 0   ;;  %s1849_s17 = smov 0  }
   0x3   :  { %s1851_s18 = smov 0  }
   0x4 LB: > { %s22_s19 = sadd.s32 1, %s1808_s16  ;;  %s25_s20 = sadd.s32 1, %s1812_s17  ;;  %s1816_s18 = sphi %s1851_s18, %s13_s18   ;;  %s1812_s17 = sphi %s1849_s17, %s2339_s17   ;;  %s1808_s16 = sphi %s1847_s16, %s2338_s16   ;;  %s1804_s15 = sphi %s1845_s15, %s2337_s15   ;;  %s1800_s14 = sphi %s1843_s14, %s2336_s14   ;;  %s1796_s13 = sphi %s1841_s13, %s2335_s13   ;;  %s1792_s12 = sphi %s1839_s12, %s2334_s12  }
   0x5   : > { %p23_p0 = scmp.ge.s32.totalorder %s22_s19, 2  ;;  %p62_p1 = scmp.ne.s32.totalorder %s1796_s13, %s1792_s12 }
   0x6   : > { %p63_p2 = scmp.eq.s32.totalorder %s1816_s18, 0  ;;  %s55_s24 = sadd.s32 1, %s1796_s13 }
   0x7   : > { %s2341_s19 = smov (%p23_p0, %s22_s19), 0  ;;  %s2343_s20 = smov (!%p23_p0, %s25_s20), %s1812_s17 }
   0x8   : > { %p64_p3 = por %p63_p2, %p62_p1  ;;  %p27_p4 = scmp.ge.s32.totalorder %s2343_s20, 2 }
   0x9   : > { %s51_s21 = ssub.s32 %s1808_s16, %s2341_s19  ;;  %p1542_p6 = scmp.ge.s32.totalorder %s1816_s18, 4 }
   0xa   : > { %s2345_s20 = smov (%p27_p4, %s2343_s20), 0 }
   0xb   : > { %s50_s22 = ssub.s32 %s1812_s17, %s2345_s20  ;;  %143 = sbr.rel (%p1542_p6) target bundleno = 80 (0x50), region = 24 }
   0xc   : > { %s52_s23 = sor.u32 %s51_s21, %s50_s22 }
   0xd   : > { %p53_p5 = scmp.eq.s32.totalorder %s52_s23, 0 }
   0xf   : > { %s1890_s25 = scalar_select %p53_p5, %s1796_s13, %s55_s24  }
  0x12   : > { %146 = sbr.rel (!%p64_p3) target bundleno = 80 (0x50), region = 28  ;;  %s148_s26 = sand.u32 (%p64_p3), 1, %s1796_s13  }
  0x13   : > { %s1687_s27 = smul.u32 (%p64_p3), 864, %s148_s26  ;;  %s1543_s28 = sshll.u32 (%p64_p3), %s1808_s16, 3 }
  0x14   : > { %s1688_s29 = smul.u32 (%p64_p3), 432, %s1812_s17 }
  0x15   : > { %s1904_s8 = scalar_lea.vmem (%p64_p3), [#allocation2], %s1687_s27 }
  0x16   : > { %s153_s30 = sadd.s32 (%p64_p3), %s1688_s29, %s1543_s28 }
  0x17   : > { %s1544_s4 = sshll.u32 (%p64_p3), %s153_s30, 2 }
  0x18   : > { %s1899_s7 = scalar_lea.vmem (%p64_p3), %s2331_s1, %s1544_s4 }
  0x19   : > { %v168_v0 = vld [vmem:[%s1899_s7] sm:$0xff]  ;;  %v170_v1 = vld [vmem:[%s1899_s7 + $0x8] sm:$0xff]  ;;  %v172_v2 = vld [vmem:[%s1899_s7 + $0x10] sm:$0xff] }
  0x1a   : > { %169 = vst [vmem:[%s1904_s8] sm:$0xff] %v168_v0  ;;  %171 = vst [vmem:[%s1904_s8 + $0x8] sm:$0xff] %v170_v1  ;;  %v174_v3 = vld [vmem:[%s1899_s7 + $0x18] sm:$0xff]  ;;  %v176_v4 = vld [vmem:[%s1899_s7 + $0x40] sm:$0xff] }
  0x1b   : > { %173 = vst [vmem:[%s1904_s8 + $0x10] sm:$0xff] %v172_v2  ;;  %v178_v5 = vld [vmem:[%s1899_s7 + $0x48] sm:$0xff]  ;;  %175 = vst [vmem:[%s1904_s8 + $0x18] sm:$0xff] %v174_v3  ;;  %v180_v6 = vld [vmem:[%s1899_s7 + $0x50] sm:$0xff] }
  0x1c   : > { %177 = vst [vmem:[%s1904_s8 + $0x20] sm:$0xff] %v176_v4  ;;  %179 = vst [vmem:[%s1904_s8 + $0x28] sm:$0xff] %v178_v5  ;;  %v182_v7 = vld [vmem:[%s1899_s7 + $0x58] sm:$0xff]  ;;  %v184_v8 = vld [vmem:[%s1899_s7 + $0x80] sm:$0xff] }
  0x1d   : > { %181 = vst [vmem:[%s1904_s8 + $0x30] sm:$0xff] %v180_v6  ;;  %183 = vst [vmem:[%s1904_s8 + $0x38] sm:$0xff] %v182_v7  ;;  %v186_v9 = vld [vmem:[%s1899_s7 + $0x88] sm:$0xff]  ;;  %v188_v10 = vld [vmem:[%s1899_s7 + $0x90] sm:$0xff] }
  0x1e   : > { %185 = vst [vmem:[%s1904_s8 + $0x40] sm:$0xff] %v184_v8  ;;  %v190_v11 = vld [vmem:[%s1899_s7 + $0x98] sm:$0xff]  ;;  %187 = vst [vmem:[%s1904_s8 + $0x48] sm:$0xff] %v186_v9  ;;  %v192_v12 = vld [vmem:[%s1899_s7 + $0xc0] sm:$0xff] }
  0x1f   : > { %189 = vst [vmem:[%s1904_s8 + $0x50] sm:$0xff] %v188_v10  ;;  %191 = vst [vmem:[%s1904_s8 + $0x58] sm:$0xff] %v190_v11  ;;  %v194_v13 = vld [vmem:[%s1899_s7 + $0xc8] sm:$0xff]  ;;  %v196_v14 = vld [vmem:[%s1899_s7 + $0xd0] sm:$0xff] }
  0x20   : > { %193 = vst [vmem:[%s1904_s8 + $0x60] sm:$0xff] %v192_v12  ;;  %195 = vst [vmem:[%s1904_s8 + $0x68] sm:$0xff] %v194_v13  ;;  %v198_v15 = vld [vmem:[%s1899_s7 + $0xd8] sm:$0xff]  ;;  %v200_v16 = vld [vmem:[%s1899_s7 + $0x100] sm:$0xff] }
  0x21   : > { %197 = vst [vmem:[%s1904_s8 + $0x70] sm:$0xff] %v196_v14  ;;  %v202_v17 = vld [vmem:[%s1899_s7 + $0x108] sm:$0xff]  ;;  %199 = vst [vmem:[%s1904_s8 + $0x78] sm:$0xff] %v198_v15  ;;  %v204_v18 = vld [vmem:[%s1899_s7 + $0x110] sm:$0xff] }
  0x22   : > { %201 = vst [vmem:[%s1904_s8 + $0x80] sm:$0xff] %v200_v16  ;;  %203 = vst [vmem:[%s1904_s8 + $0x88] sm:$0xff] %v202_v17  ;;  %v206_v19 = vld [vmem:[%s1899_s7 + $0x118] sm:$0xff]  ;;  %v208_v20 = vld [vmem:[%s1899_s7 + $0x140] sm:$0xff] }
  0x23   : > { %205 = vst [vmem:[%s1904_s8 + $0x90] sm:$0xff] %v204_v18  ;;  %207 = vst [vmem:[%s1904_s8 + $0x98] sm:$0xff] %v206_v19  ;;  %v210_v21 = vld [vmem:[%s1899_s7 + $0x148] sm:$0xff]  ;;  %v212_v22 = vld [vmem:[%s1899_s7 + $0x150] sm:$0xff] }
  0x24   : > { %209 = vst [vmem:[%s1904_s8 + $0xa0] sm:$0xff] %v208_v20  ;;  %v214_v23 = vld [vmem:[%s1899_s7 + $0x158] sm:$0xff]  ;;  %211 = vst [vmem:[%s1904_s8 + $0xa8] sm:$0xff] %v210_v21  ;;  %v216_v24 = vld [vmem:[%s1899_s7 + $0x180] sm:$0xff] }
  0x25   : > { %213 = vst [vmem:[%s1904_s8 + $0xb0] sm:$0xff] %v212_v22  ;;  %215 = vst [vmem:[%s1904_s8 + $0xb8] sm:$0xff] %v214_v23  ;;  %v218_v25 = vld [vmem:[%s1899_s7 + $0x188] sm:$0xff]  ;;  %v220_v26 = vld [vmem:[%s1899_s7 + $0x190] sm:$0xff] }
  0x26   : > { %217 = vst [vmem:[%s1904_s8 + $0xc0] sm:$0xff] %v216_v24  ;;  %219 = vst [vmem:[%s1904_s8 + $0xc8] sm:$0xff] %v218_v25  ;;  %v222_v27 = vld [vmem:[%s1899_s7 + $0x198] sm:$0xff]  ;;  %v224_v28 = vld [vmem:[%s1899_s7 + $0x1c0] sm:$0xff] }
  0x27   : > { %221 = vst [vmem:[%s1904_s8 + $0xd0] sm:$0xff] %v220_v26  ;;  %v226_v29 = vld [vmem:[%s1899_s7 + $0x1c8] sm:$0xff]  ;;  %223 = vst [vmem:[%s1904_s8 + $0xd8] sm:$0xff] %v222_v27  ;;  %v228_v30 = vld [vmem:[%s1899_s7 + $0x1d0] sm:$0xff] }
  0x28   : > { %225 = vst [vmem:[%s1904_s8 + $0xe0] sm:$0xff] %v224_v28  ;;  %227 = vst [vmem:[%s1904_s8 + $0xe8] sm:$0xff] %v226_v29  ;;  %v230_v31 = vld [vmem:[%s1899_s7 + $0x1d8] sm:$0xff]  ;;  %v232_v32 = vld [vmem:[%s1899_s7 + $0x200] sm:$0xff] }
  0x29   : > { %229 = vst [vmem:[%s1904_s8 + $0xf0] sm:$0xff] %v228_v30  ;;  %231 = vst [vmem:[%s1904_s8 + $0xf8] sm:$0xff] %v230_v31  ;;  %v234_v33 = vld [vmem:[%s1899_s7 + $0x208] sm:$0xff]  ;;  %v236_v34 = vld [vmem:[%s1899_s7 + $0x210] sm:$0xff] }
  0x2a   : > { %233 = vst [vmem:[%s1904_s8 + $0x100] sm:$0xff] %v232_v32  ;;  %v238_v35 = vld [vmem:[%s1899_s7 + $0x218] sm:$0xff]  ;;  %235 = vst [vmem:[%s1904_s8 + $0x108] sm:$0xff] %v234_v33  ;;  %v240_v36 = vld [vmem:[%s1899_s7 + $0x240] sm:$0xff] }
  0x2b   : > { %237 = vst [vmem:[%s1904_s8 + $0x110] sm:$0xff] %v236_v34  ;;  %239 = vst [vmem:[%s1904_s8 + $0x118] sm:$0xff] %v238_v35  ;;  %v242_v37 = vld [vmem:[%s1899_s7 + $0x248] sm:$0xff]  ;;  %v244_v38 = vld [vmem:[%s1899_s7 + $0x250] sm:$0xff] }
  0x2c   : > { %241 = vst [vmem:[%s1904_s8 + $0x120] sm:$0xff] %v240_v36  ;;  %243 = vst [vmem:[%s1904_s8 + $0x128] sm:$0xff] %v242_v37  ;;  %v246_v39 = vld [vmem:[%s1899_s7 + $0x258] sm:$0xff]  ;;  %v248_v40 = vld [vmem:[%s1899_s7 + $0x280] sm:$0xff] }
  0x2d   : > { %245 = vst [vmem:[%s1904_s8 + $0x130] sm:$0xff] %v244_v38  ;;  %v250_v41 = vld [vmem:[%s1899_s7 + $0x288] sm:$0xff]  ;;  %247 = vst [vmem:[%s1904_s8 + $0x138] sm:$0xff] %v246_v39  ;;  %v252_v42 = vld [vmem:[%s1899_s7 + $0x290] sm:$0xff] }
  0x2e   : > { %249 = vst [vmem:[%s1904_s8 + $0x140] sm:$0xff] %v248_v40  ;;  %251 = vst [vmem:[%s1904_s8 + $0x148] sm:$0xff] %v250_v41  ;;  %v254_v43 = vld [vmem:[%s1899_s7 + $0x298] sm:$0xff]  ;;  %v256_v44 = vld [vmem:[%s1899_s7 + $0x2c0] sm:$0xff] }
  0x2f   : > { %253 = vst [vmem:[%s1904_s8 + $0x150] sm:$0xff] %v252_v42  ;;  %255 = vst [vmem:[%s1904_s8 + $0x158] sm:$0xff] %v254_v43  ;;  %v258_v45 = vld [vmem:[%s1899_s7 + $0x2c8] sm:$0xff]  ;;  %v260_v46 = vld [vmem:[%s1899_s7 + $0x2d0] sm:$0xff] }
  0x30   : > { %257 = vst [vmem:[%s1904_s8 + $0x160] sm:$0xff] %v256_v44  ;;  %v262_v47 = vld [vmem:[%s1899_s7 + $0x2d8] sm:$0xff]  ;;  %259 = vst [vmem:[%s1904_s8 + $0x168] sm:$0xff] %v258_v45  ;;  %v264_v48 = vld [vmem:[%s1899_s7 + $0x300] sm:$0xff] }
  0x31   : > { %261 = vst [vmem:[%s1904_s8 + $0x170] sm:$0xff] %v260_v46  ;;  %263 = vst [vmem:[%s1904_s8 + $0x178] sm:$0xff] %v262_v47  ;;  %v266_v49 = vld [vmem:[%s1899_s7 + $0x308] sm:$0xff]  ;;  %v268_v50 = vld [vmem:[%s1899_s7 + $0x310] sm:$0xff] }
  0x32   : > { %265 = vst [vmem:[%s1904_s8 + $0x180] sm:$0xff] %v264_v48  ;;  %267 = vst [vmem:[%s1904_s8 + $0x188] sm:$0xff] %v266_v49  ;;  %v270_v51 = vld [vmem:[%s1899_s7 + $0x318] sm:$0xff]  ;;  %v272_v52 = vld [vmem:[%s1899_s7 + $0x340] sm:$0xff] }
  0x33   : > { %269 = vst [vmem:[%s1904_s8 + $0x190] sm:$0xff] %v268_v50  ;;  %v274_v53 = vld [vmem:[%s1899_s7 + $0x348] sm:$0xff]  ;;  %271 = vst [vmem:[%s1904_s8 + $0x198] sm:$0xff] %v270_v51  ;;  %v276_v54 = vld [vmem:[%s1899_s7 + $0x350] sm:$0xff] }
  0x34   : > { %273 = vst [vmem:[%s1904_s8 + $0x1a0] sm:$0xff] %v272_v52  ;;  %275 = vst [vmem:[%s1904_s8 + $0x1a8] sm:$0xff] %v274_v53  ;;  %v278_v55 = vld [vmem:[%s1899_s7 + $0x358] sm:$0xff]  ;;  %v280_v56 = vld [vmem:[%s1899_s7 + $0x380] sm:$0xff] }
  0x35   : > { %277 = vst [vmem:[%s1904_s8 + $0x1b0] sm:$0xff] %v276_v54  ;;  %279 = vst [vmem:[%s1904_s8 + $0x1b8] sm:$0xff] %v278_v55  ;;  %v282_v57 = vld [vmem:[%s1899_s7 + $0x388] sm:$0xff]  ;;  %v284_v58 = vld [vmem:[%s1899_s7 + $0x390] sm:$0xff] }
  0x36   : > { %281 = vst [vmem:[%s1904_s8 + $0x1c0] sm:$0xff] %v280_v56  ;;  %v286_v59 = vld [vmem:[%s1899_s7 + $0x398] sm:$0xff]  ;;  %283 = vst [vmem:[%s1904_s8 + $0x1c8] sm:$0xff] %v282_v57  ;;  %v288_v60 = vld [vmem:[%s1899_s7 + $0x3c0] sm:$0xff] }
  0x37   : > { %285 = vst [vmem:[%s1904_s8 + $0x1d0] sm:$0xff] %v284_v58  ;;  %287 = vst [vmem:[%s1904_s8 + $0x1d8] sm:$0xff] %v286_v59  ;;  %v290_v61 = vld [vmem:[%s1899_s7 + $0x3c8] sm:$0xff]  ;;  %v292_v62 = vld [vmem:[%s1899_s7 + $0x3d0] sm:$0xff] }
  0x38   : > { %289 = vst [vmem:[%s1904_s8 + $0x1e0] sm:$0xff] %v288_v60  ;;  %291 = vst [vmem:[%s1904_s8 + $0x1e8] sm:$0xff] %v290_v61  ;;  %v294_v63 = vld [vmem:[%s1899_s7 + $0x3d8] sm:$0xff]  ;;  %v296_v0 = vld [vmem:[%s1899_s7 + $0x400] sm:$0xff] }
  0x39   : > { %293 = vst [vmem:[%s1904_s8 + $0x1f0] sm:$0xff] %v292_v62  ;;  %v298_v1 = vld [vmem:[%s1899_s7 + $0x408] sm:$0xff]  ;;  %295 = vst [vmem:[%s1904_s8 + $0x1f8] sm:$0xff] %v294_v63  ;;  %v300_v2 = vld [vmem:[%s1899_s7 + $0x410] sm:$0xff] }
  0x3a   : > { %297 = vst [vmem:[%s1904_s8 + $0x200] sm:$0xff] %v296_v0  ;;  %299 = vst [vmem:[%s1904_s8 + $0x208] sm:$0xff] %v298_v1  ;;  %v302_v3 = vld [vmem:[%s1899_s7 + $0x418] sm:$0xff]  ;;  %v304_v4 = vld [vmem:[%s1899_s7 + $0x440] sm:$0xff] }
  0x3b   : > { %301 = vst [vmem:[%s1904_s8 + $0x210] sm:$0xff] %v300_v2  ;;  %303 = vst [vmem:[%s1904_s8 + $0x218] sm:$0xff] %v302_v3  ;;  %v306_v5 = vld [vmem:[%s1899_s7 + $0x448] sm:$0xff]  ;;  %v308_v6 = vld [vmem:[%s1899_s7 + $0x450] sm:$0xff] }
  0x3c   : > { %305 = vst [vmem:[%s1904_s8 + $0x220] sm:$0xff] %v304_v4  ;;  %v310_v7 = vld [vmem:[%s1899_s7 + $0x458] sm:$0xff]  ;;  %307 = vst [vmem:[%s1904_s8 + $0x228] sm:$0xff] %v306_v5  ;;  %v312_v8 = vld [vmem:[%s1899_s7 + $0x480] sm:$0xff] }
  0x3d   : > { %309 = vst [vmem:[%s1904_s8 + $0x230] sm:$0xff] %v308_v6  ;;  %311 = vst [vmem:[%s1904_s8 + $0x238] sm:$0xff] %v310_v7  ;;  %v314_v9 = vld [vmem:[%s1899_s7 + $0x488] sm:$0xff]  ;;  %v316_v10 = vld [vmem:[%s1899_s7 + $0x490] sm:$0xff] }
  0x3e   : > { %313 = vst [vmem:[%s1904_s8 + $0x240] sm:$0xff] %v312_v8  ;;  %315 = vst [vmem:[%s1904_s8 + $0x248] sm:$0xff] %v314_v9  ;;  %v318_v11 = vld [vmem:[%s1899_s7 + $0x498] sm:$0xff]  ;;  %v320_v12 = vld [vmem:[%s1899_s7 + $0x4c0] sm:$0xff] }
  0x3f   : > { %317 = vst [vmem:[%s1904_s8 + $0x250] sm:$0xff] %v316_v10  ;;  %v322_v13 = vld [vmem:[%s1899_s7 + $0x4c8] sm:$0xff]  ;;  %319 = vst [vmem:[%s1904_s8 + $0x258] sm:$0xff] %v318_v11  ;;  %v324_v14 = vld [vmem:[%s1899_s7 + $0x4d0] sm:$0xff] }
  0x40   : > { %321 = vst [vmem:[%s1904_s8 + $0x260] sm:$0xff] %v320_v12  ;;  %323 = vst [vmem:[%s1904_s8 + $0x268] sm:$0xff] %v322_v13  ;;  %v326_v15 = vld [vmem:[%s1899_s7 + $0x4d8] sm:$0xff]  ;;  %v328_v16 = vld [vmem:[%s1899_s7 + $0x500] sm:$0xff] }
  0x41   : > { %325 = vst [vmem:[%s1904_s8 + $0x270] sm:$0xff] %v324_v14  ;;  %327 = vst [vmem:[%s1904_s8 + $0x278] sm:$0xff] %v326_v15  ;;  %v330_v17 = vld [vmem:[%s1899_s7 + $0x508] sm:$0xff]  ;;  %v332_v18 = vld [vmem:[%s1899_s7 + $0x510] sm:$0xff] }
  0x42   : > { %329 = vst [vmem:[%s1904_s8 + $0x280] sm:$0xff] %v328_v16  ;;  %v334_v19 = vld [vmem:[%s1899_s7 + $0x518] sm:$0xff]  ;;  %331 = vst [vmem:[%s1904_s8 + $0x288] sm:$0xff] %v330_v17  ;;  %v336_v20 = vld [vmem:[%s1899_s7 + $0x540] sm:$0xff] }
  0x43   : > { %333 = vst [vmem:[%s1904_s8 + $0x290] sm:$0xff] %v332_v18  ;;  %335 = vst [vmem:[%s1904_s8 + $0x298] sm:$0xff] %v334_v19  ;;  %v338_v21 = vld [vmem:[%s1899_s7 + $0x548] sm:$0xff]  ;;  %v340_v22 = vld [vmem:[%s1899_s7 + $0x550] sm:$0xff] }
  0x44   : > { %337 = vst [vmem:[%s1904_s8 + $0x2a0] sm:$0xff] %v336_v20  ;;  %339 = vst [vmem:[%s1904_s8 + $0x2a8] sm:$0xff] %v338_v21  ;;  %v342_v23 = vld [vmem:[%s1899_s7 + $0x558] sm:$0xff]  ;;  %v344_v24 = vld [vmem:[%s1899_s7 + $0x580] sm:$0xff] }
  0x45   : > { %341 = vst [vmem:[%s1904_s8 + $0x2b0] sm:$0xff] %v340_v22  ;;  %v346_v25 = vld [vmem:[%s1899_s7 + $0x588] sm:$0xff]  ;;  %343 = vst [vmem:[%s1904_s8 + $0x2b8] sm:$0xff] %v342_v23  ;;  %v348_v26 = vld [vmem:[%s1899_s7 + $0x590] sm:$0xff] }
  0x46   : > { %345 = vst [vmem:[%s1904_s8 + $0x2c0] sm:$0xff] %v344_v24  ;;  %347 = vst [vmem:[%s1904_s8 + $0x2c8] sm:$0xff] %v346_v25  ;;  %v350_v27 = vld [vmem:[%s1899_s7 + $0x598] sm:$0xff]  ;;  %v352_v28 = vld [vmem:[%s1899_s7 + $0x5c0] sm:$0xff] }
  0x47   : > { %349 = vst [vmem:[%s1904_s8 + $0x2d0] sm:$0xff] %v348_v26  ;;  %351 = vst [vmem:[%s1904_s8 + $0x2d8] sm:$0xff] %v350_v27  ;;  %v354_v29 = vld [vmem:[%s1899_s7 + $0x5c8] sm:$0xff]  ;;  %v356_v30 = vld [vmem:[%s1899_s7 + $0x5d0] sm:$0xff] }
  0x48   : > { %353 = vst [vmem:[%s1904_s8 + $0x2e0] sm:$0xff] %v352_v28  ;;  %v358_v31 = vld [vmem:[%s1899_s7 + $0x5d8] sm:$0xff]  ;;  %355 = vst [vmem:[%s1904_s8 + $0x2e8] sm:$0xff] %v354_v29  ;;  %v360_v32 = vld [vmem:[%s1899_s7 + $0x600] sm:$0xff] }
  0x49   : > { %357 = vst [vmem:[%s1904_s8 + $0x2f0] sm:$0xff] %v356_v30  ;;  %359 = vst [vmem:[%s1904_s8 + $0x2f8] sm:$0xff] %v358_v31  ;;  %v362_v33 = vld [vmem:[%s1899_s7 + $0x608] sm:$0xff]  ;;  %v364_v34 = vld [vmem:[%s1899_s7 + $0x610] sm:$0xff] }
  0x4a   : > { %361 = vst [vmem:[%s1904_s8 + $0x300] sm:$0xff] %v360_v32  ;;  %363 = vst [vmem:[%s1904_s8 + $0x308] sm:$0xff] %v362_v33  ;;  %v366_v35 = vld [vmem:[%s1899_s7 + $0x618] sm:$0xff]  ;;  %v368_v36 = vld [vmem:[%s1899_s7 + $0x640] sm:$0xff] }
  0x4b   : > { %365 = vst [vmem:[%s1904_s8 + $0x310] sm:$0xff] %v364_v34  ;;  %v370_v37 = vld [vmem:[%s1899_s7 + $0x648] sm:$0xff]  ;;  %367 = vst [vmem:[%s1904_s8 + $0x318] sm:$0xff] %v366_v35  ;;  %v372_v38 = vld [vmem:[%s1899_s7 + $0x650] sm:$0xff] }
  0x4c   : > { %369 = vst [vmem:[%s1904_s8 + $0x320] sm:$0xff] %v368_v36  ;;  %371 = vst [vmem:[%s1904_s8 + $0x328] sm:$0xff] %v370_v37  ;;  %v374_v39 = vld [vmem:[%s1899_s7 + $0x658] sm:$0xff]  ;;  %v376_v40 = vld [vmem:[%s1899_s7 + $0x680] sm:$0xff] }
  0x4d   : > { %373 = vst [vmem:[%s1904_s8 + $0x330] sm:$0xff] %v372_v38  ;;  %375 = vst [vmem:[%s1904_s8 + $0x338] sm:$0xff] %v374_v39  ;;  %v378_v41 = vld [vmem:[%s1899_s7 + $0x688] sm:$0xff]  ;;  %v380_v42 = vld [vmem:[%s1899_s7 + $0x690] sm:$0xff] }
  0x4e   : > { %377 = vst [vmem:[%s1904_s8 + $0x340] sm:$0xff] %v376_v40  ;;  %v382_v43 = vld [vmem:[%s1899_s7 + $0x698] sm:$0xff]  ;;  %379 = vst [vmem:[%s1904_s8 + $0x348] sm:$0xff] %v378_v41 }
  0x4f   : > { %381 = vst [vmem:[%s1904_s8 + $0x350] sm:$0xff] %v380_v42  ;;  %383 = vst [vmem:[%s1904_s8 + $0x358] sm:$0xff] %v382_v43 }
  0x50 PF: > { %p1545_p7 = scmp.ge.s32.totalorder %s1816_s18, 1  ;;  %p388_p8 = scmp.lt.s32.totalorder %s1816_s18, 5 }
  0x52   : > { %p389_p9 = pnand %p1545_p7, %p388_p8 }
  0x53   : > { %s395_s9 = sand.u32 (!%p389_p9), 1, %s1792_s12   ;;  %v2125_v44 = vld [vmem:[%s2330_s0 + $0x4] ss:$8 sps:$4 sm:$0xff] (!%p389_p9)   ;;  %vm1104_vm0 = vcmask (!%p389_p9), 719872   ;;  %v1818_v46 = vmov (!%p389_p9), 0   ;;  %vm1111_vm1 = vcmask (!%p389_p9), 1043456  }
  0x54   : > { %392 = sbr.rel (%p389_p9) target bundleno = 437 (0x1b5), region = 51  ;;  %1666 = vmatprep.mubr.msk.bf16.mxu0 (!%p389_p9), %vm1104_vm0, %v2125_v44  ;;  %1669 = vmatprep.mubr.msk.bf16.mxu1 (!%p389_p9), %vm1104_vm0, %v2125_v44  ;;  %v1372_v45 = vld [vmem:[%s2332_s2] sm:$0xff] (!%p389_p9)  ;;  %s1546_s4 = sshll.u32 (!%p389_p9), %s1800_s14, 3 }
  0x55   : > { %s1689_s21 = smul.u32 (!%p389_p9), 864, %s395_s9  ;;  %1747 = vset.pattern.permute.xlu0 (!%p389_p9), %v1818_v46  ;;  %p424_p10 = scmp.lt.s32.totalorder (!%p389_p9), %s1804_s15, 1 }
  0x56   : > { %1375 = vperm.xlu0 (!%p389_p9), %1747, %v1372_v45   ;;  %p426_p11 = scmp.lt.s32.totalorder (!%p389_p9), %s1546_s4, 15 }
  0x57   : > { %s2134_s12 = scalar_lea.vmem (!%p389_p9), [#allocation2], %s1689_s21 }
  0x58   : > { %v438_v47 = vld [vmem:[%s2134_s12] sm:$0xff] (!%p389_p9)  ;;  %v439_v49 = vld [vmem:[%s2134_s12 + $0x8] sm:$0xff] (!%p389_p9) }
  0x59   : > { %v442_v48 = vld [vmem:[%s2134_s12 + $0x20] sm:$0xff] (!%p389_p9)  ;;  %v443_v51 = vld [vmem:[%s2134_s12 + $0x28] sm:$0xff] (!%p389_p9) }
  0x5a   : > { %v1554_v50 = vcombine.high (!%p389_p9), %v438_v47, %v442_v48  ;;  %v1553_v52 = vcombine.low (!%p389_p9), %v438_v47, %v442_v48  ;;  %v446_v53 = vld [vmem:[%s2134_s12 + $0x40] sm:$0xff] (!%p389_p9)  ;;  %v1556_v55 = vcombine.high (!%p389_p9), %v439_v49, %v443_v51  ;;  %v1555_v56 = vcombine.low (!%p389_p9), %v439_v49, %v443_v51  ;;  %v447_v58 = vld [vmem:[%s2134_s12 + $0x48] sm:$0xff] (!%p389_p9) }
  0x5b   : > { %v450_v54 = vld [vmem:[%s2134_s12 + $0x60] sm:$0xff]  ;;  %v451_v59 = vld [vmem:[%s2134_s12 + $0x68] sm:$0xff]  ;;  %s2347_s15 = smov (!%p424_p10, %s1804_s15), 1  ;;  %s2349_s4 = smov (!%p426_p11, %s1546_s4), 15 }
  0x5c   : > { %v1562_v57 = vcombine.high %v446_v53, %v450_v54  ;;  %v454_v60 = vld [vmem:[%s2134_s12 + $0x80] sm:$0xff]  ;;  %1136 = vmatprep.subr.bf16.mxu0 %v1554_v50  ;;  %v1564_v61 = vcombine.high %v447_v58, %v451_v59  ;;  %v455_v63 = vld [vmem:[%s2134_s12 + $0x88] sm:$0xff]  ;;  %1189 = vmatprep.subr.bf16.mxu1 %v1556_v55  ;;  %v1561_v1 = vcombine.low %v446_v53, %v450_v54  ;;  %s1547_s14 = sshll.u32 %s2347_s15, 4 }
  0x5d   : > { %v458_v62 = vld [vmem:[%s2134_s12 + $0xa0] sm:$0xff]  ;;  %v459_v0 = vld [vmem:[%s2134_s12 + $0xa8] sm:$0xff]  ;;  %1137 = vmatpush1.bf16.msra.mxu0 %v1553_v52  ;;  %1190 = vmatpush1.bf16.msra.mxu1 %v1555_v56  ;;  %v1563_v2 = vcombine.low %v447_v58, %v451_v59  ;;  %s429_s5 = sadd.s32 %s1547_s14, %s2349_s4 }
  0x5e   : > { %1138 = vmatprep.subr.bf16.mxu0 %v1562_v57  ;;  %v1570_v3 = vcombine.high %v454_v60, %v458_v62  ;;  %1191 = vmatprep.subr.bf16.mxu1 %v1564_v61  ;;  %v1572_v4 = vcombine.high %v455_v63, %v459_v0  ;;  %v462_v5 = vld [vmem:[%s2134_s12 + $0xc0] sm:$0xff]  ;;  %v463_v7 = vld [vmem:[%s2134_s12 + $0xc8] sm:$0xff]  ;;  %v1569_v9 = vcombine.low %v454_v60, %v458_v62  ;;  %s1548_s15 = sshll.u32 %s429_s5, 2 }
  0x5f   : > { %v466_v6 = vld [vmem:[%s2134_s12 + $0xe0] sm:$0xff]  ;;  %v467_v8 = vld [vmem:[%s2134_s12 + $0xe8] sm:$0xff]  ;;  %v1571_v10 = vcombine.low %v455_v63, %v459_v0  ;;  %s2299_s8 = scalar_lea.vmem %s2333_s3, %s1548_s15 }
  0x60   : > { %v1578_v11 = vcombine.high %v462_v5, %v466_v6  ;;  %v1580_v12 = vcombine.high %v463_v7, %v467_v8  ;;  %v470_v13 = vld [vmem:[%s2134_s12 + $0x100] sm:$0xff]  ;;  %v471_v15 = vld [vmem:[%s2134_s12 + $0x108] sm:$0xff]  ;;  %v1577_v17 = vcombine.low %v462_v5, %v466_v6  ;;  %v1579_v18 = vcombine.low %v463_v7, %v467_v8 }
  0x61   : > { %1139 = vmatpush1.bf16.msra.mxu0 %v1561_v1  ;;  %1192 = vmatpush1.bf16.msra.mxu1 %v1563_v2  ;;  %v474_v14 = vld [vmem:[%s2134_s12 + $0x120] sm:$0xff]  ;;  %v475_v16 = vld [vmem:[%s2134_s12 + $0x128] sm:$0xff] }
  0x62   : > { %1140 = vmatprep.subr.bf16.mxu0 %v1570_v3  ;;  %1193 = vmatprep.subr.bf16.mxu1 %v1572_v4  ;;  %v1586_v19 = vcombine.high %v470_v13, %v474_v14  ;;  %v1588_v20 = vcombine.high %v471_v15, %v475_v16  ;;  %v478_v21 = vld [vmem:[%s2134_s12 + $0x140] sm:$0xff]  ;;  %v479_v23 = vld [vmem:[%s2134_s12 + $0x148] sm:$0xff]  ;;  %v1585_v25 = vcombine.low %v470_v13, %v474_v14 }
  0x63   : > { %v482_v22 = vld [vmem:[%s2134_s12 + $0x160] sm:$0xff]  ;;  %v483_v24 = vld [vmem:[%s2134_s12 + $0x168] sm:$0xff]  ;;  %v1587_v26 = vcombine.low %v471_v15, %v475_v16 }
  0x64   : > { %v1594_v27 = vcombine.high %v478_v21, %v482_v22  ;;  %v1596_v28 = vcombine.high %v479_v23, %v483_v24  ;;  %v486_v29 = vld [vmem:[%s2134_s12 + $0x180] sm:$0xff]  ;;  %v487_v31 = vld [vmem:[%s2134_s12 + $0x188] sm:$0xff]  ;;  %v1593_v33 = vcombine.low %v478_v21, %v482_v22  ;;  %v1595_v34 = vcombine.low %v479_v23, %v483_v24 }
  0x65   : > { %1141 = vmatpush1.bf16.msra.mxu0 %v1569_v9  ;;  %1194 = vmatpush1.bf16.msra.mxu1 %v1571_v10  ;;  %v490_v30 = vld [vmem:[%s2134_s12 + $0x1a0] sm:$0xff]  ;;  %v491_v32 = vld [vmem:[%s2134_s12 + $0x1a8] sm:$0xff] }
  0x66   : > { %1142 = vmatprep.subr.bf16.mxu0 %v1578_v11  ;;  %1195 = vmatprep.subr.bf16.mxu1 %v1580_v12  ;;  %v1602_v35 = vcombine.high %v486_v29, %v490_v30  ;;  %v1604_v36 = vcombine.high %v487_v31, %v491_v32  ;;  %v494_v37 = vld [vmem:[%s2134_s12 + $0x1c0] sm:$0xff]  ;;  %v495_v39 = vld [vmem:[%s2134_s12 + $0x1c8] sm:$0xff]  ;;  %v1601_v41 = vcombine.low %v486_v29, %v490_v30  ;;  %v440_v30 = vld [vmem:[%s2134_s12 + $0x10] sm:$0xff] }
  0x67   : > { %v498_v38 = vld [vmem:[%s2134_s12 + $0x1e0] sm:$0xff]  ;;  %v499_v40 = vld [vmem:[%s2134_s12 + $0x1e8] sm:$0xff]  ;;  %v1603_v42 = vcombine.low %v487_v31, %v491_v32  ;;  %v444_v31 = vld [vmem:[%s2134_s12 + $0x30] sm:$0xff] }
  0x68   : > { %v1610_v43 = vcombine.high %v494_v37, %v498_v38  ;;  %v1612_v45 = vcombine.high %v495_v39, %v499_v40  ;;  %v502_v46 = vld [vmem:[%s2134_s12 + $0x200] sm:$0xff]  ;;  %v503_v48 = vld [vmem:[%s2134_s12 + $0x208] sm:$0xff]  ;;  %v1609_v50 = vcombine.low %v494_v37, %v498_v38  ;;  %v1611_v51 = vcombine.low %v495_v39, %v499_v40  ;;  %v441_v32 = vld [vmem:[%s2134_s12 + $0x18] sm:$0xff] }
  0x69   : > { %1143 = vmatpush1.bf16.msra.mxu0 %v1577_v17  ;;  %1196 = vmatpush1.bf16.msra.mxu1 %v1579_v18  ;;  %v506_v47 = vld [vmem:[%s2134_s12 + $0x220] sm:$0xff]  ;;  %v507_v49 = vld [vmem:[%s2134_s12 + $0x228] sm:$0xff]  ;;  %v448_v38 = vld [vmem:[%s2134_s12 + $0x50] sm:$0xff] }
  0x6a   : > { %1144 = vmatprep.subr.bf16.mxu0 %v1586_v19  ;;  %1197 = vmatprep.subr.bf16.mxu1 %v1588_v20  ;;  %v1618_v52 = vcombine.high %v502_v46, %v506_v47  ;;  %v1620_v53 = vcombine.high %v503_v48, %v507_v49  ;;  %v510_v54 = vld [vmem:[%s2134_s12 + $0x240] sm:$0xff]  ;;  %v511_v56 = vld [vmem:[%s2134_s12 + $0x248] sm:$0xff]  ;;  %v1617_v58 = vcombine.low %v502_v46, %v506_v47  ;;  %v452_v39 = vld [vmem:[%s2134_s12 + $0x70] sm:$0xff] }
  0x6b   : > { %v514_v55 = vld [vmem:[%s2134_s12 + $0x260] sm:$0xff]  ;;  %v515_v57 = vld [vmem:[%s2134_s12 + $0x268] sm:$0xff]  ;;  %v1619_v59 = vcombine.low %v503_v48, %v507_v49  ;;  %v1566_v46 = vcombine.high %v448_v38, %v452_v39  ;;  %v2210_v48 = vld [vmem:[%s2330_s0 + $0x14] ss:$8 sps:$4 sm:$0xff]  }
  0x6c   : > { %v1626_v60 = vcombine.high %v510_v54, %v514_v55  ;;  %v1628_v61 = vcombine.high %v511_v56, %v515_v57  ;;  %v518_v62 = vld [vmem:[%s2134_s12 + $0x280] sm:$0xff]  ;;  %v519_v0 = vld [vmem:[%s2134_s12 + $0x288] sm:$0xff]  ;;  %v1625_v2 = vcombine.low %v510_v54, %v514_v55  ;;  %v1627_v3 = vcombine.low %v511_v56, %v515_v57  ;;  %v456_v49 = vld [vmem:[%s2134_s12 + $0x90] sm:$0xff] }
  0x6d   : > { %1145 = vmatpush1.bf16.msra.mxu0 %v1585_v25  ;;  %1198 = vmatpush1.bf16.msra.mxu1 %v1587_v26  ;;  %v522_v63 = vld [vmem:[%s2134_s12 + $0x2a0] sm:$0xff]  ;;  %v523_v1 = vld [vmem:[%s2134_s12 + $0x2a8] sm:$0xff]  ;;  %v464_v57 = vld [vmem:[%s2134_s12 + $0xd0] sm:$0xff] }
  0x6e   : > { %1146 = vmatprep.subr.bf16.mxu0 %v1594_v27  ;;  %1199 = vmatprep.subr.bf16.mxu1 %v1596_v28  ;;  %v1634_v4 = vcombine.high %v518_v62, %v522_v63  ;;  %v1636_v5 = vcombine.high %v519_v0, %v523_v1  ;;  %v526_v6 = vld [vmem:[%s2134_s12 + $0x2c0] sm:$0xff]  ;;  %v527_v8 = vld [vmem:[%s2134_s12 + $0x2c8] sm:$0xff]  ;;  %v1633_v10 = vcombine.low %v518_v62, %v522_v63 }
  0x6f   : > { %v530_v7 = vld [vmem:[%s2134_s12 + $0x2e0] sm:$0xff]  ;;  %v531_v9 = vld [vmem:[%s2134_s12 + $0x2e8] sm:$0xff]  ;;  %v1635_v11 = vcombine.low %v519_v0, %v523_v1 }
  0x70   : > { %v1642_v12 = vcombine.high %v526_v6, %v530_v7  ;;  %v1644_v13 = vcombine.high %v527_v8, %v531_v9  ;;  %v534_v14 = vld [vmem:[%s2134_s12 + $0x300] sm:$0xff]  ;;  %v535_v16 = vld [vmem:[%s2134_s12 + $0x308] sm:$0xff]  ;;  %v1641_v18 = vcombine.low %v526_v6, %v530_v7  ;;  %v1643_v19 = vcombine.low %v527_v8, %v531_v9 }
  0x71   : > { %1147 = vmatpush1.bf16.msra.mxu0 %v1593_v33  ;;  %1200 = vmatpush1.bf16.msra.mxu1 %v1595_v34  ;;  %v538_v15 = vld [vmem:[%s2134_s12 + $0x320] sm:$0xff]  ;;  %v539_v17 = vld [vmem:[%s2134_s12 + $0x328] sm:$0xff]  ;;  %v445_v33 = vld [vmem:[%s2134_s12 + $0x38] sm:$0xff] }
  0x72   : > { %1148 = vmatprep.subr.bf16.mxu0 %v1602_v35  ;;  %1201 = vmatprep.subr.bf16.mxu1 %v1604_v36  ;;  %v1650_v20 = vcombine.high %v534_v14, %v538_v15  ;;  %v1652_v21 = vcombine.high %v535_v16, %v539_v17  ;;  %v542_v22 = vld [vmem:[%s2134_s12 + $0x340] sm:$0xff]  ;;  %v543_v23 = vld [vmem:[%s2134_s12 + $0x348] sm:$0xff]  ;;  %v1649_v24 = vcombine.low %v534_v14, %v538_v15 }
  0x73   : > { %v1651_v25 = vcombine.low %v535_v16, %v539_v17  ;;  %v1658_v26 = vcombine.high %v542_v22, %v542_v22  ;;  %v1657_v27 = vcombine.low %v542_v22, %v542_v22  ;;  %v1660_v28 = vcombine.high %v543_v23, %v543_v23  ;;  %v2203_v40 = vld [vmem:[%s2330_s0] ss:$8 sps:$4 sm:$0xff]  }
  0x74   : > { %v1659_v29 = vcombine.low %v543_v23, %v543_v23  ;;  %v1558_v35 = vcombine.high %v440_v30, %v444_v31  ;;  %v1560_v37 = vcombine.high %v441_v32, %v445_v33 }
  0x75   : > { %1149 = vmatpush1.bf16.msra.mxu0 %v1601_v41  ;;  %1202 = vmatpush1.bf16.msra.mxu1 %v1603_v42  ;;  %v1113_v34 = vsel %vm1111_vm1, %v1657_v27, 0  ;;  %v449_v41 = vld [vmem:[%s2134_s12 + $0x58] sm:$0xff] }
  0x76   : > { %1150 = vmatprep.subr.bf16.mxu0 %v1610_v43  ;;  %1203 = vmatprep.subr.bf16.mxu1 %v1612_v45  ;;  %v1119_v36 = vsel %vm1111_vm1, %v1659_v29, 0  ;;  %v453_v42 = vld [vmem:[%s2134_s12 + $0x78] sm:$0xff]  ;;  %v1557_v43 = vcombine.low %v440_v30, %v444_v31  ;;  %v1559_v45 = vcombine.low %v441_v32, %v445_v33  ;;  %v504_v33 = vld [vmem:[%s2134_s12 + $0x210] sm:$0xff] }
  0x77   : > { %v1568_v47 = vcombine.high %v449_v41, %v453_v42  ;;  %v1567_v54 = vcombine.low %v449_v41, %v453_v42  ;;  %v497_v27 = vld [vmem:[%s2134_s12 + $0x1d8] sm:$0xff]  ;;  %v512_v42 = vld [vmem:[%s2134_s12 + $0x250] sm:$0xff] }
  0x79   : > { %1151 = vmatpush1.bf16.msra.mxu0 %v1609_v50  ;;  %1204 = vmatpush1.bf16.msra.mxu1 %v1611_v51  ;;  %v460_v50 = vld [vmem:[%s2134_s12 + $0xb0] sm:$0xff]  ;;  %v457_v51 = vld [vmem:[%s2134_s12 + $0x98] sm:$0xff] }
  0x7a   : > { %1152 = vmatprep.subr.bf16.mxu0 %v1618_v52  ;;  %1205 = vmatprep.subr.bf16.mxu1 %v1620_v53  ;;  %v461_v52 = vld [vmem:[%s2134_s12 + $0xb8] sm:$0xff]  ;;  %v1565_v53 = vcombine.low %v448_v38, %v452_v39  ;;  %v1574_v55 = vcombine.high %v456_v49, %v460_v50  ;;  %v1573_v62 = vcombine.low %v456_v49, %v460_v50 }
  0x7b   : > { %v1576_v56 = vcombine.high %v457_v51, %v461_v52  ;;  %v1575_v63 = vcombine.low %v457_v51, %v461_v52  ;;  %v520_v52 = vld [vmem:[%s2134_s12 + $0x290] sm:$0xff] }
  0x7d   : > { %1153 = vmatpush1.bf16.msra.mxu0 %v1617_v58  ;;  %1206 = vmatpush1.bf16.msra.mxu1 %v1619_v59  ;;  %v468_v58 = vld [vmem:[%s2134_s12 + $0xf0] sm:$0xff] }
  0x7e   : > { %1154 = vmatprep.subr.bf16.mxu0 %v1626_v60  ;;  %1207 = vmatprep.subr.bf16.mxu1 %v1628_v61  ;;  %v2227_v59 = vld [vmem:[%s2330_s0 + $0x10] ss:$8 sps:$4 sm:$0xff]   ;;  %v1582_v0 = vcombine.high %v464_v57, %v468_v58  ;;  %v1581_v6 = vcombine.low %v464_v57, %v468_v58 }
  0x7f   : > { %v465_v60 = vld [vmem:[%s2134_s12 + $0xd8] sm:$0xff] }
  0x80   : > { %v469_v61 = vld [vmem:[%s2134_s12 + $0xf8] sm:$0xff] }
  0x81   : > { %1155 = vmatpush1.bf16.msra.mxu0 %v1625_v2  ;;  %1208 = vmatpush1.bf16.msra.mxu1 %v1627_v3  ;;  %v1584_v1 = vcombine.high %v465_v60, %v469_v61  ;;  %v472_v2 = vld [vmem:[%s2134_s12 + $0x110] sm:$0xff]  ;;  %v1583_v7 = vcombine.low %v465_v60, %v469_v61 }
  0x82   : > { %1156 = vmatprep.subr.bf16.mxu0 %v1634_v4  ;;  %1209 = vmatprep.subr.bf16.mxu1 %v1636_v5  ;;  %v476_v3 = vld [vmem:[%s2134_s12 + $0x130] sm:$0xff]  ;;  %v473_v4 = vld [vmem:[%s2134_s12 + $0x118] sm:$0xff] }
  0x83   : > { %v477_v5 = vld [vmem:[%s2134_s12 + $0x138] sm:$0xff]  ;;  %v1590_v8 = vcombine.high %v472_v2, %v476_v3  ;;  %v1589_v14 = vcombine.low %v472_v2, %v476_v3  ;;  %v528_v61 = vld [vmem:[%s2134_s12 + $0x2d0] sm:$0xff] }
  0x84   : > { %v1592_v9 = vcombine.high %v473_v4, %v477_v5  ;;  %v1591_v15 = vcombine.low %v473_v4, %v477_v5  ;;  %v536_v5 = vld [vmem:[%s2134_s12 + $0x310] sm:$0xff] }
  0x85   : > { %1157 = vmatpush1.bf16.msra.mxu0 %v1633_v10  ;;  %1210 = vmatpush1.bf16.msra.mxu1 %v1635_v11  ;;  %v480_v10 = vld [vmem:[%s2134_s12 + $0x150] sm:$0xff] }
  0x86   : > { %1158 = vmatprep.subr.bf16.mxu0 %v1642_v12  ;;  %1211 = vmatprep.subr.bf16.mxu1 %v1644_v13  ;;  %v484_v11 = vld [vmem:[%s2134_s12 + $0x170] sm:$0xff]  ;;  %v481_v12 = vld [vmem:[%s2134_s12 + $0x158] sm:$0xff] }
  0x87   : > { %v485_v13 = vld [vmem:[%s2134_s12 + $0x178] sm:$0xff]  ;;  %v1598_v16 = vcombine.high %v480_v10, %v484_v11  ;;  %v1597_v22 = vcombine.low %v480_v10, %v484_v11 }
  0x88   : > { %v1600_v17 = vcombine.high %v481_v12, %v485_v13 }
  0x89   : > { %1159 = vmatpush1.bf16.msra.mxu0 %v1641_v18  ;;  %1212 = vmatpush1.bf16.msra.mxu1 %v1643_v19  ;;  %v488_v18 = vld [vmem:[%s2134_s12 + $0x190] sm:$0xff] }
  0x8a   : > { %1160 = vmatprep.subr.bf16.mxu0 %v1650_v20  ;;  %1213 = vmatprep.subr.bf16.mxu1 %v1652_v21  ;;  %v492_v19 = vld [vmem:[%s2134_s12 + $0x1b0] sm:$0xff]  ;;  %v489_v20 = vld [vmem:[%s2134_s12 + $0x198] sm:$0xff] }
  0x8b   : > { %v493_v21 = vld [vmem:[%s2134_s12 + $0x1b8] sm:$0xff]  ;;  %v1606_v23 = vcombine.high %v488_v18, %v492_v19  ;;  %v1605_v29 = vcombine.low %v488_v18, %v492_v19 }
  0x8c   : > { %v1607_v30 = vcombine.low %v489_v20, %v493_v21 }
  0x8d   : > { %1161 = vmatpush1.bf16.msra.mxu0 %v1649_v24  ;;  %1214 = vmatpush1.bf16.msra.mxu1 %v1651_v25  ;;  %v1608_v24 = vcombine.high %v489_v20, %v493_v21  ;;  %v496_v25 = vld [vmem:[%s2134_s12 + $0x1d0] sm:$0xff] }
  0x8e   : > { %1665 = vmatprep.subr.msk.bf16.mxu0 %vm1111_vm1, %v1658_v26  ;;  %1668 = vmatprep.subr.msk.bf16.mxu1 %vm1111_vm1, %v1660_v28  ;;  %v500_v26 = vld [vmem:[%s2134_s12 + $0x1f0] sm:$0xff]  ;;  %v501_v28 = vld [vmem:[%s2134_s12 + $0x1f8] sm:$0xff] }
  0x8f   : > { %v1614_v31 = vcombine.high %v496_v25, %v500_v26  ;;  %v1616_v32 = vcombine.high %v497_v27, %v501_v28  ;;  %v1615_v38 = vcombine.low %v497_v27, %v501_v28 }
  0x91   : > { %1163 = vmatpush1.bf16.msra.mxu0 %v1113_v34  ;;  %1216 = vmatpush1.bf16.msra.mxu1 %v1119_v36  ;;  %v508_v34 = vld [vmem:[%s2134_s12 + $0x230] sm:$0xff]  ;;  %v509_v36 = vld [vmem:[%s2134_s12 + $0x238] sm:$0xff] }
  0x92   : > { %1242 = vmatprep.subr.bf16.mxu0 %v1558_v35  ;;  %1295 = vmatprep.subr.bf16.mxu1 %v1560_v37  ;;  %v505_v35 = vld [vmem:[%s2134_s12 + $0x218] sm:$0xff]  ;;  %v1613_v37 = vcombine.low %v496_v25, %v500_v26  ;;  %v1622_v39 = vcombine.high %v504_v33, %v508_v34 }
  0x93   : > { %v1624_v41 = vcombine.high %v505_v35, %v509_v36  ;;  %v1623_v49 = vcombine.low %v505_v35, %v509_v36 }
  0x94   : > { %1169 = vmatmul.mubr.bf16.vlgmr.msra.gmra.mrb[0].mxu0 %v2203_v40  ;;  %1222 = vmatmul.mubr.bf16.vlgmr.msra.gmra.mrb[0].mxu1 %v2203_v40 }
  0x95   : > { %1243 = vmatpush1.bf16.msra.mxu0 %v1557_v43  ;;  %1296 = vmatpush1.bf16.msra.mxu1 %v1559_v45  ;;  %v516_v43 = vld [vmem:[%s2134_s12 + $0x270] sm:$0xff]  ;;  %v513_v45 = vld [vmem:[%s2134_s12 + $0x258] sm:$0xff] }
  0x96   : > { %1244 = vmatprep.subr.bf16.mxu0 %v1566_v46  ;;  %1297 = vmatprep.subr.bf16.mxu1 %v1568_v47  ;;  %v517_v46 = vld [vmem:[%s2134_s12 + $0x278] sm:$0xff]  ;;  %v1621_v47 = vcombine.low %v504_v33, %v508_v34  ;;  %v1630_v50 = vcombine.high %v512_v42, %v516_v43 }
  0x97   : > { %1667 = vmatprep.mubr.msk.bf16.mxu0 %vm1104_vm0, %v2210_v48  ;;  %1670 = vmatprep.mubr.msk.bf16.mxu1 %vm1104_vm0, %v2210_v48  ;;  %v1632_v51 = vcombine.high %v513_v45, %v517_v46  ;;  %v1631_v57 = vcombine.low %v513_v45, %v517_v46 }
  0x99   : > { %1245 = vmatpush1.bf16.msra.mxu0 %v1565_v53  ;;  %1298 = vmatpush1.bf16.msra.mxu1 %v1567_v54  ;;  %v524_v53 = vld [vmem:[%s2134_s12 + $0x2b0] sm:$0xff]  ;;  %v521_v54 = vld [vmem:[%s2134_s12 + $0x298] sm:$0xff] }
  0x9a   : > { %1246 = vmatprep.subr.bf16.mxu0 %v1574_v55  ;;  %1299 = vmatprep.subr.bf16.mxu1 %v1576_v56  ;;  %v525_v55 = vld [vmem:[%s2134_s12 + $0x2b8] sm:$0xff]  ;;  %v1629_v56 = vcombine.low %v512_v42, %v516_v43  ;;  %v1638_v58 = vcombine.high %v520_v52, %v524_v53 }
  0x9b   : > { %v1640_v60 = vcombine.high %v521_v54, %v525_v55  ;;  %v1639_v2 = vcombine.low %v521_v54, %v525_v55 }
  0x9c   : > { %1179 = vmatmul.mubr.bf16.gmra.mrb[4].mxu0 %v2227_v59  ;;  %1232 = vmatmul.mubr.bf16.gmra.mrb[4].mxu1 %v2227_v59 }
  0x9d   : > { %1247 = vmatpush1.bf16.msra.mxu0 %v1573_v62  ;;  %1300 = vmatpush1.bf16.msra.mxu1 %v1575_v63  ;;  %v532_v62 = vld [vmem:[%s2134_s12 + $0x2f0] sm:$0xff]  ;;  %v529_v63 = vld [vmem:[%s2134_s12 + $0x2d8] sm:$0xff] }
  0x9e   : > { %1248 = vmatprep.subr.bf16.mxu0 %v1582_v0  ;;  %1301 = vmatprep.subr.bf16.mxu1 %v1584_v1  ;;  %v533_v0 = vld [vmem:[%s2134_s12 + $0x2f8] sm:$0xff]  ;;  %v1637_v1 = vcombine.low %v520_v52, %v524_v53  ;;  %v1646_v3 = vcombine.high %v528_v61, %v532_v62 }
  0x9f   : > { %1672 = vmatprep.mubr.msk.bf16.mxu0 %vm1104_vm0, %v2125_v44  ;;  %1675 = vmatprep.mubr.msk.bf16.mxu1 %vm1104_vm0, %v2125_v44  ;;  %v1599_v44 = vcombine.low %v481_v12, %v485_v13  ;;  %v1648_v4 = vcombine.high %v529_v63, %v533_v0  ;;  %v1647_v10 = vcombine.low %v529_v63, %v533_v0  ;;  %v544_v13 = vld [vmem:[%s2134_s12 + $0x350] sm:$0xff] }
  0xa0   : > { %v1661_v18 = vcombine.low %v544_v13, %v544_v13 }
  0xa1   : > { %1249 = vmatpush1.bf16.msra.mxu0 %v1581_v6  ;;  %1302 = vmatpush1.bf16.msra.mxu1 %v1583_v7  ;;  %v540_v6 = vld [vmem:[%s2134_s12 + $0x330] sm:$0xff]  ;;  %v537_v7 = vld [vmem:[%s2134_s12 + $0x318] sm:$0xff] }
  0xa2   : > { %1250 = vmatprep.subr.bf16.mxu0 %v1590_v8  ;;  %1303 = vmatprep.subr.bf16.mxu1 %v1592_v9  ;;  %v541_v8 = vld [vmem:[%s2134_s12 + $0x338] sm:$0xff]  ;;  %v1645_v9 = vcombine.low %v528_v61, %v532_v62  ;;  %v1654_v11 = vcombine.high %v536_v5, %v540_v6  ;;  %v1125_v21 = vsel %vm1111_vm1, %v1661_v18, 0 }
  0xa3   : > { %v1656_v12 = vcombine.high %v537_v7, %v541_v8 }
  0xa5   : > { %1251 = vmatpush1.bf16.msra.mxu0 %v1589_v14  ;;  %1304 = vmatpush1.bf16.msra.mxu1 %v1591_v15  ;;  %v545_v14 = vld [vmem:[%s2134_s12 + $0x358] sm:$0xff]  ;;  %v1653_v15 = vcombine.low %v536_v5, %v540_v6 }
  0xa6   : > { %1252 = vmatprep.subr.bf16.mxu0 %v1598_v16  ;;  %1305 = vmatprep.subr.bf16.mxu1 %v1600_v17  ;;  %v1655_v16 = vcombine.low %v537_v7, %v541_v8  ;;  %v1662_v17 = vcombine.high %v544_v13, %v544_v13  ;;  %v1664_v19 = vcombine.high %v545_v14, %v545_v14 }
  0xa7   : > { %v1663_v20 = vcombine.low %v545_v14, %v545_v14 }
  0xa9   : > { %1253 = vmatpush1.bf16.msra.mxu0 %v1597_v22  ;;  %1306 = vmatpush1.bf16.msra.mxu1 %v1599_v44  ;;  %v1131_v22 = vsel %vm1111_vm1, %v1663_v20, 0 }
  0xaa   : > { %1254 = vmatprep.subr.bf16.mxu0 %v1606_v23  ;;  %1307 = vmatprep.subr.bf16.mxu1 %v1608_v24 }
  0xad   : > { %1255 = vmatpush1.bf16.msra.mxu0 %v1605_v29  ;;  %1308 = vmatpush1.bf16.msra.mxu1 %v1607_v30 }
  0xae   : > { %1256 = vmatprep.subr.bf16.mxu0 %v1614_v31  ;;  %1309 = vmatprep.subr.bf16.mxu1 %v1616_v32 }
  0xb1   : > { %1257 = vmatpush1.bf16.msra.mxu0 %v1613_v37  ;;  %1310 = vmatpush1.bf16.msra.mxu1 %v1615_v38 }
  0xb2   : > { %1258 = vmatprep.subr.bf16.mxu0 %v1622_v39  ;;  %1311 = vmatprep.subr.bf16.mxu1 %v1624_v41 }
  0xb5   : > { %1259 = vmatpush1.bf16.msra.mxu0 %v1621_v47  ;;  %1312 = vmatpush1.bf16.msra.mxu1 %v1623_v49 }
  0xb6   : > { %1260 = vmatprep.subr.bf16.mxu0 %v1630_v50  ;;  %1313 = vmatprep.subr.bf16.mxu1 %v1632_v51 }
  0xb9   : > { %1261 = vmatpush1.bf16.msra.mxu0 %v1629_v56  ;;  %1314 = vmatpush1.bf16.msra.mxu1 %v1631_v57 }
  0xba   : > { %1262 = vmatprep.subr.bf16.mxu0 %v1638_v58  ;;  %1315 = vmatprep.subr.bf16.mxu1 %v1640_v60 }
  0xbd   : > { %1263 = vmatpush1.bf16.msra.mxu0 %v1637_v1  ;;  %1316 = vmatpush1.bf16.msra.mxu1 %v1639_v2 }
  0xbe   : > { %1264 = vmatprep.subr.bf16.mxu0 %v1646_v3  ;;  %1317 = vmatprep.subr.bf16.mxu1 %v1648_v4 }
  0xc1   : > { %1265 = vmatpush1.bf16.msra.mxu0 %v1645_v9  ;;  %1318 = vmatpush1.bf16.msra.mxu1 %v1647_v10 }
  0xc2   : > { %1266 = vmatprep.subr.bf16.mxu0 %v1654_v11  ;;  %1319 = vmatprep.subr.bf16.mxu1 %v1656_v12 }
  0xc5   : > { %1267 = vmatpush1.bf16.msra.mxu0 %v1653_v15  ;;  %1320 = vmatpush1.bf16.msra.mxu1 %v1655_v16 }
  0xc6   : > { %1671 = vmatprep.subr.msk.bf16.mxu0 %vm1111_vm1, %v1662_v17  ;;  %1674 = vmatprep.subr.msk.bf16.mxu1 %vm1111_vm1, %v1664_v19 }
  0xc9   : > { %1269 = vmatpush1.bf16.msra.mxu0 %v1125_v21  ;;  %1322 = vmatpush1.bf16.msra.mxu1 %v1131_v22 }
  0xcc   : > { %1275 = vmatmul.mubr.bf16.vlgmr.msra.gmra.mrb[8].mxu0 %v2203_v40  ;;  %1328 = vmatmul.mubr.bf16.vlgmr.msra.gmra.mrb[8].mxu1 %v2203_v40 }
  0xcd   : > { %1673 = vmatprep.mubr.msk.bf16.mxu0 %vm1104_vm0, %v2210_v48  ;;  %1676 = vmatprep.mubr.msk.bf16.mxu1 %vm1104_vm0, %v2210_v48 }
  0xd4   : > { %1285 = vmatmul.mubr.bf16.gmra.mrb[12].mxu0 %v2227_v59  ;;  %1338 = vmatmul.mubr.bf16.gmra.mrb[12].mxu1 %v2227_v59 }
  0xd5   : > { %v2290_v33 = vpop.permute.xlu0 %1375 }
 0x167   : > { %v1170_v44 = vpop.f32.mrb[0].mxu0  ;;  %v1223_v23 = vpop.f32.mrb[0].mxu1 }
 0x168   : > { %v1172_v24 = vpop.f32.mrb[1].mxu0  ;;  %v1225_v25 = vpop.f32.mrb[1].mxu1 }
 0x169   : > { %v1174_v26 = vpop.f32.mrb[2].mxu0  ;;  %v1227_v40 = vpop.f32.mrb[2].mxu1 }
 0x16a   : > { %v1348_v27 = vmax.f32 %v1170_v44, %v1174_v26  ;;  %v1176_v28 = vpop.f32.mrb[3].mxu0  ;;  %v1350_v29 = vmax.f32 %v1223_v23, %v1227_v40  ;;  %v1229_v31 = vpop.f32.mrb[3].mxu1 }
 0x16b   : > { %v1349_v30 = vmax.f32 %v1172_v24, %v1176_v28  ;;  %v1351_v48 = vmax.f32 %v1225_v25, %v1229_v31 }
 0x16f   : > { %v1180_v32 = vpop.f32.mrb[4].mxu0  ;;  %v1233_v34 = vpop.f32.mrb[4].mxu1 }
 0x170   : > { %v1356_v59 = vmax.f32 %v1348_v27, %v1180_v32  ;;  %v1182_v35 = vpop.f32.mrb[5].mxu0  ;;  %v1358_v36 = vmax.f32 %v1350_v29, %v1233_v34  ;;  %v1235_v38 = vpop.f32.mrb[5].mxu1 }
 0x171   : > { %v1357_v37 = vmax.f32 %v1349_v30, %v1182_v35  ;;  %v1184_v39 = vpop.f32.mrb[6].mxu0  ;;  %v1359_v41 = vmax.f32 %v1351_v48, %v1235_v38  ;;  %v1237_v43 = vpop.f32.mrb[6].mxu1 }
 0x172   : > { %v1364_v42 = vmax.f32 %v1356_v59, %v1184_v39  ;;  %v1186_v45 = vpop.f32.mrb[7].mxu0  ;;  %v1366_v46 = vmax.f32 %v1358_v36, %v1237_v43  ;;  %v1239_v49 = vpop.f32.mrb[7].mxu1 }
 0x173   : > { %v1365_v47 = vmax.f32 %v1357_v37, %v1186_v45  ;;  %v1367_v50 = vmax.f32 %v1359_v41, %v1239_v49 }
 0x174   : > { %v1378_v51 = vadd.f32 %v2290_v33, %v1364_v42  ;;  %v1380_v53 = vadd.f32 %v2290_v33, %v1366_v46 }
 0x175   : > { %v1379_v52 = vadd.f32 %v2290_v33, %v1365_v47  ;;  %v1381_v54 = vadd.f32 %v2290_v33, %v1367_v50 }
 0x176   : > { %vm1386_vm2 = vcmp.gt.f32.partialorder %v1378_v51, 0.0  ;;  %v1394_v55 = vmul.f32 0.01, %v1378_v51  ;;  %vm1388_vm4 = vcmp.gt.f32.partialorder %v1380_v53, 0.0  ;;  %v1396_v57 = vmul.f32 0.01, %v1380_v53 }
 0x177   : > { %vm1387_vm3 = vcmp.gt.f32.partialorder %v1379_v52, 0.0  ;;  %v1395_v56 = vmul.f32 0.01, %v1379_v52  ;;  %vm1389_vm5 = vcmp.gt.f32.partialorder %v1381_v54, 0.0  ;;  %v1397_v58 = vmul.f32 0.01, %v1381_v54 }
 0x178   : > { %v1402_v60 = vsel %vm1386_vm2, %v1378_v51, %v1394_v55  ;;  %v1404_v62 = vsel %vm1388_vm4, %v1380_v53, %v1396_v57 }
 0x179   : > { %v1403_v61 = vsel %vm1387_vm3, %v1379_v52, %v1395_v56  ;;  %v1405_v63 = vsel %vm1389_vm5, %v1381_v54, %v1397_v58 }
 0x17a   : > { %v1683_v0 = vpack.c.bf16 %v1403_v61, %v1402_v60  ;;  %v1684_v1 = vpack.c.bf16 %v1405_v63, %v1404_v62 }
 0x17c   : > { %1442 = vst [vmem:[%s2299_s8] sm:$0xff] %v1683_v0  ;;  %1443 = vst [vmem:[%s2299_s8 + $0x8] sm:$0xff] %v1684_v1 }
 0x19f   : > { %v1276_v2 = vpop.f32.mrb[8].mxu0  ;;  %v1329_v3 = vpop.f32.mrb[8].mxu1 }
 0x1a0   : > { %v1278_v4 = vpop.f32.mrb[9].mxu0  ;;  %v1331_v5 = vpop.f32.mrb[9].mxu1 }
 0x1a1   : > { %v1280_v6 = vpop.f32.mrb[10].mxu0  ;;  %v1333_v8 = vpop.f32.mrb[10].mxu1 }
 0x1a2   : > { %v1352_v7 = vmax.f32 %v1276_v2, %v1280_v6  ;;  %v1282_v9 = vpop.f32.mrb[11].mxu0  ;;  %v1354_v10 = vmax.f32 %v1329_v3, %v1333_v8  ;;  %v1335_v12 = vpop.f32.mrb[11].mxu1 }
 0x1a3   : > { %v1353_v11 = vmax.f32 %v1278_v4, %v1282_v9  ;;  %v1355_v13 = vmax.f32 %v1331_v5, %v1335_v12 }
 0x1a7   : > { %v1286_v14 = vpop.f32.mrb[12].mxu0  ;;  %v1339_v16 = vpop.f32.mrb[12].mxu1 }
 0x1a8   : > { %v1360_v15 = vmax.f32 %v1352_v7, %v1286_v14  ;;  %v1288_v17 = vpop.f32.mrb[13].mxu0  ;;  %v1362_v18 = vmax.f32 %v1354_v10, %v1339_v16  ;;  %v1341_v20 = vpop.f32.mrb[13].mxu1 }
 0x1a9   : > { %v1361_v19 = vmax.f32 %v1353_v11, %v1288_v17  ;;  %v1290_v21 = vpop.f32.mrb[14].mxu0  ;;  %v1363_v22 = vmax.f32 %v1355_v13, %v1341_v20  ;;  %v1343_v23 = vpop.f32.mrb[14].mxu1 }
 0x1aa   : > { %v1368_v44 = vmax.f32 %v1360_v15, %v1290_v21  ;;  %v1292_v24 = vpop.f32.mrb[15].mxu0  ;;  %v1370_v25 = vmax.f32 %v1362_v18, %v1343_v23  ;;  %v1345_v27 = vpop.f32.mrb[15].mxu1 }
 0x1ab   : > { %v1369_v26 = vmax.f32 %v1361_v19, %v1292_v24  ;;  %v1371_v28 = vmax.f32 %v1363_v22, %v1345_v27 }
 0x1ac   : > { %v1382_v40 = vadd.f32 %v2290_v33, %v1368_v44  ;;  %v1384_v29 = vadd.f32 %v2290_v33, %v1370_v25 }
 0x1ad   : > { %v1383_v30 = vadd.f32 %v2290_v33, %v1369_v26  ;;  %v1385_v48 = vadd.f32 %v2290_v33, %v1371_v28 }
 0x1ae   : > { %vm1390_vm6 = vcmp.gt.f32.partialorder %v1382_v40, 0.0  ;;  %v1398_v31 = vmul.f32 0.01, %v1382_v40  ;;  %vm1392_vm7 = vcmp.gt.f32.partialorder %v1384_v29, 0.0  ;;  %v1400_v32 = vmul.f32 0.01, %v1384_v29 }
 0x1af   : > { %vm1391_vm8 = vcmp.gt.f32.partialorder %v1383_v30, 0.0  ;;  %v1399_v59 = vmul.f32 0.01, %v1383_v30  ;;  %vm1393_vm9 = vcmp.gt.f32.partialorder %v1385_v48, 0.0  ;;  %v1401_v35 = vmul.f32 0.01, %v1385_v48 }
 0x1b0   : > { %v1406_v34 = vsel %vm1390_vm6, %v1382_v40, %v1398_v31  ;;  %v1408_v36 = vsel %vm1392_vm7, %v1384_v29, %v1400_v32 }
 0x1b1   : > { %v1407_v37 = vsel %vm1391_vm8, %v1383_v30, %v1399_v59  ;;  %v1409_v39 = vsel %vm1393_vm9, %v1385_v48, %v1401_v35 }
 0x1b2   : > { %v1685_v38 = vpack.c.bf16 %v1407_v37, %v1406_v34  ;;  %v1686_v41 = vpack.c.bf16 %v1409_v39, %v1408_v36 }
 0x1b4   : > { %1444 = vst [vmem:[%s2299_s8 + $0x10] sm:$0xff] %v1685_v38  ;;  %1445 = vst [vmem:[%s2299_s8 + $0x18] sm:$0xff] %v1686_v41 }
 0x1b5 PF: > { %s13_s18 = sadd.s32 1, %s1816_s18   ;;  %s2334_s12 = smov %s1796_s13 }
 0x1b6   : > { %p10_p12 = scmp.ge.s32.totalorder %s13_s18, 6   ;;  %s2335_s13 = smov %s1890_s25 }
 0x1b7   : > { %s2336_s14 = smov %s1808_s16  ;;  %s2337_s15 = smov %s1812_s17 }
 0x1b8   : > { %s2338_s16 = smov %s2341_s19  ;;  %s2339_s17 = smov %s2345_s20 }
 0x1b9   :  { %12 = sbr.rel (!%p10_p12) target bundleno = 4 (0x4), region = 90 }

// kernel: dga3net_forward.13
= control target key start
LH: loop header
LB: loop body
LE: loop exit
PB: predicated region body
PF: predicated region fallthrough
CT: control target
= control target key end

     0   :  { %s2057_s21 = smov 0   ;;  %s2059_s22 = smov 0   ;;  %s2590_s0 = inlined_call_operand.vmem [shape: bf16[32,216], index: 0, kind: input, shape index: {}]   ;;  %s2591_s1 = inlined_call_operand.vmem [shape: bf16[2,216,2048], index: 1, kind: input, shape index: {}]   ;;  %s2592_s2 = inlined_call_operand.vmem [shape: f32[8,1], index: 2, kind: input, shape index: {}]   ;;  %s2593_s3 = inlined_call_operand.vmem [shape: bf16[2,8,2048], index: 3, kind: input, shape index: {}]   ;;  %s2594_s4 = inlined_call_operand.vmem [shape: f32[8,1], index: 4, kind: input, shape index: {}]   ;;  %s2595_s5 = inlined_call_operand.vmem [shape: f32[8,1], index: 5, kind: input, shape index: {}]   ;;  %s2596_s6 = inlined_call_operand.vmem [shape: bf16[2,8,2048], index: 6, kind: output, shape index: {}]  }
   0x1   :  { %s2061_s23 = smov 0   ;;  %s2063_s24 = smov 0  }
   0x2   :  { %s2065_s25 = smov 0   ;;  %s2067_s26 = smov 0  }
   0x3   :  { %s2069_s27 = smov 0  }
   0x4 LB: > { %s25_s28 = sadd.s32 1, %s2011_s25  ;;  %s28_s29 = sadd.s32 1, %s2015_s26  ;;  %s2019_s27 = sphi %s2069_s27, %s16_s27   ;;  %s2015_s26 = sphi %s2067_s26, %s2602_s26   ;;  %s2011_s25 = sphi %s2065_s25, %s2601_s25   ;;  %s2007_s24 = sphi %s2063_s24, %s2600_s24   ;;  %s2003_s23 = sphi %s2061_s23, %s2599_s23   ;;  %s1999_s22 = sphi %s2059_s22, %s2598_s22   ;;  %s1995_s21 = sphi %s2057_s21, %s2597_s21  }
   0x5   : > { %p26_p0 = scmp.ge.s32.totalorder %s25_s28, 2  ;;  %p65_p1 = scmp.ne.s32.totalorder %s1999_s22, %s1995_s21 }
   0x6   : > { %p66_p2 = scmp.eq.s32.totalorder %s2019_s27, 0  ;;  %s58_s9 = sadd.s32 1, %s1999_s22 }
   0x7   : > { %s2604_s28 = smov (%p26_p0, %s25_s28), 0  ;;  %s2606_s29 = smov (!%p26_p0, %s28_s29), %s2015_s26 }
   0x8   : > { %p67_p3 = por %p66_p2, %p65_p1  ;;  %p30_p4 = scmp.ge.s32.totalorder %s2606_s29, 2 }
   0x9   : > { %s54_s30 = ssub.s32 %s2011_s25, %s2604_s28  ;;  %p1741_p6 = scmp.ge.s32.totalorder %s2019_s27, 4 }
   0xa   : > { %s2608_s29 = smov (%p30_p4, %s2606_s29), 0 }
   0xb   : > { %s53_s7 = ssub.s32 %s2015_s26, %s2608_s29  ;;  %222 = sbr.rel (%p1741_p6) target bundleno = 80 (0x50), region = 32 }
   0xc   : > { %s55_s8 = sor.u32 %s54_s30, %s53_s7 }
   0xd   : > { %p56_p5 = scmp.eq.s32.totalorder %s55_s8, 0 }
   0xf   : > { %s2108_s10 = scalar_select %p56_p5, %s1999_s22, %s58_s9  }
  0x12   : > { %225 = sbr.rel (!%p67_p3) target bundleno = 80 (0x50), region = 36  ;;  %s227_s11 = sand.u32 (%p67_p3), 1, %s1999_s22  }
  0x13   : > { %s1889_s12 = smul.u32 (%p67_p3), 864, %s227_s11  ;;  %s1742_s13 = sshll.u32 (%p67_p3), %s2011_s25, 3 }
  0x14   : > { %s1890_s14 = smul.u32 (%p67_p3), 432, %s2015_s26 }
  0x15   : > { %s2122_s20 = scalar_lea.vmem (%p67_p3), [#allocation2], %s1889_s12 }
  0x16   : > { %s232_s15 = sadd.s32 (%p67_p3), %s1890_s14, %s1742_s13 }
  0x17   : > { %s1743_s16 = sshll.u32 (%p67_p3), %s232_s15, 2 }
  0x18   : > { %s2117_s19 = scalar_lea.vmem (%p67_p3), %s2591_s1, %s1743_s16 }
  0x19   : > { %v247_v0 = vld [vmem:[%s2117_s19] sm:$0xff]  ;;  %v249_v1 = vld [vmem:[%s2117_s19 + $0x8] sm:$0xff]  ;;  %v251_v2 = vld [vmem:[%s2117_s19 + $0x10] sm:$0xff] }
  0x1a   : > { %248 = vst [vmem:[%s2122_s20] sm:$0xff] %v247_v0  ;;  %250 = vst [vmem:[%s2122_s20 + $0x8] sm:$0xff] %v249_v1  ;;  %v253_v3 = vld [vmem:[%s2117_s19 + $0x18] sm:$0xff]  ;;  %v255_v4 = vld [vmem:[%s2117_s19 + $0x40] sm:$0xff] }
  0x1b   : > { %252 = vst [vmem:[%s2122_s20 + $0x10] sm:$0xff] %v251_v2  ;;  %v257_v5 = vld [vmem:[%s2117_s19 + $0x48] sm:$0xff]  ;;  %254 = vst [vmem:[%s2122_s20 + $0x18] sm:$0xff] %v253_v3  ;;  %v259_v6 = vld [vmem:[%s2117_s19 + $0x50] sm:$0xff] }
  0x1c   : > { %256 = vst [vmem:[%s2122_s20 + $0x20] sm:$0xff] %v255_v4  ;;  %258 = vst [vmem:[%s2122_s20 + $0x28] sm:$0xff] %v257_v5  ;;  %v261_v7 = vld [vmem:[%s2117_s19 + $0x58] sm:$0xff]  ;;  %v263_v8 = vld [vmem:[%s2117_s19 + $0x80] sm:$0xff] }
  0x1d   : > { %260 = vst [vmem:[%s2122_s20 + $0x30] sm:$0xff] %v259_v6  ;;  %262 = vst [vmem:[%s2122_s20 + $0x38] sm:$0xff] %v261_v7  ;;  %v265_v9 = vld [vmem:[%s2117_s19 + $0x88] sm:$0xff]  ;;  %v267_v10 = vld [vmem:[%s2117_s19 + $0x90] sm:$0xff] }
  0x1e   : > { %264 = vst [vmem:[%s2122_s20 + $0x40] sm:$0xff] %v263_v8  ;;  %v269_v11 = vld [vmem:[%s2117_s19 + $0x98] sm:$0xff]  ;;  %266 = vst [vmem:[%s2122_s20 + $0x48] sm:$0xff] %v265_v9  ;;  %v271_v12 = vld [vmem:[%s2117_s19 + $0xc0] sm:$0xff] }
  0x1f   : > { %268 = vst [vmem:[%s2122_s20 + $0x50] sm:$0xff] %v267_v10  ;;  %270 = vst [vmem:[%s2122_s20 + $0x58] sm:$0xff] %v269_v11  ;;  %v273_v13 = vld [vmem:[%s2117_s19 + $0xc8] sm:$0xff]  ;;  %v275_v14 = vld [vmem:[%s2117_s19 + $0xd0] sm:$0xff] }
  0x20   : > { %272 = vst [vmem:[%s2122_s20 + $0x60] sm:$0xff] %v271_v12  ;;  %274 = vst [vmem:[%s2122_s20 + $0x68] sm:$0xff] %v273_v13  ;;  %v277_v15 = vld [vmem:[%s2117_s19 + $0xd8] sm:$0xff]  ;;  %v279_v16 = vld [vmem:[%s2117_s19 + $0x100] sm:$0xff] }
  0x21   : > { %276 = vst [vmem:[%s2122_s20 + $0x70] sm:$0xff] %v275_v14  ;;  %v281_v17 = vld [vmem:[%s2117_s19 + $0x108] sm:$0xff]  ;;  %278 = vst [vmem:[%s2122_s20 + $0x78] sm:$0xff] %v277_v15  ;;  %v283_v18 = vld [vmem:[%s2117_s19 + $0x110] sm:$0xff] }
  0x22   : > { %280 = vst [vmem:[%s2122_s20 + $0x80] sm:$0xff] %v279_v16  ;;  %282 = vst [vmem:[%s2122_s20 + $0x88] sm:$0xff] %v281_v17  ;;  %v285_v19 = vld [vmem:[%s2117_s19 + $0x118] sm:$0xff]  ;;  %v287_v20 = vld [vmem:[%s2117_s19 + $0x140] sm:$0xff] }
  0x23   : > { %284 = vst [vmem:[%s2122_s20 + $0x90] sm:$0xff] %v283_v18  ;;  %286 = vst [vmem:[%s2122_s20 + $0x98] sm:$0xff] %v285_v19  ;;  %v289_v21 = vld [vmem:[%s2117_s19 + $0x148] sm:$0xff]  ;;  %v291_v22 = vld [vmem:[%s2117_s19 + $0x150] sm:$0xff] }
  0x24   : > { %288 = vst [vmem:[%s2122_s20 + $0xa0] sm:$0xff] %v287_v20  ;;  %v293_v23 = vld [vmem:[%s2117_s19 + $0x158] sm:$0xff]  ;;  %290 = vst [vmem:[%s2122_s20 + $0xa8] sm:$0xff] %v289_v21  ;;  %v295_v24 = vld [vmem:[%s2117_s19 + $0x180] sm:$0xff] }
  0x25   : > { %292 = vst [vmem:[%s2122_s20 + $0xb0] sm:$0xff] %v291_v22  ;;  %294 = vst [vmem:[%s2122_s20 + $0xb8] sm:$0xff] %v293_v23  ;;  %v297_v25 = vld [vmem:[%s2117_s19 + $0x188] sm:$0xff]  ;;  %v299_v26 = vld [vmem:[%s2117_s19 + $0x190] sm:$0xff] }
  0x26   : > { %296 = vst [vmem:[%s2122_s20 + $0xc0] sm:$0xff] %v295_v24  ;;  %298 = vst [vmem:[%s2122_s20 + $0xc8] sm:$0xff] %v297_v25  ;;  %v301_v27 = vld [vmem:[%s2117_s19 + $0x198] sm:$0xff]  ;;  %v303_v28 = vld [vmem:[%s2117_s19 + $0x1c0] sm:$0xff] }
  0x27   : > { %300 = vst [vmem:[%s2122_s20 + $0xd0] sm:$0xff] %v299_v26  ;;  %v305_v29 = vld [vmem:[%s2117_s19 + $0x1c8] sm:$0xff]  ;;  %302 = vst [vmem:[%s2122_s20 + $0xd8] sm:$0xff] %v301_v27  ;;  %v307_v30 = vld [vmem:[%s2117_s19 + $0x1d0] sm:$0xff] }
  0x28   : > { %304 = vst [vmem:[%s2122_s20 + $0xe0] sm:$0xff] %v303_v28  ;;  %306 = vst [vmem:[%s2122_s20 + $0xe8] sm:$0xff] %v305_v29  ;;  %v309_v31 = vld [vmem:[%s2117_s19 + $0x1d8] sm:$0xff]  ;;  %v311_v32 = vld [vmem:[%s2117_s19 + $0x200] sm:$0xff] }
  0x29   : > { %308 = vst [vmem:[%s2122_s20 + $0xf0] sm:$0xff] %v307_v30  ;;  %310 = vst [vmem:[%s2122_s20 + $0xf8] sm:$0xff] %v309_v31  ;;  %v313_v33 = vld [vmem:[%s2117_s19 + $0x208] sm:$0xff]  ;;  %v315_v34 = vld [vmem:[%s2117_s19 + $0x210] sm:$0xff] }
  0x2a   : > { %312 = vst [vmem:[%s2122_s20 + $0x100] sm:$0xff] %v311_v32  ;;  %v317_v35 = vld [vmem:[%s2117_s19 + $0x218] sm:$0xff]  ;;  %314 = vst [vmem:[%s2122_s20 + $0x108] sm:$0xff] %v313_v33  ;;  %v319_v36 = vld [vmem:[%s2117_s19 + $0x240] sm:$0xff] }
  0x2b   : > { %316 = vst [vmem:[%s2122_s20 + $0x110] sm:$0xff] %v315_v34  ;;  %318 = vst [vmem:[%s2122_s20 + $0x118] sm:$0xff] %v317_v35  ;;  %v321_v37 = vld [vmem:[%s2117_s19 + $0x248] sm:$0xff]  ;;  %v323_v38 = vld [vmem:[%s2117_s19 + $0x250] sm:$0xff] }
  0x2c   : > { %320 = vst [vmem:[%s2122_s20 + $0x120] sm:$0xff] %v319_v36  ;;  %322 = vst [vmem:[%s2122_s20 + $0x128] sm:$0xff] %v321_v37  ;;  %v325_v39 = vld [vmem:[%s2117_s19 + $0x258] sm:$0xff]  ;;  %v327_v40 = vld [vmem:[%s2117_s19 + $0x280] sm:$0xff] }
  0x2d   : > { %324 = vst [vmem:[%s2122_s20 + $0x130] sm:$0xff] %v323_v38  ;;  %v329_v41 = vld [vmem:[%s2117_s19 + $0x288] sm:$0xff]  ;;  %326 = vst [vmem:[%s2122_s20 + $0x138] sm:$0xff] %v325_v39  ;;  %v331_v42 = vld [vmem:[%s2117_s19 + $0x290] sm:$0xff] }
  0x2e   : > { %328 = vst [vmem:[%s2122_s20 + $0x140] sm:$0xff] %v327_v40  ;;  %330 = vst [vmem:[%s2122_s20 + $0x148] sm:$0xff] %v329_v41  ;;  %v333_v43 = vld [vmem:[%s2117_s19 + $0x298] sm:$0xff]  ;;  %v335_v44 = vld [vmem:[%s2117_s19 + $0x2c0] sm:$0xff] }
  0x2f   : > { %332 = vst [vmem:[%s2122_s20 + $0x150] sm:$0xff] %v331_v42  ;;  %334 = vst [vmem:[%s2122_s20 + $0x158] sm:$0xff] %v333_v43  ;;  %v337_v45 = vld [vmem:[%s2117_s19 + $0x2c8] sm:$0xff]  ;;  %v339_v46 = vld [vmem:[%s2117_s19 + $0x2d0] sm:$0xff] }
  0x30   : > { %336 = vst [vmem:[%s2122_s20 + $0x160] sm:$0xff] %v335_v44  ;;  %v341_v47 = vld [vmem:[%s2117_s19 + $0x2d8] sm:$0xff]  ;;  %338 = vst [vmem:[%s2122_s20 + $0x168] sm:$0xff] %v337_v45  ;;  %v343_v48 = vld [vmem:[%s2117_s19 + $0x300] sm:$0xff] }
  0x31   : > { %340 = vst [vmem:[%s2122_s20 + $0x170] sm:$0xff] %v339_v46  ;;  %342 = vst [vmem:[%s2122_s20 + $0x178] sm:$0xff] %v341_v47  ;;  %v345_v49 = vld [vmem:[%s2117_s19 + $0x308] sm:$0xff]  ;;  %v347_v50 = vld [vmem:[%s2117_s19 + $0x310] sm:$0xff] }
  0x32   : > { %344 = vst [vmem:[%s2122_s20 + $0x180] sm:$0xff] %v343_v48  ;;  %346 = vst [vmem:[%s2122_s20 + $0x188] sm:$0xff] %v345_v49  ;;  %v349_v51 = vld [vmem:[%s2117_s19 + $0x318] sm:$0xff]  ;;  %v351_v52 = vld [vmem:[%s2117_s19 + $0x340] sm:$0xff] }
  0x33   : > { %348 = vst [vmem:[%s2122_s20 + $0x190] sm:$0xff] %v347_v50  ;;  %v353_v53 = vld [vmem:[%s2117_s19 + $0x348] sm:$0xff]  ;;  %350 = vst [vmem:[%s2122_s20 + $0x198] sm:$0xff] %v349_v51  ;;  %v355_v54 = vld [vmem:[%s2117_s19 + $0x350] sm:$0xff] }
  0x34   : > { %352 = vst [vmem:[%s2122_s20 + $0x1a0] sm:$0xff] %v351_v52  ;;  %354 = vst [vmem:[%s2122_s20 + $0x1a8] sm:$0xff] %v353_v53  ;;  %v357_v55 = vld [vmem:[%s2117_s19 + $0x358] sm:$0xff]  ;;  %v359_v56 = vld [vmem:[%s2117_s19 + $0x380] sm:$0xff] }
  0x35   : > { %356 = vst [vmem:[%s2122_s20 + $0x1b0] sm:$0xff] %v355_v54  ;;  %358 = vst [vmem:[%s2122_s20 + $0x1b8] sm:$0xff] %v357_v55  ;;  %v361_v57 = vld [vmem:[%s2117_s19 + $0x388] sm:$0xff]  ;;  %v363_v58 = vld [vmem:[%s2117_s19 + $0x390] sm:$0xff] }
  0x36   : > { %360 = vst [vmem:[%s2122_s20 + $0x1c0] sm:$0xff] %v359_v56  ;;  %v365_v59 = vld [vmem:[%s2117_s19 + $0x398] sm:$0xff]  ;;  %362 = vst [vmem:[%s2122_s20 + $0x1c8] sm:$0xff] %v361_v57  ;;  %v367_v60 = vld [vmem:[%s2117_s19 + $0x3c0] sm:$0xff] }
  0x37   : > { %364 = vst [vmem:[%s2122_s20 + $0x1d0] sm:$0xff] %v363_v58  ;;  %366 = vst [vmem:[%s2122_s20 + $0x1d8] sm:$0xff] %v365_v59  ;;  %v369_v61 = vld [vmem:[%s2117_s19 + $0x3c8] sm:$0xff]  ;;  %v371_v62 = vld [vmem:[%s2117_s19 + $0x3d0] sm:$0xff] }
  0x38   : > { %368 = vst [vmem:[%s2122_s20 + $0x1e0] sm:$0xff] %v367_v60  ;;  %370 = vst [vmem:[%s2122_s20 + $0x1e8] sm:$0xff] %v369_v61  ;;  %v373_v63 = vld [vmem:[%s2117_s19 + $0x3d8] sm:$0xff]  ;;  %v375_v0 = vld [vmem:[%s2117_s19 + $0x400] sm:$0xff] }
  0x39   : > { %372 = vst [vmem:[%s2122_s20 + $0x1f0] sm:$0xff] %v371_v62  ;;  %v377_v1 = vld [vmem:[%s2117_s19 + $0x408] sm:$0xff]  ;;  %374 = vst [vmem:[%s2122_s20 + $0x1f8] sm:$0xff] %v373_v63  ;;  %v379_v2 = vld [vmem:[%s2117_s19 + $0x410] sm:$0xff] }
  0x3a   : > { %376 = vst [vmem:[%s2122_s20 + $0x200] sm:$0xff] %v375_v0  ;;  %378 = vst [vmem:[%s2122_s20 + $0x208] sm:$0xff] %v377_v1  ;;  %v381_v3 = vld [vmem:[%s2117_s19 + $0x418] sm:$0xff]  ;;  %v383_v4 = vld [vmem:[%s2117_s19 + $0x440] sm:$0xff] }
  0x3b   : > { %380 = vst [vmem:[%s2122_s20 + $0x210] sm:$0xff] %v379_v2  ;;  %382 = vst [vmem:[%s2122_s20 + $0x218] sm:$0xff] %v381_v3  ;;  %v385_v5 = vld [vmem:[%s2117_s19 + $0x448] sm:$0xff]  ;;  %v387_v6 = vld [vmem:[%s2117_s19 + $0x450] sm:$0xff] }
  0x3c   : > { %384 = vst [vmem:[%s2122_s20 + $0x220] sm:$0xff] %v383_v4  ;;  %v389_v7 = vld [vmem:[%s2117_s19 + $0x458] sm:$0xff]  ;;  %386 = vst [vmem:[%s2122_s20 + $0x228] sm:$0xff] %v385_v5  ;;  %v391_v8 = vld [vmem:[%s2117_s19 + $0x480] sm:$0xff] }
  0x3d   : > { %388 = vst [vmem:[%s2122_s20 + $0x230] sm:$0xff] %v387_v6  ;;  %390 = vst [vmem:[%s2122_s20 + $0x238] sm:$0xff] %v389_v7  ;;  %v393_v9 = vld [vmem:[%s2117_s19 + $0x488] sm:$0xff]  ;;  %v395_v10 = vld [vmem:[%s2117_s19 + $0x490] sm:$0xff] }
  0x3e   : > { %392 = vst [vmem:[%s2122_s20 + $0x240] sm:$0xff] %v391_v8  ;;  %394 = vst [vmem:[%s2122_s20 + $0x248] sm:$0xff] %v393_v9  ;;  %v397_v11 = vld [vmem:[%s2117_s19 + $0x498] sm:$0xff]  ;;  %v399_v12 = vld [vmem:[%s2117_s19 + $0x4c0] sm:$0xff] }
  0x3f   : > { %396 = vst [vmem:[%s2122_s20 + $0x250] sm:$0xff] %v395_v10  ;;  %v401_v13 = vld [vmem:[%s2117_s19 + $0x4c8] sm:$0xff]  ;;  %398 = vst [vmem:[%s2122_s20 + $0x258] sm:$0xff] %v397_v11  ;;  %v403_v14 = vld [vmem:[%s2117_s19 + $0x4d0] sm:$0xff] }
  0x40   : > { %400 = vst [vmem:[%s2122_s20 + $0x260] sm:$0xff] %v399_v12  ;;  %402 = vst [vmem:[%s2122_s20 + $0x268] sm:$0xff] %v401_v13  ;;  %v405_v15 = vld [vmem:[%s2117_s19 + $0x4d8] sm:$0xff]  ;;  %v407_v16 = vld [vmem:[%s2117_s19 + $0x500] sm:$0xff] }
  0x41   : > { %404 = vst [vmem:[%s2122_s20 + $0x270] sm:$0xff] %v403_v14  ;;  %406 = vst [vmem:[%s2122_s20 + $0x278] sm:$0xff] %v405_v15  ;;  %v409_v17 = vld [vmem:[%s2117_s19 + $0x508] sm:$0xff]  ;;  %v411_v18 = vld [vmem:[%s2117_s19 + $0x510] sm:$0xff] }
  0x42   : > { %408 = vst [vmem:[%s2122_s20 + $0x280] sm:$0xff] %v407_v16  ;;  %v413_v19 = vld [vmem:[%s2117_s19 + $0x518] sm:$0xff]  ;;  %410 = vst [vmem:[%s2122_s20 + $0x288] sm:$0xff] %v409_v17  ;;  %v415_v20 = vld [vmem:[%s2117_s19 + $0x540] sm:$0xff] }
  0x43   : > { %412 = vst [vmem:[%s2122_s20 + $0x290] sm:$0xff] %v411_v18  ;;  %414 = vst [vmem:[%s2122_s20 + $0x298] sm:$0xff] %v413_v19  ;;  %v417_v21 = vld [vmem:[%s2117_s19 + $0x548] sm:$0xff]  ;;  %v419_v22 = vld [vmem:[%s2117_s19 + $0x550] sm:$0xff] }
  0x44   : > { %416 = vst [vmem:[%s2122_s20 + $0x2a0] sm:$0xff] %v415_v20  ;;  %418 = vst [vmem:[%s2122_s20 + $0x2a8] sm:$0xff] %v417_v21  ;;  %v421_v23 = vld [vmem:[%s2117_s19 + $0x558] sm:$0xff]  ;;  %v423_v24 = vld [vmem:[%s2117_s19 + $0x580] sm:$0xff] }
  0x45   : > { %420 = vst [vmem:[%s2122_s20 + $0x2b0] sm:$0xff] %v419_v22  ;;  %v425_v25 = vld [vmem:[%s2117_s19 + $0x588] sm:$0xff]  ;;  %422 = vst [vmem:[%s2122_s20 + $0x2b8] sm:$0xff] %v421_v23  ;;  %v427_v26 = vld [vmem:[%s2117_s19 + $0x590] sm:$0xff] }
  0x46   : > { %424 = vst [vmem:[%s2122_s20 + $0x2c0] sm:$0xff] %v423_v24  ;;  %426 = vst [vmem:[%s2122_s20 + $0x2c8] sm:$0xff] %v425_v25  ;;  %v429_v27 = vld [vmem:[%s2117_s19 + $0x598] sm:$0xff]  ;;  %v431_v28 = vld [vmem:[%s2117_s19 + $0x5c0] sm:$0xff] }
  0x47   : > { %428 = vst [vmem:[%s2122_s20 + $0x2d0] sm:$0xff] %v427_v26  ;;  %430 = vst [vmem:[%s2122_s20 + $0x2d8] sm:$0xff] %v429_v27  ;;  %v433_v29 = vld [vmem:[%s2117_s19 + $0x5c8] sm:$0xff]  ;;  %v435_v30 = vld [vmem:[%s2117_s19 + $0x5d0] sm:$0xff] }
  0x48   : > { %432 = vst [vmem:[%s2122_s20 + $0x2e0] sm:$0xff] %v431_v28  ;;  %v437_v31 = vld [vmem:[%s2117_s19 + $0x5d8] sm:$0xff]  ;;  %434 = vst [vmem:[%s2122_s20 + $0x2e8] sm:$0xff] %v433_v29  ;;  %v439_v32 = vld [vmem:[%s2117_s19 + $0x600] sm:$0xff] }
  0x49   : > { %436 = vst [vmem:[%s2122_s20 + $0x2f0] sm:$0xff] %v435_v30  ;;  %438 = vst [vmem:[%s2122_s20 + $0x2f8] sm:$0xff] %v437_v31  ;;  %v441_v33 = vld [vmem:[%s2117_s19 + $0x608] sm:$0xff]  ;;  %v443_v34 = vld [vmem:[%s2117_s19 + $0x610] sm:$0xff] }
  0x4a   : > { %440 = vst [vmem:[%s2122_s20 + $0x300] sm:$0xff] %v439_v32  ;;  %442 = vst [vmem:[%s2122_s20 + $0x308] sm:$0xff] %v441_v33  ;;  %v445_v35 = vld [vmem:[%s2117_s19 + $0x618] sm:$0xff]  ;;  %v447_v36 = vld [vmem:[%s2117_s19 + $0x640] sm:$0xff] }
  0x4b   : > { %444 = vst [vmem:[%s2122_s20 + $0x310] sm:$0xff] %v443_v34  ;;  %v449_v37 = vld [vmem:[%s2117_s19 + $0x648] sm:$0xff]  ;;  %446 = vst [vmem:[%s2122_s20 + $0x318] sm:$0xff] %v445_v35  ;;  %v451_v38 = vld [vmem:[%s2117_s19 + $0x650] sm:$0xff] }
  0x4c   : > { %448 = vst [vmem:[%s2122_s20 + $0x320] sm:$0xff] %v447_v36  ;;  %450 = vst [vmem:[%s2122_s20 + $0x328] sm:$0xff] %v449_v37  ;;  %v453_v39 = vld [vmem:[%s2117_s19 + $0x658] sm:$0xff]  ;;  %v455_v40 = vld [vmem:[%s2117_s19 + $0x680] sm:$0xff] }
  0x4d   : > { %452 = vst [vmem:[%s2122_s20 + $0x330] sm:$0xff] %v451_v38  ;;  %454 = vst [vmem:[%s2122_s20 + $0x338] sm:$0xff] %v453_v39  ;;  %v457_v41 = vld [vmem:[%s2117_s19 + $0x688] sm:$0xff]  ;;  %v459_v42 = vld [vmem:[%s2117_s19 + $0x690] sm:$0xff] }
  0x4e   : > { %456 = vst [vmem:[%s2122_s20 + $0x340] sm:$0xff] %v455_v40  ;;  %v461_v43 = vld [vmem:[%s2117_s19 + $0x698] sm:$0xff]  ;;  %458 = vst [vmem:[%s2122_s20 + $0x348] sm:$0xff] %v457_v41 }
  0x4f   : > { %460 = vst [vmem:[%s2122_s20 + $0x350] sm:$0xff] %v459_v42  ;;  %462 = vst [vmem:[%s2122_s20 + $0x358] sm:$0xff] %v461_v43 }
  0x50 PF: > { %p1744_p7 = scmp.ge.s32.totalorder %s2019_s27, 1  ;;  %p480_p8 = scmp.lt.s32.totalorder %s2019_s27, 5 }
  0x52   : > { %p481_p9 = pnand %p1744_p7, %p480_p8 }
  0x53   : > { %s487_s30 = sand.u32 (!%p481_p9), 1, %s1995_s21   ;;  %v2343_v44 = vld [vmem:[%s2590_s0 + $0x4] ss:$8 sps:$4 sm:$0xff] (!%p481_p9)   ;;  %vm1221_vm0 = vcmask (!%p481_p9), 719872   ;;  %v2021_v46 = vmov (!%p481_p9), 0   ;;  %vm1228_vm1 = vcmask (!%p481_p9), 1043456  }
  0x54   : > { %484 = sbr.rel (%p481_p9) target bundleno = 445 (0x1bd), region = 63  ;;  %1868 = vmatprep.mubr.msk.bf16.mxu0 (!%p481_p9), %vm1221_vm0, %v2343_v44  ;;  %1871 = vmatprep.mubr.msk.bf16.mxu1 (!%p481_p9), %vm1221_vm0, %v2343_v44  ;;  %v1489_v45 = vld [vmem:[%s2592_s2] sm:$0xff] (!%p481_p9)  ;;  %s1745_s8 = sshll.u32 (!%p481_p9), %s2003_s23, 3 }
  0x55   : > { %s1891_s9 = smul.u32 (!%p481_p9), 864, %s487_s30  ;;  %1949 = vset.pattern.permute.xlu0 (!%p481_p9), %v2021_v46  ;;  %1950 = vset.pattern.permute.xlu1 (!%p481_p9), %v2021_v46  ;;  %v1577_v47 = vld [vmem:[%s2595_s5] sm:$0xff] (!%p481_p9)  ;;  %p531_p10 = scmp.lt.s32.totalorder (!%p481_p9), %s2007_s24, 1 }
  0x56   : > { %1492 = vperm.xlu0 (!%p481_p9), %1949, %v1489_v45   ;;  %1580 = vperm.xlu1 (!%p481_p9), %1950, %v1577_v47   ;;  %v1563_v3 = vld [vmem:[%s2594_s4] sm:$0xff] (!%p481_p9)  ;;  %p533_p11 = scmp.lt.s32.totalorder (!%p481_p9), %s1745_s8, 15 }
  0x57   : > { %s2355_s14 = scalar_lea.vmem (!%p481_p9), [#allocation2], %s1891_s9 }
  0x58   : > { %v555_v48 = vld [vmem:[%s2355_s14] sm:$0xff] (!%p481_p9)  ;;  %v556_v50 = vld [vmem:[%s2355_s14 + $0x8] sm:$0xff] (!%p481_p9) }
  0x59   : > { %v559_v49 = vld [vmem:[%s2355_s14 + $0x20] sm:$0xff] (!%p481_p9)  ;;  %v560_v52 = vld [vmem:[%s2355_s14 + $0x28] sm:$0xff] (!%p481_p9) }
  0x5a   : > { %v1756_v51 = vcombine.high (!%p481_p9), %v555_v48, %v559_v49  ;;  %v1755_v53 = vcombine.low (!%p481_p9), %v555_v48, %v559_v49  ;;  %v563_v54 = vld [vmem:[%s2355_s14 + $0x40] sm:$0xff] (!%p481_p9)  ;;  %v1758_v56 = vcombine.high (!%p481_p9), %v556_v50, %v560_v52  ;;  %v1757_v57 = vcombine.low (!%p481_p9), %v556_v50, %v560_v52  ;;  %v564_v59 = vld [vmem:[%s2355_s14 + $0x48] sm:$0xff] (!%p481_p9)  ;;  %1566 = vperm.xlu0 (!%p481_p9), %1949, %v1563_v3  }
  0x5b   : > { %v567_v55 = vld [vmem:[%s2355_s14 + $0x60] sm:$0xff]  ;;  %v568_v60 = vld [vmem:[%s2355_s14 + $0x68] sm:$0xff]  ;;  %s2610_s24 = smov (!%p531_p10, %s2007_s24), 1  ;;  %s2612_s8 = smov (!%p533_p11, %s1745_s8), 15 }
  0x5c   : > { %v1764_v58 = vcombine.high %v563_v54, %v567_v55  ;;  %v571_v61 = vld [vmem:[%s2355_s14 + $0x80] sm:$0xff]  ;;  %1253 = vmatprep.subr.bf16.mxu0 %v1756_v51  ;;  %v1766_v62 = vcombine.high %v564_v59, %v568_v60  ;;  %v572_v0 = vld [vmem:[%s2355_s14 + $0x88] sm:$0xff]  ;;  %1306 = vmatprep.subr.bf16.mxu1 %v1758_v56  ;;  %v1763_v2 = vcombine.low %v563_v54, %v567_v55  ;;  %s1746_s9 = sshll.u32 %s2610_s24, 4 }
  0x5d   : > { %v575_v63 = vld [vmem:[%s2355_s14 + $0xa0] sm:$0xff]  ;;  %v576_v1 = vld [vmem:[%s2355_s14 + $0xa8] sm:$0xff]  ;;  %1254 = vmatpush1.bf16.msra.mxu0 %v1755_v53  ;;  %1307 = vmatpush1.bf16.msra.mxu1 %v1757_v57  ;;  %v1765_v4 = vcombine.low %v564_v59, %v568_v60  ;;  %s2514_s11 = sadd.s32 %s1746_s9, %s2612_s8 }
  0x5e   : > { %1255 = vmatprep.subr.bf16.mxu0 %v1764_v58  ;;  %v1772_v5 = vcombine.high %v571_v61, %v575_v63  ;;  %1308 = vmatprep.subr.bf16.mxu1 %v1766_v62  ;;  %v1774_v6 = vcombine.high %v572_v0, %v576_v1  ;;  %v579_v7 = vld [vmem:[%s2355_s14 + $0xc0] sm:$0xff]  ;;  %v580_v9 = vld [vmem:[%s2355_s14 + $0xc8] sm:$0xff]  ;;  %v1771_v11 = vcombine.low %v571_v61, %v575_v63  ;;  %s1747_s12 = sshll.u32 %s2514_s11, 2 }
  0x5f   : > { %v583_v8 = vld [vmem:[%s2355_s14 + $0xe0] sm:$0xff]  ;;  %v584_v10 = vld [vmem:[%s2355_s14 + $0xe8] sm:$0xff]  ;;  %v1773_v12 = vcombine.low %v572_v0, %v576_v1  ;;  %s2522_s24 = scalar_lea.vmem %s2593_s3, %s1747_s12  ;;  %s2548_s15 = scalar_lea.vmem %s2596_s6, %s1747_s12 }
  0x60   : > { %v1780_v13 = vcombine.high %v579_v7, %v583_v8  ;;  %v1782_v14 = vcombine.high %v580_v9, %v584_v10  ;;  %v587_v15 = vld [vmem:[%s2355_s14 + $0x100] sm:$0xff]  ;;  %v588_v17 = vld [vmem:[%s2355_s14 + $0x108] sm:$0xff]  ;;  %v1779_v19 = vcombine.low %v579_v7, %v583_v8  ;;  %v1781_v20 = vcombine.low %v580_v9, %v584_v10 }
  0x61   : > { %1256 = vmatpush1.bf16.msra.mxu0 %v1763_v2  ;;  %1309 = vmatpush1.bf16.msra.mxu1 %v1765_v4  ;;  %v591_v16 = vld [vmem:[%s2355_s14 + $0x120] sm:$0xff]  ;;  %v592_v18 = vld [vmem:[%s2355_s14 + $0x128] sm:$0xff] }
  0x62   : > { %1257 = vmatprep.subr.bf16.mxu0 %v1772_v5  ;;  %1310 = vmatprep.subr.bf16.mxu1 %v1774_v6  ;;  %v1788_v21 = vcombine.high %v587_v15, %v591_v16  ;;  %v1790_v22 = vcombine.high %v588_v17, %v592_v18  ;;  %v595_v23 = vld [vmem:[%s2355_s14 + $0x140] sm:$0xff]  ;;  %v596_v25 = vld [vmem:[%s2355_s14 + $0x148] sm:$0xff]  ;;  %v1787_v27 = vcombine.low %v587_v15, %v591_v16 }
  0x63   : > { %v599_v24 = vld [vmem:[%s2355_s14 + $0x160] sm:$0xff]  ;;  %v600_v26 = vld [vmem:[%s2355_s14 + $0x168] sm:$0xff]  ;;  %v1789_v28 = vcombine.low %v588_v17, %v592_v18 }
  0x64   : > { %v1796_v29 = vcombine.high %v595_v23, %v599_v24  ;;  %v1798_v30 = vcombine.high %v596_v25, %v600_v26  ;;  %v603_v31 = vld [vmem:[%s2355_s14 + $0x180] sm:$0xff]  ;;  %v604_v33 = vld [vmem:[%s2355_s14 + $0x188] sm:$0xff]  ;;  %v1795_v35 = vcombine.low %v595_v23, %v599_v24  ;;  %v1797_v36 = vcombine.low %v596_v25, %v600_v26 }
  0x65   : > { %1258 = vmatpush1.bf16.msra.mxu0 %v1771_v11  ;;  %1311 = vmatpush1.bf16.msra.mxu1 %v1773_v12  ;;  %v607_v32 = vld [vmem:[%s2355_s14 + $0x1a0] sm:$0xff]  ;;  %v608_v34 = vld [vmem:[%s2355_s14 + $0x1a8] sm:$0xff] }
  0x66   : > { %1259 = vmatprep.subr.bf16.mxu0 %v1780_v13  ;;  %1312 = vmatprep.subr.bf16.mxu1 %v1782_v14  ;;  %v1804_v37 = vcombine.high %v603_v31, %v607_v32  ;;  %v1806_v38 = vcombine.high %v604_v33, %v608_v34  ;;  %v611_v39 = vld [vmem:[%s2355_s14 + $0x1c0] sm:$0xff]  ;;  %v612_v41 = vld [vmem:[%s2355_s14 + $0x1c8] sm:$0xff]  ;;  %v1803_v43 = vcombine.low %v603_v31, %v607_v32  ;;  %v557_v32 = vld [vmem:[%s2355_s14 + $0x10] sm:$0xff] }
  0x67   : > { %v615_v40 = vld [vmem:[%s2355_s14 + $0x1e0] sm:$0xff]  ;;  %v616_v42 = vld [vmem:[%s2355_s14 + $0x1e8] sm:$0xff]  ;;  %v1805_v45 = vcombine.low %v604_v33, %v608_v34  ;;  %v561_v33 = vld [vmem:[%s2355_s14 + $0x30] sm:$0xff] }
  0x68   : > { %v1812_v46 = vcombine.high %v611_v39, %v615_v40  ;;  %v1814_v47 = vcombine.high %v612_v41, %v616_v42  ;;  %v619_v48 = vld [vmem:[%s2355_s14 + $0x200] sm:$0xff]  ;;  %v620_v50 = vld [vmem:[%s2355_s14 + $0x208] sm:$0xff]  ;;  %v1811_v52 = vcombine.low %v611_v39, %v615_v40  ;;  %v1813_v53 = vcombine.low %v612_v41, %v616_v42  ;;  %v558_v34 = vld [vmem:[%s2355_s14 + $0x18] sm:$0xff] }
  0x69   : > { %1260 = vmatpush1.bf16.msra.mxu0 %v1779_v19  ;;  %1313 = vmatpush1.bf16.msra.mxu1 %v1781_v20  ;;  %v623_v49 = vld [vmem:[%s2355_s14 + $0x220] sm:$0xff]  ;;  %v624_v51 = vld [vmem:[%s2355_s14 + $0x228] sm:$0xff]  ;;  %v565_v40 = vld [vmem:[%s2355_s14 + $0x50] sm:$0xff] }
  0x6a   : > { %1261 = vmatprep.subr.bf16.mxu0 %v1788_v21  ;;  %1314 = vmatprep.subr.bf16.mxu1 %v1790_v22  ;;  %v1820_v54 = vcombine.high %v619_v48, %v623_v49  ;;  %v1822_v55 = vcombine.high %v620_v50, %v624_v51  ;;  %v627_v56 = vld [vmem:[%s2355_s14 + $0x240] sm:$0xff]  ;;  %v628_v58 = vld [vmem:[%s2355_s14 + $0x248] sm:$0xff]  ;;  %v1819_v60 = vcombine.low %v619_v48, %v623_v49  ;;  %v569_v41 = vld [vmem:[%s2355_s14 + $0x70] sm:$0xff] }
  0x6b   : > { %v631_v57 = vld [vmem:[%s2355_s14 + $0x260] sm:$0xff]  ;;  %v632_v59 = vld [vmem:[%s2355_s14 + $0x268] sm:$0xff]  ;;  %v1821_v61 = vcombine.low %v620_v50, %v624_v51  ;;  %v1768_v48 = vcombine.high %v565_v40, %v569_v41  ;;  %v2434_v50 = vld [vmem:[%s2590_s0 + $0x14] ss:$8 sps:$4 sm:$0xff]  }
  0x6c   : > { %v1828_v62 = vcombine.high %v627_v56, %v631_v57  ;;  %v1830_v63 = vcombine.high %v628_v58, %v632_v59  ;;  %v635_v0 = vld [vmem:[%s2355_s14 + $0x280] sm:$0xff]  ;;  %v636_v2 = vld [vmem:[%s2355_s14 + $0x288] sm:$0xff]  ;;  %v1827_v4 = vcombine.low %v627_v56, %v631_v57  ;;  %v1829_v5 = vcombine.low %v628_v58, %v632_v59  ;;  %v573_v51 = vld [vmem:[%s2355_s14 + $0x90] sm:$0xff] }
  0x6d   : > { %1262 = vmatpush1.bf16.msra.mxu0 %v1787_v27  ;;  %1315 = vmatpush1.bf16.msra.mxu1 %v1789_v28  ;;  %v639_v1 = vld [vmem:[%s2355_s14 + $0x2a0] sm:$0xff]  ;;  %v640_v3 = vld [vmem:[%s2355_s14 + $0x2a8] sm:$0xff]  ;;  %v581_v59 = vld [vmem:[%s2355_s14 + $0xd0] sm:$0xff] }
  0x6e   : > { %1263 = vmatprep.subr.bf16.mxu0 %v1796_v29  ;;  %1316 = vmatprep.subr.bf16.mxu1 %v1798_v30  ;;  %v1836_v6 = vcombine.high %v635_v0, %v639_v1  ;;  %v1838_v7 = vcombine.high %v636_v2, %v640_v3  ;;  %v643_v8 = vld [vmem:[%s2355_s14 + $0x2c0] sm:$0xff]  ;;  %v644_v10 = vld [vmem:[%s2355_s14 + $0x2c8] sm:$0xff]  ;;  %v1835_v12 = vcombine.low %v635_v0, %v639_v1 }
  0x6f   : > { %v647_v9 = vld [vmem:[%s2355_s14 + $0x2e0] sm:$0xff]  ;;  %v648_v11 = vld [vmem:[%s2355_s14 + $0x2e8] sm:$0xff]  ;;  %v1837_v13 = vcombine.low %v636_v2, %v640_v3 }
  0x70   : > { %v1844_v14 = vcombine.high %v643_v8, %v647_v9  ;;  %v1846_v15 = vcombine.high %v644_v10, %v648_v11  ;;  %v651_v16 = vld [vmem:[%s2355_s14 + $0x300] sm:$0xff]  ;;  %v652_v18 = vld [vmem:[%s2355_s14 + $0x308] sm:$0xff]  ;;  %v1843_v20 = vcombine.low %v643_v8, %v647_v9  ;;  %v1845_v21 = vcombine.low %v644_v10, %v648_v11 }
  0x71   : > { %1264 = vmatpush1.bf16.msra.mxu0 %v1795_v35  ;;  %1317 = vmatpush1.bf16.msra.mxu1 %v1797_v36  ;;  %v655_v17 = vld [vmem:[%s2355_s14 + $0x320] sm:$0xff]  ;;  %v656_v19 = vld [vmem:[%s2355_s14 + $0x328] sm:$0xff]  ;;  %v562_v35 = vld [vmem:[%s2355_s14 + $0x38] sm:$0xff] }
  0x72   : > { %1265 = vmatprep.subr.bf16.mxu0 %v1804_v37  ;;  %1318 = vmatprep.subr.bf16.mxu1 %v1806_v38  ;;  %v1852_v22 = vcombine.high %v651_v16, %v655_v17  ;;  %v1854_v23 = vcombine.high %v652_v18, %v656_v19  ;;  %v659_v24 = vld [vmem:[%s2355_s14 + $0x340] sm:$0xff]  ;;  %v660_v25 = vld [vmem:[%s2355_s14 + $0x348] sm:$0xff]  ;;  %v1851_v26 = vcombine.low %v651_v16, %v655_v17 }
  0x73   : > { %v1853_v27 = vcombine.low %v652_v18, %v656_v19  ;;  %v1860_v28 = vcombine.high %v659_v24, %v659_v24  ;;  %v1859_v29 = vcombine.low %v659_v24, %v659_v24  ;;  %v1862_v30 = vcombine.high %v660_v25, %v660_v25  ;;  %v2427_v42 = vld [vmem:[%s2590_s0] ss:$8 sps:$4 sm:$0xff]  }
  0x74   : > { %v1861_v31 = vcombine.low %v660_v25, %v660_v25  ;;  %v1760_v37 = vcombine.high %v557_v32, %v561_v33  ;;  %v1762_v39 = vcombine.high %v558_v34, %v562_v35 }
  0x75   : > { %1266 = vmatpush1.bf16.msra.mxu0 %v1803_v43  ;;  %1319 = vmatpush1.bf16.msra.mxu1 %v1805_v45  ;;  %v1230_v36 = vsel %vm1228_vm1, %v1859_v29, 0  ;;  %v566_v43 = vld [vmem:[%s2355_s14 + $0x58] sm:$0xff] }
  0x76   : > { %1267 = vmatprep.subr.bf16.mxu0 %v1812_v46  ;;  %1320 = vmatprep.subr.bf16.mxu1 %v1814_v47  ;;  %v1236_v38 = vsel %vm1228_vm1, %v1861_v31, 0  ;;  %v570_v45 = vld [vmem:[%s2355_s14 + $0x78] sm:$0xff]  ;;  %v1759_v46 = vcombine.low %v557_v32, %v561_v33  ;;  %v1761_v47 = vcombine.low %v558_v34, %v562_v35  ;;  %v621_v35 = vld [vmem:[%s2355_s14 + $0x210] sm:$0xff] }
  0x77   : > { %v1770_v49 = vcombine.high %v566_v43, %v570_v45  ;;  %v1769_v56 = vcombine.low %v566_v43, %v570_v45  ;;  %v614_v29 = vld [vmem:[%s2355_s14 + $0x1d8] sm:$0xff]  ;;  %v629_v45 = vld [vmem:[%s2355_s14 + $0x250] sm:$0xff] }
  0x79   : > { %1268 = vmatpush1.bf16.msra.mxu0 %v1811_v52  ;;  %1321 = vmatpush1.bf16.msra.mxu1 %v1813_v53  ;;  %v577_v52 = vld [vmem:[%s2355_s14 + $0xb0] sm:$0xff]  ;;  %v574_v53 = vld [vmem:[%s2355_s14 + $0x98] sm:$0xff] }
  0x7a   : > { %1269 = vmatprep.subr.bf16.mxu0 %v1820_v54  ;;  %1322 = vmatprep.subr.bf16.mxu1 %v1822_v55  ;;  %v578_v54 = vld [vmem:[%s2355_s14 + $0xb8] sm:$0xff]  ;;  %v1767_v55 = vcombine.low %v565_v40, %v569_v41  ;;  %v1776_v57 = vcombine.high %v573_v51, %v577_v52  ;;  %v1775_v0 = vcombine.low %v573_v51, %v577_v52 }
  0x7b   : > { %v1778_v58 = vcombine.high %v574_v53, %v578_v54  ;;  %v1777_v1 = vcombine.low %v574_v53, %v578_v54  ;;  %v637_v54 = vld [vmem:[%s2355_s14 + $0x290] sm:$0xff] }
  0x7d   : > { %1270 = vmatpush1.bf16.msra.mxu0 %v1819_v60  ;;  %1323 = vmatpush1.bf16.msra.mxu1 %v1821_v61  ;;  %v585_v60 = vld [vmem:[%s2355_s14 + $0xf0] sm:$0xff] }
  0x7e   : > { %1271 = vmatprep.subr.bf16.mxu0 %v1828_v62  ;;  %1324 = vmatprep.subr.bf16.mxu1 %v1830_v63  ;;  %v2451_v61 = vld [vmem:[%s2590_s0 + $0x10] ss:$8 sps:$4 sm:$0xff]   ;;  %v1784_v2 = vcombine.high %v581_v59, %v585_v60  ;;  %v1783_v8 = vcombine.low %v581_v59, %v585_v60 }
  0x7f   : > { %v582_v62 = vld [vmem:[%s2355_s14 + $0xd8] sm:$0xff] }
  0x80   : > { %v586_v63 = vld [vmem:[%s2355_s14 + $0xf8] sm:$0xff] }
  0x81   : > { %1272 = vmatpush1.bf16.msra.mxu0 %v1827_v4  ;;  %1325 = vmatpush1.bf16.msra.mxu1 %v1829_v5  ;;  %v1786_v3 = vcombine.high %v582_v62, %v586_v63  ;;  %v589_v4 = vld [vmem:[%s2355_s14 + $0x110] sm:$0xff]  ;;  %v1785_v9 = vcombine.low %v582_v62, %v586_v63 }
  0x82   : > { %1273 = vmatprep.subr.bf16.mxu0 %v1836_v6  ;;  %1326 = vmatprep.subr.bf16.mxu1 %v1838_v7  ;;  %v593_v5 = vld [vmem:[%s2355_s14 + $0x130] sm:$0xff]  ;;  %v590_v6 = vld [vmem:[%s2355_s14 + $0x118] sm:$0xff] }
  0x83   : > { %v594_v7 = vld [vmem:[%s2355_s14 + $0x138] sm:$0xff]  ;;  %v1792_v10 = vcombine.high %v589_v4, %v593_v5  ;;  %v1791_v16 = vcombine.low %v589_v4, %v593_v5  ;;  %v645_v63 = vld [vmem:[%s2355_s14 + $0x2d0] sm:$0xff] }
  0x84   : > { %v1794_v11 = vcombine.high %v590_v6, %v594_v7  ;;  %v1793_v17 = vcombine.low %v590_v6, %v594_v7  ;;  %v653_v7 = vld [vmem:[%s2355_s14 + $0x310] sm:$0xff] }
  0x85   : > { %1274 = vmatpush1.bf16.msra.mxu0 %v1835_v12  ;;  %1327 = vmatpush1.bf16.msra.mxu1 %v1837_v13  ;;  %v597_v12 = vld [vmem:[%s2355_s14 + $0x150] sm:$0xff] }
  0x86   : > { %1275 = vmatprep.subr.bf16.mxu0 %v1844_v14  ;;  %1328 = vmatprep.subr.bf16.mxu1 %v1846_v15  ;;  %v601_v13 = vld [vmem:[%s2355_s14 + $0x170] sm:$0xff]  ;;  %v598_v14 = vld [vmem:[%s2355_s14 + $0x158] sm:$0xff] }
  0x87   : > { %v602_v15 = vld [vmem:[%s2355_s14 + $0x178] sm:$0xff]  ;;  %v1800_v18 = vcombine.high %v597_v12, %v601_v13  ;;  %v1799_v24 = vcombine.low %v597_v12, %v601_v13 }
  0x88   : > { %v1802_v19 = vcombine.high %v598_v14, %v602_v15 }
  0x89   : > { %1276 = vmatpush1.bf16.msra.mxu0 %v1843_v20  ;;  %1329 = vmatpush1.bf16.msra.mxu1 %v1845_v21  ;;  %v605_v20 = vld [vmem:[%s2355_s14 + $0x190] sm:$0xff] }
  0x8a   : > { %1277 = vmatprep.subr.bf16.mxu0 %v1852_v22  ;;  %1330 = vmatprep.subr.bf16.mxu1 %v1854_v23  ;;  %v609_v21 = vld [vmem:[%s2355_s14 + $0x1b0] sm:$0xff]  ;;  %v606_v22 = vld [vmem:[%s2355_s14 + $0x198] sm:$0xff] }
  0x8b   : > { %v610_v23 = vld [vmem:[%s2355_s14 + $0x1b8] sm:$0xff]  ;;  %v1808_v25 = vcombine.high %v605_v20, %v609_v21  ;;  %v1807_v31 = vcombine.low %v605_v20, %v609_v21 }
  0x8c   : > { %v1809_v32 = vcombine.low %v606_v22, %v610_v23 }
  0x8d   : > { %1278 = vmatpush1.bf16.msra.mxu0 %v1851_v26  ;;  %1331 = vmatpush1.bf16.msra.mxu1 %v1853_v27  ;;  %v1810_v26 = vcombine.high %v606_v22, %v610_v23  ;;  %v613_v27 = vld [vmem:[%s2355_s14 + $0x1d0] sm:$0xff] }
  0x8e   : > { %1867 = vmatprep.subr.msk.bf16.mxu0 %vm1228_vm1, %v1860_v28  ;;  %1870 = vmatprep.subr.msk.bf16.mxu1 %vm1228_vm1, %v1862_v30  ;;  %v617_v28 = vld [vmem:[%s2355_s14 + $0x1f0] sm:$0xff]  ;;  %v618_v30 = vld [vmem:[%s2355_s14 + $0x1f8] sm:$0xff] }
  0x8f   : > { %v1816_v33 = vcombine.high %v613_v27, %v617_v28  ;;  %v1818_v34 = vcombine.high %v614_v29, %v618_v30  ;;  %v1817_v40 = vcombine.low %v614_v29, %v618_v30 }
  0x91   : > { %1280 = vmatpush1.bf16.msra.mxu0 %v1230_v36  ;;  %1333 = vmatpush1.bf16.msra.mxu1 %v1236_v38  ;;  %v625_v36 = vld [vmem:[%s2355_s14 + $0x230] sm:$0xff]  ;;  %v626_v38 = vld [vmem:[%s2355_s14 + $0x238] sm:$0xff] }
  0x92   : > { %1359 = vmatprep.subr.bf16.mxu0 %v1760_v37  ;;  %1412 = vmatprep.subr.bf16.mxu1 %v1762_v39  ;;  %v622_v37 = vld [vmem:[%s2355_s14 + $0x218] sm:$0xff]  ;;  %v1815_v39 = vcombine.low %v613_v27, %v617_v28  ;;  %v1824_v41 = vcombine.high %v621_v35, %v625_v36 }
  0x93   : > { %v1826_v43 = vcombine.high %v622_v37, %v626_v38  ;;  %v1825_v51 = vcombine.low %v622_v37, %v626_v38 }
  0x94   : > { %1286 = vmatmul.mubr.bf16.vlgmr.msra.gmra.mrb[0].mxu0 %v2427_v42  ;;  %1339 = vmatmul.mubr.bf16.vlgmr.msra.gmra.mrb[0].mxu1 %v2427_v42 }
  0x95   : > { %1360 = vmatpush1.bf16.msra.mxu0 %v1759_v46  ;;  %1413 = vmatpush1.bf16.msra.mxu1 %v1761_v47  ;;  %v633_v46 = vld [vmem:[%s2355_s14 + $0x270] sm:$0xff]  ;;  %v630_v47 = vld [vmem:[%s2355_s14 + $0x258] sm:$0xff] }
  0x96   : > { %1361 = vmatprep.subr.bf16.mxu0 %v1768_v48  ;;  %1414 = vmatprep.subr.bf16.mxu1 %v1770_v49  ;;  %v634_v48 = vld [vmem:[%s2355_s14 + $0x278] sm:$0xff]  ;;  %v1823_v49 = vcombine.low %v621_v35, %v625_v36  ;;  %v1832_v52 = vcombine.high %v629_v45, %v633_v46  ;;  %v1536_v36 = vld [vmem:[%s2522_s24 + $0x8] sm:$0xff] }
  0x97   : > { %1869 = vmatprep.mubr.msk.bf16.mxu0 %vm1221_vm0, %v2434_v50  ;;  %1872 = vmatprep.mubr.msk.bf16.mxu1 %vm1221_vm0, %v2434_v50  ;;  %v1834_v53 = vcombine.high %v630_v47, %v634_v48  ;;  %v1833_v59 = vcombine.low %v630_v47, %v634_v48 }
  0x99   : > { %1362 = vmatpush1.bf16.msra.mxu0 %v1767_v55  ;;  %1415 = vmatpush1.bf16.msra.mxu1 %v1769_v56  ;;  %v641_v55 = vld [vmem:[%s2355_s14 + $0x2b0] sm:$0xff]  ;;  %v638_v56 = vld [vmem:[%s2355_s14 + $0x298] sm:$0xff] }
  0x9a   : > { %1363 = vmatprep.subr.bf16.mxu0 %v1776_v57  ;;  %1416 = vmatprep.subr.bf16.mxu1 %v1778_v58  ;;  %v642_v57 = vld [vmem:[%s2355_s14 + $0x2b8] sm:$0xff]  ;;  %v1831_v58 = vcombine.low %v629_v45, %v633_v46  ;;  %v1840_v60 = vcombine.high %v637_v54, %v641_v55 }
  0x9b   : > { %v1842_v62 = vcombine.high %v638_v56, %v642_v57  ;;  %v1841_v4 = vcombine.low %v638_v56, %v642_v57 }
  0x9c   : > { %1296 = vmatmul.mubr.bf16.gmra.mrb[4].mxu0 %v2451_v61  ;;  %1349 = vmatmul.mubr.bf16.gmra.mrb[4].mxu1 %v2451_v61 }
  0x9d   : > { %1364 = vmatpush1.bf16.msra.mxu0 %v1775_v0  ;;  %1417 = vmatpush1.bf16.msra.mxu1 %v1777_v1  ;;  %v649_v0 = vld [vmem:[%s2355_s14 + $0x2f0] sm:$0xff]  ;;  %v646_v1 = vld [vmem:[%s2355_s14 + $0x2d8] sm:$0xff] }
  0x9e   : > { %1365 = vmatprep.subr.bf16.mxu0 %v1784_v2  ;;  %1418 = vmatprep.subr.bf16.mxu1 %v1786_v3  ;;  %v650_v2 = vld [vmem:[%s2355_s14 + $0x2f8] sm:$0xff]  ;;  %v1839_v3 = vcombine.low %v637_v54, %v641_v55  ;;  %v1848_v5 = vcombine.high %v645_v63, %v649_v0 }
  0x9f   : > { %1874 = vmatprep.mubr.msk.bf16.mxu0 %vm1221_vm0, %v2343_v44  ;;  %1877 = vmatprep.mubr.msk.bf16.mxu1 %vm1221_vm0, %v2343_v44  ;;  %v1801_v44 = vcombine.low %v598_v14, %v602_v15  ;;  %v1850_v6 = vcombine.high %v646_v1, %v650_v2  ;;  %v1849_v12 = vcombine.low %v646_v1, %v650_v2  ;;  %v661_v15 = vld [vmem:[%s2355_s14 + $0x350] sm:$0xff] }
  0xa0   : > { %v1863_v20 = vcombine.low %v661_v15, %v661_v15 }
  0xa1   : > { %1366 = vmatpush1.bf16.msra.mxu0 %v1783_v8  ;;  %1419 = vmatpush1.bf16.msra.mxu1 %v1785_v9  ;;  %v657_v8 = vld [vmem:[%s2355_s14 + $0x330] sm:$0xff]  ;;  %v654_v9 = vld [vmem:[%s2355_s14 + $0x318] sm:$0xff] }
  0xa2   : > { %1367 = vmatprep.subr.bf16.mxu0 %v1792_v10  ;;  %1420 = vmatprep.subr.bf16.mxu1 %v1794_v11  ;;  %v658_v10 = vld [vmem:[%s2355_s14 + $0x338] sm:$0xff]  ;;  %v1847_v11 = vcombine.low %v645_v63, %v649_v0  ;;  %v1856_v13 = vcombine.high %v653_v7, %v657_v8  ;;  %v1242_v23 = vsel %vm1228_vm1, %v1863_v20, 0 }
  0xa3   : > { %v1858_v14 = vcombine.high %v654_v9, %v658_v10 }
  0xa5   : > { %1368 = vmatpush1.bf16.msra.mxu0 %v1791_v16  ;;  %1421 = vmatpush1.bf16.msra.mxu1 %v1793_v17  ;;  %v662_v16 = vld [vmem:[%s2355_s14 + $0x358] sm:$0xff]  ;;  %v1855_v17 = vcombine.low %v653_v7, %v657_v8 }
  0xa6   : > { %1369 = vmatprep.subr.bf16.mxu0 %v1800_v18  ;;  %1422 = vmatprep.subr.bf16.mxu1 %v1802_v19  ;;  %v1857_v18 = vcombine.low %v654_v9, %v658_v10  ;;  %v1864_v19 = vcombine.high %v661_v15, %v661_v15  ;;  %v1866_v21 = vcombine.high %v662_v16, %v662_v16 }
  0xa7   : > { %v1865_v22 = vcombine.low %v662_v16, %v662_v16 }
  0xa9   : > { %1370 = vmatpush1.bf16.msra.mxu0 %v1799_v24  ;;  %1423 = vmatpush1.bf16.msra.mxu1 %v1801_v44  ;;  %v1248_v24 = vsel %vm1228_vm1, %v1865_v22, 0 }
  0xaa   : > { %1371 = vmatprep.subr.bf16.mxu0 %v1808_v25  ;;  %1424 = vmatprep.subr.bf16.mxu1 %v1810_v26 }
  0xad   : > { %1372 = vmatpush1.bf16.msra.mxu0 %v1807_v31  ;;  %1425 = vmatpush1.bf16.msra.mxu1 %v1809_v32 }
  0xae   : > { %1373 = vmatprep.subr.bf16.mxu0 %v1816_v33  ;;  %1426 = vmatprep.subr.bf16.mxu1 %v1818_v34  ;;  %v1535_v33 = vld [vmem:[%s2522_s24] sm:$0xff] }
  0xaf   : > { %v1539_v46 = vunpack.c.l.bf16 %v1535_v33 }
  0xb1   : > { %1374 = vmatpush1.bf16.msra.mxu0 %v1815_v39  ;;  %1427 = vmatpush1.bf16.msra.mxu1 %v1817_v40  ;;  %v1547_v63 = vmul.f32 0.1, %v1539_v46 }
  0xb2   : > { %1375 = vmatprep.subr.bf16.mxu0 %v1824_v41  ;;  %1428 = vmatprep.subr.bf16.mxu1 %v1826_v43 }
  0xb5   : > { %1376 = vmatpush1.bf16.msra.mxu0 %v1823_v49  ;;  %1429 = vmatpush1.bf16.msra.mxu1 %v1825_v51 }
  0xb6   : > { %1377 = vmatprep.subr.bf16.mxu0 %v1832_v52  ;;  %1430 = vmatprep.subr.bf16.mxu1 %v1834_v53  ;;  %v1541_v52 = vunpack.c.l.bf16 %v1536_v36 }
  0xb8   : > { %v1549_v2 = vmul.f32 0.1, %v1541_v52 }
  0xb9   : > { %1378 = vmatpush1.bf16.msra.mxu0 %v1831_v58  ;;  %1431 = vmatpush1.bf16.msra.mxu1 %v1833_v59  ;;  %v1540_v58 = vunpack.c.h.bf16 %v1535_v33 }
  0xba   : > { %1379 = vmatprep.subr.bf16.mxu0 %v1840_v60  ;;  %1432 = vmatprep.subr.bf16.mxu1 %v1842_v62  ;;  %v1542_v62 = vunpack.c.h.bf16 %v1536_v36 }
  0xbb   : > { %v1548_v7 = vmul.f32 0.1, %v1540_v58 }
  0xbd   : > { %1380 = vmatpush1.bf16.msra.mxu0 %v1839_v3  ;;  %1433 = vmatpush1.bf16.msra.mxu1 %v1841_v4 }
  0xbe   : > { %1381 = vmatprep.subr.bf16.mxu0 %v1848_v5  ;;  %1434 = vmatprep.subr.bf16.mxu1 %v1850_v6 }
  0xc1   : > { %1382 = vmatpush1.bf16.msra.mxu0 %v1847_v11  ;;  %1435 = vmatpush1.bf16.msra.mxu1 %v1849_v12  ;;  %v1550_v11 = vmul.f32 0.1, %v1542_v62 }
  0xc2   : > { %1383 = vmatprep.subr.bf16.mxu0 %v1856_v13  ;;  %1436 = vmatprep.subr.bf16.mxu1 %v1858_v14 }
  0xc5   : > { %1384 = vmatpush1.bf16.msra.mxu0 %v1855_v17  ;;  %1437 = vmatpush1.bf16.msra.mxu1 %v1857_v18 }
  0xc6   : > { %1873 = vmatprep.subr.msk.bf16.mxu0 %vm1228_vm1, %v1864_v19  ;;  %1876 = vmatprep.subr.msk.bf16.mxu1 %vm1228_vm1, %v1866_v21 }
  0xc9   : > { %1386 = vmatpush1.bf16.msra.mxu0 %v1242_v23  ;;  %1439 = vmatpush1.bf16.msra.mxu1 %v1248_v24 }
  0xcc   : > { %1392 = vmatmul.mubr.bf16.vlgmr.msra.gmra.mrb[8].mxu0 %v2427_v42  ;;  %1445 = vmatmul.mubr.bf16.vlgmr.msra.gmra.mrb[8].mxu1 %v2427_v42 }
  0xcd   : > { %1875 = vmatprep.mubr.msk.bf16.mxu0 %vm1221_vm0, %v2434_v50  ;;  %1878 = vmatprep.mubr.msk.bf16.mxu1 %vm1221_vm0, %v2434_v50 }
  0xd4   : > { %1402 = vmatmul.mubr.bf16.gmra.mrb[12].mxu0 %v2451_v61  ;;  %1455 = vmatmul.mubr.bf16.gmra.mrb[12].mxu1 %v2451_v61 }
  0xd5   : > { %v2525_v35 = vpop.permute.xlu0 %1492  ;;  %v2534_v20 = vpop.permute.xlu1 %1580 }
  0xd9   : > { %v2532_v12 = vpop.permute.xlu0 %1566 }
 0x167   : > { %v1287_v42 = vpop.f32.mrb[0].mxu0  ;;  %v1340_v44 = vpop.f32.mrb[0].mxu1 }
 0x168   : > { %v1289_v25 = vpop.f32.mrb[1].mxu0  ;;  %v1342_v26 = vpop.f32.mrb[1].mxu1 }
 0x169   : > { %v1291_v50 = vpop.f32.mrb[2].mxu0  ;;  %v1344_v28 = vpop.f32.mrb[2].mxu1 }
 0x16a   : > { %v1465_v27 = vmax.f32 %v1287_v42, %v1291_v50  ;;  %v1293_v29 = vpop.f32.mrb[3].mxu0  ;;  %v1467_v61 = vmax.f32 %v1340_v44, %v1344_v28  ;;  %v1346_v31 = vpop.f32.mrb[3].mxu1 }
 0x16b   : > { %v1466_v30 = vmax.f32 %v1289_v25, %v1293_v29  ;;  %v1468_v32 = vmax.f32 %v1342_v26, %v1346_v31 }
 0x16f   : > { %v1297_v34 = vpop.f32.mrb[4].mxu0  ;;  %v1350_v38 = vpop.f32.mrb[4].mxu1 }
 0x170   : > { %v1473_v37 = vmax.f32 %v1465_v27, %v1297_v34  ;;  %v1299_v39 = vpop.f32.mrb[5].mxu0  ;;  %v1475_v40 = vmax.f32 %v1467_v61, %v1350_v38  ;;  %v1352_v43 = vpop.f32.mrb[5].mxu1 }
 0x171   : > { %v1474_v41 = vmax.f32 %v1466_v30, %v1299_v39  ;;  %v1301_v45 = vpop.f32.mrb[6].mxu0  ;;  %v1476_v47 = vmax.f32 %v1468_v32, %v1352_v43  ;;  %v1354_v49 = vpop.f32.mrb[6].mxu1 }
 0x172   : > { %v1481_v48 = vmax.f32 %v1473_v37, %v1301_v45  ;;  %v1303_v51 = vpop.f32.mrb[7].mxu0  ;;  %v1483_v53 = vmax.f32 %v1475_v40, %v1354_v49  ;;  %v1356_v55 = vpop.f32.mrb[7].mxu1  ;;  %v1538_v45 = vld [vmem:[%s2522_s24 + $0x18] sm:$0xff] }
 0x173   : > { %v1482_v54 = vmax.f32 %v1474_v41, %v1303_v51  ;;  %v1484_v56 = vmax.f32 %v1476_v47, %v1356_v55  ;;  %v1537_v41 = vld [vmem:[%s2522_s24 + $0x10] sm:$0xff]  ;;  %v1545_v58 = vunpack.c.l.bf16 %v1538_v45 }
 0x174   : > { %v1495_v57 = vadd.f32 %v2525_v35, %v1481_v48  ;;  %v1497_v60 = vadd.f32 %v2525_v35, %v1483_v53 }
 0x175   : > { %v1496_v59 = vadd.f32 %v2525_v35, %v1482_v54  ;;  %v1498_v0 = vadd.f32 %v2525_v35, %v1484_v56  ;;  %v1543_v54 = vunpack.c.l.bf16 %v1537_v41 }
 0x176   : > { %vm1503_vm2 = vcmp.gt.f32.partialorder %v1495_v57, 0.0  ;;  %v1511_v1 = vmul.f32 0.01, %v1495_v57  ;;  %vm1505_vm4 = vcmp.gt.f32.partialorder %v1497_v60, 0.0  ;;  %v1513_v4 = vmul.f32 0.01, %v1497_v60 }
 0x177   : > { %vm1504_vm3 = vcmp.gt.f32.partialorder %v1496_v59, 0.0  ;;  %v1512_v3 = vmul.f32 0.01, %v1496_v59  ;;  %vm1506_vm5 = vcmp.gt.f32.partialorder %v1498_v0, 0.0  ;;  %v1514_v5 = vmul.f32 0.01, %v1498_v0 }
 0x178   : > { %v1519_v6 = vsel %vm1503_vm2, %v1495_v57, %v1511_v1  ;;  %v1521_v9 = vsel %vm1505_vm4, %v1497_v60, %v1513_v4  ;;  %v1544_v1 = vunpack.c.h.bf16 %v1537_v41 }
 0x179   : > { %v1520_v8 = vsel %vm1504_vm3, %v1496_v59, %v1512_v3  ;;  %v1527_v10 = vmul.f32 0.9, %v1519_v6  ;;  %v1522_v13 = vsel %vm1506_vm5, %v1498_v0, %v1514_v5  ;;  %v1529_v15 = vmul.f32 0.9, %v1521_v9 }
 0x17a   : > { %v1528_v14 = vmul.f32 0.9, %v1520_v8  ;;  %v1530_v16 = vmul.f32 0.9, %v1522_v13  ;;  %v1551_v3 = vmul.f32 0.1, %v1543_v54  ;;  %v1546_v6 = vunpack.c.h.bf16 %v1538_v45 }
 0x17b   : > { %v1555_v17 = vadd.f32 %v1547_v63, %v1527_v10  ;;  %v1557_v19 = vadd.f32 %v1549_v2, %v1529_v15  ;;  %v1553_v8 = vmul.f32 0.1, %v1545_v58 }
 0x17c   : > { %v1556_v18 = vadd.f32 %v1548_v7, %v1528_v14  ;;  %v1558_v21 = vadd.f32 %v1550_v11, %v1530_v16  ;;  %v1552_v14 = vmul.f32 0.1, %v1544_v1 }
 0x17d   : > { %v1569_v22 = vmul.f32 %v2532_v12, %v1555_v17  ;;  %v1571_v24 = vmul.f32 %v2532_v12, %v1557_v19  ;;  %v1554_v19 = vmul.f32 0.1, %v1546_v6 }
 0x17e   : > { %v1570_v23 = vmul.f32 %v2532_v12, %v1556_v18  ;;  %v1572_v42 = vmul.f32 %v2532_v12, %v1558_v21 }
 0x17f   : > { %v1583_v44 = vadd.f32 %v2534_v20, %v1569_v22  ;;  %v1585_v26 = vadd.f32 %v2534_v20, %v1571_v24 }
 0x180   : > { %v1584_v25 = vadd.f32 %v2534_v20, %v1570_v23  ;;  %v1586_v50 = vadd.f32 %v2534_v20, %v1572_v42 }
 0x182   : > { %v1885_v27 = vpack.c.bf16 %v1584_v25, %v1583_v44  ;;  %v1886_v28 = vpack.c.bf16 %v1586_v50, %v1585_v26 }
 0x184   : > { %1623 = vst [vmem:[%s2548_s15] sm:$0xff] %v1885_v27  ;;  %1624 = vst [vmem:[%s2548_s15 + $0x8] sm:$0xff] %v1886_v28 }
 0x19f   : > { %v1393_v29 = vpop.f32.mrb[8].mxu0  ;;  %v1446_v61 = vpop.f32.mrb[8].mxu1 }
 0x1a0   : > { %v1395_v30 = vpop.f32.mrb[9].mxu0  ;;  %v1448_v31 = vpop.f32.mrb[9].mxu1 }
 0x1a1   : > { %v1397_v32 = vpop.f32.mrb[10].mxu0  ;;  %v1450_v34 = vpop.f32.mrb[10].mxu1 }
 0x1a2   : > { %v1469_v33 = vmax.f32 %v1393_v29, %v1397_v32  ;;  %v1399_v36 = vpop.f32.mrb[11].mxu0  ;;  %v1471_v37 = vmax.f32 %v1446_v61, %v1450_v34  ;;  %v1452_v39 = vpop.f32.mrb[11].mxu1 }
 0x1a3   : > { %v1470_v38 = vmax.f32 %v1395_v30, %v1399_v36  ;;  %v1472_v40 = vmax.f32 %v1448_v31, %v1452_v39 }
 0x1a7   : > { %v1403_v43 = vpop.f32.mrb[12].mxu0  ;;  %v1456_v47 = vpop.f32.mrb[12].mxu1 }
 0x1a8   : > { %v1477_v46 = vmax.f32 %v1469_v33, %v1403_v43  ;;  %v1405_v48 = vpop.f32.mrb[13].mxu0  ;;  %v1479_v49 = vmax.f32 %v1471_v37, %v1456_v47  ;;  %v1458_v52 = vpop.f32.mrb[13].mxu1 }
 0x1a9   : > { %v1478_v51 = vmax.f32 %v1470_v38, %v1405_v48  ;;  %v1407_v53 = vpop.f32.mrb[14].mxu0  ;;  %v1480_v55 = vmax.f32 %v1472_v40, %v1458_v52  ;;  %v1460_v57 = vpop.f32.mrb[14].mxu1 }
 0x1aa   : > { %v1485_v56 = vmax.f32 %v1477_v46, %v1407_v53  ;;  %v1409_v59 = vpop.f32.mrb[15].mxu0  ;;  %v1487_v60 = vmax.f32 %v1479_v49, %v1460_v57  ;;  %v1462_v63 = vpop.f32.mrb[15].mxu1 }
 0x1ab   : > { %v1486_v62 = vmax.f32 %v1478_v51, %v1409_v59  ;;  %v1488_v2 = vmax.f32 %v1480_v55, %v1462_v63 }
 0x1ac   : > { %v1499_v0 = vadd.f32 %v2525_v35, %v1485_v56  ;;  %v1501_v4 = vadd.f32 %v2525_v35, %v1487_v60 }
 0x1ad   : > { %v1500_v5 = vadd.f32 %v2525_v35, %v1486_v62  ;;  %v1502_v9 = vadd.f32 %v2525_v35, %v1488_v2 }
 0x1ae   : > { %vm1507_vm6 = vcmp.gt.f32.partialorder %v1499_v0, 0.0  ;;  %v1515_v7 = vmul.f32 0.01, %v1499_v0  ;;  %vm1509_vm7 = vcmp.gt.f32.partialorder %v1501_v4, 0.0  ;;  %v1517_v10 = vmul.f32 0.01, %v1501_v4 }
 0x1af   : > { %vm1508_vm8 = vcmp.gt.f32.partialorder %v1500_v5, 0.0  ;;  %v1516_v11 = vmul.f32 0.01, %v1500_v5  ;;  %vm1510_vm9 = vcmp.gt.f32.partialorder %v1502_v9, 0.0  ;;  %v1518_v15 = vmul.f32 0.01, %v1502_v9 }
 0x1b0   : > { %v1523_v13 = vsel %vm1507_vm6, %v1499_v0, %v1515_v7  ;;  %v1525_v17 = vsel %vm1509_vm7, %v1501_v4, %v1517_v10 }
 0x1b1   : > { %v1531_v16 = vmul.f32 0.9, %v1523_v13  ;;  %v1524_v18 = vsel %vm1508_vm8, %v1500_v5, %v1516_v11  ;;  %v1533_v21 = vmul.f32 0.9, %v1525_v17  ;;  %v1526_v23 = vsel %vm1510_vm9, %v1502_v9, %v1518_v15 }
 0x1b2   : > { %v1532_v22 = vmul.f32 0.9, %v1524_v18  ;;  %v1534_v42 = vmul.f32 0.9, %v1526_v23 }
 0x1b3   : > { %v1559_v24 = vadd.f32 %v1551_v3, %v1531_v16  ;;  %v1561_v35 = vadd.f32 %v1553_v8, %v1533_v21 }
 0x1b4   : > { %v1560_v44 = vadd.f32 %v1552_v14, %v1532_v22  ;;  %v1562_v26 = vadd.f32 %v1554_v19, %v1534_v42 }
 0x1b5   : > { %v1573_v25 = vmul.f32 %v2532_v12, %v1559_v24  ;;  %v1575_v50 = vmul.f32 %v2532_v12, %v1561_v35 }
 0x1b6   : > { %v1574_v27 = vmul.f32 %v2532_v12, %v1560_v44  ;;  %v1576_v29 = vmul.f32 %v2532_v12, %v1562_v26 }
 0x1b7   : > { %v1587_v28 = vadd.f32 %v2534_v20, %v1573_v25  ;;  %v1589_v61 = vadd.f32 %v2534_v20, %v1575_v50 }
 0x1b8   : > { %v1588_v30 = vadd.f32 %v2534_v20, %v1574_v27  ;;  %v1590_v31 = vadd.f32 %v2534_v20, %v1576_v29 }
 0x1ba   : > { %v1887_v32 = vpack.c.bf16 %v1588_v30, %v1587_v28  ;;  %v1888_v33 = vpack.c.bf16 %v1590_v31, %v1589_v61 }
 0x1bc   : > { %1625 = vst [vmem:[%s2548_s15 + $0x10] sm:$0xff] %v1887_v32  ;;  %1626 = vst [vmem:[%s2548_s15 + $0x18] sm:$0xff] %v1888_v33 }
 0x1bd PF: > { %s16_s27 = sadd.s32 1, %s2019_s27   ;;  %s2597_s21 = smov %s1999_s22 }
 0x1be   : > { %p13_p12 = scmp.ge.s32.totalorder %s16_s27, 6   ;;  %s2598_s22 = smov %s2108_s10 }
 0x1bf   : > { %s2599_s23 = smov %s2011_s25  ;;  %s2600_s24 = smov %s2015_s26 }
 0x1c0   : > { %s2601_s25 = smov %s2604_s28  ;;  %s2602_s26 = smov %s2608_s29 }
 0x1c1   :  { %15 = sbr.rel (!%p13_p12) target bundleno = 4 (0x4), region = 105 }

// kernel: dga3net_forward.14
= control target key start
LH: loop header
LB: loop body
LE: loop exit
PB: predicated region body
PF: predicated region fallthrough
CT: control target
= control target key end

     0   :  { %s1169_s12 = smov 0   ;;  %s1171_s13 = smov 0   ;;  %s1300_s0 = inlined_call_operand.vmem [shape: bf16[64,216], index: 0, kind: input, shape index: {}]   ;;  %s1301_s1 = inlined_call_operand.vmem [shape: bf16[2,216,512], index: 1, kind: input, shape index: {}]   ;;  %s1302_s2 = inlined_call_operand.vmem [shape: f32[16,1], index: 2, kind: input, shape index: {}]   ;;  %s1303_s3 = inlined_call_operand.vmem [shape: bf16[2,16,512], index: 3, kind: output, shape index: {}]  }
   0x1   :  { %s1173_s14 = smov 0  }
   0x2 LB: > { %s25_s15 = sadd.s32 1, %s1142_s13  ;;  %p914_p0 = scmp.ge.s32.totalorder %s1146_s14, 1  ;;  %s1146_s14 = sphi %s1173_s14, %s13_s14   ;;  %s1142_s13 = sphi %s1171_s13, %s1305_s13   ;;  %s1138_s12 = sphi %s1169_s12, %s1304_s12  }
   0x3   : > { %p27_p1 = scmp.ge.s32.totalorder %s25_s15, 2  ;;  %p158_p2 = scmp.lt.s32.totalorder %s1146_s14, 3 }
   0x5   : > { %s1307_s15 = smov (%p27_p1, %s25_s15), 0  ;;  %p159_p3 = pnand %p914_p0, %p158_p2 }
   0x6   : > { %p191_p4 = scmp.lt.s32.totalorder (!%p159_p3), %s1138_s12, 1  ;;  %v1114_v0 = vld [vmem:[%s1300_s0 + $0x4] ss:$8 sps:$4 sm:$0xff] (!%p159_p3)   ;;  %vm579_vm0 = vcmask (!%p159_p3), 719872   ;;  %v1148_v1 = vmov (!%p159_p3), 0   ;;  %vm592_vm1 = vcmask (!%p159_p3), 1043456  }
   0x7   : > { %162 = sbr.rel (%p159_p3) target bundleno = 321 (0x141), region = 32  ;;  %1029 = vset.pattern.permute.xlu0 (!%p159_p3), %v1148_v1  ;;  %983 = vmatprep.mubr.msk.bf16.mxu0 (!%p159_p3), %vm579_vm0, %v1114_v0  ;;  %v775_v2 = vld [vmem:[%s1302_s2] sm:$0xff] (!%p159_p3)  ;;  %v776_v3 = vld [vmem:[%s1302_s2 + $0x8] sm:$0xff] (!%p159_p3)  ;;  %v1115_v1 = vld [vmem:[%s1300_s0 + $0x14] ss:$8 sps:$4 sm:$0xff] (!%p159_p3)  }
   0x8   : > { %988 = vmatprep.mubr.msk.bf16.mxu1 (!%p159_p3), %vm579_vm0, %v1114_v0  ;;  %779 = vperm.xlu0 (!%p159_p3), %1029, %v775_v2   ;;  %v1112_v0 = vld [vmem:[%s1300_s0] ss:$8 sps:$4 sm:$0xff] (!%p159_p3)   ;;  %v1117_v2 = vld [vmem:[%s1300_s0 + $0x10] ss:$8 sps:$4 sm:$0xff] (!%p159_p3)  }
   0xc   : > { %784 = vperm.xlu0 (!%p159_p3), %1029, %v776_v3   ;;  %v1118_v3 = vld [vmem:[%s1300_s0 + $0x24] ss:$8 sps:$4 sm:$0xff] (!%p159_p3)  }
   0xe   : > { %s1309_s12 = smov (!%p191_p4, %s1138_s12), 1 }
   0xf   : > { %s1003_s18 = smul.u32 432, %s1309_s12  ;;  %s998_s17 = sshll.u32 %s1309_s12, 5 }
  0x10   : > { %s208_s20 = scalar_lea.vmem %s1303_s3, %s998_s17 }
  0x11   : > { %s1201_s23 = scalar_lea.vmem %s1301_s1, %s1003_s18 }
  0x12   : > { %v1030_v4 = vld [vmem:[%s1201_s23 + $0x4] ss:$16 sps:$4 sm:$0xff]   ;;  %v1032_v5 = vld [vmem:[%s1201_s23 + $0xc] ss:$16 sps:$4 sm:$0xff]   ;;  %v1034_v6 = vld [vmem:[%s1201_s23] ss:$16 sps:$4 sm:$0xff]  }
  0x13   : > { %605 = vmatprep.subr.bf16.mxu0 %v1030_v4  ;;  %v1035_v7 = vld [vmem:[%s1201_s23 + $0x8] ss:$16 sps:$4 sm:$0xff]   ;;  %678 = vmatprep.subr.bf16.mxu1 %v1032_v5  ;;  %v1036_v8 = vld [vmem:[%s1201_s23 + $0x24] ss:$16 sps:$4 sm:$0xff]   ;;  %v1038_v9 = vld [vmem:[%s1201_s23 + $0x2c] ss:$16 sps:$4 sm:$0xff]  }
  0x14   : > { %606 = vmatpush1.bf16.msra.mxu0 %v1034_v6  ;;  %679 = vmatpush1.bf16.msra.mxu1 %v1035_v7  ;;  %v1040_v10 = vld [vmem:[%s1201_s23 + $0x20] ss:$16 sps:$4 sm:$0xff]   ;;  %v1041_v11 = vld [vmem:[%s1201_s23 + $0x28] ss:$16 sps:$4 sm:$0xff]   ;;  %v1042_v12 = vld [vmem:[%s1201_s23 + $0x44] ss:$16 sps:$4 sm:$0xff]  }
  0x15   : > { %607 = vmatprep.subr.bf16.mxu0 %v1036_v8  ;;  %680 = vmatprep.subr.bf16.mxu1 %v1038_v9  ;;  %v1044_v13 = vld [vmem:[%s1201_s23 + $0x4c] ss:$16 sps:$4 sm:$0xff]   ;;  %v1046_v14 = vld [vmem:[%s1201_s23 + $0x40] ss:$16 sps:$4 sm:$0xff]   ;;  %v1047_v15 = vld [vmem:[%s1201_s23 + $0x48] ss:$16 sps:$4 sm:$0xff]  }
  0x16   : > { %v1048_v16 = vld [vmem:[%s1201_s23 + $0x64] ss:$16 sps:$4 sm:$0xff]   ;;  %v1050_v17 = vld [vmem:[%s1201_s23 + $0x6c] ss:$16 sps:$4 sm:$0xff]   ;;  %v1052_v18 = vld [vmem:[%s1201_s23 + $0x60] ss:$16 sps:$4 sm:$0xff]  }
  0x17   : > { %v1053_v19 = vld [vmem:[%s1201_s23 + $0x68] ss:$16 sps:$4 sm:$0xff]   ;;  %v1054_v20 = vld [vmem:[%s1201_s23 + $0x84] ss:$16 sps:$4 sm:$0xff]   ;;  %v1056_v21 = vld [vmem:[%s1201_s23 + $0x8c] ss:$16 sps:$4 sm:$0xff]  }
  0x18   : > { %608 = vmatpush1.bf16.msra.mxu0 %v1040_v10  ;;  %681 = vmatpush1.bf16.msra.mxu1 %v1041_v11  ;;  %v1058_v22 = vld [vmem:[%s1201_s23 + $0x80] ss:$16 sps:$4 sm:$0xff]   ;;  %v1059_v23 = vld [vmem:[%s1201_s23 + $0x88] ss:$16 sps:$4 sm:$0xff]   ;;  %v1060_v24 = vld [vmem:[%s1201_s23 + $0xa4] ss:$16 sps:$4 sm:$0xff]  }
  0x19   : > { %609 = vmatprep.subr.bf16.mxu0 %v1042_v12  ;;  %682 = vmatprep.subr.bf16.mxu1 %v1044_v13  ;;  %v1062_v25 = vld [vmem:[%s1201_s23 + $0xac] ss:$16 sps:$4 sm:$0xff]   ;;  %v1064_v26 = vld [vmem:[%s1201_s23 + $0xa0] ss:$16 sps:$4 sm:$0xff]   ;;  %v1065_v27 = vld [vmem:[%s1201_s23 + $0xa8] ss:$16 sps:$4 sm:$0xff]  }
  0x1a   : > { %v1066_v28 = vld [vmem:[%s1201_s23 + $0xc4] ss:$16 sps:$4 sm:$0xff]   ;;  %v1068_v29 = vld [vmem:[%s1201_s23 + $0xcc] ss:$16 sps:$4 sm:$0xff]   ;;  %v1070_v30 = vld [vmem:[%s1201_s23 + $0xc0] ss:$16 sps:$4 sm:$0xff]  }
  0x1b   : > { %v1071_v31 = vld [vmem:[%s1201_s23 + $0xc8] ss:$16 sps:$4 sm:$0xff]   ;;  %v1072_v32 = vld [vmem:[%s1201_s23 + $0xe4] ss:$16 sps:$4 sm:$0xff]   ;;  %v1074_v33 = vld [vmem:[%s1201_s23 + $0xec] ss:$16 sps:$4 sm:$0xff]  }
  0x1c   : > { %610 = vmatpush1.bf16.msra.mxu0 %v1046_v14  ;;  %683 = vmatpush1.bf16.msra.mxu1 %v1047_v15  ;;  %v1076_v34 = vld [vmem:[%s1201_s23 + $0xe0] ss:$16 sps:$4 sm:$0xff]   ;;  %v1077_v35 = vld [vmem:[%s1201_s23 + $0xe8] ss:$16 sps:$4 sm:$0xff]   ;;  %v1078_v36 = vld [vmem:[%s1201_s23 + $0x104] ss:$16 sps:$4 sm:$0xff]  }
  0x1d   : > { %611 = vmatprep.subr.bf16.mxu0 %v1048_v16  ;;  %684 = vmatprep.subr.bf16.mxu1 %v1050_v17  ;;  %v1080_v37 = vld [vmem:[%s1201_s23 + $0x10c] ss:$16 sps:$4 sm:$0xff]   ;;  %v1082_v38 = vld [vmem:[%s1201_s23 + $0x100] ss:$16 sps:$4 sm:$0xff]   ;;  %v1083_v39 = vld [vmem:[%s1201_s23 + $0x108] ss:$16 sps:$4 sm:$0xff]  }
  0x1e   : > { %v1084_v40 = vld [vmem:[%s1201_s23 + $0x124] ss:$16 sps:$4 sm:$0xff]   ;;  %v1086_v41 = vld [vmem:[%s1201_s23 + $0x12c] ss:$16 sps:$4 sm:$0xff]   ;;  %v1088_v42 = vld [vmem:[%s1201_s23 + $0x120] ss:$16 sps:$4 sm:$0xff]  }
  0x1f   : > { %v1089_v43 = vld [vmem:[%s1201_s23 + $0x128] ss:$16 sps:$4 sm:$0xff]   ;;  %v1090_v44 = vld [vmem:[%s1201_s23 + $0x144] ss:$16 sps:$4 sm:$0xff]   ;;  %v1092_v45 = vld [vmem:[%s1201_s23 + $0x14c] ss:$16 sps:$4 sm:$0xff]  }
  0x20   : > { %612 = vmatpush1.bf16.msra.mxu0 %v1052_v18  ;;  %685 = vmatpush1.bf16.msra.mxu1 %v1053_v19  ;;  %v1094_v46 = vld [vmem:[%s1201_s23 + $0x140] ss:$16 sps:$4 sm:$0xff]   ;;  %v1095_v47 = vld [vmem:[%s1201_s23 + $0x148] ss:$16 sps:$4 sm:$0xff]   ;;  %v1096_v48 = vld [vmem:[%s1201_s23 + $0x164] ss:$16 sps:$4 sm:$0xff]  }
  0x21   : > { %613 = vmatprep.subr.bf16.mxu0 %v1054_v20  ;;  %686 = vmatprep.subr.bf16.mxu1 %v1056_v21  ;;  %v1098_v49 = vld [vmem:[%s1201_s23 + $0x16c] ss:$16 sps:$4 sm:$0xff]   ;;  %v1100_v50 = vld [vmem:[%s1201_s23 + $0x160] ss:$16 sps:$4 sm:$0xff]   ;;  %v1101_v51 = vld [vmem:[%s1201_s23 + $0x168] ss:$16 sps:$4 sm:$0xff]  }
  0x22   : > { %v1102_v52 = vld [vmem:[%s1201_s23 + $0x184] ss:$16 sps:$4 sm:$0xff]   ;;  %v1104_v53 = vld [vmem:[%s1201_s23 + $0x18c] ss:$16 sps:$4 sm:$0xff]   ;;  %v1106_v56 = vld [vmem:[%s1201_s23 + $0x180] ss:$16 sps:$4 sm:$0xff]  }
  0x23   : > { %v271_v54 = vld [vmem:[%s1201_s23 + $0x1a0] sm:$0xff]  ;;  %v272_v55 = vld [vmem:[%s1201_s23 + $0x1a8] sm:$0xff]  ;;  %v1121_v5 = vld [vmem:[%s1300_s0 + $0x34] ss:$8 sps:$4 sm:$0xff]  }
  0x24   : > { %614 = vmatpush1.bf16.msra.mxu0 %v1058_v22  ;;  %687 = vmatpush1.bf16.msra.mxu1 %v1059_v23  ;;  %v1107_v57 = vld [vmem:[%s1201_s23 + $0x188] ss:$16 sps:$4 sm:$0xff]   ;;  %v979_v58 = vcombine.high %v271_v54, %v271_v54  ;;  %v981_v59 = vcombine.high %v272_v55, %v272_v55  ;;  %v978_v60 = vcombine.low %v271_v54, %v271_v54 }
  0x25   : > { %615 = vmatprep.subr.bf16.mxu0 %v1060_v24  ;;  %688 = vmatprep.subr.bf16.mxu1 %v1062_v25  ;;  %v980_v61 = vcombine.low %v272_v55, %v272_v55  ;;  %v1120_v4 = vld [vmem:[%s1300_s0 + $0x20] ss:$8 sps:$4 sm:$0xff]   ;;  %v1123_v6 = vld [vmem:[%s1300_s0 + $0x30] ss:$8 sps:$4 sm:$0xff]  }
  0x26   : > { %v594_v62 = vsel %vm592_vm1, %v978_v60, 0 }
  0x27   : > { %v600_v63 = vsel %vm592_vm1, %v980_v61, 0 }
  0x28   : > { %616 = vmatpush1.bf16.msra.mxu0 %v1064_v26  ;;  %689 = vmatpush1.bf16.msra.mxu1 %v1065_v27 }
  0x29   : > { %617 = vmatprep.subr.bf16.mxu0 %v1066_v28  ;;  %690 = vmatprep.subr.bf16.mxu1 %v1068_v29 }
  0x2c   : > { %618 = vmatpush1.bf16.msra.mxu0 %v1070_v30  ;;  %691 = vmatpush1.bf16.msra.mxu1 %v1071_v31 }
  0x2d   : > { %619 = vmatprep.subr.bf16.mxu0 %v1072_v32  ;;  %692 = vmatprep.subr.bf16.mxu1 %v1074_v33 }
  0x30   : > { %620 = vmatpush1.bf16.msra.mxu0 %v1076_v34  ;;  %693 = vmatpush1.bf16.msra.mxu1 %v1077_v35 }
  0x31   : > { %621 = vmatprep.subr.bf16.mxu0 %v1078_v36  ;;  %694 = vmatprep.subr.bf16.mxu1 %v1080_v37 }
  0x34   : > { %622 = vmatpush1.bf16.msra.mxu0 %v1082_v38  ;;  %695 = vmatpush1.bf16.msra.mxu1 %v1083_v39 }
  0x35   : > { %623 = vmatprep.subr.bf16.mxu0 %v1084_v40  ;;  %696 = vmatprep.subr.bf16.mxu1 %v1086_v41 }
  0x38   : > { %624 = vmatpush1.bf16.msra.mxu0 %v1088_v42  ;;  %697 = vmatpush1.bf16.msra.mxu1 %v1089_v43 }
  0x39   : > { %625 = vmatprep.subr.bf16.mxu0 %v1090_v44  ;;  %698 = vmatprep.subr.bf16.mxu1 %v1092_v45 }
  0x3c   : > { %626 = vmatpush1.bf16.msra.mxu0 %v1094_v46  ;;  %699 = vmatpush1.bf16.msra.mxu1 %v1095_v47 }
  0x3d   : > { %627 = vmatprep.subr.bf16.mxu0 %v1096_v48  ;;  %700 = vmatprep.subr.bf16.mxu1 %v1098_v49 }
  0x40   : > { %628 = vmatpush1.bf16.msra.mxu0 %v1100_v50  ;;  %701 = vmatpush1.bf16.msra.mxu1 %v1101_v51 }
  0x41   : > { %629 = vmatprep.subr.bf16.mxu0 %v1102_v52  ;;  %702 = vmatprep.subr.bf16.mxu1 %v1104_v53 }
  0x44   : > { %630 = vmatpush1.bf16.msra.mxu0 %v1106_v56  ;;  %703 = vmatpush1.bf16.msra.mxu1 %v1107_v57 }
  0x45   : > { %982 = vmatprep.subr.msk.bf16.mxu0 %vm592_vm1, %v979_v58  ;;  %987 = vmatprep.subr.msk.bf16.mxu1 %vm592_vm1, %v981_v59 }
  0x48   : > { %632 = vmatpush1.bf16.msra.mxu0 %v594_v62  ;;  %705 = vmatpush1.bf16.msra.mxu1 %v600_v63 }
  0x4b   : > { %638 = vmatmul.mubr.bf16.vlgmr.msra.gmra.mrb[0].mxu0 %v1112_v0  ;;  %711 = vmatmul.mubr.bf16.vlgmr.msra.gmra.mrb[0].mxu1 %v1112_v0 }
  0x4c   : > { %984 = vmatprep.mubr.msk.bf16.mxu0 %vm579_vm0, %v1115_v1  ;;  %989 = vmatprep.mubr.msk.bf16.mxu1 %vm579_vm0, %v1115_v1 }
  0x53   : > { %648 = vmatmul.mubr.bf16.gmra.mrb[4].mxu0 %v1117_v2  ;;  %721 = vmatmul.mubr.bf16.gmra.mrb[4].mxu1 %v1117_v2 }
  0x54   : > { %985 = vmatprep.mubr.msk.bf16.mxu0 %vm579_vm0, %v1118_v3  ;;  %990 = vmatprep.mubr.msk.bf16.mxu1 %vm579_vm0, %v1118_v3 }
  0x5b   : > { %658 = vmatmul.mubr.bf16.gmra.mrb[8].mxu0 %v1120_v4  ;;  %731 = vmatmul.mubr.bf16.gmra.mrb[8].mxu1 %v1120_v4 }
  0x5c   : > { %986 = vmatprep.mubr.msk.bf16.mxu0 %vm579_vm0, %v1121_v5  ;;  %991 = vmatprep.mubr.msk.bf16.mxu1 %vm579_vm0, %v1121_v5 }
  0x63   : > { %668 = vmatmul.mubr.bf16.gmra.mrb[12].mxu0 %v1123_v6  ;;  %741 = vmatmul.mubr.bf16.gmra.mrb[12].mxu1 %v1123_v6 }
  0x87   : > { %v780_v47 = vpop.permute.xlu0 %779 }
  0x8b   : > { %v785_v0 = vpop.permute.xlu0 %784 }
 0x11e   : > { %v639_v7 = vpop.f32.mrb[0].mxu0  ;;  %v712_v8 = vpop.f32.mrb[0].mxu1 }
 0x11f   : > { %v641_v9 = vpop.f32.mrb[1].mxu0  ;;  %v714_v10 = vpop.f32.mrb[1].mxu1 }
 0x120   : > { %v643_v11 = vpop.f32.mrb[2].mxu0  ;;  %v716_v12 = vpop.f32.mrb[2].mxu1 }
 0x121   : > { %v645_v13 = vpop.f32.mrb[3].mxu0  ;;  %v718_v14 = vpop.f32.mrb[3].mxu1 }
 0x126   : > { %v649_v15 = vpop.f32.mrb[4].mxu0  ;;  %v722_v16 = vpop.f32.mrb[4].mxu1 }
 0x127   : > { %v751_v17 = vmax.f32 %v639_v7, %v649_v15  ;;  %v753_v18 = vmax.f32 %v712_v8, %v722_v16  ;;  %v651_v19 = vpop.f32.mrb[5].mxu0  ;;  %v724_v20 = vpop.f32.mrb[5].mxu1 }
 0x128   : > { %v752_v21 = vmax.f32 %v641_v9, %v651_v19  ;;  %v754_v22 = vmax.f32 %v714_v10, %v724_v20  ;;  %v653_v23 = vpop.f32.mrb[6].mxu0  ;;  %v726_v24 = vpop.f32.mrb[6].mxu1 }
 0x129   : > { %v755_v25 = vmax.f32 %v643_v11, %v653_v23  ;;  %v757_v26 = vmax.f32 %v716_v12, %v726_v24  ;;  %v655_v27 = vpop.f32.mrb[7].mxu0  ;;  %v728_v28 = vpop.f32.mrb[7].mxu1 }
 0x12a   : > { %v756_v29 = vmax.f32 %v645_v13, %v655_v27  ;;  %v758_v30 = vmax.f32 %v718_v14, %v728_v28 }
 0x12e   : > { %v659_v31 = vpop.f32.mrb[8].mxu0  ;;  %v732_v32 = vpop.f32.mrb[8].mxu1 }
 0x12f   : > { %v759_v33 = vmax.f32 %v751_v17, %v659_v31  ;;  %v761_v34 = vmax.f32 %v753_v18, %v732_v32  ;;  %v661_v35 = vpop.f32.mrb[9].mxu0  ;;  %v734_v36 = vpop.f32.mrb[9].mxu1 }
 0x130   : > { %v760_v37 = vmax.f32 %v752_v21, %v661_v35  ;;  %v762_v38 = vmax.f32 %v754_v22, %v734_v36  ;;  %v663_v39 = vpop.f32.mrb[10].mxu0  ;;  %v736_v40 = vpop.f32.mrb[10].mxu1 }
 0x131   : > { %v763_v41 = vmax.f32 %v755_v25, %v663_v39  ;;  %v765_v42 = vmax.f32 %v757_v26, %v736_v40  ;;  %v665_v43 = vpop.f32.mrb[11].mxu0  ;;  %v738_v44 = vpop.f32.mrb[11].mxu1 }
 0x132   : > { %v764_v45 = vmax.f32 %v756_v29, %v665_v43  ;;  %v766_v46 = vmax.f32 %v758_v30, %v738_v44 }
 0x136   : > { %v669_v48 = vpop.f32.mrb[12].mxu0  ;;  %v742_v49 = vpop.f32.mrb[12].mxu1 }
 0x137   : > { %v767_v50 = vmax.f32 %v759_v33, %v669_v48  ;;  %v769_v51 = vmax.f32 %v761_v34, %v742_v49  ;;  %v671_v52 = vpop.f32.mrb[13].mxu0  ;;  %v744_v53 = vpop.f32.mrb[13].mxu1 }
 0x138   : > { %v768_v54 = vmax.f32 %v760_v37, %v671_v52  ;;  %v770_v55 = vmax.f32 %v762_v38, %v744_v53  ;;  %v673_v56 = vpop.f32.mrb[14].mxu0  ;;  %v746_v57 = vpop.f32.mrb[14].mxu1 }
 0x139   : > { %v787_v58 = vadd.f32 %v780_v47, %v767_v50  ;;  %v789_v59 = vadd.f32 %v780_v47, %v769_v51  ;;  %v771_v60 = vmax.f32 %v763_v41, %v673_v56  ;;  %v773_v61 = vmax.f32 %v765_v42, %v746_v57  ;;  %v675_v62 = vpop.f32.mrb[15].mxu0  ;;  %v748_v63 = vpop.f32.mrb[15].mxu1 }
 0x13a   : > { %v788_v1 = vadd.f32 %v780_v47, %v768_v54  ;;  %v790_v2 = vadd.f32 %v780_v47, %v770_v55  ;;  %v772_v3 = vmax.f32 %v764_v45, %v675_v62  ;;  %v774_v4 = vmax.f32 %v766_v46, %v748_v63 }
 0x13b   : > { %v791_v5 = vadd.f32 %v785_v0, %v771_v60  ;;  %v793_v6 = vadd.f32 %v785_v0, %v773_v61 }
 0x13c   : > { %v999_v7 = vpack.c.bf16 %v788_v1, %v787_v58  ;;  %v1000_v8 = vpack.c.bf16 %v790_v2, %v789_v59  ;;  %v792_v9 = vadd.f32 %v785_v0, %v772_v3  ;;  %v794_v10 = vadd.f32 %v785_v0, %v774_v4 }
 0x13e   : > { %819 = vst [vmem:[%s208_s20] sm:$0xff] %v999_v7  ;;  %820 = vst [vmem:[%s208_s20 + $0x8] sm:$0xff] %v1000_v8  ;;  %v1001_v11 = vpack.c.bf16 %v792_v9, %v791_v5  ;;  %v1002_v12 = vpack.c.bf16 %v794_v10, %v793_v6 }
 0x140   : > { %821 = vst [vmem:[%s208_s20 + $0x10] sm:$0xff] %v1001_v11  ;;  %822 = vst [vmem:[%s208_s20 + $0x18] sm:$0xff] %v1002_v12 }
 0x141 PF: > { %s13_s14 = sadd.s32 1, %s1146_s14   ;;  %s1304_s12 = smov %s1142_s13 }
 0x142   : > { %p10_p5 = scmp.ge.s32.totalorder %s13_s14, 4   ;;  %s1305_s13 = smov %s1307_s15 }
 0x144   :  { %12 = sbr.rel (!%p10_p5) target bundleno = 2 (0x2), region = 62 }

// kernel: dga3net_forward.15
= control target key start
LH: loop header
LB: loop body
LE: loop exit
PB: predicated region body
PF: predicated region fallthrough
CT: control target
= control target key end

     0   :  { %s1880_s12 = smov 0   ;;  %s1882_s13 = smov 0   ;;  %s2089_s0 = inlined_call_operand.vmem [shape: bf16[64,432], index: 0, kind: input, shape index: {}]   ;;  %s2090_s1 = inlined_call_operand.vmem [shape: bf16[2,432,512], index: 1, kind: input, shape index: {}]   ;;  %s2091_s2 = inlined_call_operand.vmem [shape: f32[16,1], index: 2, kind: input, shape index: {}]   ;;  %s2092_s3 = inlined_call_operand.vmem [shape: bf16[2,16,512], index: 3, kind: output, shape index: {}]  }
   0x1   :  { %s1884_s14 = smov 0  }
   0x2 LB: > { %s25_s15 = sadd.s32 1, %s1853_s13  ;;  %p1443_p0 = scmp.ge.s32.totalorder %s1857_s14, 1  ;;  %s1857_s14 = sphi %s1884_s14, %s13_s14   ;;  %s1853_s13 = sphi %s1882_s13, %s2094_s13   ;;  %s1849_s12 = sphi %s1880_s12, %s2093_s12  }
   0x3   : > { %p27_p1 = scmp.ge.s32.totalorder %s25_s15, 2  ;;  %p158_p2 = scmp.lt.s32.totalorder %s1857_s14, 3 }
   0x5   : > { %s2096_s15 = smov (%p27_p1, %s25_s15), 0  ;;  %p159_p3 = pnand %p1443_p0, %p158_p2 }
   0x6   : > { %p191_p4 = scmp.lt.s32.totalorder (!%p159_p3), %s1849_s12, 1  ;;  %v1747_v0 = vld [vmem:[%s2089_s0 + $0x4] ss:$16 sps:$4 sm:$0xff] (!%p159_p3)   ;;  %v1859_v15 = vmov (!%p159_p3), 0   ;;  %vm951_vm0 = vcmask (!%p159_p3), 392192  }
   0x7   : > { %162 = sbr.rel (%p159_p3) target bundleno = 379 (0x17b), region = 32  ;;  %996 = vmatprep.mubr.bf16.mxu0 (!%p159_p3), %v1747_v0  ;;  %1142 = vmatprep.mubr.bf16.mxu1 (!%p159_p3), %v1747_v0 }
   0x8   : > { %1648 = vset.pattern.permute.xlu0 (!%p159_p3), %v1859_v15  ;;  %v1780_v15 = vld [vmem:[%s2089_s0 + $0x20] ss:$16 sps:$4 sm:$0xff] (!%p159_p3)  }
   0xe   : > { %s2098_s12 = smov (!%p191_p4, %s1849_s12), 1 }
   0xf   : > { %s1622_s18 = smul.u32 864, %s2098_s12  ;;  %s1585_s6 = sshll.u32 %s2098_s12, 5 }
  0x10   : > { %s208_s12 = scalar_lea.vmem %s2092_s3, %s1585_s6 }
  0x11   : > { %s1907_s21 = scalar_lea.vmem %s2090_s1, %s1622_s18 }
  0x12   : > { %v1649_v1 = vld [vmem:[%s1907_s21 + $0x4] ss:$16 sps:$4 sm:$0xff]   ;;  %v1651_v2 = vld [vmem:[%s1907_s21 + $0xc] ss:$16 sps:$4 sm:$0xff]   ;;  %v1653_v3 = vld [vmem:[%s1907_s21] ss:$16 sps:$4 sm:$0xff]  }
  0x13   : > { %964 = vmatprep.subr.bf16.mxu0 %v1649_v1  ;;  %v1654_v4 = vld [vmem:[%s1907_s21 + $0x8] ss:$16 sps:$4 sm:$0xff]   ;;  %1110 = vmatprep.subr.bf16.mxu1 %v1651_v2  ;;  %v1655_v5 = vld [vmem:[%s1907_s21 + $0x24] ss:$16 sps:$4 sm:$0xff]   ;;  %v1657_v6 = vld [vmem:[%s1907_s21 + $0x2c] ss:$16 sps:$4 sm:$0xff]  }
  0x14   : > { %965 = vmatpush1.bf16.msra.mxu0 %v1653_v3  ;;  %1111 = vmatpush1.bf16.msra.mxu1 %v1654_v4  ;;  %v1659_v7 = vld [vmem:[%s1907_s21 + $0x20] ss:$16 sps:$4 sm:$0xff]   ;;  %v1660_v8 = vld [vmem:[%s1907_s21 + $0x28] ss:$16 sps:$4 sm:$0xff]   ;;  %v1661_v9 = vld [vmem:[%s1907_s21 + $0x44] ss:$16 sps:$4 sm:$0xff]  }
  0x15   : > { %966 = vmatprep.subr.bf16.mxu0 %v1655_v5  ;;  %1112 = vmatprep.subr.bf16.mxu1 %v1657_v6  ;;  %v1663_v10 = vld [vmem:[%s1907_s21 + $0x4c] ss:$16 sps:$4 sm:$0xff]   ;;  %v1665_v11 = vld [vmem:[%s1907_s21 + $0x40] ss:$16 sps:$4 sm:$0xff]   ;;  %v1666_v12 = vld [vmem:[%s1907_s21 + $0x48] ss:$16 sps:$4 sm:$0xff]  }
  0x16   : > { %v1667_v13 = vld [vmem:[%s1907_s21 + $0x64] ss:$16 sps:$4 sm:$0xff]   ;;  %v1669_v14 = vld [vmem:[%s1907_s21 + $0x6c] ss:$16 sps:$4 sm:$0xff]   ;;  %v1671_v16 = vld [vmem:[%s1907_s21 + $0x60] ss:$16 sps:$4 sm:$0xff]  }
  0x17   : > { %v1672_v17 = vld [vmem:[%s1907_s21 + $0x68] ss:$16 sps:$4 sm:$0xff]   ;;  %v1673_v18 = vld [vmem:[%s1907_s21 + $0x84] ss:$16 sps:$4 sm:$0xff]   ;;  %v1675_v19 = vld [vmem:[%s1907_s21 + $0x8c] ss:$16 sps:$4 sm:$0xff]  }
  0x18   : > { %967 = vmatpush1.bf16.msra.mxu0 %v1659_v7  ;;  %1113 = vmatpush1.bf16.msra.mxu1 %v1660_v8  ;;  %v1677_v20 = vld [vmem:[%s1907_s21 + $0x80] ss:$16 sps:$4 sm:$0xff]   ;;  %v1678_v21 = vld [vmem:[%s1907_s21 + $0x88] ss:$16 sps:$4 sm:$0xff]   ;;  %v1679_v22 = vld [vmem:[%s1907_s21 + $0xa4] ss:$16 sps:$4 sm:$0xff]  }
  0x19   : > { %968 = vmatprep.subr.bf16.mxu0 %v1661_v9  ;;  %1114 = vmatprep.subr.bf16.mxu1 %v1663_v10  ;;  %v1681_v23 = vld [vmem:[%s1907_s21 + $0xac] ss:$16 sps:$4 sm:$0xff]   ;;  %v1683_v24 = vld [vmem:[%s1907_s21 + $0xa0] ss:$16 sps:$4 sm:$0xff]   ;;  %v1684_v25 = vld [vmem:[%s1907_s21 + $0xa8] ss:$16 sps:$4 sm:$0xff]  }
  0x1a   : > { %v1685_v26 = vld [vmem:[%s1907_s21 + $0xc4] ss:$16 sps:$4 sm:$0xff]   ;;  %v1687_v27 = vld [vmem:[%s1907_s21 + $0xcc] ss:$16 sps:$4 sm:$0xff]   ;;  %v1689_v28 = vld [vmem:[%s1907_s21 + $0xc0] ss:$16 sps:$4 sm:$0xff]  }
  0x1b   : > { %v1690_v29 = vld [vmem:[%s1907_s21 + $0xc8] ss:$16 sps:$4 sm:$0xff]   ;;  %v1691_v30 = vld [vmem:[%s1907_s21 + $0xe4] ss:$16 sps:$4 sm:$0xff]   ;;  %v1693_v31 = vld [vmem:[%s1907_s21 + $0xec] ss:$16 sps:$4 sm:$0xff]  }
  0x1c   : > { %969 = vmatpush1.bf16.msra.mxu0 %v1665_v11  ;;  %1115 = vmatpush1.bf16.msra.mxu1 %v1666_v12  ;;  %v1695_v32 = vld [vmem:[%s1907_s21 + $0xe0] ss:$16 sps:$4 sm:$0xff]   ;;  %v1696_v33 = vld [vmem:[%s1907_s21 + $0xe8] ss:$16 sps:$4 sm:$0xff]   ;;  %v1697_v34 = vld [vmem:[%s1907_s21 + $0x104] ss:$16 sps:$4 sm:$0xff]  }
  0x1d   : > { %970 = vmatprep.subr.bf16.mxu0 %v1667_v13  ;;  %1116 = vmatprep.subr.bf16.mxu1 %v1669_v14  ;;  %v1699_v35 = vld [vmem:[%s1907_s21 + $0x10c] ss:$16 sps:$4 sm:$0xff]   ;;  %v1701_v36 = vld [vmem:[%s1907_s21 + $0x100] ss:$16 sps:$4 sm:$0xff]   ;;  %v1702_v37 = vld [vmem:[%s1907_s21 + $0x108] ss:$16 sps:$4 sm:$0xff]  }
  0x1e   : > { %v1703_v38 = vld [vmem:[%s1907_s21 + $0x124] ss:$16 sps:$4 sm:$0xff]   ;;  %v1705_v39 = vld [vmem:[%s1907_s21 + $0x12c] ss:$16 sps:$4 sm:$0xff]   ;;  %v1707_v40 = vld [vmem:[%s1907_s21 + $0x120] ss:$16 sps:$4 sm:$0xff]  }
  0x1f   : > { %v1708_v41 = vld [vmem:[%s1907_s21 + $0x128] ss:$16 sps:$4 sm:$0xff]   ;;  %v1709_v42 = vld [vmem:[%s1907_s21 + $0x144] ss:$16 sps:$4 sm:$0xff]   ;;  %v1711_v43 = vld [vmem:[%s1907_s21 + $0x14c] ss:$16 sps:$4 sm:$0xff]  }
  0x20   : > { %971 = vmatpush1.bf16.msra.mxu0 %v1671_v16  ;;  %1117 = vmatpush1.bf16.msra.mxu1 %v1672_v17  ;;  %v1713_v44 = vld [vmem:[%s1907_s21 + $0x140] ss:$16 sps:$4 sm:$0xff]   ;;  %v1714_v45 = vld [vmem:[%s1907_s21 + $0x148] ss:$16 sps:$4 sm:$0xff]   ;;  %v1715_v46 = vld [vmem:[%s1907_s21 + $0x164] ss:$16 sps:$4 sm:$0xff]  }
  0x21   : > { %972 = vmatprep.subr.bf16.mxu0 %v1673_v18  ;;  %1118 = vmatprep.subr.bf16.mxu1 %v1675_v19  ;;  %v1717_v47 = vld [vmem:[%s1907_s21 + $0x16c] ss:$16 sps:$4 sm:$0xff]   ;;  %v1719_v48 = vld [vmem:[%s1907_s21 + $0x160] ss:$16 sps:$4 sm:$0xff]   ;;  %v1720_v49 = vld [vmem:[%s1907_s21 + $0x168] ss:$16 sps:$4 sm:$0xff]  }
  0x22   : > { %v1721_v50 = vld [vmem:[%s1907_s21 + $0x184] ss:$16 sps:$4 sm:$0xff]   ;;  %v1723_v51 = vld [vmem:[%s1907_s21 + $0x18c] ss:$16 sps:$4 sm:$0xff]   ;;  %v1725_v52 = vld [vmem:[%s1907_s21 + $0x180] ss:$16 sps:$4 sm:$0xff]  }
  0x23   : > { %v1726_v53 = vld [vmem:[%s1907_s21 + $0x188] ss:$16 sps:$4 sm:$0xff]   ;;  %v1727_v54 = vld [vmem:[%s1907_s21 + $0x1a4] ss:$16 sps:$4 sm:$0xff]   ;;  %v1729_v55 = vld [vmem:[%s1907_s21 + $0x1ac] ss:$16 sps:$4 sm:$0xff]  }
  0x24   : > { %973 = vmatpush1.bf16.msra.mxu0 %v1677_v20  ;;  %1119 = vmatpush1.bf16.msra.mxu1 %v1678_v21  ;;  %v1731_v56 = vld [vmem:[%s1907_s21 + $0x1a0] ss:$16 sps:$4 sm:$0xff]   ;;  %v1732_v57 = vld [vmem:[%s1907_s21 + $0x1a8] ss:$16 sps:$4 sm:$0xff]   ;;  %v1733_v58 = vld [vmem:[%s1907_s21 + $0x1c4] ss:$16 sps:$4 sm:$0xff]  }
  0x25   : > { %974 = vmatprep.subr.bf16.mxu0 %v1679_v22  ;;  %1120 = vmatprep.subr.bf16.mxu1 %v1681_v23  ;;  %v1735_v59 = vld [vmem:[%s1907_s21 + $0x1cc] ss:$16 sps:$4 sm:$0xff]   ;;  %v1737_v60 = vld [vmem:[%s1907_s21 + $0x1c0] ss:$16 sps:$4 sm:$0xff]   ;;  %v1738_v61 = vld [vmem:[%s1907_s21 + $0x1c8] ss:$16 sps:$4 sm:$0xff]  }
  0x26   : > { %v1739_v62 = vld [vmem:[%s1907_s21 + $0x1e4] ss:$16 sps:$4 sm:$0xff]   ;;  %v1741_v63 = vld [vmem:[%s1907_s21 + $0x1ec] ss:$16 sps:$4 sm:$0xff]   ;;  %v1743_v0 = vld [vmem:[%s1907_s21 + $0x1e0] ss:$16 sps:$4 sm:$0xff]  }
  0x27   : > { %v1744_v1 = vld [vmem:[%s1907_s21 + $0x1e8] ss:$16 sps:$4 sm:$0xff]   ;;  %v1750_v2 = vld [vmem:[%s1907_s21 + $0x204] ss:$16 sps:$4 sm:$0xff]   ;;  %v1753_v3 = vld [vmem:[%s1907_s21 + $0x20c] ss:$16 sps:$4 sm:$0xff]  }
  0x28   : > { %975 = vmatpush1.bf16.msra.mxu0 %v1683_v24  ;;  %1121 = vmatpush1.bf16.msra.mxu1 %v1684_v25  ;;  %v1745_v4 = vld [vmem:[%s2089_s0] ss:$16 sps:$4 sm:$0xff]   ;;  %v1751_v6 = vld [vmem:[%s1907_s21 + $0x208] ss:$16 sps:$4 sm:$0xff]   ;;  %v1756_v7 = vld [vmem:[%s1907_s21 + $0x224] ss:$16 sps:$4 sm:$0xff]  }
  0x29   : > { %976 = vmatprep.subr.bf16.mxu0 %v1685_v26  ;;  %1122 = vmatprep.subr.bf16.mxu1 %v1687_v27  ;;  %v1748_v5 = vld [vmem:[%s1907_s21 + $0x200] ss:$16 sps:$4 sm:$0xff]   ;;  %v1759_v8 = vld [vmem:[%s1907_s21 + $0x22c] ss:$16 sps:$4 sm:$0xff]   ;;  %v1778_v9 = vld [vmem:[%s2089_s0 + $0x24] ss:$16 sps:$4 sm:$0xff]  }
  0x2a   : > { %v1754_v10 = vld [vmem:[%s1907_s21 + $0x220] ss:$16 sps:$4 sm:$0xff]   ;;  %v1757_v11 = vld [vmem:[%s1907_s21 + $0x228] ss:$16 sps:$4 sm:$0xff]   ;;  %v1762_v12 = vld [vmem:[%s1907_s21 + $0x244] ss:$16 sps:$4 sm:$0xff]  }
  0x2b   : > { %v1765_v13 = vld [vmem:[%s1907_s21 + $0x24c] ss:$16 sps:$4 sm:$0xff]   ;;  %v1760_v14 = vld [vmem:[%s1907_s21 + $0x240] ss:$16 sps:$4 sm:$0xff]   ;;  %v1763_v16 = vld [vmem:[%s1907_s21 + $0x248] ss:$16 sps:$4 sm:$0xff]  }
  0x2c   : > { %977 = vmatpush1.bf16.msra.mxu0 %v1689_v28  ;;  %1123 = vmatpush1.bf16.msra.mxu1 %v1690_v29  ;;  %v1768_v17 = vld [vmem:[%s1907_s21 + $0x264] ss:$16 sps:$4 sm:$0xff]   ;;  %v1771_v18 = vld [vmem:[%s1907_s21 + $0x26c] ss:$16 sps:$4 sm:$0xff]   ;;  %v1766_v20 = vld [vmem:[%s1907_s21 + $0x260] ss:$16 sps:$4 sm:$0xff]  }
  0x2d   : > { %978 = vmatprep.subr.bf16.mxu0 %v1691_v30  ;;  %1124 = vmatprep.subr.bf16.mxu1 %v1693_v31  ;;  %v1793_v19 = vld [vmem:[%s2089_s0 + $0x44] ss:$16 sps:$4 sm:$0xff]   ;;  %v1769_v21 = vld [vmem:[%s1907_s21 + $0x268] ss:$16 sps:$4 sm:$0xff]   ;;  %v1777_v24 = vld [vmem:[%s1907_s21 + $0x28c] ss:$16 sps:$4 sm:$0xff]  }
  0x2e   : > { %v1280_v22 = vld [vmem:[%s2091_s2] sm:$0xff]  ;;  %v1775_v27 = vld [vmem:[%s1907_s21 + $0x288] ss:$16 sps:$4 sm:$0xff]   ;;  %v1786_v29 = vld [vmem:[%s1907_s21 + $0x2ac] ss:$16 sps:$4 sm:$0xff]  }
  0x2f   : > { %v1774_v23 = vld [vmem:[%s1907_s21 + $0x284] ss:$16 sps:$4 sm:$0xff]   ;;  %v1795_v25 = vld [vmem:[%s2089_s0 + $0x40] ss:$16 sps:$4 sm:$0xff]   ;;  %1284 = vperm.xlu0 %1648, %v1280_v22  }
  0x30   : > { %979 = vmatpush1.bf16.msra.mxu0 %v1695_v32  ;;  %1125 = vmatpush1.bf16.msra.mxu1 %v1696_v33  ;;  %v1772_v26 = vld [vmem:[%s1907_s21 + $0x280] ss:$16 sps:$4 sm:$0xff]   ;;  %v1783_v28 = vld [vmem:[%s1907_s21 + $0x2a4] ss:$16 sps:$4 sm:$0xff]   ;;  %v1784_v32 = vld [vmem:[%s1907_s21 + $0x2a8] ss:$16 sps:$4 sm:$0xff]  }
  0x31   : > { %980 = vmatprep.subr.bf16.mxu0 %v1697_v34  ;;  %1126 = vmatprep.subr.bf16.mxu1 %v1699_v35  ;;  %v1808_v30 = vld [vmem:[%s2089_s0 + $0x64] ss:$16 sps:$4 sm:$0xff]   ;;  %v1781_v31 = vld [vmem:[%s1907_s21 + $0x2a0] ss:$16 sps:$4 sm:$0xff]   ;;  %v1281_v33 = vld [vmem:[%s2091_s2 + $0x8] sm:$0xff] }
  0x32   : > { %v1789_v34 = vld [vmem:[%s1907_s21 + $0x2c4] ss:$16 sps:$4 sm:$0xff]   ;;  %v1792_v35 = vld [vmem:[%s1907_s21 + $0x2cc] ss:$16 sps:$4 sm:$0xff]  }
  0x33   : > { %1289 = vperm.xlu0 %1648, %v1281_v33  }
  0x34   : > { %981 = vmatpush1.bf16.msra.mxu0 %v1701_v36  ;;  %1127 = vmatpush1.bf16.msra.mxu1 %v1702_v37  ;;  %v1810_v36 = vld [vmem:[%s2089_s0 + $0x60] ss:$16 sps:$4 sm:$0xff]  }
  0x35   : > { %982 = vmatprep.subr.bf16.mxu0 %v1703_v38  ;;  %1128 = vmatprep.subr.bf16.mxu1 %v1705_v39  ;;  %v1787_v37 = vld [vmem:[%s1907_s21 + $0x2c0] ss:$16 sps:$4 sm:$0xff]   ;;  %v1790_v38 = vld [vmem:[%s1907_s21 + $0x2c8] ss:$16 sps:$4 sm:$0xff]   ;;  %v1798_v39 = vld [vmem:[%s1907_s21 + $0x2e4] ss:$16 sps:$4 sm:$0xff]  }
  0x38   : > { %983 = vmatpush1.bf16.msra.mxu0 %v1707_v40  ;;  %1129 = vmatpush1.bf16.msra.mxu1 %v1708_v41  ;;  %v1801_v40 = vld [vmem:[%s1907_s21 + $0x2ec] ss:$16 sps:$4 sm:$0xff]  }
  0x39   : > { %984 = vmatprep.subr.bf16.mxu0 %v1709_v42  ;;  %1130 = vmatprep.subr.bf16.mxu1 %v1711_v43  ;;  %v1825_v41 = vld [vmem:[%s2089_s0 + $0xc] ss:$16 sps:$4 sm:$0xff]   ;;  %v1796_v42 = vld [vmem:[%s1907_s21 + $0x2e0] ss:$16 sps:$4 sm:$0xff]   ;;  %v1799_v43 = vld [vmem:[%s1907_s21 + $0x2e8] ss:$16 sps:$4 sm:$0xff]  }
  0x3c   : > { %985 = vmatpush1.bf16.msra.mxu0 %v1713_v44  ;;  %1131 = vmatpush1.bf16.msra.mxu1 %v1714_v45  ;;  %v1804_v44 = vld [vmem:[%s1907_s21 + $0x304] ss:$16 sps:$4 sm:$0xff]   ;;  %v1807_v45 = vld [vmem:[%s1907_s21 + $0x30c] ss:$16 sps:$4 sm:$0xff]  }
  0x3d   : > { %986 = vmatprep.subr.bf16.mxu0 %v1715_v46  ;;  %1132 = vmatprep.subr.bf16.mxu1 %v1717_v47  ;;  %v1802_v46 = vld [vmem:[%s1907_s21 + $0x300] ss:$16 sps:$4 sm:$0xff]   ;;  %v1805_v47 = vld [vmem:[%s1907_s21 + $0x308] ss:$16 sps:$4 sm:$0xff]  }
  0x40   : > { %987 = vmatpush1.bf16.msra.mxu0 %v1719_v48  ;;  %1133 = vmatpush1.bf16.msra.mxu1 %v1720_v49  ;;  %v1813_v48 = vld [vmem:[%s1907_s21 + $0x324] ss:$16 sps:$4 sm:$0xff]   ;;  %v1816_v49 = vld [vmem:[%s1907_s21 + $0x32c] ss:$16 sps:$4 sm:$0xff]  }
  0x41   : > { %988 = vmatprep.subr.bf16.mxu0 %v1721_v50  ;;  %1134 = vmatprep.subr.bf16.mxu1 %v1723_v51  ;;  %v1811_v50 = vld [vmem:[%s1907_s21 + $0x320] ss:$16 sps:$4 sm:$0xff]   ;;  %v1814_v51 = vld [vmem:[%s1907_s21 + $0x328] ss:$16 sps:$4 sm:$0xff]  }
  0x44   : > { %989 = vmatpush1.bf16.msra.mxu0 %v1725_v52  ;;  %1135 = vmatpush1.bf16.msra.mxu1 %v1726_v53  ;;  %v1819_v52 = vld [vmem:[%s1907_s21 + $0x344] ss:$16 sps:$4 sm:$0xff]   ;;  %v1822_v53 = vld [vmem:[%s1907_s21 + $0x34c] ss:$16 sps:$4 sm:$0xff]  }
  0x45   : > { %990 = vmatprep.subr.bf16.mxu0 %v1727_v54  ;;  %1136 = vmatprep.subr.bf16.mxu1 %v1729_v55  ;;  %v1817_v54 = vld [vmem:[%s1907_s21 + $0x340] ss:$16 sps:$4 sm:$0xff]   ;;  %v1820_v55 = vld [vmem:[%s1907_s21 + $0x348] ss:$16 sps:$4 sm:$0xff]  }
  0x48   : > { %991 = vmatpush1.bf16.msra.mxu0 %v1731_v56  ;;  %1137 = vmatpush1.bf16.msra.mxu1 %v1732_v57  ;;  %v1823_v56 = vld [vmem:[%s2089_s0 + $0x8] ss:$16 sps:$4 sm:$0xff]   ;;  %v1826_v57 = vld [vmem:[%s2089_s0 + $0x2c] ss:$16 sps:$4 sm:$0xff]  }
  0x49   : > { %992 = vmatprep.subr.bf16.mxu0 %v1733_v58  ;;  %1138 = vmatprep.subr.bf16.mxu1 %v1735_v59  ;;  %v1828_v58 = vld [vmem:[%s2089_s0 + $0x28] ss:$16 sps:$4 sm:$0xff]   ;;  %v1829_v59 = vld [vmem:[%s2089_s0 + $0x4c] ss:$16 sps:$4 sm:$0xff]  }
  0x4c   : > { %993 = vmatpush1.bf16.msra.mxu0 %v1737_v60  ;;  %1139 = vmatpush1.bf16.msra.mxu1 %v1738_v61  ;;  %v1831_v60 = vld [vmem:[%s2089_s0 + $0x48] ss:$16 sps:$4 sm:$0xff]   ;;  %v1832_v61 = vld [vmem:[%s2089_s0 + $0x6c] ss:$16 sps:$4 sm:$0xff]  }
  0x4d   : > { %994 = vmatprep.subr.bf16.mxu0 %v1739_v62  ;;  %1140 = vmatprep.subr.bf16.mxu1 %v1741_v63  ;;  %v1834_v62 = vld [vmem:[%s2089_s0 + $0x68] ss:$16 sps:$4 sm:$0xff]  }
  0x50   : > { %995 = vmatpush1.bf16.msra.mxu0 %v1743_v0  ;;  %1141 = vmatpush1.bf16.msra.mxu1 %v1744_v1 }
  0x51   : > { %1037 = vmatprep.subr.bf16.mxu0 %v1750_v2  ;;  %1183 = vmatprep.subr.bf16.mxu1 %v1753_v3 }
  0x53   : > { %997 = vmatmul.mubr.bf16.vlgmr.msra.gmra.mrb[0].mxu0 %v1745_v4  ;;  %1143 = vmatmul.mubr.bf16.vlgmr.msra.gmra.mrb[0].mxu1 %v1745_v4 }
  0x54   : > { %1038 = vmatpush1.bf16.msra.mxu0 %v1748_v5  ;;  %1184 = vmatpush1.bf16.msra.mxu1 %v1751_v6 }
  0x55   : > { %1039 = vmatprep.subr.bf16.mxu0 %v1756_v7  ;;  %1185 = vmatprep.subr.bf16.mxu1 %v1759_v8 }
  0x56   : > { %1006 = vmatprep.mubr.bf16.mxu0 %v1778_v9  ;;  %1152 = vmatprep.mubr.bf16.mxu1 %v1778_v9 }
  0x58   : > { %1040 = vmatpush1.bf16.msra.mxu0 %v1754_v10  ;;  %1186 = vmatpush1.bf16.msra.mxu1 %v1757_v11 }
  0x59   : > { %1041 = vmatprep.subr.bf16.mxu0 %v1762_v12  ;;  %1187 = vmatprep.subr.bf16.mxu1 %v1765_v13 }
  0x5b   : > { %1007 = vmatmul.mubr.bf16.gmra.mrb[4].mxu0 %v1780_v15  ;;  %1153 = vmatmul.mubr.bf16.gmra.mrb[4].mxu1 %v1780_v15 }
  0x5c   : > { %1042 = vmatpush1.bf16.msra.mxu0 %v1760_v14  ;;  %1188 = vmatpush1.bf16.msra.mxu1 %v1763_v16 }
  0x5d   : > { %1043 = vmatprep.subr.bf16.mxu0 %v1768_v17  ;;  %1189 = vmatprep.subr.bf16.mxu1 %v1771_v18 }
  0x5e   : > { %1016 = vmatprep.mubr.bf16.mxu0 %v1793_v19  ;;  %1162 = vmatprep.mubr.bf16.mxu1 %v1793_v19 }
  0x60   : > { %1044 = vmatpush1.bf16.msra.mxu0 %v1766_v20  ;;  %1190 = vmatpush1.bf16.msra.mxu1 %v1769_v21 }
  0x61   : > { %1045 = vmatprep.subr.bf16.mxu0 %v1774_v23  ;;  %1191 = vmatprep.subr.bf16.mxu1 %v1777_v24 }
  0x63   : > { %1017 = vmatmul.mubr.bf16.gmra.mrb[8].mxu0 %v1795_v25  ;;  %1163 = vmatmul.mubr.bf16.gmra.mrb[8].mxu1 %v1795_v25 }
  0x64   : > { %1046 = vmatpush1.bf16.msra.mxu0 %v1772_v26  ;;  %1192 = vmatpush1.bf16.msra.mxu1 %v1775_v27 }
  0x65   : > { %1047 = vmatprep.subr.bf16.mxu0 %v1783_v28  ;;  %1193 = vmatprep.subr.bf16.mxu1 %v1786_v29 }
  0x66   : > { %1026 = vmatprep.mubr.bf16.mxu0 %v1808_v30  ;;  %1172 = vmatprep.mubr.bf16.mxu1 %v1808_v30 }
  0x68   : > { %1048 = vmatpush1.bf16.msra.mxu0 %v1781_v31  ;;  %1194 = vmatpush1.bf16.msra.mxu1 %v1784_v32 }
  0x69   : > { %1049 = vmatprep.subr.bf16.mxu0 %v1789_v34  ;;  %1195 = vmatprep.subr.bf16.mxu1 %v1792_v35 }
  0x6b   : > { %1027 = vmatmul.mubr.bf16.gmra.mrb[12].mxu0 %v1810_v36  ;;  %1173 = vmatmul.mubr.bf16.gmra.mrb[12].mxu1 %v1810_v36 }
  0x6c   : > { %1050 = vmatpush1.bf16.msra.mxu0 %v1787_v37  ;;  %1196 = vmatpush1.bf16.msra.mxu1 %v1790_v38 }
  0x6d   : > { %1051 = vmatprep.subr.bf16.mxu0 %v1798_v39  ;;  %1197 = vmatprep.subr.bf16.mxu1 %v1801_v40 }
  0x6e   : > { %1571 = vmatprep.mubr.msk.bf16.mxu0 %vm951_vm0, %v1825_v41  ;;  %1575 = vmatprep.mubr.msk.bf16.mxu1 %vm951_vm0, %v1825_v41 }
  0x70   : > { %1052 = vmatpush1.bf16.msra.mxu0 %v1796_v42  ;;  %1198 = vmatpush1.bf16.msra.mxu1 %v1799_v43 }
  0x71   : > { %1053 = vmatprep.subr.bf16.mxu0 %v1804_v44  ;;  %1199 = vmatprep.subr.bf16.mxu1 %v1807_v45 }
  0x74   : > { %1054 = vmatpush1.bf16.msra.mxu0 %v1802_v46  ;;  %1200 = vmatpush1.bf16.msra.mxu1 %v1805_v47 }
  0x75   : > { %1055 = vmatprep.subr.bf16.mxu0 %v1813_v48  ;;  %1201 = vmatprep.subr.bf16.mxu1 %v1816_v49 }
  0x78   : > { %1056 = vmatpush1.bf16.msra.mxu0 %v1811_v50  ;;  %1202 = vmatpush1.bf16.msra.mxu1 %v1814_v51 }
  0x79   : > { %1057 = vmatprep.subr.bf16.mxu0 %v1819_v52  ;;  %1203 = vmatprep.subr.bf16.mxu1 %v1822_v53 }
  0x7c   : > { %1058 = vmatpush1.bf16.msra.mxu0 %v1817_v54  ;;  %1204 = vmatpush1.bf16.msra.mxu1 %v1820_v55 }
  0x7f   : > { %1070 = vmatmul.mubr.bf16.vlgmr.msra.gmra.mrb[0].mxu0 %v1823_v56  ;;  %1216 = vmatmul.mubr.bf16.vlgmr.msra.gmra.mrb[0].mxu1 %v1823_v56 }
  0x80   : > { %1572 = vmatprep.mubr.msk.bf16.mxu0 %vm951_vm0, %v1826_v57  ;;  %1576 = vmatprep.mubr.msk.bf16.mxu1 %vm951_vm0, %v1826_v57 }
  0x87   : > { %1080 = vmatmul.mubr.bf16.gmra.mrb[4].mxu0 %v1828_v58  ;;  %1226 = vmatmul.mubr.bf16.gmra.mrb[4].mxu1 %v1828_v58 }
  0x88   : > { %1573 = vmatprep.mubr.msk.bf16.mxu0 %vm951_vm0, %v1829_v59  ;;  %1577 = vmatprep.mubr.msk.bf16.mxu1 %vm951_vm0, %v1829_v59 }
  0x8f   : > { %1090 = vmatmul.mubr.bf16.gmra.mrb[8].mxu0 %v1831_v60  ;;  %1236 = vmatmul.mubr.bf16.gmra.mrb[8].mxu1 %v1831_v60 }
  0x90   : > { %1574 = vmatprep.mubr.msk.bf16.mxu0 %vm951_vm0, %v1832_v61  ;;  %1578 = vmatprep.mubr.msk.bf16.mxu1 %vm951_vm0, %v1832_v61 }
  0x97   : > { %1100 = vmatmul.mubr.bf16.gmra.mrb[12].mxu0 %v1834_v62  ;;  %1246 = vmatmul.mubr.bf16.gmra.mrb[12].mxu1 %v1834_v62 }
  0xae   : > { %v1285_v39 = vpop.permute.xlu0 %1284 }
  0xb2   : > { %v1290_v62 = vpop.permute.xlu0 %1289 }
 0x152   : > { %v1071_v63 = vpop.f32.mrb[0].mxu0  ;;  %v1217_v0 = vpop.f32.mrb[0].mxu1 }
 0x153   : > { %v1073_v1 = vpop.f32.mrb[1].mxu0  ;;  %v1219_v2 = vpop.f32.mrb[1].mxu1 }
 0x154   : > { %v1075_v3 = vpop.f32.mrb[2].mxu0  ;;  %v1221_v4 = vpop.f32.mrb[2].mxu1 }
 0x155   : > { %v1077_v5 = vpop.f32.mrb[3].mxu0  ;;  %v1223_v6 = vpop.f32.mrb[3].mxu1 }
 0x15a   : > { %v1081_v7 = vpop.f32.mrb[4].mxu0  ;;  %v1227_v8 = vpop.f32.mrb[4].mxu1 }
 0x15b   : > { %v1256_v9 = vmax.f32 %v1071_v63, %v1081_v7  ;;  %v1258_v10 = vmax.f32 %v1217_v0, %v1227_v8  ;;  %v1083_v11 = vpop.f32.mrb[5].mxu0  ;;  %v1229_v12 = vpop.f32.mrb[5].mxu1 }
 0x15c   : > { %v1257_v13 = vmax.f32 %v1073_v1, %v1083_v11  ;;  %v1259_v14 = vmax.f32 %v1219_v2, %v1229_v12  ;;  %v1085_v15 = vpop.f32.mrb[6].mxu0  ;;  %v1231_v16 = vpop.f32.mrb[6].mxu1 }
 0x15d   : > { %v1260_v17 = vmax.f32 %v1075_v3, %v1085_v15  ;;  %v1262_v18 = vmax.f32 %v1221_v4, %v1231_v16  ;;  %v1087_v19 = vpop.f32.mrb[7].mxu0  ;;  %v1233_v20 = vpop.f32.mrb[7].mxu1 }
 0x15e   : > { %v1261_v21 = vmax.f32 %v1077_v5, %v1087_v19  ;;  %v1263_v22 = vmax.f32 %v1223_v6, %v1233_v20 }
 0x162   : > { %v1091_v23 = vpop.f32.mrb[8].mxu0  ;;  %v1237_v24 = vpop.f32.mrb[8].mxu1 }
 0x163   : > { %v1264_v25 = vmax.f32 %v1256_v9, %v1091_v23  ;;  %v1266_v26 = vmax.f32 %v1258_v10, %v1237_v24  ;;  %v1093_v27 = vpop.f32.mrb[9].mxu0  ;;  %v1239_v28 = vpop.f32.mrb[9].mxu1 }
 0x164   : > { %v1265_v29 = vmax.f32 %v1257_v13, %v1093_v27  ;;  %v1267_v30 = vmax.f32 %v1259_v14, %v1239_v28  ;;  %v1095_v31 = vpop.f32.mrb[10].mxu0  ;;  %v1241_v32 = vpop.f32.mrb[10].mxu1 }
 0x165   : > { %v1268_v33 = vmax.f32 %v1260_v17, %v1095_v31  ;;  %v1270_v34 = vmax.f32 %v1262_v18, %v1241_v32  ;;  %v1097_v35 = vpop.f32.mrb[11].mxu0  ;;  %v1243_v36 = vpop.f32.mrb[11].mxu1 }
 0x166   : > { %v1269_v37 = vmax.f32 %v1261_v21, %v1097_v35  ;;  %v1271_v38 = vmax.f32 %v1263_v22, %v1243_v36 }
 0x16a   : > { %v1101_v40 = vpop.f32.mrb[12].mxu0  ;;  %v1247_v41 = vpop.f32.mrb[12].mxu1 }
 0x16b   : > { %v1272_v42 = vmax.f32 %v1264_v25, %v1101_v40  ;;  %v1274_v43 = vmax.f32 %v1266_v26, %v1247_v41  ;;  %v1103_v44 = vpop.f32.mrb[13].mxu0  ;;  %v1249_v45 = vpop.f32.mrb[13].mxu1 }
 0x16c   : > { %v1273_v46 = vmax.f32 %v1265_v29, %v1103_v44  ;;  %v1275_v47 = vmax.f32 %v1267_v30, %v1249_v45  ;;  %v1105_v48 = vpop.f32.mrb[14].mxu0  ;;  %v1251_v49 = vpop.f32.mrb[14].mxu1 }
 0x16d   : > { %v1292_v50 = vadd.f32 %v1285_v39, %v1272_v42  ;;  %v1294_v51 = vadd.f32 %v1285_v39, %v1274_v43  ;;  %v1276_v52 = vmax.f32 %v1268_v33, %v1105_v48  ;;  %v1278_v53 = vmax.f32 %v1270_v34, %v1251_v49  ;;  %v1107_v54 = vpop.f32.mrb[15].mxu0  ;;  %v1253_v55 = vpop.f32.mrb[15].mxu1 }
 0x16e   : > { %v1293_v56 = vadd.f32 %v1285_v39, %v1273_v46  ;;  %v1295_v57 = vadd.f32 %v1285_v39, %v1275_v47  ;;  %v1277_v58 = vmax.f32 %v1269_v37, %v1107_v54  ;;  %v1279_v59 = vmax.f32 %v1271_v38, %v1253_v55 }
 0x16f   : > { %vm1300_vm1 = vcmp.gt.f32.partialorder %v1292_v50, 0.0  ;;  %v1308_v60 = vmul.f32 0.01, %v1292_v50  ;;  %vm1302_vm2 = vcmp.gt.f32.partialorder %v1294_v51, 0.0  ;;  %v1310_v61 = vmul.f32 0.01, %v1294_v51 }
 0x170   : > { %vm1301_vm3 = vcmp.gt.f32.partialorder %v1293_v56, 0.0  ;;  %v1309_v63 = vmul.f32 0.01, %v1293_v56  ;;  %vm1303_vm4 = vcmp.gt.f32.partialorder %v1295_v57, 0.0  ;;  %v1311_v0 = vmul.f32 0.01, %v1295_v57 }
 0x171   : > { %v1316_v1 = vsel %vm1300_vm1, %v1292_v50, %v1308_v60  ;;  %v1318_v2 = vsel %vm1302_vm2, %v1294_v51, %v1310_v61  ;;  %v1296_v3 = vadd.f32 %v1290_v62, %v1276_v52  ;;  %v1298_v4 = vadd.f32 %v1290_v62, %v1278_v53 }
 0x172   : > { %v1317_v5 = vsel %vm1301_vm3, %v1293_v56, %v1309_v63  ;;  %v1319_v6 = vsel %vm1303_vm4, %v1295_v57, %v1311_v0  ;;  %v1297_v7 = vadd.f32 %v1290_v62, %v1277_v58  ;;  %v1299_v8 = vadd.f32 %v1290_v62, %v1279_v59 }
 0x173   : > { %v1586_v9 = vpack.c.bf16 %v1317_v5, %v1316_v1  ;;  %v1587_v10 = vpack.c.bf16 %v1319_v6, %v1318_v2  ;;  %vm1304_vm5 = vcmp.gt.f32.partialorder %v1296_v3, 0.0  ;;  %v1312_v11 = vmul.f32 0.01, %v1296_v3 }
 0x174   : > { %vm1306_vm6 = vcmp.gt.f32.partialorder %v1298_v4, 0.0  ;;  %v1314_v12 = vmul.f32 0.01, %v1298_v4  ;;  %vm1305_vm7 = vcmp.gt.f32.partialorder %v1297_v7, 0.0  ;;  %v1313_v13 = vmul.f32 0.01, %v1297_v7 }
 0x175   : > { %1348 = vst [vmem:[%s208_s12] sm:$0xff] %v1586_v9  ;;  %1349 = vst [vmem:[%s208_s12 + $0x8] sm:$0xff] %v1587_v10  ;;  %v1320_v14 = vsel %vm1304_vm5, %v1296_v3, %v1312_v11  ;;  %vm1307_vm8 = vcmp.gt.f32.partialorder %v1299_v8, 0.0  ;;  %v1315_v15 = vmul.f32 0.01, %v1299_v8 }
 0x176   : > { %v1322_v16 = vsel %vm1306_vm6, %v1298_v4, %v1314_v12  ;;  %v1321_v17 = vsel %vm1305_vm7, %v1297_v7, %v1313_v13 }
 0x177   : > { %v1588_v18 = vpack.c.bf16 %v1321_v17, %v1320_v14  ;;  %v1323_v19 = vsel %vm1307_vm8, %v1299_v8, %v1315_v15 }
 0x178   : > { %v1589_v20 = vpack.c.bf16 %v1323_v19, %v1322_v16 }
 0x179   : > { %1350 = vst [vmem:[%s208_s12 + $0x10] sm:$0xff] %v1588_v18 }
 0x17a   : > { %1351 = vst [vmem:[%s208_s12 + $0x18] sm:$0xff] %v1589_v20 }
 0x17b PF: > { %s13_s14 = sadd.s32 1, %s1857_s14   ;;  %s2093_s12 = smov %s1853_s13 }
 0x17c   : > { %p10_p5 = scmp.ge.s32.totalorder %s13_s14, 4   ;;  %s2094_s13 = smov %s2096_s15 }
 0x17e   :  { %12 = sbr.rel (!%p10_p5) target bundleno = 2 (0x2), region = 62 }

// kernel: dga3net_forward.16
= control target key start
LH: loop header
LB: loop body
LE: loop exit
PB: predicated region body
PF: predicated region fallthrough
CT: control target
= control target key end

     0   :  { %s2110_s21 = smov 0   ;;  %s2112_s22 = smov 0   ;;  %s2359_s0 = inlined_call_operand.vmem [shape: bf16[64,432], index: 0, kind: input, shape index: {}]   ;;  %s2360_s1 = inlined_call_operand.vmem [shape: bf16[2,432,512], index: 1, kind: input, shape index: {}]   ;;  %s2361_s2 = inlined_call_operand.vmem [shape: f32[16,1], index: 2, kind: input, shape index: {}]   ;;  %s2362_s3 = inlined_call_operand.vmem [shape: bf16[2,16,512], index: 3, kind: input, shape index: {}]   ;;  %s2363_s4 = inlined_call_operand.vmem [shape: f32[16,1], index: 4, kind: input, shape index: {}]   ;;  %s2364_s5 = inlined_call_operand.vmem [shape: f32[16,1], index: 5, kind: input, shape index: {}]   ;;  %s2365_s6 = inlined_call_operand.vmem [shape: bf16[2,16,512], index: 6, kind: output, shape index: {}]  }
   0x1   :  { %s2114_s23 = smov 0  }
   0x2 LB: > { %s28_s24 = sadd.s32 1, %s2068_s22  ;;  %p1654_p0 = scmp.ge.s32.totalorder %s2072_s23, 1  ;;  %s2072_s23 = sphi %s2114_s23, %s16_s23   ;;  %s2068_s22 = sphi %s2112_s22, %s2367_s22   ;;  %s2064_s21 = sphi %s2110_s21, %s2366_s21  }
   0x3   : > { %p30_p1 = scmp.ge.s32.totalorder %s28_s24, 2  ;;  %p250_p2 = scmp.lt.s32.totalorder %s2072_s23, 3 }
   0x5   : > { %s2369_s24 = smov (%p30_p1, %s28_s24), 0  ;;  %p251_p3 = pnand %p1654_p0, %p250_p2 }
   0x6   : > { %p298_p4 = scmp.lt.s32.totalorder (!%p251_p3), %s2064_s21, 1  ;;  %v1962_v0 = vld [vmem:[%s2359_s0 + $0x4] ss:$16 sps:$4 sm:$0xff] (!%p251_p3)   ;;  %v2074_v15 = vmov (!%p251_p3), 0   ;;  %vm1068_vm0 = vcmask (!%p251_p3), 392192  }
   0x7   : > { %254 = sbr.rel (%p251_p3) target bundleno = 391 (0x187), region = 44  ;;  %1113 = vmatprep.mubr.bf16.mxu0 (!%p251_p3), %v1962_v0  ;;  %1259 = vmatprep.mubr.bf16.mxu1 (!%p251_p3), %v1962_v0 }
   0x8   : > { %1862 = vset.pattern.permute.xlu0 (!%p251_p3), %v2074_v15  ;;  %1863 = vset.pattern.permute.xlu1 (!%p251_p3), %v2074_v15  ;;  %v1995_v15 = vld [vmem:[%s2359_s0 + $0x20] ss:$16 sps:$4 sm:$0xff] (!%p251_p3)  }
   0xe   : > { %s2371_s21 = smov (!%p298_p4, %s2064_s21), 1 }
   0xf   : > { %s1836_s27 = smul.u32 864, %s2371_s21  ;;  %s1798_s10 = sshll.u32 %s2371_s21, 5 }
  0x10   : > { %s315_s13 = scalar_lea.vmem %s2362_s3, %s1798_s10  ;;  %s325_s16 = scalar_lea.vmem %s2365_s6, %s1798_s10 }
  0x11   : > { %s2137_s30 = scalar_lea.vmem %s2360_s1, %s1836_s27 }
  0x12   : > { %v1864_v1 = vld [vmem:[%s2137_s30 + $0x4] ss:$16 sps:$4 sm:$0xff]   ;;  %v1866_v2 = vld [vmem:[%s2137_s30 + $0xc] ss:$16 sps:$4 sm:$0xff]   ;;  %v1868_v3 = vld [vmem:[%s2137_s30] ss:$16 sps:$4 sm:$0xff]  }
  0x13   : > { %1081 = vmatprep.subr.bf16.mxu0 %v1864_v1  ;;  %v1869_v4 = vld [vmem:[%s2137_s30 + $0x8] ss:$16 sps:$4 sm:$0xff]   ;;  %1227 = vmatprep.subr.bf16.mxu1 %v1866_v2  ;;  %v1870_v5 = vld [vmem:[%s2137_s30 + $0x24] ss:$16 sps:$4 sm:$0xff]   ;;  %v1872_v6 = vld [vmem:[%s2137_s30 + $0x2c] ss:$16 sps:$4 sm:$0xff]  }
  0x14   : > { %1082 = vmatpush1.bf16.msra.mxu0 %v1868_v3  ;;  %1228 = vmatpush1.bf16.msra.mxu1 %v1869_v4  ;;  %v1874_v7 = vld [vmem:[%s2137_s30 + $0x20] ss:$16 sps:$4 sm:$0xff]   ;;  %v1875_v8 = vld [vmem:[%s2137_s30 + $0x28] ss:$16 sps:$4 sm:$0xff]   ;;  %v1876_v9 = vld [vmem:[%s2137_s30 + $0x44] ss:$16 sps:$4 sm:$0xff]  }
  0x15   : > { %1083 = vmatprep.subr.bf16.mxu0 %v1870_v5  ;;  %1229 = vmatprep.subr.bf16.mxu1 %v1872_v6  ;;  %v1878_v10 = vld [vmem:[%s2137_s30 + $0x4c] ss:$16 sps:$4 sm:$0xff]   ;;  %v1880_v11 = vld [vmem:[%s2137_s30 + $0x40] ss:$16 sps:$4 sm:$0xff]   ;;  %v1881_v12 = vld [vmem:[%s2137_s30 + $0x48] ss:$16 sps:$4 sm:$0xff]  }
  0x16   : > { %v1882_v13 = vld [vmem:[%s2137_s30 + $0x64] ss:$16 sps:$4 sm:$0xff]   ;;  %v1884_v14 = vld [vmem:[%s2137_s30 + $0x6c] ss:$16 sps:$4 sm:$0xff]   ;;  %v1886_v16 = vld [vmem:[%s2137_s30 + $0x60] ss:$16 sps:$4 sm:$0xff]  }
  0x17   : > { %v1887_v17 = vld [vmem:[%s2137_s30 + $0x68] ss:$16 sps:$4 sm:$0xff]   ;;  %v1888_v18 = vld [vmem:[%s2137_s30 + $0x84] ss:$16 sps:$4 sm:$0xff]   ;;  %v1890_v19 = vld [vmem:[%s2137_s30 + $0x8c] ss:$16 sps:$4 sm:$0xff]  }
  0x18   : > { %1084 = vmatpush1.bf16.msra.mxu0 %v1874_v7  ;;  %1230 = vmatpush1.bf16.msra.mxu1 %v1875_v8  ;;  %v1892_v20 = vld [vmem:[%s2137_s30 + $0x80] ss:$16 sps:$4 sm:$0xff]   ;;  %v1893_v21 = vld [vmem:[%s2137_s30 + $0x88] ss:$16 sps:$4 sm:$0xff]   ;;  %v1894_v22 = vld [vmem:[%s2137_s30 + $0xa4] ss:$16 sps:$4 sm:$0xff]  }
  0x19   : > { %1085 = vmatprep.subr.bf16.mxu0 %v1876_v9  ;;  %1231 = vmatprep.subr.bf16.mxu1 %v1878_v10  ;;  %v1896_v23 = vld [vmem:[%s2137_s30 + $0xac] ss:$16 sps:$4 sm:$0xff]   ;;  %v1898_v24 = vld [vmem:[%s2137_s30 + $0xa0] ss:$16 sps:$4 sm:$0xff]   ;;  %v1899_v25 = vld [vmem:[%s2137_s30 + $0xa8] ss:$16 sps:$4 sm:$0xff]  }
  0x1a   : > { %v1900_v26 = vld [vmem:[%s2137_s30 + $0xc4] ss:$16 sps:$4 sm:$0xff]   ;;  %v1902_v27 = vld [vmem:[%s2137_s30 + $0xcc] ss:$16 sps:$4 sm:$0xff]   ;;  %v1904_v28 = vld [vmem:[%s2137_s30 + $0xc0] ss:$16 sps:$4 sm:$0xff]  }
  0x1b   : > { %v1905_v29 = vld [vmem:[%s2137_s30 + $0xc8] ss:$16 sps:$4 sm:$0xff]   ;;  %v1906_v30 = vld [vmem:[%s2137_s30 + $0xe4] ss:$16 sps:$4 sm:$0xff]   ;;  %v1908_v31 = vld [vmem:[%s2137_s30 + $0xec] ss:$16 sps:$4 sm:$0xff]  }
  0x1c   : > { %1086 = vmatpush1.bf16.msra.mxu0 %v1880_v11  ;;  %1232 = vmatpush1.bf16.msra.mxu1 %v1881_v12  ;;  %v1910_v32 = vld [vmem:[%s2137_s30 + $0xe0] ss:$16 sps:$4 sm:$0xff]   ;;  %v1911_v33 = vld [vmem:[%s2137_s30 + $0xe8] ss:$16 sps:$4 sm:$0xff]   ;;  %v1912_v34 = vld [vmem:[%s2137_s30 + $0x104] ss:$16 sps:$4 sm:$0xff]  }
  0x1d   : > { %1087 = vmatprep.subr.bf16.mxu0 %v1882_v13  ;;  %1233 = vmatprep.subr.bf16.mxu1 %v1884_v14  ;;  %v1914_v35 = vld [vmem:[%s2137_s30 + $0x10c] ss:$16 sps:$4 sm:$0xff]   ;;  %v1916_v36 = vld [vmem:[%s2137_s30 + $0x100] ss:$16 sps:$4 sm:$0xff]   ;;  %v1917_v37 = vld [vmem:[%s2137_s30 + $0x108] ss:$16 sps:$4 sm:$0xff]  }
  0x1e   : > { %v1918_v38 = vld [vmem:[%s2137_s30 + $0x124] ss:$16 sps:$4 sm:$0xff]   ;;  %v1920_v39 = vld [vmem:[%s2137_s30 + $0x12c] ss:$16 sps:$4 sm:$0xff]   ;;  %v1922_v40 = vld [vmem:[%s2137_s30 + $0x120] ss:$16 sps:$4 sm:$0xff]  }
  0x1f   : > { %v1923_v41 = vld [vmem:[%s2137_s30 + $0x128] ss:$16 sps:$4 sm:$0xff]   ;;  %v1924_v42 = vld [vmem:[%s2137_s30 + $0x144] ss:$16 sps:$4 sm:$0xff]   ;;  %v1926_v43 = vld [vmem:[%s2137_s30 + $0x14c] ss:$16 sps:$4 sm:$0xff]  }
  0x20   : > { %1088 = vmatpush1.bf16.msra.mxu0 %v1886_v16  ;;  %1234 = vmatpush1.bf16.msra.mxu1 %v1887_v17  ;;  %v1928_v44 = vld [vmem:[%s2137_s30 + $0x140] ss:$16 sps:$4 sm:$0xff]   ;;  %v1929_v45 = vld [vmem:[%s2137_s30 + $0x148] ss:$16 sps:$4 sm:$0xff]   ;;  %v1930_v46 = vld [vmem:[%s2137_s30 + $0x164] ss:$16 sps:$4 sm:$0xff]  }
  0x21   : > { %1089 = vmatprep.subr.bf16.mxu0 %v1888_v18  ;;  %1235 = vmatprep.subr.bf16.mxu1 %v1890_v19  ;;  %v1932_v47 = vld [vmem:[%s2137_s30 + $0x16c] ss:$16 sps:$4 sm:$0xff]   ;;  %v1934_v48 = vld [vmem:[%s2137_s30 + $0x160] ss:$16 sps:$4 sm:$0xff]   ;;  %v1935_v49 = vld [vmem:[%s2137_s30 + $0x168] ss:$16 sps:$4 sm:$0xff]  }
  0x22   : > { %v1936_v50 = vld [vmem:[%s2137_s30 + $0x184] ss:$16 sps:$4 sm:$0xff]   ;;  %v1938_v51 = vld [vmem:[%s2137_s30 + $0x18c] ss:$16 sps:$4 sm:$0xff]   ;;  %v1940_v52 = vld [vmem:[%s2137_s30 + $0x180] ss:$16 sps:$4 sm:$0xff]  }
  0x23   : > { %v1941_v53 = vld [vmem:[%s2137_s30 + $0x188] ss:$16 sps:$4 sm:$0xff]   ;;  %v1942_v54 = vld [vmem:[%s2137_s30 + $0x1a4] ss:$16 sps:$4 sm:$0xff]   ;;  %v1944_v55 = vld [vmem:[%s2137_s30 + $0x1ac] ss:$16 sps:$4 sm:$0xff]  }
  0x24   : > { %1090 = vmatpush1.bf16.msra.mxu0 %v1892_v20  ;;  %1236 = vmatpush1.bf16.msra.mxu1 %v1893_v21  ;;  %v1946_v56 = vld [vmem:[%s2137_s30 + $0x1a0] ss:$16 sps:$4 sm:$0xff]   ;;  %v1947_v57 = vld [vmem:[%s2137_s30 + $0x1a8] ss:$16 sps:$4 sm:$0xff]   ;;  %v1948_v58 = vld [vmem:[%s2137_s30 + $0x1c4] ss:$16 sps:$4 sm:$0xff]  }
  0x25   : > { %1091 = vmatprep.subr.bf16.mxu0 %v1894_v22  ;;  %1237 = vmatprep.subr.bf16.mxu1 %v1896_v23  ;;  %v1950_v59 = vld [vmem:[%s2137_s30 + $0x1cc] ss:$16 sps:$4 sm:$0xff]   ;;  %v1952_v60 = vld [vmem:[%s2137_s30 + $0x1c0] ss:$16 sps:$4 sm:$0xff]   ;;  %v1953_v61 = vld [vmem:[%s2137_s30 + $0x1c8] ss:$16 sps:$4 sm:$0xff]  }
  0x26   : > { %v1954_v62 = vld [vmem:[%s2137_s30 + $0x1e4] ss:$16 sps:$4 sm:$0xff]   ;;  %v1956_v63 = vld [vmem:[%s2137_s30 + $0x1ec] ss:$16 sps:$4 sm:$0xff]   ;;  %v1958_v0 = vld [vmem:[%s2137_s30 + $0x1e0] ss:$16 sps:$4 sm:$0xff]  }
  0x27   : > { %v1959_v1 = vld [vmem:[%s2137_s30 + $0x1e8] ss:$16 sps:$4 sm:$0xff]   ;;  %v1965_v2 = vld [vmem:[%s2137_s30 + $0x204] ss:$16 sps:$4 sm:$0xff]   ;;  %v1968_v3 = vld [vmem:[%s2137_s30 + $0x20c] ss:$16 sps:$4 sm:$0xff]  }
  0x28   : > { %1092 = vmatpush1.bf16.msra.mxu0 %v1898_v24  ;;  %1238 = vmatpush1.bf16.msra.mxu1 %v1899_v25  ;;  %v1960_v4 = vld [vmem:[%s2359_s0] ss:$16 sps:$4 sm:$0xff]   ;;  %v1966_v6 = vld [vmem:[%s2137_s30 + $0x208] ss:$16 sps:$4 sm:$0xff]   ;;  %v1971_v7 = vld [vmem:[%s2137_s30 + $0x224] ss:$16 sps:$4 sm:$0xff]  }
  0x29   : > { %1093 = vmatprep.subr.bf16.mxu0 %v1900_v26  ;;  %1239 = vmatprep.subr.bf16.mxu1 %v1902_v27  ;;  %v1963_v5 = vld [vmem:[%s2137_s30 + $0x200] ss:$16 sps:$4 sm:$0xff]   ;;  %v1974_v8 = vld [vmem:[%s2137_s30 + $0x22c] ss:$16 sps:$4 sm:$0xff]   ;;  %v1993_v9 = vld [vmem:[%s2359_s0 + $0x24] ss:$16 sps:$4 sm:$0xff]  }
  0x2a   : > { %v1969_v10 = vld [vmem:[%s2137_s30 + $0x220] ss:$16 sps:$4 sm:$0xff]   ;;  %v1972_v11 = vld [vmem:[%s2137_s30 + $0x228] ss:$16 sps:$4 sm:$0xff]   ;;  %v1977_v12 = vld [vmem:[%s2137_s30 + $0x244] ss:$16 sps:$4 sm:$0xff]  }
  0x2b   : > { %v1980_v13 = vld [vmem:[%s2137_s30 + $0x24c] ss:$16 sps:$4 sm:$0xff]   ;;  %v1975_v14 = vld [vmem:[%s2137_s30 + $0x240] ss:$16 sps:$4 sm:$0xff]   ;;  %v1978_v16 = vld [vmem:[%s2137_s30 + $0x248] ss:$16 sps:$4 sm:$0xff]  }
  0x2c   : > { %1094 = vmatpush1.bf16.msra.mxu0 %v1904_v28  ;;  %1240 = vmatpush1.bf16.msra.mxu1 %v1905_v29  ;;  %v1983_v17 = vld [vmem:[%s2137_s30 + $0x264] ss:$16 sps:$4 sm:$0xff]   ;;  %v1986_v18 = vld [vmem:[%s2137_s30 + $0x26c] ss:$16 sps:$4 sm:$0xff]   ;;  %v1981_v20 = vld [vmem:[%s2137_s30 + $0x260] ss:$16 sps:$4 sm:$0xff]  }
  0x2d   : > { %1095 = vmatprep.subr.bf16.mxu0 %v1906_v30  ;;  %1241 = vmatprep.subr.bf16.mxu1 %v1908_v31  ;;  %v2008_v19 = vld [vmem:[%s2359_s0 + $0x44] ss:$16 sps:$4 sm:$0xff]   ;;  %v1984_v21 = vld [vmem:[%s2137_s30 + $0x268] ss:$16 sps:$4 sm:$0xff]   ;;  %v1992_v25 = vld [vmem:[%s2137_s30 + $0x28c] ss:$16 sps:$4 sm:$0xff]  }
  0x2e   : > { %v1397_v22 = vld [vmem:[%s2361_s2] sm:$0xff]  ;;  %v1990_v28 = vld [vmem:[%s2137_s30 + $0x288] ss:$16 sps:$4 sm:$0xff]   ;;  %v2001_v30 = vld [vmem:[%s2137_s30 + $0x2ac] ss:$16 sps:$4 sm:$0xff]  }
  0x2f   : > { %v1477_v23 = vld [vmem:[%s2363_s4] sm:$0xff]  ;;  %1401 = vperm.xlu0 %1862, %v1397_v22  }
  0x30   : > { %1096 = vmatpush1.bf16.msra.mxu0 %v1910_v32  ;;  %1242 = vmatpush1.bf16.msra.mxu1 %v1911_v33  ;;  %v1989_v24 = vld [vmem:[%s2137_s30 + $0x284] ss:$16 sps:$4 sm:$0xff]   ;;  %v2010_v26 = vld [vmem:[%s2359_s0 + $0x40] ss:$16 sps:$4 sm:$0xff]   ;;  %v1999_v33 = vld [vmem:[%s2137_s30 + $0x2a8] ss:$16 sps:$4 sm:$0xff]  }
  0x31   : > { %1097 = vmatprep.subr.bf16.mxu0 %v1912_v34  ;;  %1243 = vmatprep.subr.bf16.mxu1 %v1914_v35  ;;  %v1987_v27 = vld [vmem:[%s2137_s30 + $0x280] ss:$16 sps:$4 sm:$0xff]   ;;  %v1998_v29 = vld [vmem:[%s2137_s30 + $0x2a4] ss:$16 sps:$4 sm:$0xff]   ;;  %v1398_v34 = vld [vmem:[%s2361_s2 + $0x8] sm:$0xff] }
  0x32   : > { %1481 = vperm.xlu1 %1863, %v1477_v23   ;;  %v2023_v31 = vld [vmem:[%s2359_s0 + $0x64] ss:$16 sps:$4 sm:$0xff]   ;;  %v1996_v32 = vld [vmem:[%s2137_s30 + $0x2a0] ss:$16 sps:$4 sm:$0xff]   ;;  %v1478_v35 = vld [vmem:[%s2363_s4 + $0x8] sm:$0xff] }
  0x33   : > { %1406 = vperm.xlu0 %1862, %v1398_v34  }
  0x34   : > { %1098 = vmatpush1.bf16.msra.mxu0 %v1916_v36  ;;  %1244 = vmatpush1.bf16.msra.mxu1 %v1917_v37  ;;  %v2004_v36 = vld [vmem:[%s2137_s30 + $0x2c4] ss:$16 sps:$4 sm:$0xff]   ;;  %v2007_v37 = vld [vmem:[%s2137_s30 + $0x2cc] ss:$16 sps:$4 sm:$0xff]  }
  0x35   : > { %1099 = vmatprep.subr.bf16.mxu0 %v1918_v38  ;;  %1245 = vmatprep.subr.bf16.mxu1 %v1920_v39  ;;  %v2025_v38 = vld [vmem:[%s2359_s0 + $0x60] ss:$16 sps:$4 sm:$0xff]  }
  0x36   : > { %1486 = vperm.xlu1 %1863, %v1478_v35   ;;  %v2002_v39 = vld [vmem:[%s2137_s30 + $0x2c0] ss:$16 sps:$4 sm:$0xff]  }
  0x38   : > { %1100 = vmatpush1.bf16.msra.mxu0 %v1922_v40  ;;  %1246 = vmatpush1.bf16.msra.mxu1 %v1923_v41  ;;  %v2005_v40 = vld [vmem:[%s2137_s30 + $0x2c8] ss:$16 sps:$4 sm:$0xff]   ;;  %v2013_v41 = vld [vmem:[%s2137_s30 + $0x2e4] ss:$16 sps:$4 sm:$0xff]  }
  0x39   : > { %1101 = vmatprep.subr.bf16.mxu0 %v1924_v42  ;;  %1247 = vmatprep.subr.bf16.mxu1 %v1926_v43  ;;  %v2016_v42 = vld [vmem:[%s2137_s30 + $0x2ec] ss:$16 sps:$4 sm:$0xff]  }
  0x3a   : > { %v2040_v43 = vld [vmem:[%s2359_s0 + $0xc] ss:$16 sps:$4 sm:$0xff]  }
  0x3c   : > { %1102 = vmatpush1.bf16.msra.mxu0 %v1928_v44  ;;  %1248 = vmatpush1.bf16.msra.mxu1 %v1929_v45  ;;  %v2011_v44 = vld [vmem:[%s2137_s30 + $0x2e0] ss:$16 sps:$4 sm:$0xff]   ;;  %v2014_v45 = vld [vmem:[%s2137_s30 + $0x2e8] ss:$16 sps:$4 sm:$0xff]  }
  0x3d   : > { %1103 = vmatprep.subr.bf16.mxu0 %v1930_v46  ;;  %1249 = vmatprep.subr.bf16.mxu1 %v1932_v47  ;;  %v1497_v46 = vld [vmem:[%s2364_s5] sm:$0xff]  ;;  %v1498_v47 = vld [vmem:[%s2364_s5 + $0x8] sm:$0xff] }
  0x3e   : > { %1501 = vperm.xlu0 %1862, %v1497_v46   ;;  %1506 = vperm.xlu1 %1863, %v1498_v47   ;;  %v2324_v46 = vld [vmem:[%s315_s13 + $0x18] sm:$0xff] }
  0x40   : > { %1104 = vmatpush1.bf16.msra.mxu0 %v1934_v48  ;;  %1250 = vmatpush1.bf16.msra.mxu1 %v1935_v49  ;;  %v2019_v48 = vld [vmem:[%s2137_s30 + $0x304] ss:$16 sps:$4 sm:$0xff]   ;;  %v2022_v49 = vld [vmem:[%s2137_s30 + $0x30c] ss:$16 sps:$4 sm:$0xff]  }
  0x41   : > { %1105 = vmatprep.subr.bf16.mxu0 %v1936_v50  ;;  %1251 = vmatprep.subr.bf16.mxu1 %v1938_v51  ;;  %v2017_v50 = vld [vmem:[%s2137_s30 + $0x300] ss:$16 sps:$4 sm:$0xff]   ;;  %v2020_v51 = vld [vmem:[%s2137_s30 + $0x308] ss:$16 sps:$4 sm:$0xff]  }
  0x44   : > { %1106 = vmatpush1.bf16.msra.mxu0 %v1940_v52  ;;  %1252 = vmatpush1.bf16.msra.mxu1 %v1941_v53  ;;  %v2028_v52 = vld [vmem:[%s2137_s30 + $0x324] ss:$16 sps:$4 sm:$0xff]   ;;  %v2031_v53 = vld [vmem:[%s2137_s30 + $0x32c] ss:$16 sps:$4 sm:$0xff]  }
  0x45   : > { %1107 = vmatprep.subr.bf16.mxu0 %v1942_v54  ;;  %1253 = vmatprep.subr.bf16.mxu1 %v1944_v55  ;;  %v2026_v54 = vld [vmem:[%s2137_s30 + $0x320] ss:$16 sps:$4 sm:$0xff]   ;;  %v2029_v55 = vld [vmem:[%s2137_s30 + $0x328] ss:$16 sps:$4 sm:$0xff]  }
  0x48   : > { %1108 = vmatpush1.bf16.msra.mxu0 %v1946_v56  ;;  %1254 = vmatpush1.bf16.msra.mxu1 %v1947_v57  ;;  %v2034_v56 = vld [vmem:[%s2137_s30 + $0x344] ss:$16 sps:$4 sm:$0xff]   ;;  %v2037_v57 = vld [vmem:[%s2137_s30 + $0x34c] ss:$16 sps:$4 sm:$0xff]  }
  0x49   : > { %1109 = vmatprep.subr.bf16.mxu0 %v1948_v58  ;;  %1255 = vmatprep.subr.bf16.mxu1 %v1950_v59  ;;  %v2032_v58 = vld [vmem:[%s2137_s30 + $0x340] ss:$16 sps:$4 sm:$0xff]   ;;  %v2035_v59 = vld [vmem:[%s2137_s30 + $0x348] ss:$16 sps:$4 sm:$0xff]  }
  0x4c   : > { %1110 = vmatpush1.bf16.msra.mxu0 %v1952_v60  ;;  %1256 = vmatpush1.bf16.msra.mxu1 %v1953_v61  ;;  %v2038_v60 = vld [vmem:[%s2359_s0 + $0x8] ss:$16 sps:$4 sm:$0xff]   ;;  %v2041_v61 = vld [vmem:[%s2359_s0 + $0x2c] ss:$16 sps:$4 sm:$0xff]  }
  0x4d   : > { %1111 = vmatprep.subr.bf16.mxu0 %v1954_v62  ;;  %1257 = vmatprep.subr.bf16.mxu1 %v1956_v63  ;;  %v2043_v62 = vld [vmem:[%s2359_s0 + $0x28] ss:$16 sps:$4 sm:$0xff]   ;;  %v2044_v63 = vld [vmem:[%s2359_s0 + $0x4c] ss:$16 sps:$4 sm:$0xff]  }
  0x50   : > { %1112 = vmatpush1.bf16.msra.mxu0 %v1958_v0  ;;  %1258 = vmatpush1.bf16.msra.mxu1 %v1959_v1  ;;  %v2046_v0 = vld [vmem:[%s2359_s0 + $0x48] ss:$16 sps:$4 sm:$0xff]   ;;  %v2047_v1 = vld [vmem:[%s2359_s0 + $0x6c] ss:$16 sps:$4 sm:$0xff]  }
  0x51   : > { %1154 = vmatprep.subr.bf16.mxu0 %v1965_v2  ;;  %1300 = vmatprep.subr.bf16.mxu1 %v1968_v3  ;;  %v2049_v2 = vld [vmem:[%s2359_s0 + $0x68] ss:$16 sps:$4 sm:$0xff]  }
  0x53   : > { %1114 = vmatmul.mubr.bf16.vlgmr.msra.gmra.mrb[0].mxu0 %v1960_v4  ;;  %1260 = vmatmul.mubr.bf16.vlgmr.msra.gmra.mrb[0].mxu1 %v1960_v4 }
  0x54   : > { %1155 = vmatpush1.bf16.msra.mxu0 %v1963_v5  ;;  %1301 = vmatpush1.bf16.msra.mxu1 %v1966_v6 }
  0x55   : > { %1156 = vmatprep.subr.bf16.mxu0 %v1971_v7  ;;  %1302 = vmatprep.subr.bf16.mxu1 %v1974_v8 }
  0x56   : > { %1123 = vmatprep.mubr.bf16.mxu0 %v1993_v9  ;;  %1269 = vmatprep.mubr.bf16.mxu1 %v1993_v9 }
  0x58   : > { %1157 = vmatpush1.bf16.msra.mxu0 %v1969_v10  ;;  %1303 = vmatpush1.bf16.msra.mxu1 %v1972_v11 }
  0x59   : > { %1158 = vmatprep.subr.bf16.mxu0 %v1977_v12  ;;  %1304 = vmatprep.subr.bf16.mxu1 %v1980_v13 }
  0x5b   : > { %1124 = vmatmul.mubr.bf16.gmra.mrb[4].mxu0 %v1995_v15  ;;  %1270 = vmatmul.mubr.bf16.gmra.mrb[4].mxu1 %v1995_v15 }
  0x5c   : > { %1159 = vmatpush1.bf16.msra.mxu0 %v1975_v14  ;;  %1305 = vmatpush1.bf16.msra.mxu1 %v1978_v16 }
  0x5d   : > { %1160 = vmatprep.subr.bf16.mxu0 %v1983_v17  ;;  %1306 = vmatprep.subr.bf16.mxu1 %v1986_v18 }
  0x5e   : > { %1133 = vmatprep.mubr.bf16.mxu0 %v2008_v19  ;;  %1279 = vmatprep.mubr.bf16.mxu1 %v2008_v19 }
  0x60   : > { %1161 = vmatpush1.bf16.msra.mxu0 %v1981_v20  ;;  %1307 = vmatpush1.bf16.msra.mxu1 %v1984_v21 }
  0x61   : > { %1162 = vmatprep.subr.bf16.mxu0 %v1989_v24  ;;  %1308 = vmatprep.subr.bf16.mxu1 %v1992_v25 }
  0x63   : > { %1134 = vmatmul.mubr.bf16.gmra.mrb[8].mxu0 %v2010_v26  ;;  %1280 = vmatmul.mubr.bf16.gmra.mrb[8].mxu1 %v2010_v26 }
  0x64   : > { %1163 = vmatpush1.bf16.msra.mxu0 %v1987_v27  ;;  %1309 = vmatpush1.bf16.msra.mxu1 %v1990_v28 }
  0x65   : > { %1164 = vmatprep.subr.bf16.mxu0 %v1998_v29  ;;  %1310 = vmatprep.subr.bf16.mxu1 %v2001_v30  ;;  %v1449_v29 = vld [vmem:[%s315_s13] sm:$0xff]  ;;  %v1450_v30 = vld [vmem:[%s315_s13 + $0x8] sm:$0xff] }
  0x66   : > { %1143 = vmatprep.mubr.bf16.mxu0 %v2023_v31  ;;  %1289 = vmatprep.mubr.bf16.mxu1 %v2023_v31 }
  0x68   : > { %1165 = vmatpush1.bf16.msra.mxu0 %v1996_v32  ;;  %1311 = vmatpush1.bf16.msra.mxu1 %v1999_v33 }
  0x69   : > { %1166 = vmatprep.subr.bf16.mxu0 %v2004_v36  ;;  %1312 = vmatprep.subr.bf16.mxu1 %v2007_v37 }
  0x6b   : > { %1144 = vmatmul.mubr.bf16.gmra.mrb[12].mxu0 %v2025_v38  ;;  %1290 = vmatmul.mubr.bf16.gmra.mrb[12].mxu1 %v2025_v38 }
  0x6c   : > { %1167 = vmatpush1.bf16.msra.mxu0 %v2002_v39  ;;  %1313 = vmatpush1.bf16.msra.mxu1 %v2005_v40  ;;  %v1451_v39 = vld [vmem:[%s315_s13 + $0x10] sm:$0xff] }
  0x6d   : > { %1168 = vmatprep.subr.bf16.mxu0 %v2013_v41  ;;  %1314 = vmatprep.subr.bf16.mxu1 %v2016_v42 }
  0x6e   : > { %1784 = vmatprep.mubr.msk.bf16.mxu0 %vm1068_vm0, %v2040_v43  ;;  %1788 = vmatprep.mubr.msk.bf16.mxu1 %vm1068_vm0, %v2040_v43 }
  0x70   : > { %1169 = vmatpush1.bf16.msra.mxu0 %v2011_v44  ;;  %1315 = vmatpush1.bf16.msra.mxu1 %v2014_v45  ;;  %v1453_v44 = vunpack.c.l.bf16 %v1449_v29  ;;  %v1455_v45 = vunpack.c.l.bf16 %v1450_v30 }
  0x71   : > { %1170 = vmatprep.subr.bf16.mxu0 %v2019_v48  ;;  %1316 = vmatprep.subr.bf16.mxu1 %v2022_v49  ;;  %v1454_v49 = vunpack.c.h.bf16 %v1449_v29 }
  0x74   : > { %1171 = vmatpush1.bf16.msra.mxu0 %v2017_v50  ;;  %1317 = vmatpush1.bf16.msra.mxu1 %v2020_v51  ;;  %v1456_v50 = vunpack.c.h.bf16 %v1450_v30  ;;  %v1457_v51 = vunpack.c.l.bf16 %v1451_v39 }
  0x75   : > { %1172 = vmatprep.subr.bf16.mxu0 %v2028_v52  ;;  %1318 = vmatprep.subr.bf16.mxu1 %v2031_v53  ;;  %v1458_v52 = vunpack.c.h.bf16 %v1451_v39  ;;  %v1459_v53 = vunpack.c.l.bf16 %v2324_v46 }
  0x78   : > { %1173 = vmatpush1.bf16.msra.mxu0 %v2026_v54  ;;  %1319 = vmatpush1.bf16.msra.mxu1 %v2029_v55  ;;  %v1461_v55 = vmul.f32 0.1, %v1453_v44 }
  0x79   : > { %1174 = vmatprep.subr.bf16.mxu0 %v2034_v56  ;;  %1320 = vmatprep.subr.bf16.mxu1 %v2037_v57  ;;  %v1463_v56 = vmul.f32 0.1, %v1455_v45 }
  0x7c   : > { %1175 = vmatpush1.bf16.msra.mxu0 %v2032_v58  ;;  %1321 = vmatpush1.bf16.msra.mxu1 %v2035_v59  ;;  %v1462_v59 = vmul.f32 0.1, %v1454_v49 }
  0x7f   : > { %1187 = vmatmul.mubr.bf16.vlgmr.msra.gmra.mrb[0].mxu0 %v2038_v60  ;;  %1333 = vmatmul.mubr.bf16.vlgmr.msra.gmra.mrb[0].mxu1 %v2038_v60  ;;  %v1464_v60 = vmul.f32 0.1, %v1456_v50 }
  0x80   : > { %1785 = vmatprep.mubr.msk.bf16.mxu0 %vm1068_vm0, %v2041_v61  ;;  %1789 = vmatprep.mubr.msk.bf16.mxu1 %vm1068_vm0, %v2041_v61 }
  0x87   : > { %1197 = vmatmul.mubr.bf16.gmra.mrb[4].mxu0 %v2043_v62  ;;  %1343 = vmatmul.mubr.bf16.gmra.mrb[4].mxu1 %v2043_v62 }
  0x88   : > { %1786 = vmatprep.mubr.msk.bf16.mxu0 %vm1068_vm0, %v2044_v63  ;;  %1790 = vmatprep.mubr.msk.bf16.mxu1 %vm1068_vm0, %v2044_v63 }
  0x8f   : > { %1207 = vmatmul.mubr.bf16.gmra.mrb[8].mxu0 %v2046_v0  ;;  %1353 = vmatmul.mubr.bf16.gmra.mrb[8].mxu1 %v2046_v0 }
  0x90   : > { %1787 = vmatprep.mubr.msk.bf16.mxu0 %vm1068_vm0, %v2047_v1  ;;  %1791 = vmatprep.mubr.msk.bf16.mxu1 %vm1068_vm0, %v2047_v1  ;;  %v1460_v1 = vunpack.c.h.bf16 %v2324_v46 }
  0x97   : > { %1217 = vmatmul.mubr.bf16.gmra.mrb[12].mxu0 %v2049_v2  ;;  %1363 = vmatmul.mubr.bf16.gmra.mrb[12].mxu1 %v2049_v2  ;;  %v2332_v2 = vmul.f32 0.1, %v1457_v51 }
  0xae   : > { %v1402_v54 = vpop.permute.xlu0 %1401 }
 0x152   : > { %v1188_v3 = vpop.f32.mrb[0].mxu0  ;;  %v1334_v4 = vpop.f32.mrb[0].mxu1 }
 0x153   : > { %v1190_v5 = vpop.f32.mrb[1].mxu0  ;;  %v1336_v6 = vpop.f32.mrb[1].mxu1 }
 0x154   : > { %v1192_v7 = vpop.f32.mrb[2].mxu0  ;;  %v1338_v8 = vpop.f32.mrb[2].mxu1 }
 0x155   : > { %v1194_v9 = vpop.f32.mrb[3].mxu0  ;;  %v1340_v10 = vpop.f32.mrb[3].mxu1 }
 0x15a   : > { %v1198_v11 = vpop.f32.mrb[4].mxu0  ;;  %v1344_v12 = vpop.f32.mrb[4].mxu1 }
 0x15b   : > { %v1373_v13 = vmax.f32 %v1188_v3, %v1198_v11  ;;  %v1375_v14 = vmax.f32 %v1334_v4, %v1344_v12  ;;  %v1200_v15 = vpop.f32.mrb[5].mxu0  ;;  %v1346_v16 = vpop.f32.mrb[5].mxu1 }
 0x15c   : > { %v1374_v17 = vmax.f32 %v1190_v5, %v1200_v15  ;;  %v1376_v18 = vmax.f32 %v1336_v6, %v1346_v16  ;;  %v1202_v19 = vpop.f32.mrb[6].mxu0  ;;  %v1348_v20 = vpop.f32.mrb[6].mxu1 }
 0x15d   : > { %v1377_v21 = vmax.f32 %v1192_v7, %v1202_v19  ;;  %v1379_v22 = vmax.f32 %v1338_v8, %v1348_v20  ;;  %v1204_v23 = vpop.f32.mrb[7].mxu0  ;;  %v1350_v24 = vpop.f32.mrb[7].mxu1  ;;  %v2334_v7 = vmul.f32 0.1, %v1458_v52  ;;  %v2336_v8 = vmul.f32 0.1, %v1459_v53 }
 0x15e   : > { %v1378_v25 = vmax.f32 %v1194_v9, %v1204_v23  ;;  %v1380_v26 = vmax.f32 %v1340_v10, %v1350_v24 }
 0x162   : > { %v1208_v27 = vpop.f32.mrb[8].mxu0  ;;  %v1354_v28 = vpop.f32.mrb[8].mxu1 }
 0x163   : > { %v1381_v31 = vmax.f32 %v1373_v13, %v1208_v27  ;;  %v1383_v32 = vmax.f32 %v1375_v14, %v1354_v28  ;;  %v1210_v33 = vpop.f32.mrb[9].mxu0  ;;  %v1356_v34 = vpop.f32.mrb[9].mxu1 }
 0x164   : > { %v1382_v35 = vmax.f32 %v1374_v17, %v1210_v33  ;;  %v1384_v36 = vmax.f32 %v1376_v18, %v1356_v34  ;;  %v1212_v37 = vpop.f32.mrb[10].mxu0  ;;  %v1358_v38 = vpop.f32.mrb[10].mxu1 }
 0x165   : > { %v1385_v40 = vmax.f32 %v1377_v21, %v1212_v37  ;;  %v1387_v41 = vmax.f32 %v1379_v22, %v1358_v38  ;;  %v1214_v42 = vpop.f32.mrb[11].mxu0  ;;  %v1360_v43 = vpop.f32.mrb[11].mxu1 }
 0x166   : > { %v2326_v47 = vmax.f32 %v1378_v25, %v1214_v42  ;;  %v2328_v48 = vmax.f32 %v1380_v26, %v1360_v43  ;;  %v1407_v21 = vpop.permute.xlu0 %1406  ;;  %v1482_v28 = vpop.permute.xlu1 %1481 }
 0x16a   : > { %v1218_v57 = vpop.f32.mrb[12].mxu0  ;;  %v1364_v58 = vpop.f32.mrb[12].mxu1 }
 0x16b   : > { %v1389_v61 = vmax.f32 %v1381_v31, %v1218_v57  ;;  %v1391_v62 = vmax.f32 %v1383_v32, %v1364_v58  ;;  %v1220_v63 = vpop.f32.mrb[13].mxu0  ;;  %v1366_v0 = vpop.f32.mrb[13].mxu1 }
 0x16c   : > { %v1390_v3 = vmax.f32 %v1382_v35, %v1220_v63  ;;  %v1392_v4 = vmax.f32 %v1384_v36, %v1366_v0  ;;  %v1222_v5 = vpop.f32.mrb[14].mxu0  ;;  %v1368_v6 = vpop.f32.mrb[14].mxu1 }
 0x16d   : > { %v1409_v9 = vadd.f32 %v1402_v54, %v1389_v61  ;;  %v1411_v10 = vadd.f32 %v1402_v54, %v1391_v62  ;;  %v1393_v11 = vmax.f32 %v1385_v40, %v1222_v5  ;;  %v1395_v12 = vmax.f32 %v1387_v41, %v1368_v6  ;;  %v1224_v13 = vpop.f32.mrb[15].mxu0  ;;  %v1370_v14 = vpop.f32.mrb[15].mxu1 }
 0x16e   : > { %v1410_v15 = vadd.f32 %v1402_v54, %v1390_v3  ;;  %v1412_v16 = vadd.f32 %v1402_v54, %v1392_v4  ;;  %v1394_v17 = vmax.f32 %v2326_v47, %v1224_v13  ;;  %v1396_v18 = vmax.f32 %v2328_v48, %v1370_v14  ;;  %v1502_v48 = vpop.permute.xlu0 %1501 }
 0x16f   : > { %vm1417_vm1 = vcmp.gt.f32.partialorder %v1409_v9, 0.0  ;;  %v1425_v19 = vmul.f32 0.01, %v1409_v9  ;;  %vm1419_vm2 = vcmp.gt.f32.partialorder %v1411_v10, 0.0  ;;  %v1427_v20 = vmul.f32 0.01, %v1411_v10 }
 0x170   : > { %vm1418_vm3 = vcmp.gt.f32.partialorder %v1410_v15, 0.0  ;;  %v1426_v22 = vmul.f32 0.01, %v1410_v15  ;;  %vm1420_vm4 = vcmp.gt.f32.partialorder %v1412_v16, 0.0  ;;  %v1428_v23 = vmul.f32 0.01, %v1412_v16 }
 0x171   : > { %v1433_v24 = vsel %vm1417_vm1, %v1409_v9, %v1425_v19  ;;  %v1435_v25 = vsel %vm1419_vm2, %v1411_v10, %v1427_v20  ;;  %v1413_v26 = vadd.f32 %v1407_v21, %v1393_v11  ;;  %v1415_v27 = vadd.f32 %v1407_v21, %v1395_v12 }
 0x172   : > { %v1441_v29 = vmul.f32 0.9, %v1433_v24  ;;  %v1443_v30 = vmul.f32 0.9, %v1435_v25  ;;  %v1434_v31 = vsel %vm1418_vm3, %v1410_v15, %v1426_v22  ;;  %v1436_v32 = vsel %vm1420_vm4, %v1412_v16, %v1428_v23 }
 0x173   : > { %v1442_v33 = vmul.f32 0.9, %v1434_v31  ;;  %v1444_v34 = vmul.f32 0.9, %v1436_v32  ;;  %vm1421_vm5 = vcmp.gt.f32.partialorder %v1413_v26, 0.0  ;;  %vm1423_vm6 = vcmp.gt.f32.partialorder %v1415_v27, 0.0 }
 0x174   : > { %v1469_v35 = vadd.f32 %v1461_v55, %v1441_v29  ;;  %v1471_v36 = vadd.f32 %v1463_v56, %v1443_v30  ;;  %v1429_v37 = vmul.f32 0.01, %v1413_v26  ;;  %v1431_v38 = vmul.f32 0.01, %v1415_v27  ;;  %v1487_v56 = vpop.permute.xlu1 %1486 }
 0x175   : > { %v1470_v39 = vadd.f32 %v1462_v59, %v1442_v33  ;;  %v1472_v40 = vadd.f32 %v1464_v60, %v1444_v34  ;;  %v1414_v41 = vadd.f32 %v1407_v21, %v1394_v17  ;;  %v1416_v42 = vadd.f32 %v1407_v21, %v1396_v18 }
 0x176   : > { %v1489_v43 = vmul.f32 %v1482_v28, %v1469_v35  ;;  %v1491_v44 = vmul.f32 %v1482_v28, %v1471_v36  ;;  %v1437_v45 = vsel %vm1421_vm5, %v1413_v26, %v1429_v37  ;;  %v1439_v47 = vsel %vm1423_vm6, %v1415_v27, %v1431_v38 }
 0x177   : > { %v1490_v49 = vmul.f32 %v1482_v28, %v1470_v39  ;;  %v1492_v50 = vmul.f32 %v1482_v28, %v1472_v40  ;;  %v1445_v51 = vmul.f32 0.9, %v1437_v45  ;;  %v1447_v52 = vmul.f32 0.9, %v1439_v47 }
 0x178   : > { %v1509_v53 = vadd.f32 %v1502_v48, %v1489_v43  ;;  %v1511_v54 = vadd.f32 %v1502_v48, %v1491_v44  ;;  %vm1422_vm7 = vcmp.gt.f32.partialorder %v1414_v41, 0.0  ;;  %v1430_v55 = vmul.f32 0.01, %v1414_v41  ;;  %v1507_v12 = vpop.permute.xlu1 %1506 }
 0x179   : > { %v1510_v57 = vadd.f32 %v1502_v48, %v1490_v49  ;;  %v1512_v58 = vadd.f32 %v1502_v48, %v1492_v50  ;;  %vm1424_vm8 = vcmp.gt.f32.partialorder %v1416_v42, 0.0  ;;  %v1432_v59 = vmul.f32 0.01, %v1416_v42 }
 0x17a   : > { %v1438_v60 = vsel %vm1422_vm7, %v1414_v41, %v1430_v55  ;;  %v1468_v61 = vmul.f32 0.1, %v1460_v1  ;;  %v1473_v62 = vadd.f32 %v2332_v2, %v1445_v51  ;;  %v1475_v63 = vadd.f32 %v2336_v8, %v1447_v52 }
 0x17b   : > { %v1800_v0 = vpack.c.bf16 %v1510_v57, %v1509_v53  ;;  %v1801_v3 = vpack.c.bf16 %v1512_v58, %v1511_v54  ;;  %v1446_v4 = vmul.f32 0.9, %v1438_v60  ;;  %v1440_v5 = vsel %vm1424_vm8, %v1416_v42, %v1432_v59 }
 0x17c   : > { %v1448_v6 = vmul.f32 0.9, %v1440_v5  ;;  %v1493_v9 = vmul.f32 %v1487_v56, %v1473_v62  ;;  %v1495_v10 = vmul.f32 %v1487_v56, %v1475_v63 }
 0x17d   : > { %v1474_v11 = vadd.f32 %v2334_v7, %v1446_v4  ;;  %1541 = vst [vmem:[%s325_s16] sm:$0xff] %v1800_v0  ;;  %1542 = vst [vmem:[%s325_s16 + $0x8] sm:$0xff] %v1801_v3 }
 0x17e   : > { %v1476_v13 = vadd.f32 %v1468_v61, %v1448_v6  ;;  %v1513_v46 = vadd.f32 %v1507_v12, %v1493_v9  ;;  %v1515_v15 = vadd.f32 %v1507_v12, %v1495_v10 }
 0x17f   : > { %v1494_v14 = vmul.f32 %v1487_v56, %v1474_v11 }
 0x180   : > { %v1496_v1 = vmul.f32 %v1487_v56, %v1476_v13 }
 0x181   : > { %v1514_v2 = vadd.f32 %v1507_v12, %v1494_v14 }
 0x182   : > { %v1516_v16 = vadd.f32 %v1507_v12, %v1496_v1 }
 0x183   : > { %v1802_v8 = vpack.c.bf16 %v1514_v2, %v1513_v46 }
 0x184   : > { %v1803_v17 = vpack.c.bf16 %v1516_v16, %v1515_v15 }
 0x185   : > { %1543 = vst [vmem:[%s325_s16 + $0x10] sm:$0xff] %v1802_v8 }
 0x186   : > { %1544 = vst [vmem:[%s325_s16 + $0x18] sm:$0xff] %v1803_v17 }
 0x187 PF: > { %s16_s23 = sadd.s32 1, %s2072_s23   ;;  %s2366_s21 = smov %s2068_s22 }
 0x188   : > { %p13_p5 = scmp.ge.s32.totalorder %s16_s23, 4   ;;  %s2367_s22 = smov %s2369_s24 }
 0x18a   :  { %15 = sbr.rel (!%p13_p5) target bundleno = 2 (0x2), region = 77 }

// kernel: dga3net_forward.17
= control target key start
LH: loop header
LB: loop body
LE: loop exit
PB: predicated region body
PF: predicated region fallthrough
CT: control target
= control target key end

     0   :  { %s1274_s12 = smov 0   ;;  %s1276_s13 = smov 0   ;;  %s1469_s0 = inlined_call_operand.vmem [shape: bf16[128,432], index: 0, kind: input, shape index: {}]   ;;  %s1470_s1 = inlined_call_operand.vmem [shape: bf16[2,432,128], index: 1, kind: input, shape index: {}]   ;;  %s1471_s2 = inlined_call_operand.vmem [shape: f32[32,1], index: 2, kind: input, shape index: {}]   ;;  %s1472_s3 = inlined_call_operand.vmem [shape: bf16[2,32,128], index: 3, kind: output, shape index: {}]  }
   0x1   :  { %s1278_s14 = smov 0  }
   0x2 LB: > { %s25_s15 = sadd.s32 1, %s1247_s13  ;;  %p969_p0 = scmp.ge.s32.totalorder %s1251_s14, 1  ;;  %s1251_s14 = sphi %s1278_s14, %s13_s14   ;;  %s1247_s13 = sphi %s1276_s13, %s1474_s13   ;;  %s1243_s12 = sphi %s1274_s12, %s1473_s12  }
   0x3   : > { %p27_p1 = scmp.ge.s32.totalorder %s25_s15, 2  ;;  %p156_p2 = scmp.lt.s32.totalorder %s1251_s14, 3 }
   0x5   : > { %s1476_s15 = smov (%p27_p1, %s25_s15), 0  ;;  %p157_p3 = pnand %p969_p0, %p156_p2 }
   0x6   : > { %p186_p4 = scmp.lt.s32.totalorder (!%p157_p3), %s1243_s12, 1  ;;  %v1253_v0 = vmov (!%p157_p3), 0   ;;  %v1181_v1 = vld [vmem:[%s1469_s0 + $0x4] ss:$16 sps:$4 sm:$0xff] (!%p157_p3)   ;;  %vm603_vm0 = vcmask (!%p157_p3), 392192   ;;  %v835_v38 = vld [vmem:[%s1471_s2 + $0x8] sm:$0xff] (!%p157_p3) }
   0x7   : > { %160 = sbr.rel (%p157_p3) target bundleno = 341 (0x155), region = 32  ;;  %725 = vmatprep.subr.bf16.mxu1 (!%p157_p3), %v1253_v0  ;;  %1152 = vset.pattern.permute.xlu0 (!%p157_p3), %v1253_v0  ;;  %v1186_v2 = vld [vmem:[%s1469_s0 + $0xc] ss:$16 sps:$4 sm:$0xff] (!%p157_p3)   ;;  %v1179_v28 = vld [vmem:[%s1469_s0] ss:$16 sps:$4 sm:$0xff] (!%p157_p3)  }
   0x8   : > { %1153 = vset.pattern.permute.xlu1 (!%p157_p3), %v1253_v0  ;;  %660 = vmatprep.mubr.bf16.mxu0 (!%p157_p3), %v1181_v1  ;;  %v1187_v29 = vld [vmem:[%s1469_s0 + $0x24] ss:$16 sps:$4 sm:$0xff] (!%p157_p3)   ;;  %v1184_v32 = vld [vmem:[%s1469_s0 + $0x8] ss:$16 sps:$4 sm:$0xff] (!%p157_p3)   ;;  %v1189_v33 = vld [vmem:[%s1469_s0 + $0x20] ss:$16 sps:$4 sm:$0xff] (!%p157_p3)  }
   0x9   : > { %1032 = vmatprep.mubr.msk.bf16.mxu1 (!%p157_p3), %vm603_vm0, %v1186_v2  ;;  %v1193_v34 = vld [vmem:[%s1469_s0 + $0x44] ss:$16 sps:$4 sm:$0xff] (!%p157_p3)   ;;  %v1190_v37 = vld [vmem:[%s1469_s0 + $0x2c] ss:$16 sps:$4 sm:$0xff] (!%p157_p3)   ;;  %v1195_v40 = vld [vmem:[%s1469_s0 + $0x40] ss:$16 sps:$4 sm:$0xff] (!%p157_p3)  }
   0xa   : > { %v834_v35 = vld [vmem:[%s1471_s2] sm:$0xff] (!%p157_p3)  ;;  %v836_v36 = vld [vmem:[%s1471_s2 + $0x10] sm:$0xff] (!%p157_p3)  ;;  %v837_v39 = vld [vmem:[%s1471_s2 + $0x18] sm:$0xff] (!%p157_p3) }
   0xb   : > { %840 = vperm.xlu0 (!%p157_p3), %1152, %v834_v35   ;;  %850 = vperm.xlu1 (!%p157_p3), %1153, %v836_v36   ;;  %v1192_v41 = vld [vmem:[%s1469_s0 + $0x28] ss:$16 sps:$4 sm:$0xff] (!%p157_p3)   ;;  %v1199_v42 = vld [vmem:[%s1469_s0 + $0x64] ss:$16 sps:$4 sm:$0xff] (!%p157_p3)   ;;  %v1196_v43 = vld [vmem:[%s1469_s0 + $0x4c] ss:$16 sps:$4 sm:$0xff] (!%p157_p3)  }
   0xc   : > { %v1201_v44 = vld [vmem:[%s1469_s0 + $0x60] ss:$16 sps:$4 sm:$0xff] (!%p157_p3)   ;;  %v1198_v45 = vld [vmem:[%s1469_s0 + $0x48] ss:$16 sps:$4 sm:$0xff] (!%p157_p3)   ;;  %v1205_v46 = vld [vmem:[%s1469_s0 + $0x84] ss:$16 sps:$4 sm:$0xff] (!%p157_p3)  }
   0xd   : > { %v1202_v47 = vld [vmem:[%s1469_s0 + $0x6c] ss:$16 sps:$4 sm:$0xff] (!%p157_p3)   ;;  %v1207_v48 = vld [vmem:[%s1469_s0 + $0x80] ss:$16 sps:$4 sm:$0xff] (!%p157_p3)   ;;  %v1204_v49 = vld [vmem:[%s1469_s0 + $0x68] ss:$16 sps:$4 sm:$0xff] (!%p157_p3)  }
   0xe   : > { %s1478_s12 = smov (!%p186_p4, %s1243_s12), 1  ;;  %v1211_v50 = vld [vmem:[%s1469_s0 + $0xa4] ss:$16 sps:$4 sm:$0xff]   ;;  %v1208_v51 = vld [vmem:[%s1469_s0 + $0x8c] ss:$16 sps:$4 sm:$0xff]  }
   0xf   : > { %s1126_s20 = smul.u32 216, %s1478_s12  ;;  %845 = vperm.xlu0 %1152, %v835_v38   ;;  %855 = vperm.xlu1 %1153, %v837_v39   ;;  %v1213_v52 = vld [vmem:[%s1469_s0 + $0xa0] ss:$16 sps:$4 sm:$0xff]   ;;  %v1210_v53 = vld [vmem:[%s1469_s0 + $0x88] ss:$16 sps:$4 sm:$0xff]  }
  0x10   : > { %v1217_v54 = vld [vmem:[%s1469_s0 + $0xc4] ss:$16 sps:$4 sm:$0xff]   ;;  %v1214_v55 = vld [vmem:[%s1469_s0 + $0xac] ss:$16 sps:$4 sm:$0xff]   ;;  %v1219_v56 = vld [vmem:[%s1469_s0 + $0xc0] ss:$16 sps:$4 sm:$0xff]  }
  0x11   : > { %s1308_s23 = scalar_lea.vmem %s1470_s1, %s1126_s20  ;;  %v1216_v57 = vld [vmem:[%s1469_s0 + $0xa8] ss:$16 sps:$4 sm:$0xff]   ;;  %v1223_v58 = vld [vmem:[%s1469_s0 + $0xe4] ss:$16 sps:$4 sm:$0xff]   ;;  %v1220_v59 = vld [vmem:[%s1469_s0 + $0xcc] ss:$16 sps:$4 sm:$0xff]  }
  0x12   : > { %v1154_v3 = vld [vmem:[%s1308_s23 + $0x80] sm:$0xff]   ;;  %v1155_v4 = vld [vmem:[%s1308_s23 + $0x88] sm:$0xff]   ;;  %v1158_v7 = vld [vmem:[%s1308_s23 + $0x90] sm:$0xff]  }
  0x13   : > { %726 = vmatpush1.bf16.msra.mxu1 %v1154_v3  ;;  %v1156_v5 = vld [vmem:[%s1308_s23 + $0x40] sm:$0xff]   ;;  %v1159_v8 = vld [vmem:[%s1308_s23 + $0x48] sm:$0xff]   ;;  %v1162_v10 = vld [vmem:[%s1308_s23 + $0x50] sm:$0xff]  }
  0x14   : > { %727 = vmatprep.subr.bf16.mxu1 %v1253_v0  ;;  %v1157_v6 = vld [vmem:[%s1308_s23] sm:$0xff]   ;;  %1062 = vmatprep.subr.bf16.mxu0 %v1156_v5  ;;  %v1160_v9 = vld [vmem:[%s1308_s23 + $0x8] sm:$0xff]   ;;  %v1163_v11 = vld [vmem:[%s1308_s23 + $0x10] sm:$0xff]  }
  0x15   : > { %1063 = vmatpush3.bf16.msra.mxu0 %v1157_v6  ;;  %v1161_v12 = vld [vmem:[%s1308_s23 + $0x98] sm:$0xff]   ;;  %v1164_v14 = vld [vmem:[%s1308_s23 + $0xa0] sm:$0xff]   ;;  %v1167_v17 = vld [vmem:[%s1308_s23 + $0xa8] sm:$0xff]  }
  0x16   : > { %1064 = vmatprep.subr.bf16.mxu0 %v1159_v8  ;;  %v1165_v13 = vld [vmem:[%s1308_s23 + $0x58] sm:$0xff]   ;;  %v1168_v16 = vld [vmem:[%s1308_s23 + $0x60] sm:$0xff]   ;;  %v1171_v19 = vld [vmem:[%s1308_s23 + $0x68] sm:$0xff]  }
  0x17   : > { %728 = vmatpush1.bf16.msra.mxu1 %v1155_v4  ;;  %v1166_v15 = vld [vmem:[%s1308_s23 + $0x18] sm:$0xff]   ;;  %v1169_v18 = vld [vmem:[%s1308_s23 + $0x20] sm:$0xff]   ;;  %v1170_v20 = vld [vmem:[%s1308_s23 + $0xb0] sm:$0xff]  }
  0x18   : > { %729 = vmatprep.subr.bf16.mxu1 %v1253_v0  ;;  %v1172_v21 = vld [vmem:[%s1308_s23 + $0x28] sm:$0xff]   ;;  %v1174_v22 = vld [vmem:[%s1308_s23 + $0x70] sm:$0xff]   ;;  %v1173_v23 = vld [vmem:[%s1308_s23 + $0xb8] sm:$0xff]  }
  0x19   : > { %1065 = vmatpush3.bf16.msra.mxu0 %v1160_v9  ;;  %v1175_v24 = vld [vmem:[%s1308_s23 + $0x30] sm:$0xff]   ;;  %v1177_v25 = vld [vmem:[%s1308_s23 + $0x78] sm:$0xff]   ;;  %v1176_v27 = vld [vmem:[%s1308_s23 + $0xc0] sm:$0xff]  }
  0x1a   : > { %1066 = vmatprep.subr.bf16.mxu0 %v1162_v10  ;;  %v1178_v26 = vld [vmem:[%s1308_s23 + $0x38] sm:$0xff]   ;;  %v1182_v30 = vld [vmem:[%s1308_s23 + $0xc8] sm:$0xff]   ;;  %v1183_v31 = vld [vmem:[%s1308_s23 + $0xd0] sm:$0xff]   ;;  %s1046_s23 = sshll.u32 %s1478_s12, 4 }
  0x1b   : > { %730 = vmatpush1.bf16.msra.mxu1 %v1158_v7  ;;  %v1225_v60 = vld [vmem:[%s1469_s0 + $0xe0] ss:$16 sps:$4 sm:$0xff]   ;;  %v1222_v61 = vld [vmem:[%s1469_s0 + $0xc8] ss:$16 sps:$4 sm:$0xff]   ;;  %v1226_v62 = vld [vmem:[%s1469_s0 + $0xec] ss:$16 sps:$4 sm:$0xff]   ;;  %s201_s26 = scalar_lea.vmem %s1472_s3, %s1046_s23 }
  0x1c   : > { %731 = vmatprep.subr.bf16.mxu1 %v1253_v0  ;;  %v1228_v63 = vld [vmem:[%s1469_s0 + $0xe8] ss:$16 sps:$4 sm:$0xff]  }
  0x1d   : > { %1067 = vmatpush3.bf16.msra.mxu0 %v1163_v11 }
  0x1e   : > { %1068 = vmatprep.subr.bf16.mxu0 %v1165_v13 }
  0x1f   : > { %732 = vmatpush1.bf16.msra.mxu1 %v1161_v12 }
  0x20   : > { %733 = vmatprep.subr.bf16.mxu1 %v1253_v0 }
  0x21   : > { %1069 = vmatpush3.bf16.msra.mxu0 %v1166_v15 }
  0x22   : > { %1070 = vmatprep.subr.bf16.mxu0 %v1168_v16 }
  0x23   : > { %734 = vmatpush1.bf16.msra.mxu1 %v1164_v14 }
  0x24   : > { %735 = vmatprep.subr.bf16.mxu1 %v1253_v0 }
  0x25   : > { %1071 = vmatpush3.bf16.msra.mxu0 %v1169_v18 }
  0x26   : > { %1072 = vmatprep.subr.bf16.mxu0 %v1171_v19 }
  0x27   : > { %736 = vmatpush1.bf16.msra.mxu1 %v1167_v17 }
  0x28   : > { %737 = vmatprep.subr.bf16.mxu1 %v1253_v0 }
  0x29   : > { %1073 = vmatpush3.bf16.msra.mxu0 %v1172_v21 }
  0x2a   : > { %1074 = vmatprep.subr.bf16.mxu0 %v1174_v22 }
  0x2b   : > { %738 = vmatpush1.bf16.msra.mxu1 %v1170_v20 }
  0x2c   : > { %739 = vmatprep.subr.bf16.mxu1 %v1253_v0 }
  0x2d   : > { %1075 = vmatpush3.bf16.msra.mxu0 %v1175_v24 }
  0x2e   : > { %1076 = vmatprep.subr.bf16.mxu0 %v1177_v25 }
  0x2f   : > { %740 = vmatpush1.bf16.msra.mxu1 %v1173_v23 }
  0x30   : > { %741 = vmatprep.subr.bf16.mxu1 %v1253_v0 }
  0x31   : > { %1077 = vmatpush3.bf16.msra.mxu0 %v1178_v26 }
  0x33   : > { %742 = vmatpush1.bf16.msra.mxu1 %v1176_v27 }
  0x34   : > { %743 = vmatprep.subr.bf16.mxu1 %v1253_v0  ;;  %661 = vmatmul.mubr.bf16.vlgmr.msra.gmra.mrb[0].mxu0 %v1179_v28 }
  0x35   : > { %668 = vmatprep.mubr.bf16.mxu0 %v1187_v29 }
  0x37   : > { %744 = vmatpush1.bf16.msra.mxu1 %v1182_v30 }
  0x38   : > { %745 = vmatprep.subr.bf16.mxu1 %v1253_v0 }
  0x3b   : > { %746 = vmatpush1.bf16.msra.mxu1 %v1183_v31 }
  0x3c   : > { %669 = vmatmul.mubr.bf16.gmra.mrb[4].mxu0 %v1189_v33 }
  0x3d   : > { %676 = vmatprep.mubr.bf16.mxu0 %v1193_v34 }
  0x3e   : > { %758 = vmatmul.mubr.bf16.vlgmr.msra.gmra.mrb[0].mxu1 %v1184_v32 }
  0x3f   : > { %1033 = vmatprep.mubr.msk.bf16.mxu1 %vm603_vm0, %v1190_v37 }
  0x44   : > { %677 = vmatmul.mubr.bf16.gmra.mrb[8].mxu0 %v1195_v40 }
  0x45   : > { %684 = vmatprep.mubr.bf16.mxu0 %v1199_v42 }
  0x46   : > { %766 = vmatmul.mubr.bf16.gmra.mrb[4].mxu1 %v1192_v41 }
  0x47   : > { %1034 = vmatprep.mubr.msk.bf16.mxu1 %vm603_vm0, %v1196_v43 }
  0x4c   : > { %685 = vmatmul.mubr.bf16.gmra.mrb[12].mxu0 %v1201_v44 }
  0x4d   : > { %692 = vmatprep.mubr.bf16.mxu0 %v1205_v46 }
  0x4e   : > { %774 = vmatmul.mubr.bf16.gmra.mrb[8].mxu1 %v1198_v45 }
  0x4f   : > { %1035 = vmatprep.mubr.msk.bf16.mxu1 %vm603_vm0, %v1202_v47 }
  0x54   : > { %693 = vmatmul.mubr.bf16.gmra.mrb[16].mxu0 %v1207_v48 }
  0x55   : > { %700 = vmatprep.mubr.bf16.mxu0 %v1211_v50 }
  0x56   : > { %782 = vmatmul.mubr.bf16.gmra.mrb[12].mxu1 %v1204_v49 }
  0x57   : > { %1036 = vmatprep.mubr.msk.bf16.mxu1 %vm603_vm0, %v1208_v51 }
  0x5c   : > { %701 = vmatmul.mubr.bf16.gmra.mrb[20].mxu0 %v1213_v52 }
  0x5d   : > { %708 = vmatprep.mubr.bf16.mxu0 %v1217_v54 }
  0x5e   : > { %790 = vmatmul.mubr.bf16.gmra.mrb[16].mxu1 %v1210_v53 }
  0x5f   : > { %1037 = vmatprep.mubr.msk.bf16.mxu1 %vm603_vm0, %v1214_v55 }
  0x64   : > { %709 = vmatmul.mubr.bf16.gmra.mrb[24].mxu0 %v1219_v56 }
  0x65   : > { %716 = vmatprep.mubr.bf16.mxu0 %v1223_v58 }
  0x66   : > { %798 = vmatmul.mubr.bf16.gmra.mrb[20].mxu1 %v1216_v57 }
  0x67   : > { %1038 = vmatprep.mubr.msk.bf16.mxu1 %vm603_vm0, %v1220_v59 }
  0x6c   : > { %717 = vmatmul.mubr.bf16.gmra.mrb[28].mxu0 %v1225_v60 }
  0x6e   : > { %806 = vmatmul.mubr.bf16.gmra.mrb[24].mxu1 %v1222_v61 }
  0x6f   : > { %1039 = vmatprep.mubr.msk.bf16.mxu1 %vm603_vm0, %v1226_v62 }
  0x76   : > { %814 = vmatmul.mubr.bf16.gmra.mrb[28].mxu1 %v1228_v63 }
 0x107   : > { %v1078_v0 = vpop.f32.mrb[0].mxu0 }
 0x108   : > { %v1079_v1 = vpop.f32.mrb[1].mxu0 }
 0x109   : > { %v1080_v2 = vadd.f32 %v1079_v1, %v1078_v0  ;;  %v1081_v3 = vpop.f32.mrb[2].mxu0 }
 0x10a   : > { %v1082_v4 = vpop.f32.mrb[3].mxu0 }
 0x10b   : > { %v1083_v5 = vadd.f32 %v1082_v4, %v1081_v3 }
 0x10f   : > { %v1084_v6 = vpop.f32.mrb[4].mxu0 }
 0x110   : > { %v1085_v8 = vpop.f32.mrb[5].mxu0 }
 0x111   : > { %v759_v7 = vpop.f32.mrb[0].mxu1  ;;  %v1086_v11 = vadd.f32 %v1085_v8, %v1084_v6  ;;  %v1087_v12 = vpop.f32.mrb[6].mxu0 }
 0x112   : > { %v760_v9 = vadd.f32 %v1080_v2, %v759_v7  ;;  %v761_v10 = vpop.f32.mrb[1].mxu1  ;;  %v1088_v14 = vpop.f32.mrb[7].mxu0 }
 0x113   : > { %v762_v13 = vpop.f32.mrb[2].mxu1  ;;  %v1089_v17 = vadd.f32 %v1088_v14, %v1087_v12 }
 0x114   : > { %v763_v15 = vadd.f32 %v1083_v5, %v762_v13  ;;  %v764_v16 = vpop.f32.mrb[3].mxu1 }
 0x117   : > { %v1090_v18 = vpop.f32.mrb[8].mxu0 }
 0x118   : > { %v1091_v20 = vpop.f32.mrb[9].mxu0 }
 0x119   : > { %v767_v19 = vpop.f32.mrb[4].mxu1  ;;  %v1092_v23 = vadd.f32 %v1091_v20, %v1090_v18  ;;  %v1093_v24 = vpop.f32.mrb[10].mxu0 }
 0x11a   : > { %v768_v21 = vadd.f32 %v1086_v11, %v767_v19  ;;  %v769_v22 = vpop.f32.mrb[5].mxu1  ;;  %v1094_v26 = vpop.f32.mrb[11].mxu0 }
 0x11b   : > { %v770_v25 = vpop.f32.mrb[6].mxu1  ;;  %v1095_v29 = vadd.f32 %v1094_v26, %v1093_v24  ;;  %v841_v22 = vpop.permute.xlu0 %840 }
 0x11c   : > { %v771_v27 = vadd.f32 %v1089_v17, %v770_v25  ;;  %v772_v28 = vpop.f32.mrb[7].mxu1 }
 0x11f   : > { %v1096_v30 = vpop.f32.mrb[12].mxu0 }
 0x120   : > { %v1097_v32 = vpop.f32.mrb[13].mxu0 }
 0x121   : > { %v775_v31 = vpop.f32.mrb[8].mxu1  ;;  %v1098_v35 = vadd.f32 %v1097_v32, %v1096_v30  ;;  %v1099_v36 = vpop.f32.mrb[14].mxu0 }
 0x122   : > { %v776_v33 = vadd.f32 %v1092_v23, %v775_v31  ;;  %v777_v34 = vpop.f32.mrb[9].mxu1  ;;  %v1100_v38 = vpop.f32.mrb[15].mxu0 }
 0x123   : > { %v778_v37 = vpop.f32.mrb[10].mxu1  ;;  %v1101_v42 = vadd.f32 %v1100_v38, %v1099_v36  ;;  %v846_v36 = vpop.permute.xlu0 %845 }
 0x124   : > { %v822_v39 = vmax.f32 %v760_v9, %v776_v33  ;;  %v779_v40 = vadd.f32 %v1095_v29, %v778_v37  ;;  %v780_v41 = vpop.f32.mrb[11].mxu1 }
 0x126   : > { %v823_v43 = vmax.f32 %v763_v15, %v779_v40  ;;  %v851_v40 = vpop.permute.xlu1 %850 }
 0x127   : > { %v1102_v44 = vpop.f32.mrb[16].mxu0 }
 0x128   : > { %v1103_v46 = vpop.f32.mrb[17].mxu0 }
 0x129   : > { %v783_v45 = vpop.f32.mrb[12].mxu1  ;;  %v1104_v49 = vadd.f32 %v1103_v46, %v1102_v44  ;;  %v1105_v50 = vpop.f32.mrb[18].mxu0 }
 0x12a   : > { %v784_v47 = vadd.f32 %v1098_v35, %v783_v45  ;;  %v785_v48 = vpop.f32.mrb[13].mxu1  ;;  %v1106_v52 = vpop.f32.mrb[19].mxu0 }
 0x12b   : > { %v786_v51 = vpop.f32.mrb[14].mxu1  ;;  %v1107_v56 = vadd.f32 %v1106_v52, %v1105_v50  ;;  %v856_v50 = vpop.permute.xlu1 %855 }
 0x12c   : > { %v824_v53 = vmax.f32 %v768_v21, %v784_v47  ;;  %v787_v54 = vadd.f32 %v1101_v42, %v786_v51  ;;  %v788_v55 = vpop.f32.mrb[15].mxu1 }
 0x12e   : > { %v825_v57 = vmax.f32 %v771_v27, %v787_v54 }
 0x12f   : > { %v1108_v58 = vpop.f32.mrb[20].mxu0 }
 0x130   : > { %v1109_v60 = vpop.f32.mrb[21].mxu0 }
 0x131   : > { %v791_v59 = vpop.f32.mrb[16].mxu1  ;;  %v1110_v63 = vadd.f32 %v1109_v60, %v1108_v58  ;;  %v1111_v0 = vpop.f32.mrb[22].mxu0 }
 0x132   : > { %v792_v61 = vadd.f32 %v1104_v49, %v791_v59  ;;  %v793_v62 = vpop.f32.mrb[17].mxu1  ;;  %v1112_v2 = vpop.f32.mrb[23].mxu0 }
 0x133   : > { %v794_v1 = vpop.f32.mrb[18].mxu1  ;;  %v1113_v6 = vadd.f32 %v1112_v2, %v1111_v0 }
 0x134   : > { %v826_v3 = vmax.f32 %v822_v39, %v792_v61  ;;  %v795_v4 = vadd.f32 %v1107_v56, %v794_v1  ;;  %v796_v5 = vpop.f32.mrb[19].mxu1 }
 0x136   : > { %v827_v7 = vmax.f32 %v823_v43, %v795_v4 }
 0x137   : > { %v1114_v8 = vpop.f32.mrb[24].mxu0 }
 0x138   : > { %v1115_v10 = vpop.f32.mrb[25].mxu0 }
 0x139   : > { %v799_v9 = vpop.f32.mrb[20].mxu1  ;;  %v1116_v13 = vadd.f32 %v1115_v10, %v1114_v8  ;;  %v1117_v14 = vpop.f32.mrb[26].mxu0 }
 0x13a   : > { %v800_v11 = vadd.f32 %v1110_v63, %v799_v9  ;;  %v801_v12 = vpop.f32.mrb[21].mxu1  ;;  %v1118_v16 = vpop.f32.mrb[27].mxu0 }
 0x13b   : > { %v802_v15 = vpop.f32.mrb[22].mxu1  ;;  %v1119_v20 = vadd.f32 %v1118_v16, %v1117_v14 }
 0x13c   : > { %v828_v17 = vmax.f32 %v824_v53, %v800_v11  ;;  %v803_v18 = vadd.f32 %v1113_v6, %v802_v15  ;;  %v804_v19 = vpop.f32.mrb[23].mxu1 }
 0x13e   : > { %v829_v21 = vmax.f32 %v825_v57, %v803_v18 }
 0x13f   : > { %v1120_v23 = vpop.f32.mrb[28].mxu0 }
 0x140   : > { %v1121_v25 = vpop.f32.mrb[29].mxu0 }
 0x141   : > { %v807_v24 = vpop.f32.mrb[24].mxu1  ;;  %v1122_v28 = vadd.f32 %v1121_v25, %v1120_v23  ;;  %v1123_v29 = vpop.f32.mrb[30].mxu0 }
 0x142   : > { %v808_v26 = vadd.f32 %v1116_v13, %v807_v24  ;;  %v809_v27 = vpop.f32.mrb[25].mxu1  ;;  %v1124_v31 = vpop.f32.mrb[31].mxu0 }
 0x143   : > { %v810_v30 = vpop.f32.mrb[26].mxu1  ;;  %v1125_v35 = vadd.f32 %v1124_v31, %v1123_v29 }
 0x144   : > { %v830_v32 = vmax.f32 %v826_v3, %v808_v26  ;;  %v811_v33 = vadd.f32 %v1119_v20, %v810_v30  ;;  %v812_v34 = vpop.f32.mrb[27].mxu1 }
 0x146   : > { %v831_v37 = vmax.f32 %v827_v7, %v811_v33  ;;  %v858_v38 = vadd.f32 %v841_v22, %v830_v32 }
 0x148   : > { %v859_v39 = vadd.f32 %v846_v36, %v831_v37 }
 0x149   : > { %v815_v41 = vpop.f32.mrb[28].mxu1 }
 0x14a   : > { %v1054_v42 = vpack.c.bf16 %v859_v39, %v858_v38  ;;  %v816_v43 = vadd.f32 %v1122_v28, %v815_v41  ;;  %v817_v44 = vpop.f32.mrb[29].mxu1 }
 0x14b   : > { %v818_v45 = vpop.f32.mrb[30].mxu1 }
 0x14c   : > { %1055 = vst [vmem:[%s201_s26] sm:$0xff] %v1054_v42   ;;  %v832_v46 = vmax.f32 %v828_v17, %v816_v43  ;;  %v819_v47 = vadd.f32 %v1125_v35, %v818_v45  ;;  %v820_v48 = vpop.f32.mrb[31].mxu1 }
 0x14e   : > { %v833_v49 = vmax.f32 %v829_v21, %v819_v47  ;;  %v860_v51 = vadd.f32 %v851_v40, %v832_v46 }
 0x150   : > { %v861_v52 = vadd.f32 %v856_v50, %v833_v49 }
 0x152   : > { %v1059_v53 = vpack.c.bf16 %v861_v52, %v860_v51 }
 0x154   : > { %1061 = vst [vmem:[%s201_s26 + $0x8] sm:$0xff] %v1059_v53  }
 0x155 PF: > { %s13_s14 = sadd.s32 1, %s1251_s14   ;;  %s1473_s12 = smov %s1247_s13 }
 0x156   : > { %p10_p5 = scmp.ge.s32.totalorder %s13_s14, 4   ;;  %s1474_s13 = smov %s1476_s15 }
 0x158   :  { %12 = sbr.rel (!%p10_p5) target bundleno = 2 (0x2), region = 62 }

// kernel: dga3net_forward.20
= control target key start
LH: loop header
LB: loop body
LE: loop exit
PB: predicated region body
PF: predicated region fallthrough
CT: control target
= control target key end

     0   :  { %s2369_s21 = smov 0   ;;  %s2371_s22 = smov 0   ;;  %s2735_s0 = inlined_call_operand.vmem [shape: bf16[128,864], index: 0, kind: input, shape index: {}]   ;;  %s2736_s1 = inlined_call_operand.vmem [shape: bf16[2,864,128], index: 1, kind: input, shape index: {}]   ;;  %s2737_s2 = inlined_call_operand.vmem [shape: f32[32,1], index: 2, kind: input, shape index: {}]   ;;  %s2738_s3 = inlined_call_operand.vmem [shape: bf16[2,32,128], index: 3, kind: input, shape index: {}]   ;;  %s2739_s4 = inlined_call_operand.vmem [shape: f32[32,1], index: 4, kind: input, shape index: {}]   ;;  %s2740_s5 = inlined_call_operand.vmem [shape: f32[32,1], index: 5, kind: input, shape index: {}]   ;;  %s2741_s6 = inlined_call_operand.vmem [shape: bf16[2,32,128], index: 6, kind: output, shape index: {}]  }
   0x1   :  { %s2373_s23 = smov 0  }
   0x2 LB: > { %s28_s24 = sadd.s32 1, %s2327_s22  ;;  %p1757_p0 = scmp.ge.s32.totalorder %s2331_s23, 1  ;;  %s2331_s23 = sphi %s2373_s23, %s16_s23   ;;  %s2327_s22 = sphi %s2371_s22, %s2743_s22   ;;  %s2323_s21 = sphi %s2369_s21, %s2742_s21  }
   0x3   : > { %p30_p1 = scmp.ge.s32.totalorder %s28_s24, 2  ;;  %p246_p2 = scmp.lt.s32.totalorder %s2331_s23, 3 }
   0x5   : > { %s2745_s24 = smov (%p30_p1, %s28_s24), 0  ;;  %p247_p3 = pnand %p1757_p0, %p246_p2 }
   0x6   : > { %p290_p4 = scmp.lt.s32.totalorder (!%p247_p3), %s2323_s21, 1  ;;  %v2209_v0 = vld [vmem:[%s2735_s0 + $0x4] ss:$28 sps:$4 sm:$0xff] (!%p247_p3)   ;;  %v2212_v1 = vld [vmem:[%s2735_s0 + $0xc] ss:$28 sps:$4 sm:$0xff] (!%p247_p3)   ;;  %v2333_v31 = vmov (!%p247_p3), 0  }
   0x7   : > { %250 = sbr.rel (%p247_p3) target bundleno = 412 (0x19c), region = 44  ;;  %1148 = vmatprep.mubr.bf16.mxu0 (!%p247_p3), %v2209_v0  ;;  %1245 = vmatprep.mubr.bf16.mxu1 (!%p247_p3), %v2212_v1  ;;  %v2207_v33 = vld [vmem:[%s2735_s0] ss:$28 sps:$4 sm:$0xff] (!%p247_p3)   ;;  %v2210_v35 = vld [vmem:[%s2735_s0 + $0x8] ss:$28 sps:$4 sm:$0xff] (!%p247_p3)   ;;  %vm1091_vm0 = vcmask (!%p247_p3), 785408  }
   0x8   : > { %2174 = vset.pattern.permute.xlu1 (!%p247_p3), %v2333_v31  ;;  %2173 = vset.pattern.permute.xlu0 (!%p247_p3), %v2333_v31  ;;  %v2215_v37 = vld [vmem:[%s2735_s0 + $0x3c] ss:$28 sps:$4 sm:$0xff] (!%p247_p3)   ;;  %v2217_v38 = vld [vmem:[%s2735_s0 + $0x44] ss:$28 sps:$4 sm:$0xff] (!%p247_p3)   ;;  %v2223_v46 = vld [vmem:[%s2735_s0 + $0x74] ss:$28 sps:$4 sm:$0xff] (!%p247_p3)  }
   0x9   : > { %v2219_v44 = vld [vmem:[%s2735_s0 + $0x38] ss:$28 sps:$4 sm:$0xff] (!%p247_p3)   ;;  %v2220_v45 = vld [vmem:[%s2735_s0 + $0x40] ss:$28 sps:$4 sm:$0xff] (!%p247_p3)   ;;  %v2227_v50 = vld [vmem:[%s2735_s0 + $0x70] ss:$28 sps:$4 sm:$0xff] (!%p247_p3)  }
   0xa   : > { %v2225_v47 = vld [vmem:[%s2735_s0 + $0x7c] ss:$28 sps:$4 sm:$0xff] (!%p247_p3)   ;;  %v2231_v53 = vld [vmem:[%s2735_s0 + $0xac] ss:$28 sps:$4 sm:$0xff] (!%p247_p3)   ;;  %v2233_v54 = vld [vmem:[%s2735_s0 + $0xb4] ss:$28 sps:$4 sm:$0xff] (!%p247_p3)  }
   0xb   : > { %v2228_v52 = vld [vmem:[%s2735_s0 + $0x78] ss:$28 sps:$4 sm:$0xff] (!%p247_p3)   ;;  %v2235_v59 = vld [vmem:[%s2735_s0 + $0xa8] ss:$28 sps:$4 sm:$0xff] (!%p247_p3)   ;;  %v2236_v61 = vld [vmem:[%s2735_s0 + $0xb0] ss:$28 sps:$4 sm:$0xff] (!%p247_p3)  }
   0xc   : > { %v2239_v62 = vld [vmem:[%s2735_s0 + $0xe4] ss:$28 sps:$4 sm:$0xff] (!%p247_p3)   ;;  %v2241_v0 = vld [vmem:[%s2735_s0 + $0xec] ss:$28 sps:$4 sm:$0xff] (!%p247_p3)  }
   0xd   : > { %v1576_v31 = vld [vmem:[%s2739_s4] sm:$0xff] (!%p247_p3) }
   0xe   : > { %s2747_s21 = smov (!%p290_p4, %s2323_s21), 1 }
   0xf   : > { %s2147_s29 = smul.u32 432, %s2747_s21  ;;  %s1887_s26 = sshll.u32 %s2747_s21, 4 }
  0x10   : > { %s313_s9 = scalar_lea.vmem %s2741_s6, %s1887_s26 }
  0x11   : > { %s2399_s8 = scalar_lea.vmem %s2736_s1, %s2147_s29  ;;  %s305_s29 = scalar_lea.vmem %s2738_s3, %s1887_s26 }
  0x12   : > { %v2175_v2 = vld [vmem:[%s2399_s8 + $0x40] sm:$0xff]   ;;  %v2179_v6 = vld [vmem:[%s2399_s8 + $0x48] sm:$0xff]   ;;  %v2183_v10 = vld [vmem:[%s2399_s8 + $0x50] sm:$0xff]  }
  0x13   : > { %v2176_v3 = vld [vmem:[%s2399_s8 + $0xc0] sm:$0xff]   ;;  %1913 = vmatprep.subr.bf16.mxu0 %v2175_v2  ;;  %v2180_v7 = vld [vmem:[%s2399_s8 + $0xc8] sm:$0xff]   ;;  %v2184_v11 = vld [vmem:[%s2399_s8 + $0xd0] sm:$0xff]  }
  0x14   : > { %v2177_v4 = vld [vmem:[%s2399_s8] sm:$0xff]   ;;  %1977 = vmatprep.subr.bf16.mxu1 %v2176_v3  ;;  %v2181_v8 = vld [vmem:[%s2399_s8 + $0x8] sm:$0xff]   ;;  %v2185_v12 = vld [vmem:[%s2399_s8 + $0x10] sm:$0xff]  }
  0x15   : > { %v2178_v5 = vld [vmem:[%s2399_s8 + $0x80] sm:$0xff]   ;;  %1914 = vmatpush3.bf16.msra.mxu0 %v2177_v4  ;;  %v2182_v9 = vld [vmem:[%s2399_s8 + $0x88] sm:$0xff]   ;;  %v2186_v13 = vld [vmem:[%s2399_s8 + $0x90] sm:$0xff]  }
  0x16   : > { %1978 = vmatpush3.bf16.msra.mxu1 %v2178_v5  ;;  %1915 = vmatprep.subr.bf16.mxu0 %v2179_v6  ;;  %v2187_v14 = vld [vmem:[%s2399_s8 + $0x58] sm:$0xff]   ;;  %v2191_v18 = vld [vmem:[%s2399_s8 + $0x60] sm:$0xff]   ;;  %v2195_v22 = vld [vmem:[%s2399_s8 + $0x68] sm:$0xff]  }
  0x17   : > { %1979 = vmatprep.subr.bf16.mxu1 %v2180_v7  ;;  %v2188_v15 = vld [vmem:[%s2399_s8 + $0xd8] sm:$0xff]   ;;  %v2192_v19 = vld [vmem:[%s2399_s8 + $0xe0] sm:$0xff]   ;;  %v2196_v23 = vld [vmem:[%s2399_s8 + $0xe8] sm:$0xff]  }
  0x18   : > { %v2189_v16 = vld [vmem:[%s2399_s8 + $0x18] sm:$0xff]   ;;  %v2193_v20 = vld [vmem:[%s2399_s8 + $0x20] sm:$0xff]   ;;  %v2197_v24 = vld [vmem:[%s2399_s8 + $0x28] sm:$0xff]  }
  0x19   : > { %1916 = vmatpush3.bf16.msra.mxu0 %v2181_v8  ;;  %v2190_v17 = vld [vmem:[%s2399_s8 + $0x98] sm:$0xff]   ;;  %v2194_v21 = vld [vmem:[%s2399_s8 + $0xa0] sm:$0xff]   ;;  %v2198_v25 = vld [vmem:[%s2399_s8 + $0xa8] sm:$0xff]  }
  0x1a   : > { %1980 = vmatpush3.bf16.msra.mxu1 %v2182_v9  ;;  %1917 = vmatprep.subr.bf16.mxu0 %v2183_v10  ;;  %v2199_v26 = vld [vmem:[%s2399_s8 + $0x70] sm:$0xff]   ;;  %v2203_v30 = vld [vmem:[%s2399_s8 + $0x78] sm:$0xff]   ;;  %v2213_v39 = vld [vmem:[%s2399_s8 + $0x140] sm:$0xff]  }
  0x1b   : > { %1981 = vmatprep.subr.bf16.mxu1 %v2184_v11  ;;  %v2200_v27 = vld [vmem:[%s2399_s8 + $0xf0] sm:$0xff]   ;;  %v2204_v32 = vld [vmem:[%s2399_s8 + $0xf8] sm:$0xff]   ;;  %v2214_v40 = vld [vmem:[%s2399_s8 + $0x100] sm:$0xff]  }
  0x1c   : > { %v2201_v28 = vld [vmem:[%s2399_s8 + $0x30] sm:$0xff]   ;;  %v2205_v34 = vld [vmem:[%s2399_s8 + $0x38] sm:$0xff]   ;;  %v2221_v41 = vld [vmem:[%s2399_s8 + $0x148] sm:$0xff]  }
  0x1d   : > { %1918 = vmatpush3.bf16.msra.mxu0 %v2185_v12  ;;  %v2202_v29 = vld [vmem:[%s2399_s8 + $0xb0] sm:$0xff]   ;;  %v2206_v36 = vld [vmem:[%s2399_s8 + $0xb8] sm:$0xff]   ;;  %v2222_v42 = vld [vmem:[%s2399_s8 + $0x108] sm:$0xff]  }
  0x1e   : > { %1982 = vmatpush3.bf16.msra.mxu1 %v2186_v13  ;;  %1919 = vmatprep.subr.bf16.mxu0 %v2187_v14  ;;  %v2229_v43 = vld [vmem:[%s2399_s8 + $0x150] sm:$0xff]   ;;  %v2237_v49 = vld [vmem:[%s2399_s8 + $0x158] sm:$0xff]   ;;  %v2245_v55 = vld [vmem:[%s2399_s8 + $0x160] sm:$0xff]  }
  0x1f   : > { %1983 = vmatprep.subr.bf16.mxu1 %v2188_v15  ;;  %v2230_v48 = vld [vmem:[%s2399_s8 + $0x110] sm:$0xff]   ;;  %v2238_v51 = vld [vmem:[%s2399_s8 + $0x118] sm:$0xff]   ;;  %v2246_v56 = vld [vmem:[%s2399_s8 + $0x120] sm:$0xff]  }
  0x20   : > { %v2247_v57 = vld [vmem:[%s2399_s8 + $0x180] sm:$0xff]   ;;  %v2254_v58 = vld [vmem:[%s2399_s8 + $0x168] sm:$0xff]   ;;  %v2263_v1 = vld [vmem:[%s2399_s8 + $0x170] sm:$0xff]  }
  0x21   : > { %1920 = vmatpush3.bf16.msra.mxu0 %v2189_v16  ;;  %v2255_v60 = vld [vmem:[%s2399_s8 + $0x128] sm:$0xff]   ;;  %v2264_v2 = vld [vmem:[%s2399_s8 + $0x130] sm:$0xff]   ;;  %v2243_v4 = vld [vmem:[%s2735_s0 + $0xe0] ss:$28 sps:$4 sm:$0xff]  }
  0x22   : > { %1984 = vmatpush3.bf16.msra.mxu1 %v2190_v17  ;;  %1921 = vmatprep.subr.bf16.mxu0 %v2191_v18  ;;  %v2260_v63 = vld [vmem:[%s2399_s8 + $0x188] sm:$0xff]   ;;  %v2265_v3 = vld [vmem:[%s2399_s8 + $0x190] sm:$0xff]   ;;  %v2248_v6 = vld [vmem:[%s2735_s0 + $0x11c] ss:$28 sps:$4 sm:$0xff]  }
  0x23   : > { %1985 = vmatprep.subr.bf16.mxu1 %v2192_v19  ;;  %v2244_v5 = vld [vmem:[%s2735_s0 + $0xe8] ss:$28 sps:$4 sm:$0xff]   ;;  %v2272_v8 = vld [vmem:[%s2399_s8 + $0x178] sm:$0xff]   ;;  %v2256_v15 = vld [vmem:[%s2735_s0 + $0x154] ss:$28 sps:$4 sm:$0xff]  }
  0x24   : > { %v2250_v7 = vld [vmem:[%s2735_s0 + $0x124] ss:$28 sps:$4 sm:$0xff]   ;;  %v2273_v9 = vld [vmem:[%s2399_s8 + $0x198] sm:$0xff]   ;;  %v2279_v13 = vld [vmem:[%s2399_s8 + $0x1a8] sm:$0xff]  }
  0x25   : > { %1922 = vmatpush3.bf16.msra.mxu0 %v2193_v20  ;;  %v2274_v10 = vld [vmem:[%s2399_s8 + $0x138] sm:$0xff]   ;;  %v2275_v11 = vld [vmem:[%s2399_s8 + $0x1a0] sm:$0xff]   ;;  %v2261_v17 = vld [vmem:[%s2735_s0 + $0x150] ss:$28 sps:$4 sm:$0xff]  }
  0x26   : > { %1986 = vmatpush3.bf16.msra.mxu1 %v2194_v21  ;;  %1923 = vmatprep.subr.bf16.mxu0 %v2195_v22  ;;  %v2252_v12 = vld [vmem:[%s2735_s0 + $0x118] ss:$28 sps:$4 sm:$0xff]   ;;  %v2253_v14 = vld [vmem:[%s2735_s0 + $0x120] ss:$28 sps:$4 sm:$0xff]   ;;  %v2266_v19 = vld [vmem:[%s2735_s0 + $0x18c] ss:$28 sps:$4 sm:$0xff]  }
  0x27   : > { %1987 = vmatprep.subr.bf16.mxu1 %v2196_v23  ;;  %v2258_v16 = vld [vmem:[%s2735_s0 + $0x15c] ss:$28 sps:$4 sm:$0xff]   ;;  %v2268_v20 = vld [vmem:[%s2735_s0 + $0x194] ss:$28 sps:$4 sm:$0xff]   ;;  %v2270_v21 = vld [vmem:[%s2735_s0 + $0x188] ss:$28 sps:$4 sm:$0xff]  }
  0x28   : > { %v2262_v18 = vld [vmem:[%s2735_s0 + $0x158] ss:$28 sps:$4 sm:$0xff]   ;;  %v1516_v23 = vld [vmem:[%s2737_s2] sm:$0xff] }
  0x29   : > { %1924 = vmatpush3.bf16.msra.mxu0 %v2197_v24  ;;  %v1518_v22 = vld [vmem:[%s2737_s2 + $0x10] sm:$0xff]  ;;  %1522 = vperm.xlu0 %2173, %v1516_v23  }
  0x2a   : > { %1988 = vmatpush3.bf16.msra.mxu1 %v2198_v25  ;;  %1925 = vmatprep.subr.bf16.mxu0 %v2199_v26  ;;  %v2271_v24 = vld [vmem:[%s2735_s0 + $0x190] ss:$28 sps:$4 sm:$0xff]   ;;  %v2280_v26 = vld [vmem:[%s2735_s0 + $0x18] ss:$28 sps:$4 sm:$0xff]  }
  0x2b   : > { %1989 = vmatprep.subr.bf16.mxu1 %v2200_v27  ;;  %v2278_v25 = vld [vmem:[%s2735_s0 + $0x14] ss:$28 sps:$4 sm:$0xff]   ;;  %1532 = vperm.xlu1 %2174, %v1518_v22   ;;  %v1519_v27 = vld [vmem:[%s2737_s2 + $0x18] sm:$0xff] }
  0x2d   : > { %1926 = vmatpush3.bf16.msra.mxu0 %v2201_v28  ;;  %v1517_v28 = vld [vmem:[%s2737_s2 + $0x8] sm:$0xff] }
  0x2e   : > { %1990 = vmatpush3.bf16.msra.mxu1 %v2202_v29  ;;  %1927 = vmatprep.subr.bf16.mxu0 %v2203_v30  ;;  %v1577_v29 = vld [vmem:[%s2739_s4 + $0x8] sm:$0xff] }
  0x2f   : > { %1991 = vmatprep.subr.bf16.mxu1 %v2204_v32  ;;  %1537 = vperm.xlu1 %2174, %v1519_v27   ;;  %v2276_v30 = vld [vmem:[%s2735_s0 + $0x10] ss:$28 sps:$4 sm:$0xff]  }
  0x30   : > { %1527 = vperm.xlu0 %2173, %v1517_v28   ;;  %v2281_v32 = vld [vmem:[%s2735_s0 + $0x50] ss:$28 sps:$4 sm:$0xff]  }
  0x31   : > { %1928 = vmatpush3.bf16.msra.mxu0 %v2205_v34  ;;  %v2288_v34 = vld [vmem:[%s2735_s0 + $0x88] ss:$28 sps:$4 sm:$0xff]  }
  0x32   : > { %1992 = vmatpush3.bf16.msra.mxu1 %v2206_v36  ;;  %2041 = vmatprep.subr.bf16.mxu0 %v2213_v39  ;;  %v1578_v36 = vld [vmem:[%s2739_s4 + $0x10] sm:$0xff]  ;;  %v1604_v39 = vld [vmem:[%s2740_s5] sm:$0xff] }
  0x33   : > { %2119 = vmatprep.subr.bf16.mxu1 %v2247_v57  ;;  %1587 = vperm.xlu1 %2174, %v1577_v29  }
  0x34   : > { %1149 = vmatmul.mubr.bf16.vlgmr.msra.gmra.mrb[0].mxu0 %v2207_v33  ;;  %v2282_v33 = vld [vmem:[%s2735_s0 + $0x4c] ss:$28 sps:$4 sm:$0xff]   ;;  %1582 = vperm.xlu0 %2173, %v1576_v31  }
  0x35   : > { %1246 = vmatmul.mubr.bf16.vlgmr.msra.gmra.mrb[0].mxu1 %v2210_v35  ;;  %2042 = vmatpush3.bf16.msra.mxu0 %v2214_v40  ;;  %v1579_v35 = vld [vmem:[%s2739_s4 + $0x18] sm:$0xff]  ;;  %v2285_v40 = vld [vmem:[%s2735_s0 + $0x84] ss:$28 sps:$4 sm:$0xff]  }
  0x36   : > { %1156 = vmatprep.mubr.bf16.mxu0 %v2215_v37  ;;  %1253 = vmatprep.mubr.bf16.mxu1 %v2217_v38  ;;  %v1605_v37 = vld [vmem:[%s2740_s5 + $0x8] sm:$0xff] }
  0x37   : > { %2043 = vmatprep.subr.bf16.mxu0 %v2221_v41  ;;  %2120 = vmatpush3.bf16.msra.mxu1 %v2247_v57  ;;  %v2284_v38 = vld [vmem:[%s2735_s0 + $0x48] ss:$28 sps:$4 sm:$0xff]   ;;  %v2289_v41 = vld [vmem:[%s2735_s0 + $0xc0] ss:$28 sps:$4 sm:$0xff]  }
  0x38   : > { %2121 = vmatprep.subr.bf16.mxu1 %v2260_v63  ;;  %1597 = vperm.xlu1 %2174, %v1579_v35   ;;  %v2306_v57 = vld [vmem:[%s2735_s0 + $0x19c] ss:$28 sps:$4 sm:$0xff]  }
  0x39   : > { %2044 = vmatpush3.bf16.msra.mxu0 %v2222_v42  ;;  %1592 = vperm.xlu0 %2173, %v1578_v36   ;;  %v2296_v42 = vld [vmem:[%s2735_s0 + $0xf8] ss:$28 sps:$4 sm:$0xff]  }
  0x3a   : > { %2045 = vmatprep.subr.bf16.mxu0 %v2229_v43  ;;  %v1607_v43 = vld [vmem:[%s2740_s5 + $0x18] sm:$0xff] }
  0x3b   : > { %2122 = vmatpush3.bf16.msra.mxu1 %v2260_v63 }
  0x3c   : > { %1157 = vmatmul.mubr.bf16.gmra.mrb[4].mxu0 %v2219_v44  ;;  %2123 = vmatprep.subr.bf16.mxu1 %v2265_v3  ;;  %v1606_v44 = vld [vmem:[%s2740_s5 + $0x10] sm:$0xff] }
  0x3d   : > { %1254 = vmatmul.mubr.bf16.gmra.mrb[4].mxu1 %v2220_v45  ;;  %1164 = vmatprep.mubr.bf16.mxu0 %v2223_v46  ;;  %v2287_v45 = vld [vmem:[%s2735_s0 + $0x80] ss:$28 sps:$4 sm:$0xff]  }
  0x3e   : > { %1261 = vmatprep.mubr.bf16.mxu1 %v2225_v47  ;;  %2046 = vmatpush3.bf16.msra.mxu0 %v2230_v48  ;;  %v2290_v46 = vld [vmem:[%s2735_s0 + $0xbc] ss:$28 sps:$4 sm:$0xff]   ;;  %v2297_v47 = vld [vmem:[%s2735_s0 + $0x130] ss:$28 sps:$4 sm:$0xff]   ;;  %v2304_v48 = vld [vmem:[%s2735_s0 + $0x168] ss:$28 sps:$4 sm:$0xff]  }
  0x3f   : > { %2047 = vmatprep.subr.bf16.mxu0 %v2237_v49  ;;  %2124 = vmatpush3.bf16.msra.mxu1 %v2265_v3  ;;  %v2292_v49 = vld [vmem:[%s2735_s0 + $0xb8] ss:$28 sps:$4 sm:$0xff]  }
  0x40   : > { %2125 = vmatprep.subr.bf16.mxu1 %v2273_v9  ;;  %1615 = vperm.xlu1 %2174, %v1605_v37  }
  0x41   : > { %1610 = vperm.xlu0 %2173, %v1604_v39  }
  0x42   : > { %2048 = vmatpush3.bf16.msra.mxu0 %v2238_v51  ;;  %v2305_v51 = vld [vmem:[%s2735_s0 + $0x1a0] ss:$28 sps:$4 sm:$0xff]  }
  0x43   : > { %2049 = vmatprep.subr.bf16.mxu0 %v2245_v55  ;;  %2126 = vmatpush3.bf16.msra.mxu1 %v2273_v9  ;;  %v2301_v55 = vld [vmem:[%s2735_s0 + $0x164] ss:$28 sps:$4 sm:$0xff]  }
  0x44   : > { %1165 = vmatmul.mubr.bf16.gmra.mrb[8].mxu0 %v2227_v50  ;;  %2127 = vmatprep.subr.bf16.mxu1 %v2275_v11  ;;  %v2293_v50 = vld [vmem:[%s2735_s0 + $0xf4] ss:$28 sps:$4 sm:$0xff]  }
  0x45   : > { %1262 = vmatmul.mubr.bf16.gmra.mrb[8].mxu1 %v2228_v52  ;;  %1172 = vmatprep.mubr.bf16.mxu0 %v2231_v53  ;;  %v2295_v52 = vld [vmem:[%s2735_s0 + $0xf0] ss:$28 sps:$4 sm:$0xff]  }
  0x46   : > { %1269 = vmatprep.mubr.bf16.mxu1 %v2233_v54  ;;  %2050 = vmatpush3.bf16.msra.mxu0 %v2246_v56  ;;  %v2298_v53 = vld [vmem:[%s2735_s0 + $0x12c] ss:$28 sps:$4 sm:$0xff]   ;;  %v2303_v56 = vld [vmem:[%s2735_s0 + $0x160] ss:$28 sps:$4 sm:$0xff]  }
  0x47   : > { %2051 = vmatprep.subr.bf16.mxu0 %v2254_v58  ;;  %2128 = vmatpush3.bf16.msra.mxu1 %v2275_v11  ;;  %v2300_v54 = vld [vmem:[%s2735_s0 + $0x128] ss:$28 sps:$4 sm:$0xff]   ;;  %v2308_v58 = vld [vmem:[%s2735_s0 + $0x198] ss:$28 sps:$4 sm:$0xff]  }
  0x48   : > { %2129 = vmatprep.subr.bf16.mxu1 %v2279_v13  ;;  %1625 = vperm.xlu1 %2174, %v1607_v43  }
  0x49   : > { %1620 = vperm.xlu0 %2173, %v1606_v44  }
  0x4a   : > { %2052 = vmatpush3.bf16.msra.mxu0 %v2255_v60 }
  0x4b   : > { %2053 = vmatprep.subr.bf16.mxu0 %v2263_v1  ;;  %2130 = vmatpush3.bf16.msra.mxu1 %v2279_v13 }
  0x4c   : > { %1173 = vmatmul.mubr.bf16.gmra.mrb[12].mxu0 %v2235_v59 }
  0x4d   : > { %1270 = vmatmul.mubr.bf16.gmra.mrb[12].mxu1 %v2236_v61  ;;  %1180 = vmatprep.mubr.bf16.mxu0 %v2239_v62 }
  0x4e   : > { %1277 = vmatprep.mubr.bf16.mxu1 %v2241_v0  ;;  %2054 = vmatpush3.bf16.msra.mxu0 %v2264_v2 }
  0x4f   : > { %2055 = vmatprep.subr.bf16.mxu0 %v2272_v8 }
  0x52   : > { %2056 = vmatpush3.bf16.msra.mxu0 %v2274_v10 }
  0x54   : > { %1181 = vmatmul.mubr.bf16.gmra.mrb[16].mxu0 %v2243_v4 }
  0x55   : > { %1278 = vmatmul.mubr.bf16.gmra.mrb[16].mxu1 %v2244_v5  ;;  %1188 = vmatprep.mubr.bf16.mxu0 %v2248_v6 }
  0x56   : > { %1285 = vmatprep.mubr.bf16.mxu1 %v2250_v7 }
  0x5c   : > { %1189 = vmatmul.mubr.bf16.gmra.mrb[20].mxu0 %v2252_v12 }
  0x5d   : > { %1286 = vmatmul.mubr.bf16.gmra.mrb[20].mxu1 %v2253_v14  ;;  %1196 = vmatprep.mubr.bf16.mxu0 %v2256_v15 }
  0x5e   : > { %1293 = vmatprep.mubr.bf16.mxu1 %v2258_v16 }
  0x64   : > { %1197 = vmatmul.mubr.bf16.gmra.mrb[24].mxu0 %v2261_v17 }
  0x65   : > { %1294 = vmatmul.mubr.bf16.gmra.mrb[24].mxu1 %v2262_v18  ;;  %1204 = vmatprep.mubr.bf16.mxu0 %v2266_v19 }
  0x66   : > { %1301 = vmatprep.mubr.bf16.mxu1 %v2268_v20 }
  0x6c   : > { %1205 = vmatmul.mubr.bf16.gmra.mrb[28].mxu0 %v2270_v21 }
  0x6d   : > { %1302 = vmatmul.mubr.bf16.gmra.mrb[28].mxu1 %v2271_v24  ;;  %1342 = vmatprep.mubr.bf16.mxu0 %v2278_v25 }
  0x6e   : > { %2131 = vmatprep.mubr.msk.bf16.mxu1 %vm1091_vm0, %v2280_v26 }
  0x74   : > { %1343 = vmatmul.mubr.bf16.vlgmr.msra.gmra.mrb[32].mxu0 %v2276_v30 }
  0x75   : > { %2132 = vmatmul.mubr.msk.bf16.vlgmr.msra.gmra.mrb[32].mxu1 %vm1091_vm0, %v2281_v32  ;;  %1350 = vmatprep.mubr.bf16.mxu0 %v2282_v33 }
  0x76   : > { %2135 = vmatprep.mubr.msk.bf16.mxu1 %vm1091_vm0, %v2288_v34 }
  0x7c   : > { %1351 = vmatmul.mubr.bf16.gmra.mrb[36].mxu0 %v2284_v38 }
  0x7d   : > { %1358 = vmatprep.mubr.bf16.mxu0 %v2285_v40  ;;  %2136 = vmatmul.mubr.msk.bf16.gmra.mrb[36].mxu1 %vm1091_vm0, %v2289_v41 }
  0x7e   : > { %2139 = vmatprep.mubr.msk.bf16.mxu1 %vm1091_vm0, %v2296_v42 }
  0x84   : > { %1359 = vmatmul.mubr.bf16.gmra.mrb[40].mxu0 %v2287_v45 }
  0x85   : > { %1366 = vmatprep.mubr.bf16.mxu0 %v2290_v46  ;;  %2140 = vmatmul.mubr.msk.bf16.gmra.mrb[40].mxu1 %vm1091_vm0, %v2297_v47 }
  0x86   : > { %2143 = vmatprep.mubr.msk.bf16.mxu1 %vm1091_vm0, %v2304_v48 }
  0x8c   : > { %1367 = vmatmul.mubr.bf16.gmra.mrb[44].mxu0 %v2292_v49 }
  0x8d   : > { %1374 = vmatprep.mubr.bf16.mxu0 %v2293_v50  ;;  %2144 = vmatmul.mubr.msk.bf16.gmra.mrb[44].mxu1 %vm1091_vm0, %v2305_v51 }
  0x94   : > { %1375 = vmatmul.mubr.bf16.gmra.mrb[48].mxu0 %v2295_v52 }
  0x95   : > { %1382 = vmatprep.mubr.bf16.mxu0 %v2298_v53 }
  0x9c   : > { %1383 = vmatmul.mubr.bf16.gmra.mrb[52].mxu0 %v2300_v54 }
  0x9d   : > { %1390 = vmatprep.mubr.bf16.mxu0 %v2301_v55 }
  0xa4   : > { %1391 = vmatmul.mubr.bf16.gmra.mrb[56].mxu0 %v2303_v56 }
  0xa5   : > { %1398 = vmatprep.mubr.bf16.mxu0 %v2306_v57 }
  0xac   : > { %1399 = vmatmul.mubr.bf16.gmra.mrb[60].mxu0 %v2308_v58 }
 0x107   : > { %v1929_v59 = vpop.f32.mrb[0].mxu0 }
 0x108   : > { %v1993_v60 = vpop.f32.mrb[0].mxu1  ;;  %v1930_v61 = vpop.f32.mrb[1].mxu0 }
 0x109   : > { %v1931_v62 = vadd.f32 %v1930_v61, %v1929_v59  ;;  %v1994_v63 = vpop.f32.mrb[1].mxu1  ;;  %v1932_v0 = vpop.f32.mrb[2].mxu0 }
 0x10a   : > { %v1995_v1 = vadd.f32 %v1994_v63, %v1993_v60  ;;  %v1996_v2 = vpop.f32.mrb[2].mxu1  ;;  %v1933_v3 = vpop.f32.mrb[3].mxu0 }
 0x10b   : > { %v1934_v4 = vadd.f32 %v1933_v3, %v1932_v0  ;;  %v1997_v5 = vpop.f32.mrb[3].mxu1 }
 0x10c   : > { %v2661_v6 = vadd.f32 %v1995_v1, %v1931_v62  ;;  %v1998_v7 = vadd.f32 %v1997_v5, %v1996_v2 }
 0x10e   : > { %v2663_v8 = vadd.f32 %v1998_v7, %v1934_v4 }
 0x10f   : > { %v1935_v9 = vpop.f32.mrb[4].mxu0 }
 0x110   : > { %v1999_v10 = vpop.f32.mrb[4].mxu1  ;;  %v1936_v11 = vpop.f32.mrb[5].mxu0 }
 0x111   : > { %v1937_v12 = vadd.f32 %v1936_v11, %v1935_v9  ;;  %v2000_v13 = vpop.f32.mrb[5].mxu1  ;;  %v1938_v14 = vpop.f32.mrb[6].mxu0 }
 0x112   : > { %v2001_v15 = vadd.f32 %v2000_v13, %v1999_v10  ;;  %v2002_v16 = vpop.f32.mrb[6].mxu1  ;;  %v1939_v17 = vpop.f32.mrb[7].mxu0 }
 0x113   : > { %v1940_v18 = vadd.f32 %v1939_v17, %v1938_v14  ;;  %v2003_v19 = vpop.f32.mrb[7].mxu1 }
 0x114   : > { %v2665_v20 = vadd.f32 %v2001_v15, %v1937_v12  ;;  %v2004_v21 = vadd.f32 %v2003_v19, %v2002_v16 }
 0x116   : > { %v2667_v22 = vadd.f32 %v2004_v21, %v1940_v18 }
 0x117   : > { %v1941_v23 = vpop.f32.mrb[8].mxu0 }
 0x118   : > { %v2005_v24 = vpop.f32.mrb[8].mxu1  ;;  %v1942_v25 = vpop.f32.mrb[9].mxu0 }
 0x119   : > { %v1943_v26 = vadd.f32 %v1942_v25, %v1941_v23  ;;  %v2006_v27 = vpop.f32.mrb[9].mxu1  ;;  %v1944_v28 = vpop.f32.mrb[10].mxu0 }
 0x11a   : > { %v2007_v29 = vadd.f32 %v2006_v27, %v2005_v24  ;;  %v2008_v30 = vpop.f32.mrb[10].mxu1  ;;  %v1945_v31 = vpop.f32.mrb[11].mxu0 }
 0x11b   : > { %v1946_v32 = vadd.f32 %v1945_v31, %v1944_v28  ;;  %v2009_v33 = vpop.f32.mrb[11].mxu1 }
 0x11c   : > { %v2669_v34 = vadd.f32 %v2007_v29, %v1943_v26  ;;  %v2010_v35 = vadd.f32 %v2009_v33, %v2008_v30 }
 0x11e   : > { %v2671_v36 = vadd.f32 %v2010_v35, %v1946_v32 }
 0x11f   : > { %v1947_v37 = vpop.f32.mrb[12].mxu0 }
 0x120   : > { %v2011_v38 = vpop.f32.mrb[12].mxu1  ;;  %v1948_v39 = vpop.f32.mrb[13].mxu0 }
 0x121   : > { %v1949_v40 = vadd.f32 %v1948_v39, %v1947_v37  ;;  %v2012_v41 = vpop.f32.mrb[13].mxu1  ;;  %v1950_v42 = vpop.f32.mrb[14].mxu0 }
 0x122   : > { %v2013_v43 = vadd.f32 %v2012_v41, %v2011_v38  ;;  %v2014_v44 = vpop.f32.mrb[14].mxu1  ;;  %v1951_v45 = vpop.f32.mrb[15].mxu0 }
 0x123   : > { %v1952_v46 = vadd.f32 %v1951_v45, %v1950_v42  ;;  %v2015_v47 = vpop.f32.mrb[15].mxu1 }
 0x124   : > { %v2673_v48 = vadd.f32 %v2013_v43, %v1949_v40  ;;  %v2016_v49 = vadd.f32 %v2015_v47, %v2014_v44 }
 0x126   : > { %v2675_v50 = vadd.f32 %v2016_v49, %v1952_v46 }
 0x127   : > { %v1953_v51 = vpop.f32.mrb[16].mxu0 }
 0x128   : > { %v2017_v52 = vpop.f32.mrb[16].mxu1  ;;  %v1954_v53 = vpop.f32.mrb[17].mxu0 }
 0x129   : > { %v1955_v54 = vadd.f32 %v1954_v53, %v1953_v51  ;;  %v2018_v55 = vpop.f32.mrb[17].mxu1  ;;  %v1956_v56 = vpop.f32.mrb[18].mxu0 }
 0x12a   : > { %v2019_v57 = vadd.f32 %v2018_v55, %v2017_v52  ;;  %v2020_v58 = vpop.f32.mrb[18].mxu1  ;;  %v1957_v59 = vpop.f32.mrb[19].mxu0 }
 0x12b   : > { %v1958_v60 = vadd.f32 %v1957_v59, %v1956_v56  ;;  %v2021_v61 = vpop.f32.mrb[19].mxu1 }
 0x12c   : > { %v2677_v62 = vadd.f32 %v2019_v57, %v1955_v54  ;;  %v2022_v63 = vadd.f32 %v2021_v61, %v2020_v58 }
 0x12e   : > { %v2679_v0 = vadd.f32 %v2022_v63, %v1958_v60 }
 0x12f   : > { %v1959_v1 = vpop.f32.mrb[20].mxu0 }
 0x130   : > { %v2023_v2 = vpop.f32.mrb[20].mxu1  ;;  %v1960_v3 = vpop.f32.mrb[21].mxu0 }
 0x131   : > { %v1961_v4 = vadd.f32 %v1960_v3, %v1959_v1  ;;  %v2024_v5 = vpop.f32.mrb[21].mxu1  ;;  %v1962_v7 = vpop.f32.mrb[22].mxu0 }
 0x132   : > { %v2025_v9 = vadd.f32 %v2024_v5, %v2023_v2  ;;  %v2026_v10 = vpop.f32.mrb[22].mxu1  ;;  %v1963_v11 = vpop.f32.mrb[23].mxu0 }
 0x133   : > { %v1964_v12 = vadd.f32 %v1963_v11, %v1962_v7  ;;  %v2027_v13 = vpop.f32.mrb[23].mxu1 }
 0x134   : > { %v2681_v14 = vadd.f32 %v2025_v9, %v1961_v4  ;;  %v2028_v15 = vadd.f32 %v2027_v13, %v2026_v10 }
 0x136   : > { %v2683_v16 = vadd.f32 %v2028_v15, %v1964_v12 }
 0x137   : > { %v1965_v17 = vpop.f32.mrb[24].mxu0 }
 0x138   : > { %v2029_v18 = vpop.f32.mrb[24].mxu1  ;;  %v1966_v19 = vpop.f32.mrb[25].mxu0 }
 0x139   : > { %v1967_v21 = vadd.f32 %v1966_v19, %v1965_v17  ;;  %v2030_v23 = vpop.f32.mrb[25].mxu1  ;;  %v1968_v24 = vpop.f32.mrb[26].mxu0 }
 0x13a   : > { %v2031_v25 = vadd.f32 %v2030_v23, %v2029_v18  ;;  %v2032_v26 = vpop.f32.mrb[26].mxu1  ;;  %v1969_v27 = vpop.f32.mrb[27].mxu0 }
 0x13b   : > { %v1970_v28 = vadd.f32 %v1969_v27, %v1968_v24  ;;  %v2033_v29 = vpop.f32.mrb[27].mxu1 }
 0x13c   : > { %v2685_v30 = vadd.f32 %v2031_v25, %v1967_v21  ;;  %v2034_v31 = vadd.f32 %v2033_v29, %v2032_v26 }
 0x13e   : > { %v2687_v32 = vadd.f32 %v2034_v31, %v1970_v28 }
 0x13f   : > { %v1971_v33 = vpop.f32.mrb[28].mxu0 }
 0x140   : > { %v2035_v35 = vpop.f32.mrb[28].mxu1  ;;  %v1972_v37 = vpop.f32.mrb[29].mxu0 }
 0x141   : > { %v1973_v38 = vadd.f32 %v1972_v37, %v1971_v33  ;;  %v2036_v39 = vpop.f32.mrb[29].mxu1  ;;  %v1974_v40 = vpop.f32.mrb[30].mxu0 }
 0x142   : > { %v2037_v41 = vadd.f32 %v2036_v39, %v2035_v35  ;;  %v2038_v42 = vpop.f32.mrb[30].mxu1  ;;  %v1975_v43 = vpop.f32.mrb[31].mxu0 }
 0x143   : > { %v1976_v44 = vadd.f32 %v1975_v43, %v1974_v40  ;;  %v2039_v45 = vpop.f32.mrb[31].mxu1 }
 0x144   : > { %v2689_v46 = vadd.f32 %v2037_v41, %v1973_v38  ;;  %v2040_v47 = vadd.f32 %v2039_v45, %v2038_v42 }
 0x146   : > { %v2691_v49 = vadd.f32 %v2040_v47, %v1976_v44 }
 0x147   : > { %v2057_v51 = vpop.f32.mrb[32].mxu0 }
 0x148   : > { %v2058_v52 = vpop.f32.mrb[33].mxu0  ;;  %v2133_v53 = vpop.f32.mrb[32].mxu1 }
 0x149   : > { %v2059_v54 = vadd.f32 %v2058_v52, %v2057_v51  ;;  %v2060_v55 = vpop.f32.mrb[34].mxu0  ;;  %v1441_v56 = vpop.f32.mrb[33].mxu1 }
 0x14a   : > { %v2061_v57 = vpop.f32.mrb[35].mxu0  ;;  %v2134_v58 = vpop.f32.mrb[34].mxu1 }
 0x14b   : > { %v2062_v59 = vadd.f32 %v2061_v57, %v2060_v55  ;;  %v1345_v60 = vadd.f32 %v2059_v54, %v2661_v6  ;;  %v1444_v61 = vpop.f32.mrb[35].mxu1 }
 0x14d   : > { %v1442_v63 = vadd.f32 %v1441_v56, %v1345_v60  ;;  %v1348_v1 = vadd.f32 %v2062_v59, %v2663_v8 }
 0x14f   : > { %v1445_v2 = vadd.f32 %v1444_v61, %v1348_v1  ;;  %v2063_v3 = vpop.f32.mrb[36].mxu0 }
 0x150   : > { %v2064_v4 = vpop.f32.mrb[37].mxu0  ;;  %v2137_v5 = vpop.f32.mrb[36].mxu1 }
 0x151   : > { %v2065_v7 = vadd.f32 %v2064_v4, %v2063_v3  ;;  %v2066_v9 = vpop.f32.mrb[38].mxu0  ;;  %v1457_v10 = vpop.f32.mrb[37].mxu1 }
 0x152   : > { %v2067_v11 = vpop.f32.mrb[39].mxu0  ;;  %v2138_v12 = vpop.f32.mrb[38].mxu1 }
 0x153   : > { %v1353_v13 = vadd.f32 %v2065_v7, %v2665_v20  ;;  %v2068_v15 = vadd.f32 %v2067_v11, %v2066_v9  ;;  %v1460_v17 = vpop.f32.mrb[39].mxu1 }
 0x155   : > { %v1450_v18 = vadd.f32 %v2133_v53, %v1353_v13  ;;  %v1356_v6 = vadd.f32 %v2068_v15, %v2667_v22  ;;  %v1523_v15 = vpop.permute.xlu0 %1522 }
 0x157   : > { %v1453_v19 = vadd.f32 %v2134_v58, %v1356_v6  ;;  %v2069_v21 = vpop.f32.mrb[40].mxu0 }
 0x158   : > { %v2070_v23 = vpop.f32.mrb[41].mxu0  ;;  %v2141_v8 = vpop.f32.mrb[40].mxu1 }
 0x159   : > { %v2071_v24 = vadd.f32 %v2070_v23, %v2069_v21  ;;  %v2072_v25 = vpop.f32.mrb[42].mxu0  ;;  %v1473_v26 = vpop.f32.mrb[41].mxu1 }
 0x15a   : > { %v2073_v27 = vpop.f32.mrb[43].mxu0  ;;  %v2142_v28 = vpop.f32.mrb[42].mxu1 }
 0x15b   : > { %v2074_v29 = vadd.f32 %v2073_v27, %v2072_v25  ;;  %v1361_v31 = vadd.f32 %v2071_v24, %v2669_v34  ;;  %v1476_v33 = vpop.f32.mrb[43].mxu1 }
 0x15d   : > { %v1458_v35 = vadd.f32 %v1457_v10, %v1361_v31  ;;  %v1364_v20 = vadd.f32 %v2074_v29, %v2671_v36  ;;  %v1894_v31 = vld [vmem:[%s305_s29] sm:$0xff]  }
 0x15f   : > { %v1504_v37 = vmax.f32 %v1442_v63, %v1458_v35  ;;  %v1461_v38 = vadd.f32 %v1460_v17, %v1364_v20  ;;  %v2075_v39 = vpop.f32.mrb[44].mxu0  ;;  %v1533_v17 = vpop.permute.xlu1 %1532 }
 0x160   : > { %v2076_v22 = vpop.f32.mrb[45].mxu0  ;;  %v2699_v40 = vpop.f32.mrb[44].mxu1 }
 0x161   : > { %v1505_v41 = vmax.f32 %v1445_v2, %v1461_v38  ;;  %v2077_v42 = vadd.f32 %v2076_v22, %v2075_v39  ;;  %v2078_v43 = vpop.f32.mrb[46].mxu0  ;;  %v1489_v44 = vpop.f32.mrb[45].mxu1  ;;  %v1895_v38 = vunpack.c.l.bf16 %v1894_v31 }
 0x162   : > { %v2079_v45 = vpop.f32.mrb[47].mxu0  ;;  %v2701_v47 = vpop.f32.mrb[46].mxu1 }
 0x163   : > { %v1369_v51 = vadd.f32 %v2077_v42, %v2673_v48  ;;  %v2080_v34 = vadd.f32 %v2079_v45, %v2078_v43  ;;  %v1492_v52 = vpop.f32.mrb[47].mxu1 }
 0x165   : > { %v1466_v53 = vadd.f32 %v2137_v5, %v1369_v51  ;;  %v1372_v36 = vadd.f32 %v2080_v34, %v2675_v50  ;;  %v1896_v51 = vunpack.c.h.bf16 %v1894_v31 }
 0x167   : > { %v1506_v54 = vmax.f32 %v1450_v18, %v1466_v53  ;;  %v1469_v55 = vadd.f32 %v2138_v12, %v1372_v36  ;;  %v2081_v56 = vpop.f32.mrb[48].mxu0  ;;  %v1568_v36 = vmul.f32 0.1, %v1895_v38 }
 0x168   : > { %v2082_v57 = vpop.f32.mrb[49].mxu0 }
 0x169   : > { %v1507_v58 = vmax.f32 %v1453_v19, %v1469_v55  ;;  %v2083_v59 = vadd.f32 %v2082_v57, %v2081_v56  ;;  %v2084_v60 = vpop.f32.mrb[50].mxu0  ;;  %v1911_v56 = vld [vmem:[%s305_s29 + $0x8] sm:$0xff]  }
 0x16a   : > { %v2085_v61 = vpop.f32.mrb[51].mxu0 }
 0x16b   : > { %v2086_v63 = vadd.f32 %v2085_v61, %v2084_v60  ;;  %v1377_v1 = vadd.f32 %v2083_v59, %v2677_v62  ;;  %v1569_v59 = vmul.f32 0.1, %v1896_v51 }
 0x16d   : > { %v1474_v2 = vadd.f32 %v1473_v26, %v1377_v1  ;;  %v1380_v3 = vadd.f32 %v2086_v63, %v2679_v0  ;;  %v1528_v26 = vpop.permute.xlu0 %1527 }
 0x16f   : > { %v1508_v48 = vmax.f32 %v1504_v37, %v1474_v2  ;;  %v1477_v4 = vadd.f32 %v1476_v33, %v1380_v3  ;;  %v2087_v5 = vpop.f32.mrb[52].mxu0 }
 0x170   : > { %v2088_v7 = vpop.f32.mrb[53].mxu0 }
 0x171   : > { %v1509_v50 = vmax.f32 %v1505_v41, %v1477_v4  ;;  %v2089_v9 = vadd.f32 %v2088_v7, %v2087_v5  ;;  %v2090_v10 = vpop.f32.mrb[54].mxu0  ;;  %v1583_v37 = vpop.permute.xlu0 %1582 }
 0x172   : > { %v2091_v11 = vpop.f32.mrb[55].mxu0 }
 0x173   : > { %v1385_v12 = vadd.f32 %v2089_v9, %v2681_v14  ;;  %v2092_v13 = vadd.f32 %v2091_v11, %v2090_v10  ;;  %v1538_v14 = vpop.permute.xlu1 %1537  ;;  %v1900_v9 = vunpack.c.h.bf16 %v1911_v56 }
 0x175   : > { %v1482_v18 = vadd.f32 %v2141_v8, %v1385_v12  ;;  %v1388_v62 = vadd.f32 %v2092_v13, %v2683_v16  ;;  %v1593_v57 = vpop.permute.xlu0 %1592 }
 0x177   : > { %v1510_v6 = vmax.f32 %v1506_v54, %v1482_v18  ;;  %v1485_v0 = vadd.f32 %v2142_v28, %v1388_v62  ;;  %v2093_v19 = vpop.f32.mrb[56].mxu0  ;;  %v1588_v22 = vpop.permute.xlu1 %1587 }
 0x178   : > { %v2094_v21 = vpop.f32.mrb[57].mxu0 }
 0x179   : > { %v1511_v23 = vmax.f32 %v1507_v58, %v1485_v0  ;;  %v2095_v24 = vadd.f32 %v2094_v21, %v2093_v19  ;;  %v2096_v25 = vpop.f32.mrb[58].mxu0  ;;  %v1611_v10 = vpop.permute.xlu0 %1610 }
 0x17a   : > { %v2097_v27 = vpop.f32.mrb[59].mxu0 }
 0x17b   : > { %v2098_v29 = vadd.f32 %v2097_v27, %v2096_v25  ;;  %v1393_v8 = vadd.f32 %v2095_v24, %v2685_v30  ;;  %v1598_v61 = vpop.permute.xlu1 %1597 }
 0x17d   : > { %v1490_v16 = vadd.f32 %v1489_v44, %v1393_v8  ;;  %v1396_v28 = vadd.f32 %v2098_v29, %v2687_v32 }
 0x17f   : > { %v1512_v33 = vmax.f32 %v1508_v48, %v1490_v16  ;;  %v1493_v35 = vadd.f32 %v1492_v52, %v1396_v28  ;;  %v2099_v20 = vpop.f32.mrb[60].mxu0  ;;  %v1899_v48 = vunpack.c.l.bf16 %v1911_v56  ;;  %v1616_v13 = vpop.permute.xlu1 %1615 }
 0x180   : > { %v2100_v39 = vpop.f32.mrb[61].mxu0 }
 0x181   : > { %v1540_v41 = vadd.f32 %v1523_v15, %v1512_v33  ;;  %v1513_v42 = vmax.f32 %v1509_v50, %v1493_v35  ;;  %v2101_v43 = vadd.f32 %v2100_v39, %v2099_v20  ;;  %v2102_v45 = vpop.f32.mrb[62].mxu0  ;;  %v1570_v12 = vmul.f32 0.1, %v1899_v48 }
 0x182   : > { %v2103_v34 = vpop.f32.mrb[63].mxu0 }
 0x183   : > { %v1548_v53 = vmul.f32 0.01, %v1540_v41  ;;  %vm1544_vm1 = vcmp.gt.f32.partialorder %v1540_v41, 0.0  ;;  %v1541_v30 = vadd.f32 %v1528_v26, %v1513_v42  ;;  %v1401_v44 = vadd.f32 %v2101_v43, %v2689_v46  ;;  %v1626_v27 = vpop.permute.xlu1 %1625 }
 0x184   : > { %v2104_v32 = vadd.f32 %v2103_v34, %v2102_v45 }
 0x185   : > { %v1552_v54 = vsel %vm1544_vm1, %v1540_v41, %v1548_v53  ;;  %vm1545_vm2 = vcmp.gt.f32.partialorder %v1541_v30, 0.0  ;;  %v1549_v52 = vmul.f32 0.01, %v1541_v30  ;;  %v1498_v55 = vadd.f32 %v2699_v40, %v1401_v44 }
 0x186   : > { %v1556_v58 = vmul.f32 0.9, %v1552_v54  ;;  %v1404_v60 = vadd.f32 %v2104_v32, %v2691_v49 }
 0x187   : > { %v1553_v63 = vsel %vm1545_vm2, %v1541_v30, %v1549_v52  ;;  %v1514_v1 = vmax.f32 %v1510_v6, %v1498_v55 }
 0x188   : > { %v1572_v2 = vadd.f32 %v1568_v36, %v1556_v58  ;;  %v1557_v3 = vmul.f32 0.9, %v1553_v63  ;;  %v1501_v46 = vadd.f32 %v2701_v47, %v1404_v60  ;;  %v1571_v47 = vmul.f32 0.1, %v1900_v9 }
 0x189   : > { %v1542_v4 = vadd.f32 %v1533_v17, %v1514_v1 }
 0x18a   : > { %v1600_v5 = vmul.f32 %v1583_v37, %v1572_v2  ;;  %v1573_v7 = vadd.f32 %v1569_v59, %v1557_v3  ;;  %v1515_v50 = vmax.f32 %v1511_v23, %v1501_v46 }
 0x18b   : > { %vm1546_vm3 = vcmp.gt.f32.partialorder %v1542_v4, 0.0  ;;  %v1550_v40 = vmul.f32 0.01, %v1542_v4 }
 0x18c   : > { %v1601_v11 = vmul.f32 %v1588_v22, %v1573_v7  ;;  %v1543_v49 = vadd.f32 %v1538_v14, %v1515_v50  ;;  %v1628_v15 = vadd.f32 %v1611_v10, %v1600_v5  ;;  %v1621_v14 = vpop.permute.xlu0 %1620 }
 0x18d   : > { %v1554_v18 = vsel %vm1546_vm3, %v1542_v4, %v1550_v40 }
 0x18e   : > { %v1629_v62 = vadd.f32 %v1616_v13, %v1601_v11  ;;  %v1558_v6 = vmul.f32 0.9, %v1554_v18  ;;  %vm1547_vm4 = vcmp.gt.f32.partialorder %v1543_v49, 0.0  ;;  %v1551_v0 = vmul.f32 0.01, %v1543_v49 }
 0x190   : > { %v1904_v17 = vpack.c.bf16 %v1629_v62, %v1628_v15  ;;  %v1574_v19 = vadd.f32 %v1570_v12, %v1558_v6  ;;  %v1555_v21 = vsel %vm1547_vm4, %v1543_v49, %v1551_v0 }
 0x191   : > { %v1559_v23 = vmul.f32 0.9, %v1555_v21 }
 0x192   : > { %1905 = vst [vmem:[%s313_s9] sm:$0xff] %v1904_v17   ;;  %v1602_v24 = vmul.f32 %v1593_v57, %v1574_v19 }
 0x193   : > { %v1575_v25 = vadd.f32 %v1571_v47, %v1559_v23 }
 0x194   : > { %v1630_v29 = vadd.f32 %v1621_v14, %v1602_v24 }
 0x195   : > { %v1603_v26 = vmul.f32 %v1598_v61, %v1575_v25 }
 0x197   : > { %v1631_v8 = vadd.f32 %v1626_v27, %v1603_v26 }
 0x199   : > { %v1909_v16 = vpack.c.bf16 %v1631_v8, %v1630_v29 }
 0x19b   : > { %1912 = vst [vmem:[%s313_s9 + $0x8] sm:$0xff] %v1909_v16  }
 0x19c PF: > { %s16_s23 = sadd.s32 1, %s2331_s23   ;;  %s2742_s21 = smov %s2327_s22 }
 0x19d   : > { %p13_p5 = scmp.ge.s32.totalorder %s16_s23, 4   ;;  %s2743_s22 = smov %s2745_s24 }
 0x19f   :  { %15 = sbr.rel (!%p13_p5) target bundleno = 2 (0x2), region = 77 }

// kernel: dga3net_forward.18
= control target key start
LH: loop header
LB: loop body
LE: loop exit
PB: predicated region body
PF: predicated region fallthrough
CT: control target
= control target key end

     0   :  { %s2136_s12 = smov 0   ;;  %s2138_s13 = smov 0   ;;  %s2471_s0 = inlined_call_operand.vmem [shape: bf16[128,864], index: 0, kind: input, shape index: {}]   ;;  %s2472_s1 = inlined_call_operand.vmem [shape: bf16[2,864,128], index: 1, kind: input, shape index: {}]   ;;  %s2473_s2 = inlined_call_operand.vmem [shape: f32[32,1], index: 2, kind: input, shape index: {}]   ;;  %s2474_s3 = inlined_call_operand.vmem [shape: bf16[2,32,128], index: 3, kind: output, shape index: {}]  }
   0x1   :  { %s2140_s14 = smov 0  }
   0x2 LB: > { %s25_s15 = sadd.s32 1, %s2109_s13  ;;  %p1551_p0 = scmp.ge.s32.totalorder %s2113_s14, 1  ;;  %s2113_s14 = sphi %s2140_s14, %s13_s14   ;;  %s2109_s13 = sphi %s2138_s13, %s2476_s13   ;;  %s2105_s12 = sphi %s2136_s12, %s2475_s12  }
   0x3   : > { %p27_p1 = scmp.ge.s32.totalorder %s25_s15, 2  ;;  %p156_p2 = scmp.lt.s32.totalorder %s2113_s14, 3 }
   0x5   : > { %s2478_s15 = smov (%p27_p1, %s25_s15), 0  ;;  %p157_p3 = pnand %p1551_p0, %p156_p2 }
   0x6   : > { %p186_p4 = scmp.lt.s32.totalorder (!%p157_p3), %s2105_s12, 1  ;;  %v1991_v0 = vld [vmem:[%s2471_s0 + $0x4] ss:$28 sps:$4 sm:$0xff] (!%p157_p3)   ;;  %v1994_v1 = vld [vmem:[%s2471_s0 + $0xc] ss:$28 sps:$4 sm:$0xff] (!%p157_p3)   ;;  %v2115_v31 = vmov (!%p157_p3), 0  }
   0x7   : > { %160 = sbr.rel (%p157_p3) target bundleno = 404 (0x194), region = 32  ;;  %1036 = vmatprep.mubr.bf16.mxu0 (!%p157_p3), %v1991_v0  ;;  %1133 = vmatprep.mubr.bf16.mxu1 (!%p157_p3), %v1994_v1  ;;  %v1989_v33 = vld [vmem:[%s2471_s0] ss:$28 sps:$4 sm:$0xff] (!%p157_p3)   ;;  %v1992_v35 = vld [vmem:[%s2471_s0 + $0x8] ss:$28 sps:$4 sm:$0xff] (!%p157_p3)   ;;  %vm979_vm0 = vcmask (!%p157_p3), 785408  }
   0x8   : > { %1955 = vset.pattern.permute.xlu0 (!%p157_p3), %v2115_v31  ;;  %1956 = vset.pattern.permute.xlu1 (!%p157_p3), %v2115_v31  ;;  %v1997_v37 = vld [vmem:[%s2471_s0 + $0x3c] ss:$28 sps:$4 sm:$0xff] (!%p157_p3)   ;;  %v1999_v38 = vld [vmem:[%s2471_s0 + $0x44] ss:$28 sps:$4 sm:$0xff] (!%p157_p3)   ;;  %v2005_v46 = vld [vmem:[%s2471_s0 + $0x74] ss:$28 sps:$4 sm:$0xff] (!%p157_p3)  }
   0x9   : > { %v2001_v44 = vld [vmem:[%s2471_s0 + $0x38] ss:$28 sps:$4 sm:$0xff] (!%p157_p3)   ;;  %v2002_v45 = vld [vmem:[%s2471_s0 + $0x40] ss:$28 sps:$4 sm:$0xff] (!%p157_p3)   ;;  %v2009_v50 = vld [vmem:[%s2471_s0 + $0x70] ss:$28 sps:$4 sm:$0xff] (!%p157_p3)  }
   0xa   : > { %v2007_v47 = vld [vmem:[%s2471_s0 + $0x7c] ss:$28 sps:$4 sm:$0xff] (!%p157_p3)   ;;  %v2013_v53 = vld [vmem:[%s2471_s0 + $0xac] ss:$28 sps:$4 sm:$0xff] (!%p157_p3)   ;;  %v2015_v54 = vld [vmem:[%s2471_s0 + $0xb4] ss:$28 sps:$4 sm:$0xff] (!%p157_p3)  }
   0xb   : > { %v2010_v52 = vld [vmem:[%s2471_s0 + $0x78] ss:$28 sps:$4 sm:$0xff] (!%p157_p3)   ;;  %v2017_v59 = vld [vmem:[%s2471_s0 + $0xa8] ss:$28 sps:$4 sm:$0xff] (!%p157_p3)   ;;  %v2018_v61 = vld [vmem:[%s2471_s0 + $0xb0] ss:$28 sps:$4 sm:$0xff] (!%p157_p3)  }
   0xc   : > { %v2021_v62 = vld [vmem:[%s2471_s0 + $0xe4] ss:$28 sps:$4 sm:$0xff] (!%p157_p3)   ;;  %v2023_v0 = vld [vmem:[%s2471_s0 + $0xec] ss:$28 sps:$4 sm:$0xff] (!%p157_p3)  }
   0xd   : > { %v2070_v31 = vld [vmem:[%s2471_s0 + $0x88] ss:$28 sps:$4 sm:$0xff] (!%p157_p3)  }
   0xe   : > { %s2480_s12 = smov (!%p186_p4, %s2105_s12), 1 }
   0xf   : > { %s1929_s20 = smul.u32 432, %s2480_s12  ;;  %s1679_s27 = sshll.u32 %s2480_s12, 4 }
  0x10   : > { %s201_s29 = scalar_lea.vmem %s2474_s3, %s1679_s27 }
  0x11   : > { %s2166_s23 = scalar_lea.vmem %s2472_s1, %s1929_s20 }
  0x12   : > { %v1957_v2 = vld [vmem:[%s2166_s23 + $0x40] sm:$0xff]   ;;  %v1961_v6 = vld [vmem:[%s2166_s23 + $0x48] sm:$0xff]   ;;  %v1965_v10 = vld [vmem:[%s2166_s23 + $0x50] sm:$0xff]  }
  0x13   : > { %v1958_v3 = vld [vmem:[%s2166_s23 + $0xc0] sm:$0xff]   ;;  %1695 = vmatprep.subr.bf16.mxu0 %v1957_v2  ;;  %v1962_v7 = vld [vmem:[%s2166_s23 + $0xc8] sm:$0xff]   ;;  %v1966_v11 = vld [vmem:[%s2166_s23 + $0xd0] sm:$0xff]  }
  0x14   : > { %v1959_v4 = vld [vmem:[%s2166_s23] sm:$0xff]   ;;  %1759 = vmatprep.subr.bf16.mxu1 %v1958_v3  ;;  %v1963_v8 = vld [vmem:[%s2166_s23 + $0x8] sm:$0xff]   ;;  %v1967_v12 = vld [vmem:[%s2166_s23 + $0x10] sm:$0xff]  }
  0x15   : > { %v1960_v5 = vld [vmem:[%s2166_s23 + $0x80] sm:$0xff]   ;;  %1696 = vmatpush3.bf16.msra.mxu0 %v1959_v4  ;;  %v1964_v9 = vld [vmem:[%s2166_s23 + $0x88] sm:$0xff]   ;;  %v1968_v13 = vld [vmem:[%s2166_s23 + $0x90] sm:$0xff]  }
  0x16   : > { %1760 = vmatpush3.bf16.msra.mxu1 %v1960_v5  ;;  %1697 = vmatprep.subr.bf16.mxu0 %v1961_v6  ;;  %v1969_v14 = vld [vmem:[%s2166_s23 + $0x58] sm:$0xff]   ;;  %v1973_v18 = vld [vmem:[%s2166_s23 + $0x60] sm:$0xff]   ;;  %v1977_v22 = vld [vmem:[%s2166_s23 + $0x68] sm:$0xff]  }
  0x17   : > { %1761 = vmatprep.subr.bf16.mxu1 %v1962_v7  ;;  %v1970_v15 = vld [vmem:[%s2166_s23 + $0xd8] sm:$0xff]   ;;  %v1974_v19 = vld [vmem:[%s2166_s23 + $0xe0] sm:$0xff]   ;;  %v1978_v23 = vld [vmem:[%s2166_s23 + $0xe8] sm:$0xff]  }
  0x18   : > { %v1971_v16 = vld [vmem:[%s2166_s23 + $0x18] sm:$0xff]   ;;  %v1975_v20 = vld [vmem:[%s2166_s23 + $0x20] sm:$0xff]   ;;  %v1979_v24 = vld [vmem:[%s2166_s23 + $0x28] sm:$0xff]  }
  0x19   : > { %1698 = vmatpush3.bf16.msra.mxu0 %v1963_v8  ;;  %v1972_v17 = vld [vmem:[%s2166_s23 + $0x98] sm:$0xff]   ;;  %v1976_v21 = vld [vmem:[%s2166_s23 + $0xa0] sm:$0xff]   ;;  %v1980_v25 = vld [vmem:[%s2166_s23 + $0xa8] sm:$0xff]  }
  0x1a   : > { %1762 = vmatpush3.bf16.msra.mxu1 %v1964_v9  ;;  %1699 = vmatprep.subr.bf16.mxu0 %v1965_v10  ;;  %v1981_v26 = vld [vmem:[%s2166_s23 + $0x70] sm:$0xff]   ;;  %v1985_v30 = vld [vmem:[%s2166_s23 + $0x78] sm:$0xff]   ;;  %v1995_v39 = vld [vmem:[%s2166_s23 + $0x140] sm:$0xff]  }
  0x1b   : > { %1763 = vmatprep.subr.bf16.mxu1 %v1966_v11  ;;  %v1982_v27 = vld [vmem:[%s2166_s23 + $0xf0] sm:$0xff]   ;;  %v1986_v32 = vld [vmem:[%s2166_s23 + $0xf8] sm:$0xff]   ;;  %v1996_v40 = vld [vmem:[%s2166_s23 + $0x100] sm:$0xff]  }
  0x1c   : > { %v1983_v28 = vld [vmem:[%s2166_s23 + $0x30] sm:$0xff]   ;;  %v1987_v34 = vld [vmem:[%s2166_s23 + $0x38] sm:$0xff]   ;;  %v2003_v41 = vld [vmem:[%s2166_s23 + $0x148] sm:$0xff]  }
  0x1d   : > { %1700 = vmatpush3.bf16.msra.mxu0 %v1967_v12  ;;  %v1984_v29 = vld [vmem:[%s2166_s23 + $0xb0] sm:$0xff]   ;;  %v1988_v36 = vld [vmem:[%s2166_s23 + $0xb8] sm:$0xff]   ;;  %v2004_v42 = vld [vmem:[%s2166_s23 + $0x108] sm:$0xff]  }
  0x1e   : > { %1764 = vmatpush3.bf16.msra.mxu1 %v1968_v13  ;;  %1701 = vmatprep.subr.bf16.mxu0 %v1969_v14  ;;  %v2011_v43 = vld [vmem:[%s2166_s23 + $0x150] sm:$0xff]   ;;  %v2019_v49 = vld [vmem:[%s2166_s23 + $0x158] sm:$0xff]   ;;  %v2027_v55 = vld [vmem:[%s2166_s23 + $0x160] sm:$0xff]  }
  0x1f   : > { %1765 = vmatprep.subr.bf16.mxu1 %v1970_v15  ;;  %v2012_v48 = vld [vmem:[%s2166_s23 + $0x110] sm:$0xff]   ;;  %v2020_v51 = vld [vmem:[%s2166_s23 + $0x118] sm:$0xff]   ;;  %v2028_v56 = vld [vmem:[%s2166_s23 + $0x120] sm:$0xff]  }
  0x20   : > { %v2029_v57 = vld [vmem:[%s2166_s23 + $0x180] sm:$0xff]   ;;  %v2036_v58 = vld [vmem:[%s2166_s23 + $0x168] sm:$0xff]   ;;  %v2045_v1 = vld [vmem:[%s2166_s23 + $0x170] sm:$0xff]  }
  0x21   : > { %1702 = vmatpush3.bf16.msra.mxu0 %v1971_v16  ;;  %v2037_v60 = vld [vmem:[%s2166_s23 + $0x128] sm:$0xff]   ;;  %v2046_v2 = vld [vmem:[%s2166_s23 + $0x130] sm:$0xff]   ;;  %v2025_v4 = vld [vmem:[%s2471_s0 + $0xe0] ss:$28 sps:$4 sm:$0xff]  }
  0x22   : > { %1766 = vmatpush3.bf16.msra.mxu1 %v1972_v17  ;;  %1703 = vmatprep.subr.bf16.mxu0 %v1973_v18  ;;  %v2042_v63 = vld [vmem:[%s2166_s23 + $0x188] sm:$0xff]   ;;  %v2047_v3 = vld [vmem:[%s2166_s23 + $0x190] sm:$0xff]   ;;  %v2030_v6 = vld [vmem:[%s2471_s0 + $0x11c] ss:$28 sps:$4 sm:$0xff]  }
  0x23   : > { %1767 = vmatprep.subr.bf16.mxu1 %v1974_v19  ;;  %v2026_v5 = vld [vmem:[%s2471_s0 + $0xe8] ss:$28 sps:$4 sm:$0xff]   ;;  %v2054_v8 = vld [vmem:[%s2166_s23 + $0x178] sm:$0xff]   ;;  %v2038_v15 = vld [vmem:[%s2471_s0 + $0x154] ss:$28 sps:$4 sm:$0xff]  }
  0x24   : > { %v2032_v7 = vld [vmem:[%s2471_s0 + $0x124] ss:$28 sps:$4 sm:$0xff]   ;;  %v2055_v9 = vld [vmem:[%s2166_s23 + $0x198] sm:$0xff]   ;;  %v2061_v13 = vld [vmem:[%s2166_s23 + $0x1a8] sm:$0xff]  }
  0x25   : > { %1704 = vmatpush3.bf16.msra.mxu0 %v1975_v20  ;;  %v2056_v10 = vld [vmem:[%s2166_s23 + $0x138] sm:$0xff]   ;;  %v2057_v11 = vld [vmem:[%s2166_s23 + $0x1a0] sm:$0xff]   ;;  %v2043_v17 = vld [vmem:[%s2471_s0 + $0x150] ss:$28 sps:$4 sm:$0xff]  }
  0x26   : > { %1768 = vmatpush3.bf16.msra.mxu1 %v1976_v21  ;;  %1705 = vmatprep.subr.bf16.mxu0 %v1977_v22  ;;  %v2034_v12 = vld [vmem:[%s2471_s0 + $0x118] ss:$28 sps:$4 sm:$0xff]   ;;  %v2035_v14 = vld [vmem:[%s2471_s0 + $0x120] ss:$28 sps:$4 sm:$0xff]   ;;  %v2048_v19 = vld [vmem:[%s2471_s0 + $0x18c] ss:$28 sps:$4 sm:$0xff]  }
  0x27   : > { %1769 = vmatprep.subr.bf16.mxu1 %v1978_v23  ;;  %v2040_v16 = vld [vmem:[%s2471_s0 + $0x15c] ss:$28 sps:$4 sm:$0xff]   ;;  %v2050_v20 = vld [vmem:[%s2471_s0 + $0x194] ss:$28 sps:$4 sm:$0xff]   ;;  %v2052_v21 = vld [vmem:[%s2471_s0 + $0x188] ss:$28 sps:$4 sm:$0xff]  }
  0x28   : > { %v2044_v18 = vld [vmem:[%s2471_s0 + $0x158] ss:$28 sps:$4 sm:$0xff]   ;;  %v1404_v22 = vld [vmem:[%s2473_s2] sm:$0xff] }
  0x29   : > { %1706 = vmatpush3.bf16.msra.mxu0 %v1979_v24  ;;  %v1406_v23 = vld [vmem:[%s2473_s2 + $0x10] sm:$0xff]  ;;  %1410 = vperm.xlu0 %1955, %v1404_v22  }
  0x2a   : > { %1770 = vmatpush3.bf16.msra.mxu1 %v1980_v25  ;;  %1707 = vmatprep.subr.bf16.mxu0 %v1981_v26  ;;  %v2053_v24 = vld [vmem:[%s2471_s0 + $0x190] ss:$28 sps:$4 sm:$0xff]   ;;  %v2062_v26 = vld [vmem:[%s2471_s0 + $0x18] ss:$28 sps:$4 sm:$0xff]  }
  0x2b   : > { %1771 = vmatprep.subr.bf16.mxu1 %v1982_v27  ;;  %v2060_v25 = vld [vmem:[%s2471_s0 + $0x14] ss:$28 sps:$4 sm:$0xff]   ;;  %1420 = vperm.xlu1 %1956, %v1406_v23   ;;  %v1405_v27 = vld [vmem:[%s2473_s2 + $0x8] sm:$0xff] }
  0x2d   : > { %1708 = vmatpush3.bf16.msra.mxu0 %v1983_v28  ;;  %1415 = vperm.xlu0 %1955, %v1405_v27   ;;  %v2058_v28 = vld [vmem:[%s2471_s0 + $0x10] ss:$28 sps:$4 sm:$0xff]  }
  0x2e   : > { %1772 = vmatpush3.bf16.msra.mxu1 %v1984_v29  ;;  %1709 = vmatprep.subr.bf16.mxu0 %v1985_v30  ;;  %v2063_v29 = vld [vmem:[%s2471_s0 + $0x50] ss:$28 sps:$4 sm:$0xff]  }
  0x2f   : > { %1773 = vmatprep.subr.bf16.mxu1 %v1986_v32  ;;  %v2064_v30 = vld [vmem:[%s2471_s0 + $0x4c] ss:$28 sps:$4 sm:$0xff]  }
  0x30   : > { %v2066_v32 = vld [vmem:[%s2471_s0 + $0x48] ss:$28 sps:$4 sm:$0xff]  }
  0x31   : > { %1710 = vmatpush3.bf16.msra.mxu0 %v1987_v34  ;;  %v2071_v34 = vld [vmem:[%s2471_s0 + $0xc0] ss:$28 sps:$4 sm:$0xff]  }
  0x32   : > { %1774 = vmatpush3.bf16.msra.mxu1 %v1988_v36  ;;  %1823 = vmatprep.subr.bf16.mxu0 %v1995_v39  ;;  %v2069_v36 = vld [vmem:[%s2471_s0 + $0x80] ss:$28 sps:$4 sm:$0xff]   ;;  %v2086_v39 = vld [vmem:[%s2471_s0 + $0x168] ss:$28 sps:$4 sm:$0xff]  }
  0x33   : > { %1901 = vmatprep.subr.bf16.mxu1 %v2029_v57 }
  0x34   : > { %1037 = vmatmul.mubr.bf16.vlgmr.msra.gmra.mrb[0].mxu0 %v1989_v33  ;;  %v2067_v33 = vld [vmem:[%s2471_s0 + $0x84] ss:$28 sps:$4 sm:$0xff]  }
  0x35   : > { %1134 = vmatmul.mubr.bf16.vlgmr.msra.gmra.mrb[0].mxu1 %v1992_v35  ;;  %1824 = vmatpush3.bf16.msra.mxu0 %v1996_v40  ;;  %v2078_v35 = vld [vmem:[%s2471_s0 + $0xf8] ss:$28 sps:$4 sm:$0xff]  }
  0x36   : > { %1044 = vmatprep.mubr.bf16.mxu0 %v1997_v37  ;;  %1141 = vmatprep.mubr.bf16.mxu1 %v1999_v38  ;;  %v2072_v37 = vld [vmem:[%s2471_s0 + $0xbc] ss:$28 sps:$4 sm:$0xff]   ;;  %v2079_v38 = vld [vmem:[%s2471_s0 + $0x130] ss:$28 sps:$4 sm:$0xff]  }
  0x37   : > { %1825 = vmatprep.subr.bf16.mxu0 %v2003_v41  ;;  %1902 = vmatpush3.bf16.msra.mxu1 %v2029_v57  ;;  %v1407_v40 = vld [vmem:[%s2473_s2 + $0x18] sm:$0xff] }
  0x38   : > { %1903 = vmatprep.subr.bf16.mxu1 %v2042_v63  ;;  %v2074_v41 = vld [vmem:[%s2471_s0 + $0xb8] ss:$28 sps:$4 sm:$0xff]   ;;  %1425 = vperm.xlu1 %1956, %v1407_v40  }
  0x39   : > { %1826 = vmatpush3.bf16.msra.mxu0 %v2004_v42  ;;  %v2075_v42 = vld [vmem:[%s2471_s0 + $0xf4] ss:$28 sps:$4 sm:$0xff]  }
  0x3a   : > { %1827 = vmatprep.subr.bf16.mxu0 %v2011_v43  ;;  %v2087_v43 = vld [vmem:[%s2471_s0 + $0x1a0] ss:$28 sps:$4 sm:$0xff]  }
  0x3b   : > { %1904 = vmatpush3.bf16.msra.mxu1 %v2042_v63 }
  0x3c   : > { %1045 = vmatmul.mubr.bf16.gmra.mrb[4].mxu0 %v2001_v44  ;;  %1905 = vmatprep.subr.bf16.mxu1 %v2047_v3  ;;  %v2077_v44 = vld [vmem:[%s2471_s0 + $0xf0] ss:$28 sps:$4 sm:$0xff]  }
  0x3d   : > { %1142 = vmatmul.mubr.bf16.gmra.mrb[4].mxu1 %v2002_v45  ;;  %1052 = vmatprep.mubr.bf16.mxu0 %v2005_v46  ;;  %v2080_v45 = vld [vmem:[%s2471_s0 + $0x12c] ss:$28 sps:$4 sm:$0xff]  }
  0x3e   : > { %1149 = vmatprep.mubr.bf16.mxu1 %v2007_v47  ;;  %1828 = vmatpush3.bf16.msra.mxu0 %v2012_v48  ;;  %v2082_v46 = vld [vmem:[%s2471_s0 + $0x128] ss:$28 sps:$4 sm:$0xff]   ;;  %v2085_v48 = vld [vmem:[%s2471_s0 + $0x160] ss:$28 sps:$4 sm:$0xff]  }
  0x3f   : > { %1829 = vmatprep.subr.bf16.mxu0 %v2019_v49  ;;  %1906 = vmatpush3.bf16.msra.mxu1 %v2047_v3  ;;  %v2083_v47 = vld [vmem:[%s2471_s0 + $0x164] ss:$28 sps:$4 sm:$0xff]   ;;  %v2088_v49 = vld [vmem:[%s2471_s0 + $0x19c] ss:$28 sps:$4 sm:$0xff]  }
  0x40   : > { %1907 = vmatprep.subr.bf16.mxu1 %v2055_v9 }
  0x42   : > { %1830 = vmatpush3.bf16.msra.mxu0 %v2020_v51 }
  0x43   : > { %1831 = vmatprep.subr.bf16.mxu0 %v2027_v55  ;;  %1908 = vmatpush3.bf16.msra.mxu1 %v2055_v9 }
  0x44   : > { %1053 = vmatmul.mubr.bf16.gmra.mrb[8].mxu0 %v2009_v50  ;;  %1909 = vmatprep.subr.bf16.mxu1 %v2057_v11  ;;  %v2090_v50 = vld [vmem:[%s2471_s0 + $0x198] ss:$28 sps:$4 sm:$0xff]  }
  0x45   : > { %1150 = vmatmul.mubr.bf16.gmra.mrb[8].mxu1 %v2010_v52  ;;  %1060 = vmatprep.mubr.bf16.mxu0 %v2013_v53 }
  0x46   : > { %1157 = vmatprep.mubr.bf16.mxu1 %v2015_v54  ;;  %1832 = vmatpush3.bf16.msra.mxu0 %v2028_v56 }
  0x47   : > { %1833 = vmatprep.subr.bf16.mxu0 %v2036_v58  ;;  %1910 = vmatpush3.bf16.msra.mxu1 %v2057_v11 }
  0x48   : > { %1911 = vmatprep.subr.bf16.mxu1 %v2061_v13 }
  0x4a   : > { %1834 = vmatpush3.bf16.msra.mxu0 %v2037_v60 }
  0x4b   : > { %1835 = vmatprep.subr.bf16.mxu0 %v2045_v1  ;;  %1912 = vmatpush3.bf16.msra.mxu1 %v2061_v13 }
  0x4c   : > { %1061 = vmatmul.mubr.bf16.gmra.mrb[12].mxu0 %v2017_v59 }
  0x4d   : > { %1158 = vmatmul.mubr.bf16.gmra.mrb[12].mxu1 %v2018_v61  ;;  %1068 = vmatprep.mubr.bf16.mxu0 %v2021_v62 }
  0x4e   : > { %1165 = vmatprep.mubr.bf16.mxu1 %v2023_v0  ;;  %1836 = vmatpush3.bf16.msra.mxu0 %v2046_v2 }
  0x4f   : > { %1837 = vmatprep.subr.bf16.mxu0 %v2054_v8 }
  0x52   : > { %1838 = vmatpush3.bf16.msra.mxu0 %v2056_v10 }
  0x54   : > { %1069 = vmatmul.mubr.bf16.gmra.mrb[16].mxu0 %v2025_v4 }
  0x55   : > { %1166 = vmatmul.mubr.bf16.gmra.mrb[16].mxu1 %v2026_v5  ;;  %1076 = vmatprep.mubr.bf16.mxu0 %v2030_v6 }
  0x56   : > { %1173 = vmatprep.mubr.bf16.mxu1 %v2032_v7 }
  0x5c   : > { %1077 = vmatmul.mubr.bf16.gmra.mrb[20].mxu0 %v2034_v12 }
  0x5d   : > { %1174 = vmatmul.mubr.bf16.gmra.mrb[20].mxu1 %v2035_v14  ;;  %1084 = vmatprep.mubr.bf16.mxu0 %v2038_v15 }
  0x5e   : > { %1181 = vmatprep.mubr.bf16.mxu1 %v2040_v16 }
  0x64   : > { %1085 = vmatmul.mubr.bf16.gmra.mrb[24].mxu0 %v2043_v17 }
  0x65   : > { %1182 = vmatmul.mubr.bf16.gmra.mrb[24].mxu1 %v2044_v18  ;;  %1092 = vmatprep.mubr.bf16.mxu0 %v2048_v19 }
  0x66   : > { %1189 = vmatprep.mubr.bf16.mxu1 %v2050_v20 }
  0x6c   : > { %1093 = vmatmul.mubr.bf16.gmra.mrb[28].mxu0 %v2052_v21 }
  0x6d   : > { %1190 = vmatmul.mubr.bf16.gmra.mrb[28].mxu1 %v2053_v24  ;;  %1230 = vmatprep.mubr.bf16.mxu0 %v2060_v25 }
  0x6e   : > { %1913 = vmatprep.mubr.msk.bf16.mxu1 %vm979_vm0, %v2062_v26 }
  0x74   : > { %1231 = vmatmul.mubr.bf16.vlgmr.msra.gmra.mrb[32].mxu0 %v2058_v28 }
  0x75   : > { %1914 = vmatmul.mubr.msk.bf16.vlgmr.msra.gmra.mrb[32].mxu1 %vm979_vm0, %v2063_v29  ;;  %1238 = vmatprep.mubr.bf16.mxu0 %v2064_v30 }
  0x76   : > { %1917 = vmatprep.mubr.msk.bf16.mxu1 %vm979_vm0, %v2070_v31 }
  0x7c   : > { %1239 = vmatmul.mubr.bf16.gmra.mrb[36].mxu0 %v2066_v32 }
  0x7d   : > { %1246 = vmatprep.mubr.bf16.mxu0 %v2067_v33  ;;  %1918 = vmatmul.mubr.msk.bf16.gmra.mrb[36].mxu1 %vm979_vm0, %v2071_v34 }
  0x7e   : > { %1921 = vmatprep.mubr.msk.bf16.mxu1 %vm979_vm0, %v2078_v35 }
  0x84   : > { %1247 = vmatmul.mubr.bf16.gmra.mrb[40].mxu0 %v2069_v36 }
  0x85   : > { %1254 = vmatprep.mubr.bf16.mxu0 %v2072_v37  ;;  %1922 = vmatmul.mubr.msk.bf16.gmra.mrb[40].mxu1 %vm979_vm0, %v2079_v38 }
  0x86   : > { %1925 = vmatprep.mubr.msk.bf16.mxu1 %vm979_vm0, %v2086_v39 }
  0x8c   : > { %1255 = vmatmul.mubr.bf16.gmra.mrb[44].mxu0 %v2074_v41 }
  0x8d   : > { %1262 = vmatprep.mubr.bf16.mxu0 %v2075_v42  ;;  %1926 = vmatmul.mubr.msk.bf16.gmra.mrb[44].mxu1 %vm979_vm0, %v2087_v43 }
  0x94   : > { %1263 = vmatmul.mubr.bf16.gmra.mrb[48].mxu0 %v2077_v44 }
  0x95   : > { %1270 = vmatprep.mubr.bf16.mxu0 %v2080_v45 }
  0x9c   : > { %1271 = vmatmul.mubr.bf16.gmra.mrb[52].mxu0 %v2082_v46 }
  0x9d   : > { %1278 = vmatprep.mubr.bf16.mxu0 %v2083_v47 }
  0xa4   : > { %1279 = vmatmul.mubr.bf16.gmra.mrb[56].mxu0 %v2085_v48 }
  0xa5   : > { %1286 = vmatprep.mubr.bf16.mxu0 %v2088_v49 }
  0xac   : > { %1287 = vmatmul.mubr.bf16.gmra.mrb[60].mxu0 %v2090_v50 }
 0x107   : > { %v1711_v51 = vpop.f32.mrb[0].mxu0 }
 0x108   : > { %v1775_v52 = vpop.f32.mrb[0].mxu1  ;;  %v1712_v53 = vpop.f32.mrb[1].mxu0 }
 0x109   : > { %v1713_v54 = vadd.f32 %v1712_v53, %v1711_v51  ;;  %v1776_v55 = vpop.f32.mrb[1].mxu1  ;;  %v1714_v56 = vpop.f32.mrb[2].mxu0 }
 0x10a   : > { %v1777_v57 = vadd.f32 %v1776_v55, %v1775_v52  ;;  %v1778_v58 = vpop.f32.mrb[2].mxu1  ;;  %v1715_v59 = vpop.f32.mrb[3].mxu0 }
 0x10b   : > { %v1716_v60 = vadd.f32 %v1715_v59, %v1714_v56  ;;  %v1779_v61 = vpop.f32.mrb[3].mxu1 }
 0x10c   : > { %v2404_v62 = vadd.f32 %v1777_v57, %v1713_v54  ;;  %v1780_v63 = vadd.f32 %v1779_v61, %v1778_v58 }
 0x10e   : > { %v2406_v0 = vadd.f32 %v1780_v63, %v1716_v60 }
 0x10f   : > { %v1717_v1 = vpop.f32.mrb[4].mxu0 }
 0x110   : > { %v1781_v2 = vpop.f32.mrb[4].mxu1  ;;  %v1718_v3 = vpop.f32.mrb[5].mxu0 }
 0x111   : > { %v1719_v4 = vadd.f32 %v1718_v3, %v1717_v1  ;;  %v1782_v5 = vpop.f32.mrb[5].mxu1  ;;  %v1720_v6 = vpop.f32.mrb[6].mxu0 }
 0x112   : > { %v1783_v7 = vadd.f32 %v1782_v5, %v1781_v2  ;;  %v1784_v8 = vpop.f32.mrb[6].mxu1  ;;  %v1721_v9 = vpop.f32.mrb[7].mxu0 }
 0x113   : > { %v1722_v10 = vadd.f32 %v1721_v9, %v1720_v6  ;;  %v1785_v11 = vpop.f32.mrb[7].mxu1 }
 0x114   : > { %v2408_v12 = vadd.f32 %v1783_v7, %v1719_v4  ;;  %v1786_v13 = vadd.f32 %v1785_v11, %v1784_v8 }
 0x116   : > { %v2410_v14 = vadd.f32 %v1786_v13, %v1722_v10 }
 0x117   : > { %v1723_v15 = vpop.f32.mrb[8].mxu0 }
 0x118   : > { %v1787_v16 = vpop.f32.mrb[8].mxu1  ;;  %v1724_v17 = vpop.f32.mrb[9].mxu0 }
 0x119   : > { %v1725_v18 = vadd.f32 %v1724_v17, %v1723_v15  ;;  %v1788_v19 = vpop.f32.mrb[9].mxu1  ;;  %v1726_v20 = vpop.f32.mrb[10].mxu0 }
 0x11a   : > { %v1789_v21 = vadd.f32 %v1788_v19, %v1787_v16  ;;  %v1790_v22 = vpop.f32.mrb[10].mxu1  ;;  %v1727_v23 = vpop.f32.mrb[11].mxu0 }
 0x11b   : > { %v1728_v24 = vadd.f32 %v1727_v23, %v1726_v20  ;;  %v1791_v25 = vpop.f32.mrb[11].mxu1 }
 0x11c   : > { %v2412_v26 = vadd.f32 %v1789_v21, %v1725_v18  ;;  %v1792_v27 = vadd.f32 %v1791_v25, %v1790_v22 }
 0x11e   : > { %v2414_v28 = vadd.f32 %v1792_v27, %v1728_v24 }
 0x11f   : > { %v1729_v29 = vpop.f32.mrb[12].mxu0 }
 0x120   : > { %v1793_v30 = vpop.f32.mrb[12].mxu1  ;;  %v1730_v31 = vpop.f32.mrb[13].mxu0 }
 0x121   : > { %v1731_v32 = vadd.f32 %v1730_v31, %v1729_v29  ;;  %v1794_v33 = vpop.f32.mrb[13].mxu1  ;;  %v1732_v34 = vpop.f32.mrb[14].mxu0 }
 0x122   : > { %v1795_v35 = vadd.f32 %v1794_v33, %v1793_v30  ;;  %v1796_v36 = vpop.f32.mrb[14].mxu1  ;;  %v1733_v37 = vpop.f32.mrb[15].mxu0 }
 0x123   : > { %v1734_v38 = vadd.f32 %v1733_v37, %v1732_v34  ;;  %v1797_v39 = vpop.f32.mrb[15].mxu1 }
 0x124   : > { %v2416_v40 = vadd.f32 %v1795_v35, %v1731_v32  ;;  %v1798_v41 = vadd.f32 %v1797_v39, %v1796_v36 }
 0x126   : > { %v2418_v42 = vadd.f32 %v1798_v41, %v1734_v38 }
 0x127   : > { %v1735_v43 = vpop.f32.mrb[16].mxu0 }
 0x128   : > { %v1799_v44 = vpop.f32.mrb[16].mxu1  ;;  %v1736_v45 = vpop.f32.mrb[17].mxu0 }
 0x129   : > { %v1737_v46 = vadd.f32 %v1736_v45, %v1735_v43  ;;  %v1800_v47 = vpop.f32.mrb[17].mxu1  ;;  %v1738_v48 = vpop.f32.mrb[18].mxu0 }
 0x12a   : > { %v1801_v49 = vadd.f32 %v1800_v47, %v1799_v44  ;;  %v1802_v50 = vpop.f32.mrb[18].mxu1  ;;  %v1739_v51 = vpop.f32.mrb[19].mxu0 }
 0x12b   : > { %v1740_v52 = vadd.f32 %v1739_v51, %v1738_v48  ;;  %v1803_v53 = vpop.f32.mrb[19].mxu1 }
 0x12c   : > { %v2420_v54 = vadd.f32 %v1801_v49, %v1737_v46  ;;  %v1804_v55 = vadd.f32 %v1803_v53, %v1802_v50 }
 0x12e   : > { %v2422_v56 = vadd.f32 %v1804_v55, %v1740_v52 }
 0x12f   : > { %v1741_v57 = vpop.f32.mrb[20].mxu0 }
 0x130   : > { %v1805_v58 = vpop.f32.mrb[20].mxu1  ;;  %v1742_v59 = vpop.f32.mrb[21].mxu0 }
 0x131   : > { %v1743_v60 = vadd.f32 %v1742_v59, %v1741_v57  ;;  %v1806_v61 = vpop.f32.mrb[21].mxu1  ;;  %v1744_v63 = vpop.f32.mrb[22].mxu0 }
 0x132   : > { %v1807_v1 = vadd.f32 %v1806_v61, %v1805_v58  ;;  %v1808_v2 = vpop.f32.mrb[22].mxu1  ;;  %v1745_v3 = vpop.f32.mrb[23].mxu0 }
 0x133   : > { %v1746_v4 = vadd.f32 %v1745_v3, %v1744_v63  ;;  %v1809_v5 = vpop.f32.mrb[23].mxu1 }
 0x134   : > { %v2424_v6 = vadd.f32 %v1807_v1, %v1743_v60  ;;  %v1810_v7 = vadd.f32 %v1809_v5, %v1808_v2 }
 0x136   : > { %v2426_v8 = vadd.f32 %v1810_v7, %v1746_v4 }
 0x137   : > { %v1747_v9 = vpop.f32.mrb[24].mxu0 }
 0x138   : > { %v1811_v10 = vpop.f32.mrb[24].mxu1  ;;  %v1748_v11 = vpop.f32.mrb[25].mxu0 }
 0x139   : > { %v1749_v13 = vadd.f32 %v1748_v11, %v1747_v9  ;;  %v1812_v15 = vpop.f32.mrb[25].mxu1  ;;  %v1750_v16 = vpop.f32.mrb[26].mxu0 }
 0x13a   : > { %v1813_v17 = vadd.f32 %v1812_v15, %v1811_v10  ;;  %v1814_v18 = vpop.f32.mrb[26].mxu1  ;;  %v1751_v19 = vpop.f32.mrb[27].mxu0 }
 0x13b   : > { %v1752_v20 = vadd.f32 %v1751_v19, %v1750_v16  ;;  %v1815_v21 = vpop.f32.mrb[27].mxu1 }
 0x13c   : > { %v2428_v22 = vadd.f32 %v1813_v17, %v1749_v13  ;;  %v1816_v23 = vadd.f32 %v1815_v21, %v1814_v18 }
 0x13e   : > { %v2430_v24 = vadd.f32 %v1816_v23, %v1752_v20 }
 0x13f   : > { %v1753_v25 = vpop.f32.mrb[28].mxu0 }
 0x140   : > { %v1817_v27 = vpop.f32.mrb[28].mxu1  ;;  %v1754_v29 = vpop.f32.mrb[29].mxu0 }
 0x141   : > { %v1755_v30 = vadd.f32 %v1754_v29, %v1753_v25  ;;  %v1818_v31 = vpop.f32.mrb[29].mxu1  ;;  %v1756_v32 = vpop.f32.mrb[30].mxu0 }
 0x142   : > { %v1819_v33 = vadd.f32 %v1818_v31, %v1817_v27  ;;  %v1820_v34 = vpop.f32.mrb[30].mxu1  ;;  %v1757_v35 = vpop.f32.mrb[31].mxu0 }
 0x143   : > { %v1758_v36 = vadd.f32 %v1757_v35, %v1756_v32  ;;  %v1821_v37 = vpop.f32.mrb[31].mxu1 }
 0x144   : > { %v2432_v38 = vadd.f32 %v1819_v33, %v1755_v30  ;;  %v1822_v39 = vadd.f32 %v1821_v37, %v1820_v34 }
 0x146   : > { %v2434_v41 = vadd.f32 %v1822_v39, %v1758_v36 }
 0x147   : > { %v1839_v43 = vpop.f32.mrb[32].mxu0 }
 0x148   : > { %v1840_v44 = vpop.f32.mrb[33].mxu0  ;;  %v1915_v45 = vpop.f32.mrb[32].mxu1 }
 0x149   : > { %v1841_v46 = vadd.f32 %v1840_v44, %v1839_v43  ;;  %v1842_v47 = vpop.f32.mrb[34].mxu0  ;;  %v1329_v48 = vpop.f32.mrb[33].mxu1 }
 0x14a   : > { %v1843_v49 = vpop.f32.mrb[35].mxu0  ;;  %v1916_v50 = vpop.f32.mrb[34].mxu1 }
 0x14b   : > { %v1844_v51 = vadd.f32 %v1843_v49, %v1842_v47  ;;  %v1233_v52 = vadd.f32 %v1841_v46, %v2404_v62  ;;  %v1332_v53 = vpop.f32.mrb[35].mxu1 }
 0x14d   : > { %v1330_v55 = vadd.f32 %v1329_v48, %v1233_v52  ;;  %v1236_v57 = vadd.f32 %v1844_v51, %v2406_v0 }
 0x14f   : > { %v1333_v58 = vadd.f32 %v1332_v53, %v1236_v57  ;;  %v1845_v59 = vpop.f32.mrb[36].mxu0 }
 0x150   : > { %v1846_v60 = vpop.f32.mrb[37].mxu0  ;;  %v1919_v61 = vpop.f32.mrb[36].mxu1 }
 0x151   : > { %v1847_v63 = vadd.f32 %v1846_v60, %v1845_v59  ;;  %v1848_v1 = vpop.f32.mrb[38].mxu0  ;;  %v1345_v2 = vpop.f32.mrb[37].mxu1 }
 0x152   : > { %v1849_v3 = vpop.f32.mrb[39].mxu0  ;;  %v1920_v4 = vpop.f32.mrb[38].mxu1 }
 0x153   : > { %v1241_v5 = vadd.f32 %v1847_v63, %v2408_v12  ;;  %v1850_v7 = vadd.f32 %v1849_v3, %v1848_v1  ;;  %v1348_v9 = vpop.f32.mrb[39].mxu1 }
 0x155   : > { %v1338_v10 = vadd.f32 %v1915_v45, %v1241_v5  ;;  %v1244_v62 = vadd.f32 %v1850_v7, %v2410_v14 }
 0x157   : > { %v1341_v11 = vadd.f32 %v1916_v50, %v1244_v62  ;;  %v1851_v13 = vpop.f32.mrb[40].mxu0 }
 0x158   : > { %v1852_v15 = vpop.f32.mrb[41].mxu0  ;;  %v1923_v0 = vpop.f32.mrb[40].mxu1 }
 0x159   : > { %v1853_v16 = vadd.f32 %v1852_v15, %v1851_v13  ;;  %v1854_v17 = vpop.f32.mrb[42].mxu0  ;;  %v1361_v18 = vpop.f32.mrb[41].mxu1 }
 0x15a   : > { %v1855_v19 = vpop.f32.mrb[43].mxu0  ;;  %v1924_v20 = vpop.f32.mrb[42].mxu1 }
 0x15b   : > { %v1856_v21 = vadd.f32 %v1855_v19, %v1854_v17  ;;  %v1249_v23 = vadd.f32 %v1853_v16, %v2412_v26  ;;  %v1364_v25 = vpop.f32.mrb[43].mxu1  ;;  %v1411_v17 = vpop.permute.xlu0 %1410 }
 0x15d   : > { %v1346_v27 = vadd.f32 %v1345_v2, %v1249_v23  ;;  %v1252_v12 = vadd.f32 %v1856_v21, %v2414_v28 }
 0x15f   : > { %v1392_v29 = vmax.f32 %v1330_v55, %v1346_v27  ;;  %v1349_v30 = vadd.f32 %v1348_v9, %v1252_v12  ;;  %v1857_v31 = vpop.f32.mrb[44].mxu0 }
 0x160   : > { %v1858_v14 = vpop.f32.mrb[45].mxu0  ;;  %v2442_v32 = vpop.f32.mrb[44].mxu1 }
 0x161   : > { %v1393_v33 = vmax.f32 %v1333_v58, %v1349_v30  ;;  %v1859_v34 = vadd.f32 %v1858_v14, %v1857_v31  ;;  %v1860_v35 = vpop.f32.mrb[46].mxu0  ;;  %v1377_v36 = vpop.f32.mrb[45].mxu1 }
 0x162   : > { %v1861_v37 = vpop.f32.mrb[47].mxu0  ;;  %v2444_v39 = vpop.f32.mrb[46].mxu1 }
 0x163   : > { %v1257_v43 = vadd.f32 %v1859_v34, %v2416_v40  ;;  %v1862_v26 = vadd.f32 %v1861_v37, %v1860_v35  ;;  %v1380_v44 = vpop.f32.mrb[47].mxu1 }
 0x165   : > { %v1354_v45 = vadd.f32 %v1919_v61, %v1257_v43  ;;  %v1260_v28 = vadd.f32 %v1862_v26, %v2418_v42 }
 0x167   : > { %v1357_v46 = vadd.f32 %v1920_v4, %v1260_v28  ;;  %v1863_v47 = vpop.f32.mrb[48].mxu0  ;;  %v1394_v48 = vmax.f32 %v1338_v10, %v1354_v45 }
 0x168   : > { %v1864_v49 = vpop.f32.mrb[49].mxu0 }
 0x169   : > { %v1865_v50 = vadd.f32 %v1864_v49, %v1863_v47  ;;  %v1866_v51 = vpop.f32.mrb[50].mxu0  ;;  %v1395_v52 = vmax.f32 %v1341_v11, %v1357_v46 }
 0x16a   : > { %v1867_v53 = vpop.f32.mrb[51].mxu0 }
 0x16b   : > { %v1868_v55 = vadd.f32 %v1867_v53, %v1866_v51  ;;  %v1265_v57 = vadd.f32 %v1865_v50, %v2420_v54 }
 0x16d   : > { %v1362_v58 = vadd.f32 %v1361_v18, %v1265_v57  ;;  %v1268_v59 = vadd.f32 %v1868_v55, %v2422_v56 }
 0x16f   : > { %v1396_v40 = vmax.f32 %v1392_v29, %v1362_v58  ;;  %v1365_v60 = vadd.f32 %v1364_v25, %v1268_v59  ;;  %v1869_v63 = vpop.f32.mrb[52].mxu0 }
 0x170   : > { %v1870_v61 = vpop.f32.mrb[53].mxu0 }
 0x171   : > { %v1397_v1 = vmax.f32 %v1393_v33, %v1365_v60  ;;  %v1871_v42 = vadd.f32 %v1870_v61, %v1869_v63  ;;  %v1872_v2 = vpop.f32.mrb[54].mxu0 }
 0x172   : > { %v1873_v3 = vpop.f32.mrb[55].mxu0 }
 0x173   : > { %v1273_v4 = vadd.f32 %v1871_v42, %v2424_v6  ;;  %v1874_v5 = vadd.f32 %v1873_v3, %v1872_v2 }
 0x175   : > { %v1370_v7 = vadd.f32 %v1923_v0, %v1273_v4  ;;  %v1276_v9 = vadd.f32 %v1874_v5, %v2426_v8 }
 0x177   : > { %v1373_v10 = vadd.f32 %v1924_v20, %v1276_v9  ;;  %v1875_v62 = vpop.f32.mrb[56].mxu0  ;;  %v1398_v54 = vmax.f32 %v1394_v48, %v1370_v7  ;;  %v1416_v20 = vpop.permute.xlu0 %1415 }
 0x178   : > { %v1876_v11 = vpop.f32.mrb[57].mxu0 }
 0x179   : > { %v1877_v13 = vadd.f32 %v1876_v11, %v1875_v62  ;;  %v1878_v56 = vpop.f32.mrb[58].mxu0  ;;  %v1399_v15 = vmax.f32 %v1395_v52, %v1373_v10 }
 0x17a   : > { %v1879_v16 = vpop.f32.mrb[59].mxu0 }
 0x17b   : > { %v1880_v18 = vadd.f32 %v1879_v16, %v1878_v56  ;;  %v1281_v19 = vadd.f32 %v1877_v13, %v2428_v22 }
 0x17d   : > { %v1378_v21 = vadd.f32 %v1377_v36, %v1281_v19  ;;  %v1284_v6 = vadd.f32 %v1880_v18, %v2430_v24  ;;  %v1421_v24 = vpop.permute.xlu1 %1420 }
 0x17f   : > { %v1400_v23 = vmax.f32 %v1396_v40, %v1378_v21  ;;  %v1381_v0 = vadd.f32 %v1380_v44, %v1284_v6  ;;  %v1881_v25 = vpop.f32.mrb[60].mxu0 }
 0x180   : > { %v1882_v8 = vpop.f32.mrb[61].mxu0 }
 0x181   : > { %v1428_v27 = vadd.f32 %v1411_v17, %v1400_v23  ;;  %v1883_v12 = vadd.f32 %v1882_v8, %v1881_v25  ;;  %v1884_v29 = vpop.f32.mrb[62].mxu0  ;;  %v1401_v30 = vmax.f32 %v1397_v1, %v1381_v0  ;;  %v1426_v47 = vpop.permute.xlu1 %1425 }
 0x182   : > { %v1885_v31 = vpop.f32.mrb[63].mxu0 }
 0x183   : > { %v1436_v14 = vmul.f32 0.01, %v1428_v27  ;;  %v1289_v33 = vadd.f32 %v1883_v12, %v2432_v38  ;;  %v1429_v34 = vadd.f32 %v1416_v20, %v1401_v30  ;;  %vm1432_vm1 = vcmp.gt.f32.partialorder %v1428_v27, 0.0 }
 0x184   : > { %v1886_v22 = vadd.f32 %v1885_v31, %v1884_v29 }
 0x185   : > { %vm1433_vm2 = vcmp.gt.f32.partialorder %v1429_v34, 0.0  ;;  %v1437_v35 = vmul.f32 0.01, %v1429_v34  ;;  %v1386_v36 = vadd.f32 %v2442_v32, %v1289_v33  ;;  %v1440_v43 = vsel %vm1432_vm1, %v1428_v27, %v1436_v14 }
 0x186   : > { %v1292_v37 = vadd.f32 %v1886_v22, %v2434_v41 }
 0x187   : > { %v1441_v26 = vsel %vm1433_vm2, %v1429_v34, %v1437_v35  ;;  %v1402_v44 = vmax.f32 %v1398_v54, %v1386_v36 }
 0x188   : > { %v1687_v45 = vpack.c.bf16 %v1441_v26, %v1440_v43  ;;  %v1389_v38 = vadd.f32 %v2444_v39, %v1292_v37 }
 0x189   : > { %v1430_v28 = vadd.f32 %v1421_v24, %v1402_v44 }
 0x18a   : > { %1688 = vst [vmem:[%s201_s29] sm:$0xff] %v1687_v45   ;;  %v1403_v46 = vmax.f32 %v1399_v15, %v1389_v38 }
 0x18b   : > { %v1438_v48 = vmul.f32 0.01, %v1430_v28  ;;  %vm1434_vm3 = vcmp.gt.f32.partialorder %v1430_v28, 0.0 }
 0x18c   : > { %v1431_v49 = vadd.f32 %v1426_v47, %v1403_v46 }
 0x18d   : > { %v1442_v41 = vsel %vm1434_vm3, %v1430_v28, %v1438_v48 }
 0x18e   : > { %vm1435_vm4 = vcmp.gt.f32.partialorder %v1431_v49, 0.0  ;;  %v1439_v32 = vmul.f32 0.01, %v1431_v49 }
 0x190   : > { %v1443_v50 = vsel %vm1435_vm4, %v1431_v49, %v1439_v32 }
 0x191   : > { %v1692_v51 = vpack.c.bf16 %v1443_v50, %v1442_v41 }
 0x193   : > { %1694 = vst [vmem:[%s201_s29 + $0x8] sm:$0xff] %v1692_v51  }
 0x194 PF: > { %s13_s14 = sadd.s32 1, %s2113_s14   ;;  %s2475_s12 = smov %s2109_s13 }
 0x195   : > { %p10_p5 = scmp.ge.s32.totalorder %s13_s14, 4   ;;  %s2476_s13 = smov %s2478_s15 }
 0x197   :  { %12 = sbr.rel (!%p10_p5) target bundleno = 2 (0x2), region = 62 }

// kernel: dga3net_forward.21
= control target key start
LH: loop header
LB: loop body
LE: loop exit
PB: predicated region body
PF: predicated region fallthrough
CT: control target
= control target key end

     0   :  { %vm1243_vm0 = vmmov 0   ;;  %vm453_vm2 = vcmask 326656   ;;  %vm640_vm8 = vcmask 261120   ;;  %vm829_vm9 = vcmask 15360   ;;  %s1712_s1 = inlined_call_operand.vmem [shape: f32[512,128], index: 1, kind: input, shape index: {}]   ;;  %s1713_s0 = inlined_call_operand.vmem [shape: f32[40,512], index: 0, kind: input, shape index: {}]   ;;  %s1714_s3 = inlined_call_operand.vmem [shape: f32[128,32], index: 3, kind: input, shape index: {}]   ;;  %s1715_s2 = inlined_call_operand.vmem [shape: f32[1,128], index: 2, kind: input, shape index: {}]   ;;  %s1716_s5 = inlined_call_operand.vmem [shape: f32[32,2], index: 5, kind: input, shape index: {}]   ;;  %s1717_s4 = inlined_call_operand.vmem [shape: f32[1,32], index: 4, kind: input, shape index: {}]   ;;  %s1718_s6 = inlined_call_operand.vmem [shape: f32[32,2], index: 6, kind: input, shape index: {}]   ;;  %s1719_s7 = inlined_call_operand.vmem [shape: f32[1,2], index: 7, kind: input, shape index: {}]   ;;  %s1720_s8 = inlined_call_operand.vmem [shape: f32[20,2], index: 8, kind: output, shape index: {}]  }
   0x1   :  { %v65_v0 = vld [vmem:[%s1712_s1 + $0x80] sm:$0xff]  ;;  %v66_v1 = vld [vmem:[%s1712_s1 + $0x88] sm:$0xff]  ;;  %v67_v11 = vld [vmem:[%s1712_s1 + $0x90] sm:$0xff]  ;;  %vm832_vm10 = vcmask 11264  }
   0x2   :  { %v49_v2 = vld [vmem:[%s1712_s1] sm:$0xff]  ;;  %v1123_v3 = vpack.c.bf16 %v66_v1, %v65_v0  ;;  %v50_v4 = vld [vmem:[%s1712_s1 + $0x8] sm:$0xff]  ;;  %v68_v13 = vld [vmem:[%s1712_s1 + $0x98] sm:$0xff] }
   0x3   :  { %v97_v5 = vld [vmem:[%s1712_s1 + $0x180] sm:$0xff]  ;;  %v98_v6 = vld [vmem:[%s1712_s1 + $0x188] sm:$0xff]  ;;  %v1125_v7 = vpack.c.bf16 %v50_v4, %v49_v2  ;;  %v51_v14 = vld [vmem:[%s1712_s1 + $0x10] sm:$0xff]  ;;  %v1127_v16 = vpack.c.bf16 %v68_v13, %v67_v11 }
   0x4   :  { %v1155_v8 = vpack.c.bf16 %v98_v6, %v97_v5  ;;  %v81_v9 = vld [vmem:[%s1712_s1 + $0x100] sm:$0xff]  ;;  %v82_v10 = vld [vmem:[%s1712_s1 + $0x108] sm:$0xff]  ;;  %1124 = vmatprep.subr.bf16.mxu0 %v1123_v3  ;;  %v52_v15 = vld [vmem:[%s1712_s1 + $0x18] sm:$0xff] }
   0x5   :  { %v1157_v12 = vpack.c.bf16 %v82_v10, %v81_v9  ;;  %1126 = vmatpush3.bf16.msra.mxu0 %v1125_v7  ;;  %v1129_v17 = vpack.c.bf16 %v52_v15, %v51_v14  ;;  %v99_v18 = vld [vmem:[%s1712_s1 + $0x190] sm:$0xff]  ;;  %v100_v19 = vld [vmem:[%s1712_s1 + $0x198] sm:$0xff]  ;;  %v69_v23 = vld [vmem:[%s1712_s1 + $0xa0] sm:$0xff] }
   0x6   :  { %1156 = vmatprep.subr.bf16.mxu1 %v1155_v8  ;;  %v83_v20 = vld [vmem:[%s1712_s1 + $0x110] sm:$0xff]  ;;  %v1159_v21 = vpack.c.bf16 %v100_v19, %v99_v18  ;;  %v84_v22 = vld [vmem:[%s1712_s1 + $0x118] sm:$0xff]  ;;  %v70_v24 = vld [vmem:[%s1712_s1 + $0xa8] sm:$0xff]  ;;  %1128 = vmatprep.subr.bf16.mxu0 %v1127_v16 }
   0x7   :  { %1158 = vmatpush3.bf16.msra.mxu1 %v1157_v12  ;;  %v1161_v25 = vpack.c.bf16 %v84_v22, %v83_v20  ;;  %v1131_v26 = vpack.c.bf16 %v70_v24, %v69_v23  ;;  %v53_v27 = vld [vmem:[%s1712_s1 + $0x20] sm:$0xff]  ;;  %v54_v28 = vld [vmem:[%s1712_s1 + $0x28] sm:$0xff]  ;;  %v71_v35 = vld [vmem:[%s1712_s1 + $0xb0] sm:$0xff] }
   0x8   :  { %v101_v29 = vld [vmem:[%s1712_s1 + $0x1a0] sm:$0xff]  ;;  %1160 = vmatprep.subr.bf16.mxu1 %v1159_v21  ;;  %v102_v30 = vld [vmem:[%s1712_s1 + $0x1a8] sm:$0xff]  ;;  %v1133_v33 = vpack.c.bf16 %v54_v28, %v53_v27  ;;  %v72_v36 = vld [vmem:[%s1712_s1 + $0xb8] sm:$0xff] }
   0x9   :  { %v85_v31 = vld [vmem:[%s1712_s1 + $0x120] sm:$0xff]  ;;  %v86_v32 = vld [vmem:[%s1712_s1 + $0x128] sm:$0xff]  ;;  %1130 = vmatpush3.bf16.msra.mxu0 %v1129_v17  ;;  %v1163_v34 = vpack.c.bf16 %v102_v30, %v101_v29  ;;  %v55_v37 = vld [vmem:[%s1712_s1 + $0x30] sm:$0xff]  ;;  %v1135_v39 = vpack.c.bf16 %v72_v36, %v71_v35 }
   0xa   :  { %1132 = vmatprep.subr.bf16.mxu0 %v1131_v26  ;;  %v1165_v38 = vpack.c.bf16 %v86_v32, %v85_v31  ;;  %v56_v40 = vld [vmem:[%s1712_s1 + $0x38] sm:$0xff]  ;;  %v103_v41 = vld [vmem:[%s1712_s1 + $0x1b0] sm:$0xff]  ;;  %v73_v46 = vld [vmem:[%s1712_s1 + $0xc0] sm:$0xff] }
   0xb   :  { %1162 = vmatpush3.bf16.msra.mxu1 %v1161_v25  ;;  %v104_v42 = vld [vmem:[%s1712_s1 + $0x1b8] sm:$0xff]  ;;  %v87_v44 = vld [vmem:[%s1712_s1 + $0x130] sm:$0xff]  ;;  %v74_v47 = vld [vmem:[%s1712_s1 + $0xc8] sm:$0xff]  ;;  %v1137_v48 = vpack.c.bf16 %v56_v40, %v55_v37 }
   0xc   :  { %1164 = vmatprep.subr.bf16.mxu1 %v1163_v34  ;;  %v1167_v43 = vpack.c.bf16 %v104_v42, %v103_v41  ;;  %v88_v45 = vld [vmem:[%s1712_s1 + $0x138] sm:$0xff]  ;;  %v105_v49 = vld [vmem:[%s1712_s1 + $0x1c0] sm:$0xff]  ;;  %v106_v50 = vld [vmem:[%s1712_s1 + $0x1c8] sm:$0xff]  ;;  %v1139_v52 = vpack.c.bf16 %v74_v47, %v73_v46 }
   0xd   :  { %1134 = vmatpush3.bf16.msra.mxu0 %v1133_v33  ;;  %v1169_v51 = vpack.c.bf16 %v88_v45, %v87_v44  ;;  %v57_v53 = vld [vmem:[%s1712_s1 + $0x40] sm:$0xff]  ;;  %v58_v54 = vld [vmem:[%s1712_s1 + $0x48] sm:$0xff]  ;;  %v1171_v56 = vpack.c.bf16 %v106_v50, %v105_v49  ;;  %v75_v58 = vld [vmem:[%s1712_s1 + $0xd0] sm:$0xff] }
   0xe   :  { %1136 = vmatprep.subr.bf16.mxu0 %v1135_v39  ;;  %v89_v55 = vld [vmem:[%s1712_s1 + $0x140] sm:$0xff]  ;;  %v90_v57 = vld [vmem:[%s1712_s1 + $0x148] sm:$0xff]  ;;  %v76_v59 = vld [vmem:[%s1712_s1 + $0xd8] sm:$0xff]  ;;  %v1141_v62 = vpack.c.bf16 %v58_v54, %v57_v53  ;;  %v1242_v39 = vmov 0.0|0.0  }
   0xf   :  { %1166 = vmatpush3.bf16.msra.mxu1 %v1165_v38  ;;  %v107_v60 = vld [vmem:[%s1712_s1 + $0x1d0] sm:$0xff]  ;;  %v108_v61 = vld [vmem:[%s1712_s1 + $0x1d8] sm:$0xff]  ;;  %v1173_v63 = vpack.c.bf16 %v90_v57, %v89_v55  ;;  %v1143_v0 = vpack.c.bf16 %v76_v59, %v75_v58  ;;  %v77_v6 = vld [vmem:[%s1712_s1 + $0xe0] sm:$0xff] }
  0x10   :  { %1168 = vmatprep.subr.bf16.mxu1 %v1167_v43  ;;  %v59_v1 = vld [vmem:[%s1712_s1 + $0x50] sm:$0xff]  ;;  %v60_v2 = vld [vmem:[%s1712_s1 + $0x58] sm:$0xff]  ;;  %v1175_v4 = vpack.c.bf16 %v108_v61, %v107_v60  ;;  %v78_v7 = vld [vmem:[%s1712_s1 + $0xe8] sm:$0xff] }
  0x11   :  { %1138 = vmatpush3.bf16.msra.mxu0 %v1137_v48  ;;  %v91_v3 = vld [vmem:[%s1712_s1 + $0x150] sm:$0xff]  ;;  %v92_v5 = vld [vmem:[%s1712_s1 + $0x158] sm:$0xff]  ;;  %v109_v8 = vld [vmem:[%s1712_s1 + $0x1e0] sm:$0xff]  ;;  %v1145_v10 = vpack.c.bf16 %v60_v2, %v59_v1  ;;  %v1147_v14 = vpack.c.bf16 %v78_v7, %v77_v6 }
  0x12   :  { %1140 = vmatprep.subr.bf16.mxu0 %v1139_v52  ;;  %v110_v9 = vld [vmem:[%s1712_s1 + $0x1e8] sm:$0xff]  ;;  %v61_v11 = vld [vmem:[%s1712_s1 + $0x60] sm:$0xff]  ;;  %v1177_v13 = vpack.c.bf16 %v92_v5, %v91_v3  ;;  %v79_v19 = vld [vmem:[%s1712_s1 + $0xf0] sm:$0xff] }
  0x13   :  { %1170 = vmatpush3.bf16.msra.mxu1 %v1169_v51  ;;  %v62_v12 = vld [vmem:[%s1712_s1 + $0x68] sm:$0xff]  ;;  %v93_v15 = vld [vmem:[%s1712_s1 + $0x160] sm:$0xff]  ;;  %v1179_v18 = vpack.c.bf16 %v110_v9, %v109_v8  ;;  %v80_v20 = vld [vmem:[%s1712_s1 + $0xf8] sm:$0xff] }
  0x14   :  { %1172 = vmatprep.subr.bf16.mxu1 %v1171_v56  ;;  %v94_v16 = vld [vmem:[%s1712_s1 + $0x168] sm:$0xff]  ;;  %v32_v21 = vld [vmem:[%s1713_s0 + $0x18] sm:$0xff]  ;;  %v111_v22 = vld [vmem:[%s1712_s1 + $0x1f0] sm:$0xff]  ;;  %v1149_v24 = vpack.c.bf16 %v62_v12, %v61_v11  ;;  %v1151_v26 = vpack.c.bf16 %v80_v20, %v79_v19 }
  0x15   :  { %1142 = vmatpush3.bf16.msra.mxu0 %v1141_v62  ;;  %v30_v17 = vld [vmem:[%s1713_s0 + $0x8] sm:$0xff]  ;;  %v112_v23 = vld [vmem:[%s1712_s1 + $0x1f8] sm:$0xff]  ;;  %274 = vmatprep.mubr.f32.mxu1 %v32_v21  ;;  %v1181_v25 = vpack.c.bf16 %v94_v16, %v93_v15  ;;  %v63_v27 = vld [vmem:[%s1712_s1 + $0x70] sm:$0xff] }
  0x16   :  { %1144 = vmatprep.subr.bf16.mxu0 %v1143_v0  ;;  %184 = vmatprep.mubr.f32.mxu0 %v30_v17  ;;  %v64_v28 = vld [vmem:[%s1712_s1 + $0x78] sm:$0xff]  ;;  %v1183_v29 = vpack.c.bf16 %v112_v23, %v111_v22  ;;  %v95_v30 = vld [vmem:[%s1712_s1 + $0x170] sm:$0xff]  ;;  %v305_v34 = vld [vmem:[%s1714_s3] sm:$0xff] }
  0x17   :  { %1174 = vmatpush3.bf16.msra.mxu1 %v1173_v63  ;;  %v96_v31 = vld [vmem:[%s1712_s1 + $0x178] sm:$0xff]  ;;  %v1153_v32 = vpack.c.bf16 %v64_v28, %v63_v27  ;;  %v306_v35 = vld [vmem:[%s1714_s3 + $0x8] sm:$0xff]  ;;  %v29_v36 = vld [vmem:[%s1713_s0] sm:$0xff] }
  0x18   :  { %1176 = vmatprep.subr.bf16.mxu1 %v1175_v4  ;;  %v1185_v33 = vpack.c.bf16 %v96_v31, %v95_v30  ;;  %v31_v37 = vld [vmem:[%s1713_s0 + $0x10] sm:$0xff]  ;;  %v34_v38 = vld [vmem:[%s1713_s0 + $0x28] sm:$0xff]  ;;  %v1188_v40 = vpack.c.bf16 %v306_v35, %v305_v34  ;;  %v36_v41 = vld [vmem:[%s1713_s0 + $0x38] sm:$0xff] }
  0x19   :  { %1146 = vmatpush3.bf16.msra.mxu0 %v1145_v10  ;;  %v307_v42 = vld [vmem:[%s1714_s3 + $0x10] sm:$0xff]  ;;  %v308_v43 = vld [vmem:[%s1714_s3 + $0x18] sm:$0xff]  ;;  %v33_v44 = vld [vmem:[%s1713_s0 + $0x20] sm:$0xff] }
  0x1a   :  { %1148 = vmatprep.subr.bf16.mxu0 %v1147_v14  ;;  %v35_v45 = vld [vmem:[%s1713_s0 + $0x30] sm:$0xff]  ;;  %v38_v46 = vld [vmem:[%s1713_s0 + $0x48] sm:$0xff]  ;;  %v1191_v47 = vpack.c.bf16 %v308_v43, %v307_v42  ;;  %v40_v48 = vld [vmem:[%s1713_s0 + $0x58] sm:$0xff] }
  0x1b   :  { %1178 = vmatpush3.bf16.msra.mxu1 %v1177_v13  ;;  %v309_v49 = vld [vmem:[%s1714_s3 + $0x20] sm:$0xff]  ;;  %v310_v50 = vld [vmem:[%s1714_s3 + $0x28] sm:$0xff]  ;;  %v39_v52 = vld [vmem:[%s1713_s0 + $0x50] sm:$0xff]  ;;  %v1244_v13 = vmov 0.0  }
  0x1c   :  { %1180 = vmatprep.subr.bf16.mxu1 %v1179_v18  ;;  %v37_v51 = vld [vmem:[%s1713_s0 + $0x40] sm:$0xff]  ;;  %v42_v53 = vld [vmem:[%s1713_s0 + $0x68] sm:$0xff]  ;;  %v1194_v54 = vpack.c.bf16 %v310_v50, %v309_v49  ;;  %v44_v55 = vld [vmem:[%s1713_s0 + $0x78] sm:$0xff] }
  0x1d   :  { %1150 = vmatpush3.bf16.msra.mxu0 %v1149_v24  ;;  %v311_v56 = vld [vmem:[%s1714_s3 + $0x30] sm:$0xff]  ;;  %v312_v57 = vld [vmem:[%s1714_s3 + $0x38] sm:$0xff]  ;;  %v41_v58 = vld [vmem:[%s1713_s0 + $0x60] sm:$0xff] }
  0x1e   :  { %1152 = vmatprep.subr.bf16.mxu0 %v1151_v26  ;;  %v43_v59 = vld [vmem:[%s1713_s0 + $0x70] sm:$0xff]  ;;  %v46_v60 = vld [vmem:[%s1713_s0 + $0x88] sm:$0xff]  ;;  %v1197_v61 = vpack.c.bf16 %v312_v57, %v311_v56  ;;  %v48_v62 = vld [vmem:[%s1713_s0 + $0x98] sm:$0xff] }
  0x1f   :  { %1182 = vmatpush3.bf16.msra.mxu1 %v1181_v25  ;;  %v313_v63 = vld [vmem:[%s1714_s3 + $0x40] sm:$0xff]  ;;  %v314_v0 = vld [vmem:[%s1714_s3 + $0x48] sm:$0xff]  ;;  %v47_v2 = vld [vmem:[%s1713_s0 + $0x90] sm:$0xff] }
  0x20   :  { %1184 = vmatprep.subr.bf16.mxu1 %v1183_v29  ;;  %v45_v1 = vld [vmem:[%s1713_s0 + $0x80] sm:$0xff]  ;;  %v1200_v3 = vpack.c.bf16 %v314_v0, %v313_v63  ;;  %v315_v4 = vld [vmem:[%s1714_s3 + $0x50] sm:$0xff]  ;;  %v316_v5 = vld [vmem:[%s1714_s3 + $0x58] sm:$0xff] }
  0x21   :  { %1154 = vmatpush3.bf16.msra.mxu0 %v1153_v32  ;;  %v1203_v6 = vpack.c.bf16 %v316_v5, %v315_v4  ;;  %v317_v7 = vld [vmem:[%s1714_s3 + $0x60] sm:$0xff]  ;;  %v318_v8 = vld [vmem:[%s1714_s3 + $0x68] sm:$0xff]  ;;  %v319_v10 = vld [vmem:[%s1714_s3 + $0x70] sm:$0xff] }
  0x22   :  { %1187 = vmatprep.subr.bf16.mxu0 %v1242_v39  ;;  %v1206_v9 = vpack.c.bf16 %v318_v8, %v317_v7  ;;  %v320_v11 = vld [vmem:[%s1714_s3 + $0x78] sm:$0xff]  ;;  %v838_v15 = vld [vmem:[%s1715_s2] ss:$0 sm:$0xff]  ;;  %v634_v63 = vld [vmem:[%s1716_s5 + $0x10] sm:$0xff] }
  0x23   :  { %1186 = vmatpush3.bf16.msra.mxu1 %v1185_v33  ;;  %v1209_v12 = vpack.c.bf16 %v320_v11, %v319_v10  ;;  %v423_v10 = vlaneseq }
  0x24   :  { %1211 = vmatprep.subr.bf16.mxu1 %v1242_v39  ;;  %185 = vmatmul.mubr.f32.vlgmr.msra.gmra.mrb[0].mxu0 %v29_v36 }
  0x25   :  { %189 = vmatprep.mubr.f32.mxu0 %v34_v38  ;;  %1189 = vmatpush3.bf16.msra.mxu0 %v1188_v40 }
  0x26   :  { %275 = vmatmul.mubr.f32.vlgmr.msra.gmra.mrb[0].mxu1 %v31_v37  ;;  %1190 = vmatprep.subr.bf16.mxu0 %v1242_v39 }
  0x27   :  { %279 = vmatprep.mubr.f32.mxu1 %v36_v41 }
  0x28   :  { %190 = vmatmul.mubr.f32.gmra.mrb[2].mxu0 %v33_v44 }
  0x29   :  { %194 = vmatprep.mubr.f32.mxu0 %v38_v46  ;;  %1192 = vmatpush3.bf16.msra.mxu0 %v1191_v47 }
  0x2a   :  { %280 = vmatmul.mubr.f32.gmra.mrb[2].mxu1 %v35_v45  ;;  %1193 = vmatprep.subr.bf16.mxu0 %v1242_v39 }
  0x2b   :  { %284 = vmatprep.mubr.f32.mxu1 %v40_v48 }
  0x2c   :  { %195 = vmatmul.mubr.f32.gmra.mrb[4].mxu0 %v37_v51 }
  0x2d   :  { %199 = vmatprep.mubr.f32.mxu0 %v42_v53  ;;  %1195 = vmatpush3.bf16.msra.mxu0 %v1194_v54 }
  0x2e   :  { %285 = vmatmul.mubr.f32.gmra.mrb[4].mxu1 %v39_v52  ;;  %1196 = vmatprep.subr.bf16.mxu0 %v1242_v39 }
  0x2f   :  { %289 = vmatprep.mubr.f32.mxu1 %v44_v55 }
  0x30   :  { %200 = vmatmul.mubr.f32.gmra.mrb[6].mxu0 %v41_v58 }
  0x31   :  { %204 = vmatprep.mubr.f32.mxu0 %v46_v60  ;;  %1198 = vmatpush3.bf16.msra.mxu0 %v1197_v61  ;;  %v632_v61 = vld [vmem:[%s1716_s5] sm:$0xff] }
  0x32   :  { %290 = vmatmul.mubr.f32.gmra.mrb[6].mxu1 %v43_v59  ;;  %1199 = vmatprep.subr.bf16.mxu0 %v1242_v39 }
  0x33   :  { %294 = vmatprep.mubr.f32.mxu1 %v48_v62  ;;  %v633_v62 = vld [vmem:[%s1716_s5 + $0x8] sm:$0xff] }
  0x34   :  { %205 = vmatmul.mubr.f32.gmra.mrb[8].mxu0 %v45_v1  ;;  %v1626_v0 = vpack.c.bf16 %v633_v62, %v632_v61  ;;  %v635_v1 = vld [vmem:[%s1716_s5 + $0x18] sm:$0xff] }
  0x35   :  { %1201 = vmatpush3.bf16.msra.mxu0 %v1200_v3  ;;  %1036 = vmatprep.mubr.msk.f32.mxu0 %vm1243_vm0, %v1244_v13  ;;  %v839_v3 = vld [vmem:[%s1717_s4] ss:$0 sm:$0xff] }
  0x36   :  { %295 = vmatmul.mubr.f32.gmra.mrb[8].mxu1 %v47_v2  ;;  %1202 = vmatprep.subr.bf16.mxu0 %v1242_v39  ;;  %v1632_v2 = vpack.c.bf16 %v635_v1, %v634_v63 }
  0x37   :  { %1061 = vmatprep.mubr.msk.f32.mxu1 %vm1243_vm0, %v1244_v13 }
  0x39   :  { %1204 = vmatpush3.bf16.msra.mxu0 %v1203_v6 }
  0x3a   :  { %1205 = vmatprep.subr.bf16.mxu0 %v1242_v39 }
  0x3d   :  { %1207 = vmatpush3.bf16.msra.mxu0 %v1206_v9 }
  0x3e   :  { %1208 = vmatprep.subr.bf16.mxu0 %v1242_v39 }
  0x41   :  { %1210 = vmatpush3.bf16.msra.mxu0 %v1209_v12 }
  0x42   :  { %1229 = vmatprep.subr.bf16.mxu0 %v1242_v39 }
  0xf7   :  { %v891_v14 = vpop.f32.mrb[0].mxu0 }
  0xf8   :  { %v892_v16 = vpop.f32.mrb[1].mxu0 }
  0xf9   :  { %v938_v17 = vpop.f32.mrb[0].mxu1  ;;  %v893_v18 = vadd.f32 %v892_v16, %v891_v14 }
  0xfa   :  { %v939_v19 = vpop.f32.mrb[1].mxu1 }
  0xfb   :  { %v940_v20 = vadd.f32 %v939_v19, %v938_v17  ;;  %v187_v21 = vadd.f32 %v893_v18, %v838_v15  ;;  %v894_v22 = vpop.f32.mrb[2].mxu0  ;;  %v424_v17 = vshrl.u32 %v423_v10, 7 }
  0xfc   :  { %v895_v23 = vpop.f32.mrb[3].mxu0 }
  0xfd   :  { %v941_v24 = vpop.f32.mrb[2].mxu1  ;;  %v277_v25 = vadd.f32 %v940_v20, %v187_v21  ;;  %v896_v26 = vadd.f32 %v895_v23, %v894_v22  ;;  %v428_v22 = vand.u32 127, %v423_v10  ;;  %v429_v23 = vmul.u32 2, %v424_v17 }
  0xfe   :  { %v942_v27 = vpop.f32.mrb[3].mxu1 }
  0xff   :  { %v943_v28 = vadd.f32 %v942_v27, %v941_v24  ;;  %v300_v29 = vmax.f32 %v277_v25, 0.0  ;;  %v192_v30 = vadd.f32 %v896_v26, %v838_v15  ;;  %v897_v31 = vpop.f32.mrb[4].mxu0  ;;  %v425_v24 = vadd.s32 8, %v424_v17 }
 0x100   :  { %v898_v32 = vpop.f32.mrb[5].mxu0  ;;  %vm432_vm1 = vcmp.eq.s32.totalorder %v428_v22, %v429_v23 }
 0x101   :  { %v944_v33 = vpop.f32.mrb[4].mxu1  ;;  %v282_v34 = vadd.f32 %v943_v28, %v192_v30  ;;  %v899_v35 = vadd.f32 %v898_v32, %v897_v31  ;;  %1037 = vmatmul.mubr.f32.vlgmr.msra.gmra.mrb[10].mxu0 %v300_v29  ;;  %v430_v31 = vmul.u32 2, %v425_v24  ;;  %v426_v32 = vadd.s32 16, %v424_v17 }
 0x102   :  { %v945_v36 = vpop.f32.mrb[5].mxu1  ;;  %1039 = vmatprep.mubr.msk.f32.mxu0 %vm1243_vm0, %v1244_v13  ;;  %1231 = vmatpush3.bf16.msra.mxu0 %v1626_v0 }
 0x103   :  { %v946_v37 = vadd.f32 %v945_v36, %v944_v33  ;;  %v301_v38 = vmax.f32 %v282_v34, 0.0  ;;  %v197_v40 = vadd.f32 %v899_v35, %v838_v15  ;;  %v900_v41 = vpop.f32.mrb[6].mxu0  ;;  %1232 = vmatprep.subr.bf16.mxu0 %v1242_v39  ;;  %v840_v34 = vsel %vm432_vm1, 1.0, %v1244_v13 }
 0x104   :  { %v901_v42 = vpop.f32.mrb[7].mxu0  ;;  %vm433_vm3 = vcmp.eq.s32.totalorder %v428_v22, %v430_v31  ;;  %v431_v35 = vmul.u32 2, %v426_v32 }
 0x105   :  { %v947_v43 = vpop.f32.mrb[6].mxu1  ;;  %v287_v44 = vadd.f32 %v946_v37, %v197_v40  ;;  %v902_v45 = vadd.f32 %v901_v42, %v900_v41  ;;  %1040 = vmatmul.mubr.f32.gmra.mrb[12].mxu0 %v301_v38  ;;  %v841_v36 = vsel %vm433_vm3, 1.0, %v1244_v13  ;;  %v441_v37 = vadd.s32 1, %v429_v23 }
 0x106   :  { %v948_v46 = vpop.f32.mrb[7].mxu1  ;;  %1042 = vmatprep.mubr.msk.f32.mxu0 %vm1243_vm0, %v1244_v13  ;;  %1234 = vmatpush3.bf16.msra.mxu0 %v1632_v2  ;;  %vm434_vm4 = vcmp.eq.s32.totalorder %v428_v22, %v431_v35  ;;  %v442_v40 = vadd.s32 1, %v430_v31  ;;  %v443_v42 = vadd.s32 1, %v431_v35 }
 0x107   :  { %v949_v47 = vadd.f32 %v948_v46, %v947_v43  ;;  %v302_v48 = vmax.f32 %v287_v44, 0.0  ;;  %v202_v49 = vadd.f32 %v902_v45, %v838_v15  ;;  %v903_v50 = vpop.f32.mrb[8].mxu0  ;;  %v842_v38 = vsel %vm434_vm4, 1.0, %v1244_v13  ;;  %v636_v45 = vld [vmem:[%s1718_s6] sm:$0xff]  ;;  %v637_v46 = vld [vmem:[%s1718_s6 + $0x8] sm:$0xff] }
 0x108   :  { %v904_v51 = vpop.f32.mrb[9].mxu0  ;;  %vm444_vm5 = vcmp.eq.s32.totalorder %v428_v22, %v441_v37  ;;  %vm445_vm6 = vcmp.eq.s32.totalorder %v428_v22, %v442_v40  ;;  %vm446_vm7 = vcmp.eq.s32.totalorder %v428_v22, %v443_v42 }
 0x109   :  { %v950_v52 = vpop.f32.mrb[8].mxu1  ;;  %v292_v53 = vadd.f32 %v949_v47, %v202_v49  ;;  %1043 = vmatmul.mubr.f32.gmra.mrb[14].mxu0 %v302_v48  ;;  %v905_v54 = vadd.f32 %v904_v51, %v903_v50  ;;  %v843_v41 = vsel %vm444_vm5, 1.0, %v1244_v13  ;;  %v844_v43 = vsel %vm445_vm6, 1.0, %v1244_v13  ;;  %v638_v48 = vld [vmem:[%s1718_s6 + $0x10] sm:$0xff]  ;;  %v639_v49 = vld [vmem:[%s1718_s6 + $0x18] sm:$0xff] }
 0x10a   :  { %v951_v55 = vpop.f32.mrb[9].mxu1  ;;  %1045 = vmatprep.mubr.msk.f32.mxu0 %vm1243_vm0, %v1244_v13  ;;  %v845_v44 = vsel %vm446_vm7, 1.0, %v1244_v13  ;;  %v1224_v47 = vpack.c.bf16 %v637_v46, %v636_v45  ;;  %v1227_v50 = vpack.c.bf16 %v639_v49, %v638_v48 }
 0x10b   :  { %v952_v56 = vadd.f32 %v951_v55, %v950_v52  ;;  %v303_v57 = vmax.f32 %v292_v53, 0.0  ;;  %v207_v58 = vadd.f32 %v905_v54, %v838_v15 }
 0x10d   :  { %v297_v59 = vadd.f32 %v952_v56, %v207_v58  ;;  %1046 = vmatmul.mubr.f32.gmra.mrb[16].mxu0 %v303_v57 }
 0x10e   :  { %1048 = vmatprep.mubr.msk.f32.mxu0 %vm1243_vm0, %v1244_v13 }
 0x10f   :  { %v304_v60 = vmax.f32 %v297_v59, 0.0 }
 0x111   :  { %1049 = vmatmul.mubr.f32.gmra.mrb[18].mxu0 %v304_v60 }
 0x112   :  { %1114 = vmatprep.mubr.msk.f32.mxu0 %vm1243_vm0, %v1244_v13 }
 0x1d4   :  { %v394_v4 = vpop.f32.mrb[10].mxu0 }
 0x1d5   :  { %v1038_v5 = vpop.f32.mrb[11].mxu0  ;;  %v395_v6 = vadd.f32 %v839_v3, %v394_v4  ;;  %v858_v4 = vld [vmem:[%s1719_s7] ss:$0 sm:$0xff] }
 0x1d7   :  { %v418_v11 = vmax.f32 %v395_v6, 0.0 }
 0x1d8   :  { %v399_v7 = vpop.f32.mrb[12].mxu0 }
 0x1d9   :  { %v400_v8 = vadd.f32 %v839_v3, %v399_v7  ;;  %v1041_v9 = vpop.f32.mrb[13].mxu0 }
 0x1db   :  { %v419_v12 = vmax.f32 %v400_v8, 0.0 }
 0x1dc   :  { %v404_v14 = vpop.f32.mrb[14].mxu0 }
 0x1dd   :  { %v1212_v15 = vpack.c.bf16 %v419_v12, %v418_v11  ;;  %v1044_v16 = vpop.f32.mrb[15].mxu0  ;;  %v405_v18 = vadd.f32 %v839_v3, %v404_v14 }
 0x1df   :  { %1213 = vmatpush3.bf16.msra.mxu1 %v1212_v15  ;;  %v420_v25 = vmax.f32 %v405_v18, 0.0 }
 0x1e0   :  { %v409_v19 = vpop.f32.mrb[16].mxu0  ;;  %1214 = vmatprep.subr.bf16.mxu1 %v1242_v39 }
 0x1e1   :  { %v410_v20 = vadd.f32 %v839_v3, %v409_v19  ;;  %v1047_v21 = vpop.f32.mrb[17].mxu0 }
 0x1e3   :  { %v421_v26 = vmax.f32 %v410_v20, 0.0 }
 0x1e4   :  { %v414_v27 = vpop.f32.mrb[18].mxu0 }
 0x1e5   :  { %v1215_v28 = vpack.c.bf16 %v421_v26, %v420_v25  ;;  %v415_v29 = vadd.f32 %v839_v3, %v414_v27  ;;  %v1050_v30 = vpop.f32.mrb[19].mxu0 }
 0x1e7   :  { %v422_v33 = vmax.f32 %v415_v29, 0.0  ;;  %1216 = vmatpush3.bf16.msra.mxu1 %v1215_v28 }
 0x1e8   :  { %1059 = vmatprep.subr.mxu1 %v1244_v13 }
 0x1eb   :  { %1060 = vmatpush3.msra.mxu1 %v422_v33 }
 0x1ec   :  { %1062 = vmatmul.mubr.msk.f32.vlgmr.msra.gmra.mrb[10].mxu1 %vm453_vm2, %v840_v34  ;;  %1217 = vmatprep.subr.bf16.mxu1 %v1242_v39 }
 0x1ed   :  { %1219 = vmatpush3.bf16.msra.mxu1 %v1212_v15  ;;  %1064 = vmatprep.mubr.msk.f32.mxu1 %vm1243_vm0, %v1244_v13 }
 0x1ee   :  { %1220 = vmatprep.subr.bf16.mxu1 %v1242_v39 }
 0x1f0   :  { %1065 = vmatmul.mubr.msk.f32.gmra.mrb[12].mxu1 %vm453_vm2, %v841_v36 }
 0x1f1   :  { %1222 = vmatpush3.bf16.msra.mxu1 %v1215_v28  ;;  %1067 = vmatprep.mubr.msk.f32.mxu1 %vm1243_vm0, %v1244_v13 }
 0x1f2   :  { %1078 = vmatprep.subr.mxu1 %v1244_v13 }
 0x1f4   :  { %1068 = vmatmul.mubr.msk.f32.gmra.mrb[14].mxu1 %vm453_vm2, %v842_v38 }
 0x1f5   :  { %1079 = vmatpush3.msra.mxu1 %v422_v33  ;;  %1080 = vmatprep.mubr.msk.f32.mxu1 %vm1243_vm0, %v1244_v13 }
 0x1f6   :  { %1223 = vmatprep.subr.bf16.mxu1 %v1242_v39 }
 0x1f8   :  { %1081 = vmatmul.mubr.msk.f32.vlgmr.msra.gmra.mrb[16].mxu1 %vm453_vm2, %v843_v41 }
 0x1f9   :  { %1083 = vmatprep.mubr.msk.f32.mxu1 %vm1243_vm0, %v1244_v13  ;;  %1225 = vmatpush3.bf16.msra.mxu1 %v1224_v47 }
 0x1fa   :  { %1226 = vmatprep.subr.bf16.mxu1 %v1242_v39 }
 0x1fc   :  { %1084 = vmatmul.mubr.msk.f32.gmra.mrb[18].mxu1 %vm453_vm2, %v844_v43 }
 0x1fd   :  { %1086 = vmatprep.mubr.msk.f32.mxu1 %vm1243_vm0, %v1244_v13  ;;  %1228 = vmatpush3.bf16.msra.mxu1 %v1227_v50 }
 0x1fe   :  { %1235 = vmatprep.subr.bf16.mxu1 %v1242_v39 }
 0x200   :  { %1087 = vmatmul.mubr.msk.f32.gmra.mrb[20].mxu1 %vm453_vm2, %v845_v44 }
 0x201   :  { %1097 = vmatprep.mubr.msk.f32.mxu1 %vm1243_vm0, %v1244_v13 }
 0x2bf   :  { %v529_v51 = vpop.f32.mrb[10].mxu1 }
 0x2c0   :  { %v1063_v52 = vpop.f32.mrb[11].mxu1  ;;  %1115 = vmatmul.mubr.msk.f32.vlgmr.msra.gmra.mrb[20].mxu0 %vm640_vm8, %v529_v51 }
 0x2c1   :  { %1117 = vmatprep.mubr.msk.f32.mxu0 %vm1243_vm0, %v1244_v13 }
 0x2c3   :  { %v534_v53 = vpop.f32.mrb[12].mxu1 }
 0x2c4   :  { %v1066_v54 = vpop.f32.mrb[13].mxu1  ;;  %1118 = vmatmul.mubr.msk.f32.gmra.mrb[22].mxu0 %vm640_vm8, %v534_v53 }
 0x2c7   :  { %v539_v55 = vpop.f32.mrb[14].mxu1 }
 0x2c8   :  { %v1069_v56 = vpop.f32.mrb[15].mxu1 }
 0x2cb   :  { %v618_v57 = vpop.f32.mrb[16].mxu1 }
 0x2cc   :  { %1098 = vmatmul.mubr.msk.f32.vlgmr.msra.gmra.mrb[22].mxu1 %vm640_vm8, %v618_v57  ;;  %v1082_v58 = vpop.f32.mrb[17].mxu1 }
 0x2cd   :  { %1100 = vmatprep.mubr.msk.f32.mxu1 %vm1243_vm0, %v1244_v13  ;;  %1237 = vmatpush3.bf16.msra.mxu1 %v1626_v0 }
 0x2ce   :  { %1236 = vmatprep.subr.bf16.mxu1 %v1242_v39 }
 0x2cf   :  { %v623_v59 = vpop.f32.mrb[18].mxu1 }
 0x2d0   :  { %1101 = vmatmul.mubr.msk.f32.gmra.mrb[24].mxu1 %vm640_vm8, %v623_v59  ;;  %v1085_v60 = vpop.f32.mrb[19].mxu1 }
 0x2d1   :  { %1103 = vmatprep.mubr.msk.f32.mxu1 %vm1243_vm0, %v1244_v13  ;;  %1238 = vmatpush3.bf16.msra.mxu1 %v1632_v2 }
 0x2d3   :  { %v628_v61 = vpop.f32.mrb[20].mxu1 }
 0x2d4   :  { %1104 = vmatmul.mubr.msk.f32.gmra.mrb[26].mxu1 %vm640_vm8, %v628_v61  ;;  %v1088_v62 = vpop.f32.mrb[21].mxu1 }
 0x2d5   :  { %1120 = vmatprep.mubr.msk.f32.mxu1 %vm1243_vm0, %v1244_v13 }
 0x2d8   :  { %1121 = vmatmul.mubr.msk.f32.vlgmr.msra.gmra.mrb[28].mxu1 %vm640_vm8, %v539_v55 }
 0x393   :  { %v805_v63 = vpop.f32.mrb[20].mxu0 }
 0x394   :  { %v1116_v39 = vpop.f32.mrb[21].mxu0 }
 0x397   :  { %v810_v0 = vpop.f32.mrb[22].mxu0 }
 0x398   :  { %v1119_v1 = vpop.f32.mrb[23].mxu0 }
 0x39f   :  { %v716_v3 = vpop.f32.mrb[22].mxu1 }
 0x3a0   :  { %v806_v5 = vadd.f32 %v805_v63, %v716_v3  ;;  %v1099_v2 = vpop.f32.mrb[23].mxu1 }
 0x3a2   :  { %v826_v6 = vadd.f32 %v858_v4, %v806_v5 }
 0x3a3   :  { %v721_v7 = vpop.f32.mrb[24].mxu1 }
 0x3a4   :  { %830 = vst.msk [vmem:[%s1720_s8] sm:$0xff] %vm829_vm9, %v826_v6  ;;  %v811_v13 = vadd.f32 %v810_v0, %v721_v7  ;;  %v1102_v8 = vpop.f32.mrb[25].mxu1 }
 0x3a6   :  { %v827_v9 = vadd.f32 %v858_v4, %v811_v13 }
 0x3a7   :  { %v726_v10 = vpop.f32.mrb[26].mxu1 }
 0x3a8   :  { %831 = vst.msk [vmem:[%s1720_s8 + $0x8] sm:$0xff] %vm829_vm9, %v827_v9  ;;  %v1105_v11 = vpop.f32.mrb[27].mxu1 }
 0x3ab   :  { %v815_v12 = vpop.f32.mrb[28].mxu1 }
 0x3ac   :  { %v816_v14 = vadd.f32 %v815_v12, %v726_v10  ;;  %v1122_v15 = vpop.f32.mrb[29].mxu1 }
 0x3ae   :  { %v828_v16 = vadd.f32 %v858_v4, %v816_v14 }
 0x3b0   :  { %833 = vst.msk [vmem:[%s1720_s8 + $0x10] sm:$0xf] %vm832_vm10, %v828_v16 }

</bundles_post_ra>
